<compile_context>
chip_gen: v6e
topology: v6e:2x2x1
jax: 0.10.0
libtpu: 0.0.40
codegen_flags: <defaults>
</compile_context>

<pallas_src>
import functools
import math

import jax
import jax.numpy as jnp
from jax.experimental import pallas as pl


# ----------------------------------------------------------------------------
# Shared helpers
# ----------------------------------------------------------------------------

def _mm(a, b):
    return jnp.dot(a, b, preferred_element_type=jnp.float32)


def _lstm_cell(gates, c_prev, H):
    """PyTorch LSTM cell update from fused pre-activation gates (B, 4H), order i,f,g,o."""
    i = jax.nn.sigmoid(gates[:, 0 * H:1 * H])
    f = jax.nn.sigmoid(gates[:, 1 * H:2 * H])
    g = jnp.tanh(gates[:, 2 * H:3 * H])
    o = jax.nn.sigmoid(gates[:, 3 * H:4 * H])
    c = f * c_prev + i * g
    h = o * jnp.tanh(c)
    return h, c


# ----------------------------------------------------------------------------
# Kernel 1: plain fused linear (used for the hoisted encoder input projection)
# ----------------------------------------------------------------------------

def _linear_kernel(x_ref, w_ref, b_ref, o_ref):
    o_ref[...] = _mm(x_ref[...], w_ref[...]) + b_ref[...]


def linear(x, w, b):
    n = x.shape[0]
    dout = w.shape[1]
    return pl.pallas_call(
        _linear_kernel,
        out_shape=jax.ShapeDtypeStruct((n, dout), jnp.float32),
    )(x, w, b)


# ----------------------------------------------------------------------------
# Kernel 2: fused bidirectional encoder LSTM (zero init state) + fc epilogue.
#   gx_ref : (T, B, 8H)  precomputed x @ [Wih_f | Wih_r] + (b_f | b_r)
#   whh_ref: (2, H, 4H)  recurrent weights per direction
#   Outputs: fc(r_out[:, -1, :]) -> (B, E);  h_n, c_n -> (2, B, H) each.
# ----------------------------------------------------------------------------

def _enc_bilstm_kernel(gx_ref, whh_ref, fcw_ref, fcb_ref,
                       out_ref, hn_ref, cn_ref, *, T, H):
    B = gx_ref.shape[1]
    H4 = 4 * H
    whh_f = whh_ref[0]
    whh_r = whh_ref[1]

    h_f = jnp.zeros((B, H), jnp.float32)
    c_f = jnp.zeros((B, H), jnp.float32)
    h_r = jnp.zeros((B, H), jnp.float32)
    c_r = jnp.zeros((B, H), jnp.float32)
    h_r_at_last_t = None

    for t in range(T):                       # statically unrolled, h/c in vregs
        # forward direction processes time index t
        g_f = gx_ref[t][:, :H4] + _mm(h_f, whh_f)
        h_f, c_f = _lstm_cell(g_f, c_f, H)
        # reverse direction processes time index T-1-t
        g_r = gx_ref[T - 1 - t][:, H4:] + _mm(h_r, whh_r)
        h_r, c_r = _lstm_cell(g_r, c_r, H)
        if t == 0:
            h_r_at_last_t = h_r              # reverse output aligned with t=T-1

    # r_out[:, -1, :] = [forward h_{T-1} | reverse output at t=T-1]
    last = jnp.concatenate([h_f, h_r_at_last_t], axis=1)        # (B, 2H)
    out_ref[...] = _mm(last, fcw_ref[...]) + fcb_ref[...]
    hn_ref[0] = h_f
    hn_ref[1] = h_r
    cn_ref[0] = c_f
    cn_ref[1] = c_r


# ----------------------------------------------------------------------------
# Kernel 3: fused latent block
#   FC_mean, FC_state (h & c of both directions batched into one (4B,2H) matmul),
#   Encoder_latent (+ reparameterization), Decoder_latent, and the decoder-LSTM
#   input projection (constant across out_len) -- all in one pallas_call.
# ----------------------------------------------------------------------------

def _latent_kernel(e_in_ref, hc_ref, eps_ref,
                   fcm_w_ref, fcm_b_ref, fcs_w_ref, fcs_b_ref,
                   h1w_ref, h1b_ref, h2w_ref, h2b_ref, h3w_ref, h3b_ref,
                   mw_ref, mb_ref, vw_ref, vb_ref,
                   dhw_ref, dhb_ref, dow_ref, dob_ref,
                   dwih_ref, db_ref,
                   state_ref, mean_ref, lv_ref, gx_ref):
    # MTVAE.FC_mean on cat(eA, eB)
    e = _mm(e_in_ref[...], fcm_w_ref[...]) + fcm_b_ref[...]
    # MTVAE.FC_state applied jointly to [h_cat ; c_cat]  -> (4B, H)
    state_ref[...] = _mm(hc_ref[...], fcs_w_ref[...]) + fcs_b_ref[...]

    # Encoder_latent. NOTE: nn.ReLU(inplace=True) means `residual` aliases the
    # ReLU'd tensor -> residual = relu(FC_hidden(e)).
    h1 = _mm(e, h1w_ref[...]) + h1b_ref[...]
    residual = jnp.maximum(h1, 0.0)
    x = jnp.maximum(_mm(residual, h2w_ref[...]) + h2b_ref[...], 0.0)
    x = jnp.maximum(_mm(x, h3w_ref[...]) + h3b_ref[...], 0.0)
    x = x + residual
    mean = _mm(x, mw_ref[...]) + mb_ref[...]
    log_var = _mm(x, vw_ref[...]) + vb_ref[...]
    z = mean + jnp.exp(0.5 * log_var) * eps_ref[...]
    mean_ref[...] = mean
    lv_ref[...] = log_var

    # Decoder_latent: the SAME FC_hidden applied three times (as in the module).
    t = jnp.maximum(_mm(z, dhw_ref[...]) + dhb_ref[...], 0.0)
    t = jnp.maximum(_mm(t, dhw_ref[...]) + dhb_ref[...], 0.0)
    t = jnp.maximum(_mm(t, dhw_ref[...]) + dhb_ref[...], 0.0)
    eB_hat = _mm(jnp.concatenate([e, t], axis=1), dow_ref[...]) + dob_ref[...]

    # Decoder LSTM input projection: decoder input is eB_hat repeated out_len
    # times, so a single (B, E) @ (E, 8H) matmul covers every time step.
    gx_ref[...] = _mm(eB_hat, dwih_ref[...]) + db_ref[...]


# ----------------------------------------------------------------------------
# Kernel 4: fused bidirectional decoder LSTM with given initial state + w1.
#   gx_ref : (B, 8H)  constant-per-step input gates (bias included)
#   y_ref  : (T, B, Fp)  lane-dense (Fp = 128-padded) w1 output per step
# ----------------------------------------------------------------------------

def _dec_bilstm_kernel(gx_ref, h0_ref, c0_ref, whh_ref, w1_ref, b1_ref,
                       y_ref, *, T, H):
    H4 = 4 * H
    gx = gx_ref[...]
    gx_f = gx[:, :H4]
    gx_r = gx[:, H4:]
    whh_f = whh_ref[0]
    whh_r = whh_ref[1]

    h_f = h0_ref[0]
    c_f = c0_ref[0]
    h_r = h0_ref[1]
    c_r = c0_ref[1]

    hf, hr = [], []
    for _ in range(T):                       # statically unrolled recurrences
        h_f, c_f = _lstm_cell(gx_f + _mm(h_f, whh_f), c_f, H)
        hf.append(h_f)
        h_r, c_r = _lstm_cell(gx_r + _mm(h_r, whh_r), c_r, H)
        hr.append(h_r)                       # hr[k] corresponds to time T-1-k

    w1 = w1_ref[...]
    b1 = b1_ref[...]
    for t in range(T):
        hcat = jnp.concatenate([hf[t], hr[T - 1 - t]], axis=1)   # (B, 2H)
        y_ref[t] = _mm(hcat, w1) + b1


# ----------------------------------------------------------------------------
# Model wrapper (XLA glue: transposes / concats / reshapes of tiny tensors)
# ----------------------------------------------------------------------------

def mtvae_forward(params, x, eps, *, inp_len, out_len, H, E, F):
    B = x.shape[0]
    half = inp_len // 2
    T = half
    B2 = 2 * B

    # Encoder_LSTM_x and Encoder_LSTM_y are the same module -> batch both halves.
    x_all = jnp.concatenate([x[:, :half, :], x[:, half:, :]], axis=0)   # (2B,T,F)
    x_flat = jnp.transpose(x_all, (1, 0, 2)).reshape(T * B2, F)         # time-major

    enc = params["enc"]
    # Hoisted input projection for both directions: one (T*2B, F)@(F, 8H) matmul.
    gx_enc = linear(x_flat, enc["wih"], enc["b"]).reshape(T, B2, 8 * H)

    enc_out, hn, cn = pl.pallas_call(
        functools.partial(_enc_bilstm_kernel, T=T, H=H),
        out_shape=(jax.ShapeDtypeStruct((B2, E), jnp.float32),
                   jax.ShapeDtypeStruct((2, B2, H), jnp.float32),
                   jax.ShapeDtypeStruct((2, B2, H), jnp.float32)),
    )(gx_enc, enc["whh"], enc["fc_w"], enc["fc_b"])

    eA, eB = enc_out[:B], enc_out[B:]
    e_in = jnp.concatenate([eA, eB], axis=1)                            # (B, 2E)
    h_cat = jnp.concatenate([hn[:, :B, :], hn[:, B:, :]], axis=2)       # (2,B,2H)
    c_cat = jnp.concatenate([cn[:, :B, :], cn[:, B:, :]], axis=2)
    hc_in = jnp.concatenate([h_cat.reshape(2 * B, 2 * H),
                             c_cat.reshape(2 * B, 2 * H)], axis=0)      # (4B,2H)

    el, dl, dec = params["el"], params["dl"], params["dec"]
    state_out, mean, log_var, gx_dec = pl.pallas_call(
        _latent_kernel,
        out_shape=(jax.ShapeDtypeStruct((4 * B, H), jnp.float32),
                   jax.ShapeDtypeStruct((B, E), jnp.float32),
                   jax.ShapeDtypeStruct((B, E), jnp.float32),
                   jax.ShapeDtypeStruct((B, 8 * H), jnp.float32)),
    )(e_in, hc_in, eps,
      params["fc_mean_w"], params["fc_mean_b"],
      params["fc_state_w"], params["fc_state_b"],
      el["h1_w"], el["h1_b"], el["h2_w"], el["h2_b"], el["h3_w"], el["h3_b"],
      el["mean_w"], el["mean_b"], el["var_w"], el["var_b"],
      dl["h_w"], dl["h_b"], dl["out_w"], dl["out_b"],
      dec["wih"], dec["b"])

    h_state = state_out[:2 * B].reshape(2, B, H)
    c_state = state_out[2 * B:].reshape(2, B, H)

    # Pad w1 so the per-step decoder stores are 128-lane dense; slice afterwards.
    Fp = ((F + 127) // 128) * 128
    w1p = jnp.zeros((2 * H, Fp), jnp.float32).at[:, :F].set(dec["w1_w"])
    b1p = jnp.zeros((1, Fp), jnp.float32).at[:, :F].set(dec["w1_b"])

    y_pad = pl.pallas_call(
        functools.partial(_dec_bilstm_kernel, T=out_len, H=H),
        out_shape=jax.ShapeDtypeStruct((out_len, B, Fp), jnp.float32),
    )(gx_dec, h_state, c_state, dec["whh"], w1p, b1p)

    y = jnp.transpose(y_pad[:, :, :F], (1, 0, 2))                       # (B,T_out,F)
    return y, mean, log_var


# ----------------------------------------------------------------------------
# Deterministic parameter init (synthetic, no checkpoint)
# ----------------------------------------------------------------------------

def init_params(key, F, H, E):
    keys = iter(jax.random.split(key, 24))

    def mat(shape, fan_in):
        return jax.random.normal(next(keys), shape, jnp.float32) / math.sqrt(fan_in)

    def zeros(shape):
        return jnp.zeros(shape, jnp.float32)

    def bilstm(I):
        # Fused layouts: W_ih of both directions concatenated along the gate axis
        # -> (I, 8H); combined (b_ih + b_hh) bias -> (1, 8H); recurrent weights
        # stacked per direction -> (2, H, 4H). Gate order within 4H: i, f, g, o.
        return {"wih": mat((I, 8 * H), I),
                "whh": mat((2, H, 4 * H), H),
                "b": mat((1, 8 * H), H)}

    return {
        "enc": dict(bilstm(F), fc_w=mat((2 * H, E), 2 * H), fc_b=zeros((1, E))),
        "fc_mean_w": mat((2 * E, E), 2 * E), "fc_mean_b": zeros((1, E)),
        "fc_state_w": mat((2 * H, H), 2 * H), "fc_state_b": zeros((1, H)),
        "el": {"h1_w": mat((E, H), E), "h1_b": zeros((1, H)),
               "h2_w": mat((H, H), H), "h2_b": zeros((1, H)),
               "h3_w": mat((H, H), H), "h3_b": zeros((1, H)),
               "mean_w": mat((H, E), H), "mean_b": zeros((1, E)),
               "var_w": mat((H, E), H), "var_b": zeros((1, E))},
        "dl": {"h_w": mat((E, E), E), "h_b": zeros((1, E)),
               "out_w": mat((2 * E, E), 2 * E), "out_b": zeros((1, E))},
        "dec": dict(bilstm(E), w1_w=mat((2 * H, F), 2 * H), w1_b=zeros((1, F))),
    }


# ----------------------------------------------------------------------------

if __name__ == "__main__":
    B, F, H, E = 2, 12, 128, 32
    inp_len, out_len = 8, 6

    key = jax.random.PRNGKey(0)
    kp, kx, ke = jax.random.split(key, 3)
    params = init_params(kp, F, H, E)
    x = jax.random.normal(kx, (B, inp_len, F), jnp.float32)
    # TODO(synk): torch draws epsilon inside the module; here it is drawn
    # deterministically host-side and passed in (same distribution/shape).
    eps = jax.random.normal(ke, (B, E), jnp.float32)

    fwd = jax.jit(functools.partial(mtvae_forward, inp_len=inp_len,
                                    out_len=out_len, H=H, E=E, F=F))
    y, mean, log_var = fwd(params, x, eps)
    jax.block_until_ready((y, mean, log_var))

    assert y.shape == (B, out_len, F)
    assert mean.shape == (B, E) and log_var.shape == (B, E)
    assert bool(jnp.all(jnp.isfinite(y)))
    assert bool(jnp.all(jnp.isfinite(mean))) and bool(jnp.all(jnp.isfinite(log_var)))
    print("KERNEL_OK")
</pallas_src>

<mosaic_0001>
module attributes {stable_mosaic.version = 11 : i64} {
  func.func @_linear_kernel(%arg0: memref<16x12xf32, #tpu.memory_space<vmem>>, %arg1: memref<12x1024xf32, #tpu.memory_space<vmem>>, %arg2: memref<1x1024xf32, #tpu.memory_space<vmem>>, %arg3: memref<16x1024xf32, #tpu.memory_space<vmem>>) attributes {dimension_semantics = [], scalar_prefetch = 0 : i64, scratch_operands = 0 : i64, tpu.core_type = #tpu.core_type<tc>} {
    %c0 = arith.constant 0 : index
    %c0_0 = arith.constant 0 : index
    %0 = vector.load %arg0[%c0, %c0_0] : memref<16x12xf32, #tpu.memory_space<vmem>>, vector<16x12xf32>
    %c0_1 = arith.constant 0 : index
    %c0_2 = arith.constant 0 : index
    %1 = vector.load %arg1[%c0_1, %c0_2] : memref<12x1024xf32, #tpu.memory_space<vmem>>, vector<12x1024xf32>
    %cst = arith.constant dense<0.000000e+00> : vector<16x1024xf32>
    %2 = tpu.matmul %0, %1, %cst {dimension_numbers = #tpu.dot_dimension_numbers<[1], [0], [0], [1], [0, 0, 1, 1], [], []>} : vector<16x12xf32>, vector<12x1024xf32>, vector<16x1024xf32> -> vector<16x1024xf32>
    %c0_3 = arith.constant 0 : index
    %c0_4 = arith.constant 0 : index
    %3 = vector.load %arg2[%c0_3, %c0_4] : memref<1x1024xf32, #tpu.memory_space<vmem>>, vector<1x1024xf32>
    %4 = vector.broadcast %3 : vector<1x1024xf32> to vector<16x1024xf32>
    %5 = arith.addf %2, %4 : vector<16x1024xf32>
    %c0_5 = arith.constant 0 : index
    %c0_6 = arith.constant 0 : index
    %6 = vector.load %arg3[%c0_5, %c0_6] : memref<16x1024xf32, #tpu.memory_space<vmem>>, vector<16x1024xf32>
    tpu.vector_store %arg3[%c0_5, %c0_6], %5 {strides = array<i32>} : memref<16x1024xf32, #tpu.memory_space<vmem>>, vector<16x1024xf32>,
    return
  }
}

module attributes {stable_mosaic.version = 11 : i64} {
  func.func @_enc_bilstm_kernel(%arg0: memref<4x4x1024xf32, #tpu.memory_space<vmem>>, %arg1: memref<2x128x512xf32, #tpu.memory_space<vmem>>, %arg2: memref<256x32xf32, #tpu.memory_space<vmem>>, %arg3: memref<1x32xf32, #tpu.memory_space<vmem>>, %arg4: memref<4x32xf32, #tpu.memory_space<vmem>>, %arg5: memref<2x4x128xf32, #tpu.memory_space<vmem>>, %arg6: memref<2x4x128xf32, #tpu.memory_space<vmem>>) attributes {dimension_semantics = [], scalar_prefetch = 0 : i64, scratch_operands = 0 : i64, tpu.core_type = #tpu.core_type<tc>} {
    %c0 = arith.constant 0 : index
    %c0_0 = arith.constant 0 : index
    %c0_1 = arith.constant 0 : index
    %0 = vector.load %arg1[%c0, %c0_0, %c0_1] : memref<2x128x512xf32, #tpu.memory_space<vmem>>, vector<1x128x512xf32>
    %1 = vector.shape_cast %0 : vector<1x128x512xf32> to vector<128x512xf32>
    %c1 = arith.constant 1 : index
    %c0_2 = arith.constant 0 : index
    %c0_3 = arith.constant 0 : index
    %2 = vector.load %arg1[%c1, %c0_2, %c0_3] : memref<2x128x512xf32, #tpu.memory_space<vmem>>, vector<1x128x512xf32>
    %3 = vector.shape_cast %2 : vector<1x128x512xf32> to vector<128x512xf32>
    %cst = arith.constant 0.000000e+00 : f32
    %4 = vector.broadcast %cst : f32 to vector<4x128xf32>
    %cst_4 = arith.constant 0.000000e+00 : f32
    %5 = vector.broadcast %cst_4 : f32 to vector<4x128xf32>
    %cst_5 = arith.constant 0.000000e+00 : f32
    %6 = vector.broadcast %cst_5 : f32 to vector<4x128xf32>
    %cst_6 = arith.constant 0.000000e+00 : f32
    %7 = vector.broadcast %cst_6 : f32 to vector<4x128xf32>
    %c0_7 = arith.constant 0 : index
    %c0_8 = arith.constant 0 : index
    %c0_9 = arith.constant 0 : index
    %8 = vector.load %arg0[%c0_7, %c0_8, %c0_9] : memref<4x4x1024xf32, #tpu.memory_space<vmem>>, vector<1x4x1024xf32>
    %9 = vector.shape_cast %8 : vector<1x4x1024xf32> to vector<4x1024xf32>
    %10 = vector.extract_strided_slice %9 {offsets = [0, 0], sizes = [4, 512], strides = [1, 1]} : vector<4x1024xf32> to vector<4x512xf32>
    %cst_10 = arith.constant dense<0.000000e+00> : vector<4x512xf32>
    %11 = tpu.matmul %4, %1, %cst_10 {dimension_numbers = #tpu.dot_dimension_numbers<[1], [0], [0], [1], [0, 0, 1, 1], [], []>} : vector<4x128xf32>, vector<128x512xf32>, vector<4x512xf32> -> vector<4x512xf32>
    %12 = arith.addf %10, %11 : vector<4x512xf32>
    %13 = vector.extract_strided_slice %12 {offsets = [0, 0], sizes = [4, 128], strides = [1, 1]} : vector<4x512xf32> to vector<4x128xf32>
    %14 = arith.negf %13 : vector<4x128xf32>
    %15 = math.exp %14 : vector<4x128xf32>
    %cst_11 = arith.constant 1.000000e+00 : f32
    %16 = vector.broadcast %cst_11 : f32 to vector<4x128xf32>
    %17 = arith.addf %16, %15 : vector<4x128xf32>
    %18 = arith.divf %16, %17 : vector<4x128xf32>
    %19 = vector.extract_strided_slice %12 {offsets = [0, 128], sizes = [4, 128], strides = [1, 1]} : vector<4x512xf32> to vector<4x128xf32>
    %20 = arith.negf %19 : vector<4x128xf32>
    %21 = math.exp %20 : vector<4x128xf32>
    %cst_12 = arith.constant 1.000000e+00 : f32
    %22 = vector.broadcast %cst_12 : f32 to vector<4x128xf32>
    %23 = arith.addf %22, %21 : vector<4x128xf32>
    %24 = arith.divf %22, %23 : vector<4x128xf32>
    %25 = vector.extract_strided_slice %12 {offsets = [0, 256], sizes = [4, 128], strides = [1, 1]} : vector<4x512xf32> to vector<4x128xf32>
    %26 = math.tanh %25 : vector<4x128xf32>
    %27 = vector.extract_strided_slice %12 {offsets = [0, 384], sizes = [4, 128], strides = [1, 1]} : vector<4x512xf32> to vector<4x128xf32>
    %28 = arith.negf %27 : vector<4x128xf32>
    %29 = math.exp %28 : vector<4x128xf32>
    %cst_13 = arith.constant 1.000000e+00 : f32
    %30 = vector.broadcast %cst_13 : f32 to vector<4x128xf32>
    %31 = arith.addf %30, %29 : vector<4x128xf32>
    %32 = arith.divf %30, %31 : vector<4x128xf32>
    %33 = arith.mulf %24, %5 : vector<4x128xf32>
    %34 = arith.mulf %18, %26 : vector<4x128xf32>
    %35 = arith.addf %33, %34 : vector<4x128xf32>
    %36 = math.tanh %35 : vector<4x128xf32>
    %37 = arith.mulf %32, %36 : vector<4x128xf32>
    %c3 = arith.constant 3 : index
    %c0_14 = arith.constant 0 : index
    %c0_15 = arith.constant 0 : index
    %38 = vector.load %arg0[%c3, %c0_14, %c0_15] : memref<4x4x1024xf32, #tpu.memory_space<vmem>>, vector<1x4x1024xf32>
    %39 = vector.shape_cast %38 : vector<1x4x1024xf32> to vector<4x1024xf32>
    %40 = vector.extract_strided_slice %39 {offsets = [0, 512], sizes = [4, 512], strides = [1, 1]} : vector<4x1024xf32> to vector<4x512xf32>
    %cst_16 = arith.constant dense<0.000000e+00> : vector<4x512xf32>
    %41 = tpu.matmul %6, %3, %cst_16 {dimension_numbers = #tpu.dot_dimension_numbers<[1], [0], [0], [1], [0, 0, 1, 1], [], []>} : vector<4x128xf32>, vector<128x512xf32>, vector<4x512xf32> -> vector<4x512xf32>
    %42 = arith.addf %40, %41 : vector<4x512xf32>
    %43 = vector.extract_strided_slice %42 {offsets = [0, 0], sizes = [4, 128], strides = [1, 1]} : vector<4x512xf32> to vector<4x128xf32>
    %44 = arith.negf %43 : vector<4x128xf32>
    %45 = math.exp %44 : vector<4x128xf32>
    %cst_17 = arith.constant 1.000000e+00 : f32
    %46 = vector.broadcast %cst_17 : f32 to vector<4x128xf32>
    %47 = arith.addf %46, %45 : vector<4x128xf32>
    %48 = arith.divf %46, %47 : vector<4x128xf32>
    %49 = vector.extract_strided_slice %42 {offsets = [0, 128], sizes = [4, 128], strides = [1, 1]} : vector<4x512xf32> to vector<4x128xf32>
    %50 = arith.negf %49 : vector<4x128xf32>
    %51 = math.exp %50 : vector<4x128xf32>
    %cst_18 = arith.constant 1.000000e+00 : f32
    %52 = vector.broadcast %cst_18 : f32 to vector<4x128xf32>
    %53 = arith.addf %52, %51 : vector<4x128xf32>
    %54 = arith.divf %52, %53 : vector<4x128xf32>
    %55 = vector.extract_strided_slice %42 {offsets = [0, 256], sizes = [4, 128], strides = [1, 1]} : vector<4x512xf32> to vector<4x128xf32>
    %56 = math.tanh %55 : vector<4x128xf32>
    %57 = vector.extract_strided_slice %42 {offsets = [0, 384], sizes = [4, 128], strides = [1, 1]} : vector<4x512xf32> to vector<4x128xf32>
    %58 = arith.negf %57 : vector<4x128xf32>
    %59 = math.exp %58 : vector<4x128xf32>
    %cst_19 = arith.constant 1.000000e+00 : f32
    %60 = vector.broadcast %cst_19 : f32 to vector<4x128xf32>
    %61 = arith.addf %60, %59 : vector<4x128xf32>
    %62 = arith.divf %60, %61 : vector<4x128xf32>
    %63 = arith.mulf %54, %7 : vector<4x128xf32>
    %64 = arith.mulf %48, %56 : vector<4x128xf32>
    %65 = arith.addf %63, %64 : vector<4x128xf32>
    %66 = math.tanh %65 : vector<4x128xf32>
    %67 = arith.mulf %62, %66 : vector<4x128xf32>
    %c1_20 = arith.constant 1 : index
    %c0_21 = arith.constant 0 : index
    %c0_22 = arith.constant 0 : index
    %68 = vector.load %arg0[%c1_20, %c0_21, %c0_22] : memref<4x4x1024xf32, #tpu.memory_space<vmem>>, vector<1x4x1024xf32>
    %69 = vector.shape_cast %68 : vector<1x4x1024xf32> to vector<4x1024xf32>
    %70 = vector.extract_strided_slice %69 {offsets = [0, 0], sizes = [4, 512], strides = [1, 1]} : vector<4x1024xf32> to vector<4x512xf32>
    %cst_23 = arith.constant dense<0.000000e+00> : vector<4x512xf32>
    %71 = tpu.matmul %37, %1, %cst_23 {dimension_numbers = #tpu.dot_dimension_numbers<[1], [0], [0], [1], [0, 0, 1, 1], [], []>} : vector<4x128xf32>, vector<128x512xf32>, vector<4x512xf32> -> vector<4x512xf32>
    %72 = arith.addf %70, %71 : vector<4x512xf32>
    %73 = vector.extract_strided_slice %72 {offsets = [0, 0], sizes = [4, 128], strides = [1, 1]} : vector<4x512xf32> to vector<4x128xf32>
    %74 = arith.negf %73 : vector<4x128xf32>
    %75 = math.exp %74 : vector<4x128xf32>
    %cst_24 = arith.constant 1.000000e+00 : f32
    %76 = vector.broadcast %cst_24 : f32 to vector<4x128xf32>
    %77 = arith.addf %76, %75 : vector<4x128xf32>
    %78 = arith.divf %76, %77 : vector<4x128xf32>
    %79 = vector.extract_strided_slice %72 {offsets = [0, 128], sizes = [4, 128], strides = [1, 1]} : vector<4x512xf32> to vector<4x128xf32>
    %80 = arith.negf %79 : vector<4x128xf32>
    %81 = math.exp %80 : vector<4x128xf32>
    %cst_25 = arith.constant 1.000000e+00 : f32
    %82 = vector.broadcast %cst_25 : f32 to vector<4x128xf32>
    %83 = arith.addf %82, %81 : vector<4x128xf32>
    %84 = arith.divf %82, %83 : vector<4x128xf32>
    %85 = vector.extract_strided_slice %72 {offsets = [0, 256], sizes = [4, 128], strides = [1, 1]} : vector<4x512xf32> to vector<4x128xf32>
    %86 = math.tanh %85 : vector<4x128xf32>
    %87 = vector.extract_strided_slice %72 {offsets = [0, 384], sizes = [4, 128], strides = [1, 1]} : vector<4x512xf32> to vector<4x128xf32>
    %88 = arith.negf %87 : vector<4x128xf32>
    %89 = math.exp %88 : vector<4x128xf32>
    %cst_26 = arith.constant 1.000000e+00 : f32
    %90 = vector.broadcast %cst_26 : f32 to vector<4x128xf32>
    %91 = arith.addf %90, %89 : vector<4x128xf32>
    %92 = arith.divf %90, %91 : vector<4x128xf32>
    %93 = arith.mulf %84, %35 : vector<4x128xf32>
    %94 = arith.mulf %78, %86 : vector<4x128xf32>
    %95 = arith.addf %93, %94 : vector<4x128xf32>
    %96 = math.tanh %95 : vector<4x128xf32>
    %97 = arith.mulf %92, %96 : vector<4x128xf32>
    %c2 = arith.constant 2 : index
    %c0_27 = arith.constant 0 : index
    %c0_28 = arith.constant 0 : index
    %98 = vector.load %arg0[%c2, %c0_27, %c0_28] : memref<4x4x1024xf32, #tpu.memory_space<vmem>>, vector<1x4x1024xf32>
    %99 = vector.shape_cast %98 : vector<1x4x1024xf32> to vector<4x1024xf32>
    %100 = vector.extract_strided_slice %99 {offsets = [0, 512], sizes = [4, 512], strides = [1, 1]} : vector<4x1024xf32> to vector<4x512xf32>
    %cst_29 = arith.constant dense<0.000000e+00> : vector<4x512xf32>
    %101 = tpu.matmul %67, %3, %cst_29 {dimension_numbers = #tpu.dot_dimension_numbers<[1], [0], [0], [1], [0, 0, 1, 1], [], []>} : vector<4x128xf32>, vector<128x512xf32>, vector<4x512xf32> -> vector<4x512xf32>
    %102 = arith.addf %100, %101 : vector<4x512xf32>
    %103 = vector.extract_strided_slice %102 {offsets = [0, 0], sizes = [4, 128], strides = [1, 1]} : vector<4x512xf32> to vector<4x128xf32>
    %104 = arith.negf %103 : vector<4x128xf32>
    %105 = math.exp %104 : vector<4x128xf32>
    %cst_30 = arith.constant 1.000000e+00 : f32
    %106 = vector.broadcast %cst_30 : f32 to vector<4x128xf32>
    %107 = arith.addf %106, %105 : vector<4x128xf32>
    %108 = arith.divf %106, %107 : vector<4x128xf32>
    %109 = vector.extract_strided_slice %102 {offsets = [0, 128], sizes = [4, 128], strides = [1, 1]} : vector<4x512xf32> to vector<4x128xf32>
    %110 = arith.negf %109 : vector<4x128xf32>
    %111 = math.exp %110 : vector<4x128xf32>
    %cst_31 = arith.constant 1.000000e+00 : f32
    %112 = vector.broadcast %cst_31 : f32 to vector<4x128xf32>
    %113 = arith.addf %112, %111 : vector<4x128xf32>
    %114 = arith.divf %112, %113 : vector<4x128xf32>
    %115 = vector.extract_strided_slice %102 {offsets = [0, 256], sizes = [4, 128], strides = [1, 1]} : vector<4x512xf32> to vector<4x128xf32>
    %116 = math.tanh %115 : vector<4x128xf32>
    %117 = vector.extract_strided_slice %102 {offsets = [0, 384], sizes = [4, 128], strides = [1, 1]} : vector<4x512xf32> to vector<4x128xf32>
    %118 = arith.negf %117 : vector<4x128xf32>
    %119 = math.exp %118 : vector<4x128xf32>
    %cst_32 = arith.constant 1.000000e+00 : f32
    %120 = vector.broadcast %cst_32 : f32 to vector<4x128xf32>
    %121 = arith.addf %120, %119 : vector<4x128xf32>
    %122 = arith.divf %120, %121 : vector<4x128xf32>
    %123 = arith.mulf %114, %65 : vector<4x128xf32>
    %124 = arith.mulf %108, %116 : vector<4x128xf32>
    %125 = arith.addf %123, %124 : vector<4x128xf32>
    %126 = math.tanh %125 : vector<4x128xf32>
    %127 = arith.mulf %122, %126 : vector<4x128xf32>
    %c2_33 = arith.constant 2 : index
    %c0_34 = arith.constant 0 : index
    %c0_35 = arith.constant 0 : index
    %128 = vector.load %arg0[%c2_33, %c0_34, %c0_35] : memref<4x4x1024xf32, #tpu.memory_space<vmem>>, vector<1x4x1024xf32>
    %129 = vector.shape_cast %128 : vector<1x4x1024xf32> to vector<4x1024xf32>
    %130 = vector.extract_strided_slice %129 {offsets = [0, 0], sizes = [4, 512], strides = [1, 1]} : vector<4x1024xf32> to vector<4x512xf32>
    %cst_36 = arith.constant dense<0.000000e+00> : vector<4x512xf32>
    %131 = tpu.matmul %97, %1, %cst_36 {dimension_numbers = #tpu.dot_dimension_numbers<[1], [0], [0], [1], [0, 0, 1, 1], [], []>} : vector<4x128xf32>, vector<128x512xf32>, vector<4x512xf32> -> vector<4x512xf32>
    %132 = arith.addf %130, %131 : vector<4x512xf32>
    %133 = vector.extract_strided_slice %132 {offsets = [0, 0], sizes = [4, 128], strides = [1, 1]} : vector<4x512xf32> to vector<4x128xf32>
    %134 = arith.negf %133 : vector<4x128xf32>
    %135 = math.exp %134 : vector<4x128xf32>
    %cst_37 = arith.constant 1.000000e+00 : f32
    %136 = vector.broadcast %cst_37 : f32 to vector<4x128xf32>
    %137 = arith.addf %136, %135 : vector<4x128xf32>
    %138 = arith.divf %136, %137 : vector<4x128xf32>
    %139 = vector.extract_strided_slice %132 {offsets = [0, 128], sizes = [4, 128], strides = [1, 1]} : vector<4x512xf32> to vector<4x128xf32>
    %140 = arith.negf %139 : vector<4x128xf32>
    %141 = math.exp %140 : vector<4x128xf32>
    %cst_38 = arith.constant 1.000000e+00 : f32
    %142 = vector.broadcast %cst_38 : f32 to vector<4x128xf32>
    %143 = arith.addf %142, %141 : vector<4x128xf32>
    %144 = arith.divf %142, %143 : vector<4x128xf32>
    %145 = vector.extract_strided_slice %132 {offsets = [0, 256], sizes = [4, 128], strides = [1, 1]} : vector<4x512xf32> to vector<4x128xf32>
    %146 = math.tanh %145 : vector<4x128xf32>
    %147 = vector.extract_strided_slice %132 {offsets = [0, 384], sizes = [4, 128], strides = [1, 1]} : vector<4x512xf32> to vector<4x128xf32>
    %148 = arith.negf %147 : vector<4x128xf32>
    %149 = math.exp %148 : vector<4x128xf32>
    %cst_39 = arith.constant 1.000000e+00 : f32
    %150 = vector.broadcast %cst_39 : f32 to vector<4x128xf32>
    %151 = arith.addf %150, %149 : vector<4x128xf32>
    %152 = arith.divf %150, %151 : vector<4x128xf32>
    %153 = arith.mulf %144, %95 : vector<4x128xf32>
    %154 = arith.mulf %138, %146 : vector<4x128xf32>
    %155 = arith.addf %153, %154 : vector<4x128xf32>
    %156 = math.tanh %155 : vector<4x128xf32>
    %157 = arith.mulf %152, %156 : vector<4x128xf32>
    %c1_40 = arith.constant 1 : index
    %c0_41 = arith.constant 0 : index
    %c0_42 = arith.constant 0 : index
    %158 = vector.load %arg0[%c1_40, %c0_41, %c0_42] : memref<4x4x1024xf32, #tpu.memory_space<vmem>>, vector<1x4x1024xf32>
    %159 = vector.shape_cast %158 : vector<1x4x1024xf32> to vector<4x1024xf32>
    %160 = vector.extract_strided_slice %159 {offsets = [0, 512], sizes = [4, 512], strides = [1, 1]} : vector<4x1024xf32> to vector<4x512xf32>
    %cst_43 = arith.constant dense<0.000000e+00> : vector<4x512xf32>
    %161 = tpu.matmul %127, %3, %cst_43 {dimension_numbers = #tpu.dot_dimension_numbers<[1], [0], [0], [1], [0, 0, 1, 1], [], []>} : vector<4x128xf32>, vector<128x512xf32>, vector<4x512xf32> -> vector<4x512xf32>
    %162 = arith.addf %160, %161 : vector<4x512xf32>
    %163 = vector.extract_strided_slice %162 {offsets = [0, 0], sizes = [4, 128], strides = [1, 1]} : vector<4x512xf32> to vector<4x128xf32>
    %164 = arith.negf %163 : vector<4x128xf32>
    %165 = math.exp %164 : vector<4x128xf32>
    %cst_44 = arith.constant 1.000000e+00 : f32
    %166 = vector.broadcast %cst_44 : f32 to vector<4x128xf32>
    %167 = arith.addf %166, %165 : vector<4x128xf32>
    %168 = arith.divf %166, %167 : vector<4x128xf32>
    %169 = vector.extract_strided_slice %162 {offsets = [0, 128], sizes = [4, 128], strides = [1, 1]} : vector<4x512xf32> to vector<4x128xf32>
    %170 = arith.negf %169 : vector<4x128xf32>
    %171 = math.exp %170 : vector<4x128xf32>
    %cst_45 = arith.constant 1.000000e+00 : f32
    %172 = vector.broadcast %cst_45 : f32 to vector<4x128xf32>
    %173 = arith.addf %172, %171 : vector<4x128xf32>
    %174 = arith.divf %172, %173 : vector<4x128xf32>
    %175 = vector.extract_strided_slice %162 {offsets = [0, 256], sizes = [4, 128], strides = [1, 1]} : vector<4x512xf32> to vector<4x128xf32>
    %176 = math.tanh %175 : vector<4x128xf32>
    %177 = vector.extract_strided_slice %162 {offsets = [0, 384], sizes = [4, 128], strides = [1, 1]} : vector<4x512xf32> to vector<4x128xf32>
    %178 = arith.negf %177 : vector<4x128xf32>
    %179 = math.exp %178 : vector<4x128xf32>
    %cst_46 = arith.constant 1.000000e+00 : f32
    %180 = vector.broadcast %cst_46 : f32 to vector<4x128xf32>
    %181 = arith.addf %180, %179 : vector<4x128xf32>
    %182 = arith.divf %180, %181 : vector<4x128xf32>
    %183 = arith.mulf %174, %125 : vector<4x128xf32>
    %184 = arith.mulf %168, %176 : vector<4x128xf32>
    %185 = arith.addf %183, %184 : vector<4x128xf32>
    %186 = math.tanh %185 : vector<4x128xf32>
    %187 = arith.mulf %182, %186 : vector<4x128xf32>
    %c3_47 = arith.constant 3 : index
    %c0_48 = arith.constant 0 : index
    %c0_49 = arith.constant 0 : index
    %188 = vector.load %arg0[%c3_47, %c0_48, %c0_49] : memref<4x4x1024xf32, #tpu.memory_space<vmem>>, vector<1x4x1024xf32>
    %189 = vector.shape_cast %188 : vector<1x4x1024xf32> to vector<4x1024xf32>
    %190 = vector.extract_strided_slice %189 {offsets = [0, 0], sizes = [4, 512], strides = [1, 1]} : vector<4x1024xf32> to vector<4x512xf32>
    %cst_50 = arith.constant dense<0.000000e+00> : vector<4x512xf32>
    %191 = tpu.matmul %157, %1, %cst_50 {dimension_numbers = #tpu.dot_dimension_numbers<[1], [0], [0], [1], [0, 0, 1, 1], [], []>} : vector<4x128xf32>, vector<128x512xf32>, vector<4x512xf32> -> vector<4x512xf32>
    %192 = arith.addf %190, %191 : vector<4x512xf32>
    %193 = vector.extract_strided_slice %192 {offsets = [0, 0], sizes = [4, 128], strides = [1, 1]} : vector<4x512xf32> to vector<4x128xf32>
    %194 = arith.negf %193 : vector<4x128xf32>
    %195 = math.exp %194 : vector<4x128xf32>
    %cst_51 = arith.constant 1.000000e+00 : f32
    %196 = vector.broadcast %cst_51 : f32 to vector<4x128xf32>
    %197 = arith.addf %196, %195 : vector<4x128xf32>
    %198 = arith.divf %196, %197 : vector<4x128xf32>
    %199 = vector.extract_strided_slice %192 {offsets = [0, 128], sizes = [4, 128], strides = [1, 1]} : vector<4x512xf32> to vector<4x128xf32>
    %200 = arith.negf %199 : vector<4x128xf32>
    %201 = math.exp %200 : vector<4x128xf32>
    %cst_52 = arith.constant 1.000000e+00 : f32
    %202 = vector.broadcast %cst_52 : f32 to vector<4x128xf32>
    %203 = arith.addf %202, %201 : vector<4x128xf32>
    %204 = arith.divf %202, %203 : vector<4x128xf32>
    %205 = vector.extract_strided_slice %192 {offsets = [0, 256], sizes = [4, 128], strides = [1, 1]} : vector<4x512xf32> to vector<4x128xf32>
    %206 = math.tanh %205 : vector<4x128xf32>
    %207 = vector.extract_strided_slice %192 {offsets = [0, 384], sizes = [4, 128], strides = [1, 1]} : vector<4x512xf32> to vector<4x128xf32>
    %208 = arith.negf %207 : vector<4x128xf32>
    %209 = math.exp %208 : vector<4x128xf32>
    %cst_53 = arith.constant 1.000000e+00 : f32
    %210 = vector.broadcast %cst_53 : f32 to vector<4x128xf32>
    %211 = arith.addf %210, %209 : vector<4x128xf32>
    %212 = arith.divf %210, %211 : vector<4x128xf32>
    %213 = arith.mulf %204, %155 : vector<4x128xf32>
    %214 = arith.mulf %198, %206 : vector<4x128xf32>
    %215 = arith.addf %213, %214 : vector<4x128xf32>
    %216 = math.tanh %215 : vector<4x128xf32>
    %217 = arith.mulf %212, %216 : vector<4x128xf32>
    %c0_54 = arith.constant 0 : index
    %c0_55 = arith.constant 0 : index
    %c0_56 = arith.constant 0 : index
    %218 = vector.load %arg0[%c0_54, %c0_55, %c0_56] : memref<4x4x1024xf32, #tpu.memory_space<vmem>>, vector<1x4x1024xf32>
    %219 = vector.shape_cast %218 : vector<1x4x1024xf32> to vector<4x1024xf32>
    %220 = vector.extract_strided_slice %219 {offsets = [0, 512], sizes = [4, 512], strides = [1, 1]} : vector<4x1024xf32> to vector<4x512xf32>
    %cst_57 = arith.constant dense<0.000000e+00> : vector<4x512xf32>
    %221 = tpu.matmul %187, %3, %cst_57 {dimension_numbers = #tpu.dot_dimension_numbers<[1], [0], [0], [1], [0, 0, 1, 1], [], []>} : vector<4x128xf32>, vector<128x512xf32>, vector<4x512xf32> -> vector<4x512xf32>
    %222 = arith.addf %220, %221 : vector<4x512xf32>
    %223 = vector.extract_strided_slice %222 {offsets = [0, 0], sizes = [4, 128], strides = [1, 1]} : vector<4x512xf32> to vector<4x128xf32>
    %224 = arith.negf %223 : vector<4x128xf32>
    %225 = math.exp %224 : vector<4x128xf32>
    %cst_58 = arith.constant 1.000000e+00 : f32
    %226 = vector.broadcast %cst_58 : f32 to vector<4x128xf32>
    %227 = arith.addf %226, %225 : vector<4x128xf32>
    %228 = arith.divf %226, %227 : vector<4x128xf32>
    %229 = vector.extract_strided_slice %222 {offsets = [0, 128], sizes = [4, 128], strides = [1, 1]} : vector<4x512xf32> to vector<4x128xf32>
    %230 = arith.negf %229 : vector<4x128xf32>
    %231 = math.exp %230 : vector<4x128xf32>
    %cst_59 = arith.constant 1.000000e+00 : f32
    %232 = vector.broadcast %cst_59 : f32 to vector<4x128xf32>
    %233 = arith.addf %232, %231 : vector<4x128xf32>
    %234 = arith.divf %232, %233 : vector<4x128xf32>
    %235 = vector.extract_strided_slice %222 {offsets = [0, 256], sizes = [4, 128], strides = [1, 1]} : vector<4x512xf32> to vector<4x128xf32>
    %236 = math.tanh %235 : vector<4x128xf32>
    %237 = vector.extract_strided_slice %222 {offsets = [0, 384], sizes = [4, 128], strides = [1, 1]} : vector<4x512xf32> to vector<4x128xf32>
    %238 = arith.negf %237 : vector<4x128xf32>
    %239 = math.exp %238 : vector<4x128xf32>
    %cst_60 = arith.constant 1.000000e+00 : f32
    %240 = vector.broadcast %cst_60 : f32 to vector<4x128xf32>
    %241 = arith.addf %240, %239 : vector<4x128xf32>
    %242 = arith.divf %240, %241 : vector<4x128xf32>
    %243 = arith.mulf %234, %185 : vector<4x128xf32>
    %244 = arith.mulf %228, %236 : vector<4x128xf32>
    %245 = arith.addf %243, %244 : vector<4x128xf32>
    %246 = math.tanh %245 : vector<4x128xf32>
    %247 = arith.mulf %242, %246 : vector<4x128xf32>
    %248 = tpu.concatenate %217, %67 in 1 : vector<4x128xf32>, vector<4x128xf32> -> vector<4x256xf32>
    %c0_61 = arith.constant 0 : index
    %c0_62 = arith.constant 0 : index
    %249 = vector.load %arg2[%c0_61, %c0_62] : memref<256x32xf32, #tpu.memory_space<vmem>>, vector<256x32xf32>
    %cst_63 = arith.constant dense<0.000000e+00> : vector<4x32xf32>
    %250 = tpu.matmul %248, %249, %cst_63 {dimension_numbers = #tpu.dot_dimension_numbers<[1], [0], [0], [1], [0, 0, 1, 1], [], []>} : vector<4x256xf32>, vector<256x32xf32>, vector<4x32xf32> -> vector<4x32xf32>
    %c0_64 = arith.constant 0 : index
    %c0_65 = arith.constant 0 : index
    %251 = vector.load %arg3[%c0_64, %c0_65] : memref<1x32xf32, #tpu.memory_space<vmem>>, vector<1x32xf32>
    %252 = vector.broadcast %251 : vector<1x32xf32> to vector<4x32xf32>
    %253 = arith.addf %250, %252 : vector<4x32xf32>
    %c0_66 = arith.constant 0 : index
    %c0_67 = arith.constant 0 : index
    %254 = vector.load %arg4[%c0_66, %c0_67] : memref<4x32xf32, #tpu.memory_space<vmem>>, vector<4x32xf32>
    tpu.vector_store %arg4[%c0_66, %c0_67], %253 {strides = array<i32>} : memref<4x32xf32, #tpu.memory_space<vmem>>, vector<4x32xf32>,
    %c0_68 = arith.constant 0 : index
    %c0_69 = arith.constant 0 : index
    %c0_70 = arith.constant 0 : index
    %255 = vector.load %arg5[%c0_68, %c0_69, %c0_70] : memref<2x4x128xf32, #tpu.memory_space<vmem>>, vector<1x4x128xf32>
    %256 = vector.shape_cast %255 : vector<1x4x128xf32> to vector<4x128xf32>
    %257 = vector.shape_cast %217 : vector<4x128xf32> to vector<1x4x128xf32>
    tpu.vector_store %arg5[%c0_68, %c0_69, %c0_70], %257 {strides = array<i32>} : memref<2x4x128xf32, #tpu.memory_space<vmem>>, vector<1x4x128xf32>,
    %c1_71 = arith.constant 1 : index
    %c0_72 = arith.constant 0 : index
    %c0_73 = arith.constant 0 : index
    %258 = vector.load %arg5[%c1_71, %c0_72, %c0_73] : memref<2x4x128xf32, #tpu.memory_space<vmem>>, vector<1x4x128xf32>
    %259 = vector.shape_cast %258 : vector<1x4x128xf32> to vector<4x128xf32>
    %260 = vector.shape_cast %247 : vector<4x128xf32> to vector<1x4x128xf32>
    tpu.vector_store %arg5[%c1_71, %c0_72, %c0_73], %260 {strides = array<i32>} : memref<2x4x128xf32, #tpu.memory_space<vmem>>, vector<1x4x128xf32>,
    %c0_74 = arith.constant 0 : index
    %c0_75 = arith.constant 0 : index
    %c0_76 = arith.constant 0 : index
    %261 = vector.load %arg6[%c0_74, %c0_75, %c0_76] : memref<2x4x128xf32, #tpu.memory_space<vmem>>, vector<1x4x128xf32>
    %262 = vector.shape_cast %261 : vector<1x4x128xf32> to vector<4x128xf32>
    %263 = vector.shape_cast %215 : vector<4x128xf32> to vector<1x4x128xf32>
    tpu.vector_store %arg6[%c0_74, %c0_75, %c0_76], %263 {strides = array<i32>} : memref<2x4x128xf32, #tpu.memory_space<vmem>>, vector<1x4x128xf32>,
    %c1_77 = arith.constant 1 : index
    %c0_78 = arith.constant 0 : index
    %c0_79 = arith.constant 0 : index
    %264 = vector.load %arg6[%c1_77, %c0_78, %c0_79] : memref<2x4x128xf32, #tpu.memory_space<vmem>>, vector<1x4x128xf32>
    %265 = vector.shape_cast %264 : vector<1x4x128xf32> to vector<4x128xf32>
    %266 = vector.shape_cast %245 : vector<4x128xf32> to vector<1x4x128xf32>
    tpu.vector_store %arg6[%c1_77, %c0_78, %c0_79], %266 {strides = array<i32>} : memref<2x4x128xf32, #tpu.memory_space<vmem>>, vector<1x4x128xf32>,
    return
  }
}

module attributes {stable_mosaic.version = 11 : i64} {
  func.func @_latent_kernel(%arg0: memref<2x64xf32, #tpu.memory_space<vmem>>, %arg1: memref<8x256xf32, #tpu.memory_space<vmem>>, %arg2: memref<2x32xf32, #tpu.memory_space<vmem>>, %arg3: memref<64x32xf32, #tpu.memory_space<vmem>>, %arg4: memref<1x32xf32, #tpu.memory_space<vmem>>, %arg5: memref<256x128xf32, #tpu.memory_space<vmem>>, %arg6: memref<1x128xf32, #tpu.memory_space<vmem>>, %arg7: memref<32x128xf32, #tpu.memory_space<vmem>>, %arg8: memref<1x128xf32, #tpu.memory_space<vmem>>, %arg9: memref<128x128xf32, #tpu.memory_space<vmem>>, %arg10: memref<1x128xf32, #tpu.memory_space<vmem>>, %arg11: memref<128x128xf32, #tpu.memory_space<vmem>>, %arg12: memref<1x128xf32, #tpu.memory_space<vmem>>, %arg13: memref<128x32xf32, #tpu.memory_space<vmem>>, %arg14: memref<1x32xf32, #tpu.memory_space<vmem>>, %arg15: memref<128x32xf32, #tpu.memory_space<vmem>>, %arg16: memref<1x32xf32, #tpu.memory_space<vmem>>, %arg17: memref<32x32xf32, #tpu.memory_space<vmem>>, %arg18: memref<1x32xf32, #tpu.memory_space<vmem>>, %arg19: memref<64x32xf32, #tpu.memory_space<vmem>>, %arg20: memref<1x32xf32, #tpu.memory_space<vmem>>, %arg21: memref<32x1024xf32, #tpu.memory_space<vmem>>, %arg22: memref<1x1024xf32, #tpu.memory_space<vmem>>, %arg23: memref<8x128xf32, #tpu.memory_space<vmem>>, %arg24: memref<2x32xf32, #tpu.memory_space<vmem>>, %arg25: memref<2x32xf32, #tpu.memory_space<vmem>>, %arg26: memref<2x1024xf32, #tpu.memory_space<vmem>>) attributes {dimension_semantics = [], scalar_prefetch = 0 : i64, scratch_operands = 0 : i64, tpu.core_type = #tpu.core_type<tc>} {
    %c0 = arith.constant 0 : index
    %c0_0 = arith.constant 0 : index
    %0 = vector.load %arg0[%c0, %c0_0] : memref<2x64xf32, #tpu.memory_space<vmem>>, vector<2x64xf32>
    %c0_1 = arith.constant 0 : index
    %c0_2 = arith.constant 0 : index
    %1 = vector.load %arg3[%c0_1, %c0_2] : memref<64x32xf32, #tpu.memory_space<vmem>>, vector<64x32xf32>
    %cst = arith.constant dense<0.000000e+00> : vector<2x32xf32>
    %2 = tpu.matmul %0, %1, %cst {dimension_numbers = #tpu.dot_dimension_numbers<[1], [0], [0], [1], [0, 0, 1, 1], [], []>} : vector<2x64xf32>, vector<64x32xf32>, vector<2x32xf32> -> vector<2x32xf32>
    %c0_3 = arith.constant 0 : index
    %c0_4 = arith.constant 0 : index
    %3 = vector.load %arg4[%c0_3, %c0_4] : memref<1x32xf32, #tpu.memory_space<vmem>>, vector<1x32xf32>
    %4 = vector.broadcast %3 : vector<1x32xf32> to vector<2x32xf32>
    %5 = arith.addf %2, %4 : vector<2x32xf32>
    %c0_5 = arith.constant 0 : index
    %c0_6 = arith.constant 0 : index
    %6 = vector.load %arg1[%c0_5, %c0_6] : memref<8x256xf32, #tpu.memory_space<vmem>>, vector<8x256xf32>
    %c0_7 = arith.constant 0 : index
    %c0_8 = arith.constant 0 : index
    %7 = vector.load %arg5[%c0_7, %c0_8] : memref<256x128xf32, #tpu.memory_space<vmem>>, vector<256x128xf32>
    %cst_9 = arith.constant dense<0.000000e+00> : vector<8x128xf32>
    %8 = tpu.matmul %6, %7, %cst_9 {dimension_numbers = #tpu.dot_dimension_numbers<[1], [0], [0], [1], [0, 0, 1, 1], [], []>} : vector<8x256xf32>, vector<256x128xf32>, vector<8x128xf32> -> vector<8x128xf32>
    %c0_10 = arith.constant 0 : index
    %c0_11 = arith.constant 0 : index
    %9 = vector.load %arg6[%c0_10, %c0_11] : memref<1x128xf32, #tpu.memory_space<vmem>>, vector<1x128xf32>
    %10 = vector.broadcast %9 : vector<1x128xf32> to vector<8x128xf32>
    %11 = arith.addf %8, %10 : vector<8x128xf32>
    %c0_12 = arith.constant 0 : index
    %c0_13 = arith.constant 0 : index
    %12 = vector.load %arg23[%c0_12, %c0_13] : memref<8x128xf32, #tpu.memory_space<vmem>>, vector<8x128xf32>
    tpu.vector_store %arg23[%c0_12, %c0_13], %11 {strides = array<i32>} : memref<8x128xf32, #tpu.memory_space<vmem>>, vector<8x128xf32>,
    %c0_14 = arith.constant 0 : index
    %c0_15 = arith.constant 0 : index
    %13 = vector.load %arg7[%c0_14, %c0_15] : memref<32x128xf32, #tpu.memory_space<vmem>>, vector<32x128xf32>
    %cst_16 = arith.constant dense<0.000000e+00> : vector<2x128xf32>
    %14 = tpu.matmul %5, %13, %cst_16 {dimension_numbers = #tpu.dot_dimension_numbers<[1], [0], [0], [1], [0, 0, 1, 1], [], []>} : vector<2x32xf32>, vector<32x128xf32>, vector<2x128xf32> -> vector<2x128xf32>
    %c0_17 = arith.constant 0 : index
    %c0_18 = arith.constant 0 : index
    %15 = vector.load %arg8[%c0_17, %c0_18] : memref<1x128xf32, #tpu.memory_space<vmem>>, vector<1x128xf32>
    %16 = vector.broadcast %15 : vector<1x128xf32> to vector<2x128xf32>
    %17 = arith.addf %14, %16 : vector<2x128xf32>
    %cst_19 = arith.constant 0.000000e+00 : f32
    %18 = vector.broadcast %cst_19 : f32 to vector<2x128xf32>
    %19 = arith.maximumf %17, %18 : vector<2x128xf32>
    %c0_20 = arith.constant 0 : index
    %c0_21 = arith.constant 0 : index
    %20 = vector.load %arg9[%c0_20, %c0_21] : memref<128x128xf32, #tpu.memory_space<vmem>>, vector<128x128xf32>
    %cst_22 = arith.constant dense<0.000000e+00> : vector<2x128xf32>
    %21 = tpu.matmul %19, %20, %cst_22 {dimension_numbers = #tpu.dot_dimension_numbers<[1], [0], [0], [1], [0, 0, 1, 1], [], []>} : vector<2x128xf32>, vector<128x128xf32>, vector<2x128xf32> -> vector<2x128xf32>
    %c0_23 = arith.constant 0 : index
    %c0_24 = arith.constant 0 : index
    %22 = vector.load %arg10[%c0_23, %c0_24] : memref<1x128xf32, #tpu.memory_space<vmem>>, vector<1x128xf32>
    %23 = vector.broadcast %22 : vector<1x128xf32> to vector<2x128xf32>
    %24 = arith.addf %21, %23 : vector<2x128xf32>
    %cst_25 = arith.constant 0.000000e+00 : f32
    %25 = vector.broadcast %cst_25 : f32 to vector<2x128xf32>
    %26 = arith.maximumf %24, %25 : vector<2x128xf32>
    %c0_26 = arith.constant 0 : index
    %c0_27 = arith.constant 0 : index
    %27 = vector.load %arg11[%c0_26, %c0_27] : memref<128x128xf32, #tpu.memory_space<vmem>>, vector<128x128xf32>
    %cst_28 = arith.constant dense<0.000000e+00> : vector<2x128xf32>
    %28 = tpu.matmul %26, %27, %cst_28 {dimension_numbers = #tpu.dot_dimension_numbers<[1], [0], [0], [1], [0, 0, 1, 1], [], []>} : vector<2x128xf32>, vector<128x128xf32>, vector<2x128xf32> -> vector<2x128xf32>
    %c0_29 = arith.constant 0 : index
    %c0_30 = arith.constant 0 : index
    %29 = vector.load %arg12[%c0_29, %c0_30] : memref<1x128xf32, #tpu.memory_space<vmem>>, vector<1x128xf32>
    %30 = vector.broadcast %29 : vector<1x128xf32> to vector<2x128xf32>
    %31 = arith.addf %28, %30 : vector<2x128xf32>
    %cst_31 = arith.constant 0.000000e+00 : f32
    %32 = vector.broadcast %cst_31 : f32 to vector<2x128xf32>
    %33 = arith.maximumf %31, %32 : vector<2x128xf32>
    %34 = arith.addf %33, %19 : vector<2x128xf32>
    %c0_32 = arith.constant 0 : index
    %c0_33 = arith.constant 0 : index
    %35 = vector.load %arg13[%c0_32, %c0_33] : memref<128x32xf32, #tpu.memory_space<vmem>>, vector<128x32xf32>
    %cst_34 = arith.constant dense<0.000000e+00> : vector<2x32xf32>
    %36 = tpu.matmul %34, %35, %cst_34 {dimension_numbers = #tpu.dot_dimension_numbers<[1], [0], [0], [1], [0, 0, 1, 1], [], []>} : vector<2x128xf32>, vector<128x32xf32>, vector<2x32xf32> -> vector<2x32xf32>
    %c0_35 = arith.constant 0 : index
    %c0_36 = arith.constant 0 : index
    %37 = vector.load %arg14[%c0_35, %c0_36] : memref<1x32xf32, #tpu.memory_space<vmem>>, vector<1x32xf32>
    %38 = vector.broadcast %37 : vector<1x32xf32> to vector<2x32xf32>
    %39 = arith.addf %36, %38 : vector<2x32xf32>
    %c0_37 = arith.constant 0 : index
    %c0_38 = arith.constant 0 : index
    %40 = vector.load %arg15[%c0_37, %c0_38] : memref<128x32xf32, #tpu.memory_space<vmem>>, vector<128x32xf32>
    %cst_39 = arith.constant dense<0.000000e+00> : vector<2x32xf32>
    %41 = tpu.matmul %34, %40, %cst_39 {dimension_numbers = #tpu.dot_dimension_numbers<[1], [0], [0], [1], [0, 0, 1, 1], [], []>} : vector<2x128xf32>, vector<128x32xf32>, vector<2x32xf32> -> vector<2x32xf32>
    %c0_40 = arith.constant 0 : index
    %c0_41 = arith.constant 0 : index
    %42 = vector.load %arg16[%c0_40, %c0_41] : memref<1x32xf32, #tpu.memory_space<vmem>>, vector<1x32xf32>
    %43 = vector.broadcast %42 : vector<1x32xf32> to vector<2x32xf32>
    %44 = arith.addf %41, %43 : vector<2x32xf32>
    %cst_42 = arith.constant 5.000000e-01 : f32
    %45 = vector.broadcast %cst_42 : f32 to vector<2x32xf32>
    %46 = arith.mulf %45, %44 : vector<2x32xf32>
    %47 = math.exp %46 : vector<2x32xf32>
    %c0_43 = arith.constant 0 : index
    %c0_44 = arith.constant 0 : index
    %48 = vector.load %arg2[%c0_43, %c0_44] : memref<2x32xf32, #tpu.memory_space<vmem>>, vector<2x32xf32>
    %49 = arith.mulf %47, %48 : vector<2x32xf32>
    %50 = arith.addf %39, %49 : vector<2x32xf32>
    %c0_45 = arith.constant 0 : index
    %c0_46 = arith.constant 0 : index
    %51 = vector.load %arg24[%c0_45, %c0_46] : memref<2x32xf32, #tpu.memory_space<vmem>>, vector<2x32xf32>
    tpu.vector_store %arg24[%c0_45, %c0_46], %39 {strides = array<i32>} : memref<2x32xf32, #tpu.memory_space<vmem>>, vector<2x32xf32>,
    %c0_47 = arith.constant 0 : index
    %c0_48 = arith.constant 0 : index
    %52 = vector.load %arg25[%c0_47, %c0_48] : memref<2x32xf32, #tpu.memory_space<vmem>>, vector<2x32xf32>
    tpu.vector_store %arg25[%c0_47, %c0_48], %44 {strides = array<i32>} : memref<2x32xf32, #tpu.memory_space<vmem>>, vector<2x32xf32>,
    %c0_49 = arith.constant 0 : index
    %c0_50 = arith.constant 0 : index
    %53 = vector.load %arg17[%c0_49, %c0_50] : memref<32x32xf32, #tpu.memory_space<vmem>>, vector<32x32xf32>
    %cst_51 = arith.constant dense<0.000000e+00> : vector<2x32xf32>
    %54 = tpu.matmul %50, %53, %cst_51 {dimension_numbers = #tpu.dot_dimension_numbers<[1], [0], [0], [1], [0, 0, 1, 1], [], []>} : vector<2x32xf32>, vector<32x32xf32>, vector<2x32xf32> -> vector<2x32xf32>
    %c0_52 = arith.constant 0 : index
    %c0_53 = arith.constant 0 : index
    %55 = vector.load %arg18[%c0_52, %c0_53] : memref<1x32xf32, #tpu.memory_space<vmem>>, vector<1x32xf32>
    %56 = vector.broadcast %55 : vector<1x32xf32> to vector<2x32xf32>
    %57 = arith.addf %54, %56 : vector<2x32xf32>
    %cst_54 = arith.constant 0.000000e+00 : f32
    %58 = vector.broadcast %cst_54 : f32 to vector<2x32xf32>
    %59 = arith.maximumf %57, %58 : vector<2x32xf32>
    %c0_55 = arith.constant 0 : index
    %c0_56 = arith.constant 0 : index
    %60 = vector.load %arg17[%c0_55, %c0_56] : memref<32x32xf32, #tpu.memory_space<vmem>>, vector<32x32xf32>
    %cst_57 = arith.constant dense<0.000000e+00> : vector<2x32xf32>
    %61 = tpu.matmul %59, %60, %cst_57 {dimension_numbers = #tpu.dot_dimension_numbers<[1], [0], [0], [1], [0, 0, 1, 1], [], []>} : vector<2x32xf32>, vector<32x32xf32>, vector<2x32xf32> -> vector<2x32xf32>
    %c0_58 = arith.constant 0 : index
    %c0_59 = arith.constant 0 : index
    %62 = vector.load %arg18[%c0_58, %c0_59] : memref<1x32xf32, #tpu.memory_space<vmem>>, vector<1x32xf32>
    %63 = vector.broadcast %62 : vector<1x32xf32> to vector<2x32xf32>
    %64 = arith.addf %61, %63 : vector<2x32xf32>
    %cst_60 = arith.constant 0.000000e+00 : f32
    %65 = vector.broadcast %cst_60 : f32 to vector<2x32xf32>
    %66 = arith.maximumf %64, %65 : vector<2x32xf32>
    %c0_61 = arith.constant 0 : index
    %c0_62 = arith.constant 0 : index
    %67 = vector.load %arg17[%c0_61, %c0_62] : memref<32x32xf32, #tpu.memory_space<vmem>>, vector<32x32xf32>
    %cst_63 = arith.constant dense<0.000000e+00> : vector<2x32xf32>
    %68 = tpu.matmul %66, %67, %cst_63 {dimension_numbers = #tpu.dot_dimension_numbers<[1], [0], [0], [1], [0, 0, 1, 1], [], []>} : vector<2x32xf32>, vector<32x32xf32>, vector<2x32xf32> -> vector<2x32xf32>
    %c0_64 = arith.constant 0 : index
    %c0_65 = arith.constant 0 : index
    %69 = vector.load %arg18[%c0_64, %c0_65] : memref<1x32xf32, #tpu.memory_space<vmem>>, vector<1x32xf32>
    %70 = vector.broadcast %69 : vector<1x32xf32> to vector<2x32xf32>
    %71 = arith.addf %68, %70 : vector<2x32xf32>
    %cst_66 = arith.constant 0.000000e+00 : f32
    %72 = vector.broadcast %cst_66 : f32 to vector<2x32xf32>
    %73 = arith.maximumf %71, %72 : vector<2x32xf32>
    %74 = tpu.concatenate %5, %73 in 1 : vector<2x32xf32>, vector<2x32xf32> -> vector<2x64xf32>
    %c0_67 = arith.constant 0 : index
    %c0_68 = arith.constant 0 : index
    %75 = vector.load %arg19[%c0_67, %c0_68] : memref<64x32xf32, #tpu.memory_space<vmem>>, vector<64x32xf32>
    %cst_69 = arith.constant dense<0.000000e+00> : vector<2x32xf32>
    %76 = tpu.matmul %74, %75, %cst_69 {dimension_numbers = #tpu.dot_dimension_numbers<[1], [0], [0], [1], [0, 0, 1, 1], [], []>} : vector<2x64xf32>, vector<64x32xf32>, vector<2x32xf32> -> vector<2x32xf32>
    %c0_70 = arith.constant 0 : index
    %c0_71 = arith.constant 0 : index
    %77 = vector.load %arg20[%c0_70, %c0_71] : memref<1x32xf32, #tpu.memory_space<vmem>>, vector<1x32xf32>
    %78 = vector.broadcast %77 : vector<1x32xf32> to vector<2x32xf32>
    %79 = arith.addf %76, %78 : vector<2x32xf32>
    %c0_72 = arith.constant 0 : index
    %c0_73 = arith.constant 0 : index
    %80 = vector.load %arg21[%c0_72, %c0_73] : memref<32x1024xf32, #tpu.memory_space<vmem>>, vector<32x1024xf32>
    %cst_74 = arith.constant dense<0.000000e+00> : vector<2x1024xf32>
    %81 = tpu.matmul %79, %80, %cst_74 {dimension_numbers = #tpu.dot_dimension_numbers<[1], [0], [0], [1], [0, 0, 1, 1], [], []>} : vector<2x32xf32>, vector<32x1024xf32>, vector<2x1024xf32> -> vector<2x1024xf32>
    %c0_75 = arith.constant 0 : index
    %c0_76 = arith.constant 0 : index
    %82 = vector.load %arg22[%c0_75, %c0_76] : memref<1x1024xf32, #tpu.memory_space<vmem>>, vector<1x1024xf32>
    %83 = vector.broadcast %82 : vector<1x1024xf32> to vector<2x1024xf32>
    %84 = arith.addf %81, %83 : vector<2x1024xf32>
    %c0_77 = arith.constant 0 : index
    %c0_78 = arith.constant 0 : index
    %85 = vector.load %arg26[%c0_77, %c0_78] : memref<2x1024xf32, #tpu.memory_space<vmem>>, vector<2x1024xf32>
    tpu.vector_store %arg26[%c0_77, %c0_78], %84 {strides = array<i32>} : memref<2x1024xf32, #tpu.memory_space<vmem>>, vector<2x1024xf32>,
    return
  }
}

module attributes {stable_mosaic.version = 11 : i64} {
  func.func @_dec_bilstm_kernel(%arg0: memref<2x1024xf32, #tpu.memory_space<vmem>>, %arg1: memref<2x2x128xf32, #tpu.memory_space<vmem>>, %arg2: memref<2x2x128xf32, #tpu.memory_space<vmem>>, %arg3: memref<2x128x512xf32, #tpu.memory_space<vmem>>, %arg4: memref<256x128xf32, #tpu.memory_space<vmem>>, %arg5: memref<1x128xf32, #tpu.memory_space<vmem>>, %arg6: memref<6x2x128xf32, #tpu.memory_space<vmem>>) attributes {dimension_semantics = [], scalar_prefetch = 0 : i64, scratch_operands = 0 : i64, tpu.core_type = #tpu.core_type<tc>} {
    %c0 = arith.constant 0 : index
    %c0_0 = arith.constant 0 : index
    %0 = vector.load %arg0[%c0, %c0_0] : memref<2x1024xf32, #tpu.memory_space<vmem>>, vector<2x1024xf32>
    %1 = vector.extract_strided_slice %0 {offsets = [0, 0], sizes = [2, 512], strides = [1, 1]} : vector<2x1024xf32> to vector<2x512xf32>
    %2 = vector.extract_strided_slice %0 {offsets = [0, 512], sizes = [2, 512], strides = [1, 1]} : vector<2x1024xf32> to vector<2x512xf32>
    %c0_1 = arith.constant 0 : index
    %c0_2 = arith.constant 0 : index
    %c0_3 = arith.constant 0 : index
    %3 = vector.load %arg3[%c0_1, %c0_2, %c0_3] : memref<2x128x512xf32, #tpu.memory_space<vmem>>, vector<1x128x512xf32>
    %4 = vector.shape_cast %3 : vector<1x128x512xf32> to vector<128x512xf32>
    %c1 = arith.constant 1 : index
    %c0_4 = arith.constant 0 : index
    %c0_5 = arith.constant 0 : index
    %5 = vector.load %arg3[%c1, %c0_4, %c0_5] : memref<2x128x512xf32, #tpu.memory_space<vmem>>, vector<1x128x512xf32>
    %6 = vector.shape_cast %5 : vector<1x128x512xf32> to vector<128x512xf32>
    %c0_6 = arith.constant 0 : index
    %c0_7 = arith.constant 0 : index
    %c0_8 = arith.constant 0 : index
    %7 = vector.load %arg1[%c0_6, %c0_7, %c0_8] : memref<2x2x128xf32, #tpu.memory_space<vmem>>, vector<1x2x128xf32>
    %8 = vector.shape_cast %7 : vector<1x2x128xf32> to vector<2x128xf32>
    %c0_9 = arith.constant 0 : index
    %c0_10 = arith.constant 0 : index
    %c0_11 = arith.constant 0 : index
    %9 = vector.load %arg2[%c0_9, %c0_10, %c0_11] : memref<2x2x128xf32, #tpu.memory_space<vmem>>, vector<1x2x128xf32>
    %10 = vector.shape_cast %9 : vector<1x2x128xf32> to vector<2x128xf32>
    %c1_12 = arith.constant 1 : index
    %c0_13 = arith.constant 0 : index
    %c0_14 = arith.constant 0 : index
    %11 = vector.load %arg1[%c1_12, %c0_13, %c0_14] : memref<2x2x128xf32, #tpu.memory_space<vmem>>, vector<1x2x128xf32>
    %12 = vector.shape_cast %11 : vector<1x2x128xf32> to vector<2x128xf32>
    %c1_15 = arith.constant 1 : index
    %c0_16 = arith.constant 0 : index
    %c0_17 = arith.constant 0 : index
    %13 = vector.load %arg2[%c1_15, %c0_16, %c0_17] : memref<2x2x128xf32, #tpu.memory_space<vmem>>, vector<1x2x128xf32>
    %14 = vector.shape_cast %13 : vector<1x2x128xf32> to vector<2x128xf32>
    %cst = arith.constant dense<0.000000e+00> : vector<2x512xf32>
    %15 = tpu.matmul %8, %4, %cst {dimension_numbers = #tpu.dot_dimension_numbers<[1], [0], [0], [1], [0, 0, 1, 1], [], []>} : vector<2x128xf32>, vector<128x512xf32>, vector<2x512xf32> -> vector<2x512xf32>
    %16 = arith.addf %1, %15 : vector<2x512xf32>
    %17 = vector.extract_strided_slice %16 {offsets = [0, 0], sizes = [2, 128], strides = [1, 1]} : vector<2x512xf32> to vector<2x128xf32>
    %18 = arith.negf %17 : vector<2x128xf32>
    %19 = math.exp %18 : vector<2x128xf32>
    %cst_18 = arith.constant 1.000000e+00 : f32
    %20 = vector.broadcast %cst_18 : f32 to vector<2x128xf32>
    %21 = arith.addf %20, %19 : vector<2x128xf32>
    %22 = arith.divf %20, %21 : vector<2x128xf32>
    %23 = vector.extract_strided_slice %16 {offsets = [0, 128], sizes = [2, 128], strides = [1, 1]} : vector<2x512xf32> to vector<2x128xf32>
    %24 = arith.negf %23 : vector<2x128xf32>
    %25 = math.exp %24 : vector<2x128xf32>
    %cst_19 = arith.constant 1.000000e+00 : f32
    %26 = vector.broadcast %cst_19 : f32 to vector<2x128xf32>
    %27 = arith.addf %26, %25 : vector<2x128xf32>
    %28 = arith.divf %26, %27 : vector<2x128xf32>
    %29 = vector.extract_strided_slice %16 {offsets = [0, 256], sizes = [2, 128], strides = [1, 1]} : vector<2x512xf32> to vector<2x128xf32>
    %30 = math.tanh %29 : vector<2x128xf32>
    %31 = vector.extract_strided_slice %16 {offsets = [0, 384], sizes = [2, 128], strides = [1, 1]} : vector<2x512xf32> to vector<2x128xf32>
    %32 = arith.negf %31 : vector<2x128xf32>
    %33 = math.exp %32 : vector<2x128xf32>
    %cst_20 = arith.constant 1.000000e+00 : f32
    %34 = vector.broadcast %cst_20 : f32 to vector<2x128xf32>
    %35 = arith.addf %34, %33 : vector<2x128xf32>
    %36 = arith.divf %34, %35 : vector<2x128xf32>
    %37 = arith.mulf %28, %10 : vector<2x128xf32>
    %38 = arith.mulf %22, %30 : vector<2x128xf32>
    %39 = arith.addf %37, %38 : vector<2x128xf32>
    %40 = math.tanh %39 : vector<2x128xf32>
    %41 = arith.mulf %36, %40 : vector<2x128xf32>
    %cst_21 = arith.constant dense<0.000000e+00> : vector<2x512xf32>
    %42 = tpu.matmul %12, %6, %cst_21 {dimension_numbers = #tpu.dot_dimension_numbers<[1], [0], [0], [1], [0, 0, 1, 1], [], []>} : vector<2x128xf32>, vector<128x512xf32>, vector<2x512xf32> -> vector<2x512xf32>
    %43 = arith.addf %2, %42 : vector<2x512xf32>
    %44 = vector.extract_strided_slice %43 {offsets = [0, 0], sizes = [2, 128], strides = [1, 1]} : vector<2x512xf32> to vector<2x128xf32>
    %45 = arith.negf %44 : vector<2x128xf32>
    %46 = math.exp %45 : vector<2x128xf32>
    %cst_22 = arith.constant 1.000000e+00 : f32
    %47 = vector.broadcast %cst_22 : f32 to vector<2x128xf32>
    %48 = arith.addf %47, %46 : vector<2x128xf32>
    %49 = arith.divf %47, %48 : vector<2x128xf32>
    %50 = vector.extract_strided_slice %43 {offsets = [0, 128], sizes = [2, 128], strides = [1, 1]} : vector<2x512xf32> to vector<2x128xf32>
    %51 = arith.negf %50 : vector<2x128xf32>
    %52 = math.exp %51 : vector<2x128xf32>
    %cst_23 = arith.constant 1.000000e+00 : f32
    %53 = vector.broadcast %cst_23 : f32 to vector<2x128xf32>
    %54 = arith.addf %53, %52 : vector<2x128xf32>
    %55 = arith.divf %53, %54 : vector<2x128xf32>
    %56 = vector.extract_strided_slice %43 {offsets = [0, 256], sizes = [2, 128], strides = [1, 1]} : vector<2x512xf32> to vector<2x128xf32>
    %57 = math.tanh %56 : vector<2x128xf32>
    %58 = vector.extract_strided_slice %43 {offsets = [0, 384], sizes = [2, 128], strides = [1, 1]} : vector<2x512xf32> to vector<2x128xf32>
    %59 = arith.negf %58 : vector<2x128xf32>
    %60 = math.exp %59 : vector<2x128xf32>
    %cst_24 = arith.constant 1.000000e+00 : f32
    %61 = vector.broadcast %cst_24 : f32 to vector<2x128xf32>
    %62 = arith.addf %61, %60 : vector<2x128xf32>
    %63 = arith.divf %61, %62 : vector<2x128xf32>
    %64 = arith.mulf %55, %14 : vector<2x128xf32>
    %65 = arith.mulf %49, %57 : vector<2x128xf32>
    %66 = arith.addf %64, %65 : vector<2x128xf32>
    %67 = math.tanh %66 : vector<2x128xf32>
    %68 = arith.mulf %63, %67 : vector<2x128xf32>
    %cst_25 = arith.constant dense<0.000000e+00> : vector<2x512xf32>
    %69 = tpu.matmul %41, %4, %cst_25 {dimension_numbers = #tpu.dot_dimension_numbers<[1], [0], [0], [1], [0, 0, 1, 1], [], []>} : vector<2x128xf32>, vector<128x512xf32>, vector<2x512xf32> -> vector<2x512xf32>
    %70 = arith.addf %1, %69 : vector<2x512xf32>
    %71 = vector.extract_strided_slice %70 {offsets = [0, 0], sizes = [2, 128], strides = [1, 1]} : vector<2x512xf32> to vector<2x128xf32>
    %72 = arith.negf %71 : vector<2x128xf32>
    %73 = math.exp %72 : vector<2x128xf32>
    %cst_26 = arith.constant 1.000000e+00 : f32
    %74 = vector.broadcast %cst_26 : f32 to vector<2x128xf32>
    %75 = arith.addf %74, %73 : vector<2x128xf32>
    %76 = arith.divf %74, %75 : vector<2x128xf32>
    %77 = vector.extract_strided_slice %70 {offsets = [0, 128], sizes = [2, 128], strides = [1, 1]} : vector<2x512xf32> to vector<2x128xf32>
    %78 = arith.negf %77 : vector<2x128xf32>
    %79 = math.exp %78 : vector<2x128xf32>
    %cst_27 = arith.constant 1.000000e+00 : f32
    %80 = vector.broadcast %cst_27 : f32 to vector<2x128xf32>
    %81 = arith.addf %80, %79 : vector<2x128xf32>
    %82 = arith.divf %80, %81 : vector<2x128xf32>
    %83 = vector.extract_strided_slice %70 {offsets = [0, 256], sizes = [2, 128], strides = [1, 1]} : vector<2x512xf32> to vector<2x128xf32>
    %84 = math.tanh %83 : vector<2x128xf32>
    %85 = vector.extract_strided_slice %70 {offsets = [0, 384], sizes = [2, 128], strides = [1, 1]} : vector<2x512xf32> to vector<2x128xf32>
    %86 = arith.negf %85 : vector<2x128xf32>
    %87 = math.exp %86 : vector<2x128xf32>
    %cst_28 = arith.constant 1.000000e+00 : f32
    %88 = vector.broadcast %cst_28 : f32 to vector<2x128xf32>
    %89 = arith.addf %88, %87 : vector<2x128xf32>
    %90 = arith.divf %88, %89 : vector<2x128xf32>
    %91 = arith.mulf %82, %39 : vector<2x128xf32>
    %92 = arith.mulf %76, %84 : vector<2x128xf32>
    %93 = arith.addf %91, %92 : vector<2x128xf32>
    %94 = math.tanh %93 : vector<2x128xf32>
    %95 = arith.mulf %90, %94 : vector<2x128xf32>
    %cst_29 = arith.constant dense<0.000000e+00> : vector<2x512xf32>
    %96 = tpu.matmul %68, %6, %cst_29 {dimension_numbers = #tpu.dot_dimension_numbers<[1], [0], [0], [1], [0, 0, 1, 1], [], []>} : vector<2x128xf32>, vector<128x512xf32>, vector<2x512xf32> -> vector<2x512xf32>
    %97 = arith.addf %2, %96 : vector<2x512xf32>
    %98 = vector.extract_strided_slice %97 {offsets = [0, 0], sizes = [2, 128], strides = [1, 1]} : vector<2x512xf32> to vector<2x128xf32>
    %99 = arith.negf %98 : vector<2x128xf32>
    %100 = math.exp %99 : vector<2x128xf32>
    %cst_30 = arith.constant 1.000000e+00 : f32
    %101 = vector.broadcast %cst_30 : f32 to vector<2x128xf32>
    %102 = arith.addf %101, %100 : vector<2x128xf32>
    %103 = arith.divf %101, %102 : vector<2x128xf32>
    %104 = vector.extract_strided_slice %97 {offsets = [0, 128], sizes = [2, 128], strides = [1, 1]} : vector<2x512xf32> to vector<2x128xf32>
    %105 = arith.negf %104 : vector<2x128xf32>
    %106 = math.exp %105 : vector<2x128xf32>
    %cst_31 = arith.constant 1.000000e+00 : f32
    %107 = vector.broadcast %cst_31 : f32 to vector<2x128xf32>
    %108 = arith.addf %107, %106 : vector<2x128xf32>
    %109 = arith.divf %107, %108 : vector<2x128xf32>
    %110 = vector.extract_strided_slice %97 {offsets = [0, 256], sizes = [2, 128], strides = [1, 1]} : vector<2x512xf32> to vector<2x128xf32>
    %111 = math.tanh %110 : vector<2x128xf32>
    %112 = vector.extract_strided_slice %97 {offsets = [0, 384], sizes = [2, 128], strides = [1, 1]} : vector<2x512xf32> to vector<2x128xf32>
    %113 = arith.negf %112 : vector<2x128xf32>
    %114 = math.exp %113 : vector<2x128xf32>
    %cst_32 = arith.constant 1.000000e+00 : f32
    %115 = vector.broadcast %cst_32 : f32 to vector<2x128xf32>
    %116 = arith.addf %115, %114 : vector<2x128xf32>
    %117 = arith.divf %115, %116 : vector<2x128xf32>
    %118 = arith.mulf %109, %66 : vector<2x128xf32>
    %119 = arith.mulf %103, %111 : vector<2x128xf32>
    %120 = arith.addf %118, %119 : vector<2x128xf32>
    %121 = math.tanh %120 : vector<2x128xf32>
    %122 = arith.mulf %117, %121 : vector<2x128xf32>
    %cst_33 = arith.constant dense<0.000000e+00> : vector<2x512xf32>
    %123 = tpu.matmul %95, %4, %cst_33 {dimension_numbers = #tpu.dot_dimension_numbers<[1], [0], [0], [1], [0, 0, 1, 1], [], []>} : vector<2x128xf32>, vector<128x512xf32>, vector<2x512xf32> -> vector<2x512xf32>
    %124 = arith.addf %1, %123 : vector<2x512xf32>
    %125 = vector.extract_strided_slice %124 {offsets = [0, 0], sizes = [2, 128], strides = [1, 1]} : vector<2x512xf32> to vector<2x128xf32>
    %126 = arith.negf %125 : vector<2x128xf32>
    %127 = math.exp %126 : vector<2x128xf32>
    %cst_34 = arith.constant 1.000000e+00 : f32
    %128 = vector.broadcast %cst_34 : f32 to vector<2x128xf32>
    %129 = arith.addf %128, %127 : vector<2x128xf32>
    %130 = arith.divf %128, %129 : vector<2x128xf32>
    %131 = vector.extract_strided_slice %124 {offsets = [0, 128], sizes = [2, 128], strides = [1, 1]} : vector<2x512xf32> to vector<2x128xf32>
    %132 = arith.negf %131 : vector<2x128xf32>
    %133 = math.exp %132 : vector<2x128xf32>
    %cst_35 = arith.constant 1.000000e+00 : f32
    %134 = vector.broadcast %cst_35 : f32 to vector<2x128xf32>
    %135 = arith.addf %134, %133 : vector<2x128xf32>
    %136 = arith.divf %134, %135 : vector<2x128xf32>
    %137 = vector.extract_strided_slice %124 {offsets = [0, 256], sizes = [2, 128], strides = [1, 1]} : vector<2x512xf32> to vector<2x128xf32>
    %138 = math.tanh %137 : vector<2x128xf32>
    %139 = vector.extract_strided_slice %124 {offsets = [0, 384], sizes = [2, 128], strides = [1, 1]} : vector<2x512xf32> to vector<2x128xf32>
    %140 = arith.negf %139 : vector<2x128xf32>
    %141 = math.exp %140 : vector<2x128xf32>
    %cst_36 = arith.constant 1.000000e+00 : f32
    %142 = vector.broadcast %cst_36 : f32 to vector<2x128xf32>
    %143 = arith.addf %142, %141 : vector<2x128xf32>
    %144 = arith.divf %142, %143 : vector<2x128xf32>
    %145 = arith.mulf %136, %93 : vector<2x128xf32>
    %146 = arith.mulf %130, %138 : vector<2x128xf32>
    %147 = arith.addf %145, %146 : vector<2x128xf32>
    %148 = math.tanh %147 : vector<2x128xf32>
    %149 = arith.mulf %144, %148 : vector<2x128xf32>
    %cst_37 = arith.constant dense<0.000000e+00> : vector<2x512xf32>
    %150 = tpu.matmul %122, %6, %cst_37 {dimension_numbers = #tpu.dot_dimension_numbers<[1], [0], [0], [1], [0, 0, 1, 1], [], []>} : vector<2x128xf32>, vector<128x512xf32>, vector<2x512xf32> -> vector<2x512xf32>
    %151 = arith.addf %2, %150 : vector<2x512xf32>
    %152 = vector.extract_strided_slice %151 {offsets = [0, 0], sizes = [2, 128], strides = [1, 1]} : vector<2x512xf32> to vector<2x128xf32>
    %153 = arith.negf %152 : vector<2x128xf32>
    %154 = math.exp %153 : vector<2x128xf32>
    %cst_38 = arith.constant 1.000000e+00 : f32
    %155 = vector.broadcast %cst_38 : f32 to vector<2x128xf32>
    %156 = arith.addf %155, %154 : vector<2x128xf32>
    %157 = arith.divf %155, %156 : vector<2x128xf32>
    %158 = vector.extract_strided_slice %151 {offsets = [0, 128], sizes = [2, 128], strides = [1, 1]} : vector<2x512xf32> to vector<2x128xf32>
    %159 = arith.negf %158 : vector<2x128xf32>
    %160 = math.exp %159 : vector<2x128xf32>
    %cst_39 = arith.constant 1.000000e+00 : f32
    %161 = vector.broadcast %cst_39 : f32 to vector<2x128xf32>
    %162 = arith.addf %161, %160 : vector<2x128xf32>
    %163 = arith.divf %161, %162 : vector<2x128xf32>
    %164 = vector.extract_strided_slice %151 {offsets = [0, 256], sizes = [2, 128], strides = [1, 1]} : vector<2x512xf32> to vector<2x128xf32>
    %165 = math.tanh %164 : vector<2x128xf32>
    %166 = vector.extract_strided_slice %151 {offsets = [0, 384], sizes = [2, 128], strides = [1, 1]} : vector<2x512xf32> to vector<2x128xf32>
    %167 = arith.negf %166 : vector<2x128xf32>
    %168 = math.exp %167 : vector<2x128xf32>
    %cst_40 = arith.constant 1.000000e+00 : f32
    %169 = vector.broadcast %cst_40 : f32 to vector<2x128xf32>
    %170 = arith.addf %169, %168 : vector<2x128xf32>
    %171 = arith.divf %169, %170 : vector<2x128xf32>
    %172 = arith.mulf %163, %120 : vector<2x128xf32>
    %173 = arith.mulf %157, %165 : vector<2x128xf32>
    %174 = arith.addf %172, %173 : vector<2x128xf32>
    %175 = math.tanh %174 : vector<2x128xf32>
    %176 = arith.mulf %171, %175 : vector<2x128xf32>
    %cst_41 = arith.constant dense<0.000000e+00> : vector<2x512xf32>
    %177 = tpu.matmul %149, %4, %cst_41 {dimension_numbers = #tpu.dot_dimension_numbers<[1], [0], [0], [1], [0, 0, 1, 1], [], []>} : vector<2x128xf32>, vector<128x512xf32>, vector<2x512xf32> -> vector<2x512xf32>
    %178 = arith.addf %1, %177 : vector<2x512xf32>
    %179 = vector.extract_strided_slice %178 {offsets = [0, 0], sizes = [2, 128], strides = [1, 1]} : vector<2x512xf32> to vector<2x128xf32>
    %180 = arith.negf %179 : vector<2x128xf32>
    %181 = math.exp %180 : vector<2x128xf32>
    %cst_42 = arith.constant 1.000000e+00 : f32
    %182 = vector.broadcast %cst_42 : f32 to vector<2x128xf32>
    %183 = arith.addf %182, %181 : vector<2x128xf32>
    %184 = arith.divf %182, %183 : vector<2x128xf32>
    %185 = vector.extract_strided_slice %178 {offsets = [0, 128], sizes = [2, 128], strides = [1, 1]} : vector<2x512xf32> to vector<2x128xf32>
    %186 = arith.negf %185 : vector<2x128xf32>
    %187 = math.exp %186 : vector<2x128xf32>
    %cst_43 = arith.constant 1.000000e+00 : f32
    %188 = vector.broadcast %cst_43 : f32 to vector<2x128xf32>
    %189 = arith.addf %188, %187 : vector<2x128xf32>
    %190 = arith.divf %188, %189 : vector<2x128xf32>
    %191 = vector.extract_strided_slice %178 {offsets = [0, 256], sizes = [2, 128], strides = [1, 1]} : vector<2x512xf32> to vector<2x128xf32>
    %192 = math.tanh %191 : vector<2x128xf32>
    %193 = vector.extract_strided_slice %178 {offsets = [0, 384], sizes = [2, 128], strides = [1, 1]} : vector<2x512xf32> to vector<2x128xf32>
    %194 = arith.negf %193 : vector<2x128xf32>
    %195 = math.exp %194 : vector<2x128xf32>
    %cst_44 = arith.constant 1.000000e+00 : f32
    %196 = vector.broadcast %cst_44 : f32 to vector<2x128xf32>
    %197 = arith.addf %196, %195 : vector<2x128xf32>
    %198 = arith.divf %196, %197 : vector<2x128xf32>
    %199 = arith.mulf %190, %147 : vector<2x128xf32>
    %200 = arith.mulf %184, %192 : vector<2x128xf32>
    %201 = arith.addf %199, %200 : vector<2x128xf32>
    %202 = math.tanh %201 : vector<2x128xf32>
    %203 = arith.mulf %198, %202 : vector<2x128xf32>
    %cst_45 = arith.constant dense<0.000000e+00> : vector<2x512xf32>
    %204 = tpu.matmul %176, %6, %cst_45 {dimension_numbers = #tpu.dot_dimension_numbers<[1], [0], [0], [1], [0, 0, 1, 1], [], []>} : vector<2x128xf32>, vector<128x512xf32>, vector<2x512xf32> -> vector<2x512xf32>
    %205 = arith.addf %2, %204 : vector<2x512xf32>
    %206 = vector.extract_strided_slice %205 {offsets = [0, 0], sizes = [2, 128], strides = [1, 1]} : vector<2x512xf32> to vector<2x128xf32>
    %207 = arith.negf %206 : vector<2x128xf32>
    %208 = math.exp %207 : vector<2x128xf32>
    %cst_46 = arith.constant 1.000000e+00 : f32
    %209 = vector.broadcast %cst_46 : f32 to vector<2x128xf32>
    %210 = arith.addf %209, %208 : vector<2x128xf32>
    %211 = arith.divf %209, %210 : vector<2x128xf32>
    %212 = vector.extract_strided_slice %205 {offsets = [0, 128], sizes = [2, 128], strides = [1, 1]} : vector<2x512xf32> to vector<2x128xf32>
    %213 = arith.negf %212 : vector<2x128xf32>
    %214 = math.exp %213 : vector<2x128xf32>
    %cst_47 = arith.constant 1.000000e+00 : f32
    %215 = vector.broadcast %cst_47 : f32 to vector<2x128xf32>
    %216 = arith.addf %215, %214 : vector<2x128xf32>
    %217 = arith.divf %215, %216 : vector<2x128xf32>
    %218 = vector.extract_strided_slice %205 {offsets = [0, 256], sizes = [2, 128], strides = [1, 1]} : vector<2x512xf32> to vector<2x128xf32>
    %219 = math.tanh %218 : vector<2x128xf32>
    %220 = vector.extract_strided_slice %205 {offsets = [0, 384], sizes = [2, 128], strides = [1, 1]} : vector<2x512xf32> to vector<2x128xf32>
    %221 = arith.negf %220 : vector<2x128xf32>
    %222 = math.exp %221 : vector<2x128xf32>
    %cst_48 = arith.constant 1.000000e+00 : f32
    %223 = vector.broadcast %cst_48 : f32 to vector<2x128xf32>
    %224 = arith.addf %223, %222 : vector<2x128xf32>
    %225 = arith.divf %223, %224 : vector<2x128xf32>
    %226 = arith.mulf %217, %174 : vector<2x128xf32>
    %227 = arith.mulf %211, %219 : vector<2x128xf32>
    %228 = arith.addf %226, %227 : vector<2x128xf32>
    %229 = math.tanh %228 : vector<2x128xf32>
    %230 = arith.mulf %225, %229 : vector<2x128xf32>
    %cst_49 = arith.constant dense<0.000000e+00> : vector<2x512xf32>
    %231 = tpu.matmul %203, %4, %cst_49 {dimension_numbers = #tpu.dot_dimension_numbers<[1], [0], [0], [1], [0, 0, 1, 1], [], []>} : vector<2x128xf32>, vector<128x512xf32>, vector<2x512xf32> -> vector<2x512xf32>
    %232 = arith.addf %1, %231 : vector<2x512xf32>
    %233 = vector.extract_strided_slice %232 {offsets = [0, 0], sizes = [2, 128], strides = [1, 1]} : vector<2x512xf32> to vector<2x128xf32>
    %234 = arith.negf %233 : vector<2x128xf32>
    %235 = math.exp %234 : vector<2x128xf32>
    %cst_50 = arith.constant 1.000000e+00 : f32
    %236 = vector.broadcast %cst_50 : f32 to vector<2x128xf32>
    %237 = arith.addf %236, %235 : vector<2x128xf32>
    %238 = arith.divf %236, %237 : vector<2x128xf32>
    %239 = vector.extract_strided_slice %232 {offsets = [0, 128], sizes = [2, 128], strides = [1, 1]} : vector<2x512xf32> to vector<2x128xf32>
    %240 = arith.negf %239 : vector<2x128xf32>
    %241 = math.exp %240 : vector<2x128xf32>
    %cst_51 = arith.constant 1.000000e+00 : f32
    %242 = vector.broadcast %cst_51 : f32 to vector<2x128xf32>
    %243 = arith.addf %242, %241 : vector<2x128xf32>
    %244 = arith.divf %242, %243 : vector<2x128xf32>
    %245 = vector.extract_strided_slice %232 {offsets = [0, 256], sizes = [2, 128], strides = [1, 1]} : vector<2x512xf32> to vector<2x128xf32>
    %246 = math.tanh %245 : vector<2x128xf32>
    %247 = vector.extract_strided_slice %232 {offsets = [0, 384], sizes = [2, 128], strides = [1, 1]} : vector<2x512xf32> to vector<2x128xf32>
    %248 = arith.negf %247 : vector<2x128xf32>
    %249 = math.exp %248 : vector<2x128xf32>
    %cst_52 = arith.constant 1.000000e+00 : f32
    %250 = vector.broadcast %cst_52 : f32 to vector<2x128xf32>
    %251 = arith.addf %250, %249 : vector<2x128xf32>
    %252 = arith.divf %250, %251 : vector<2x128xf32>
    %253 = arith.mulf %244, %201 : vector<2x128xf32>
    %254 = arith.mulf %238, %246 : vector<2x128xf32>
    %255 = arith.addf %253, %254 : vector<2x128xf32>
    %256 = math.tanh %255 : vector<2x128xf32>
    %257 = arith.mulf %252, %256 : vector<2x128xf32>
    %cst_53 = arith.constant dense<0.000000e+00> : vector<2x512xf32>
    %258 = tpu.matmul %230, %6, %cst_53 {dimension_numbers = #tpu.dot_dimension_numbers<[1], [0], [0], [1], [0, 0, 1, 1], [], []>} : vector<2x128xf32>, vector<128x512xf32>, vector<2x512xf32> -> vector<2x512xf32>
    %259 = arith.addf %2, %258 : vector<2x512xf32>
    %260 = vector.extract_strided_slice %259 {offsets = [0, 0], sizes = [2, 128], strides = [1, 1]} : vector<2x512xf32> to vector<2x128xf32>
    %261 = arith.negf %260 : vector<2x128xf32>
    %262 = math.exp %261 : vector<2x128xf32>
    %cst_54 = arith.constant 1.000000e+00 : f32
    %263 = vector.broadcast %cst_54 : f32 to vector<2x128xf32>
    %264 = arith.addf %263, %262 : vector<2x128xf32>
    %265 = arith.divf %263, %264 : vector<2x128xf32>
    %266 = vector.extract_strided_slice %259 {offsets = [0, 128], sizes = [2, 128], strides = [1, 1]} : vector<2x512xf32> to vector<2x128xf32>
    %267 = arith.negf %266 : vector<2x128xf32>
    %268 = math.exp %267 : vector<2x128xf32>
    %cst_55 = arith.constant 1.000000e+00 : f32
    %269 = vector.broadcast %cst_55 : f32 to vector<2x128xf32>
    %270 = arith.addf %269, %268 : vector<2x128xf32>
    %271 = arith.divf %269, %270 : vector<2x128xf32>
    %272 = vector.extract_strided_slice %259 {offsets = [0, 256], sizes = [2, 128], strides = [1, 1]} : vector<2x512xf32> to vector<2x128xf32>
    %273 = math.tanh %272 : vector<2x128xf32>
    %274 = vector.extract_strided_slice %259 {offsets = [0, 384], sizes = [2, 128], strides = [1, 1]} : vector<2x512xf32> to vector<2x128xf32>
    %275 = arith.negf %274 : vector<2x128xf32>
    %276 = math.exp %275 : vector<2x128xf32>
    %cst_56 = arith.constant 1.000000e+00 : f32
    %277 = vector.broadcast %cst_56 : f32 to vector<2x128xf32>
    %278 = arith.addf %277, %276 : vector<2x128xf32>
    %279 = arith.divf %277, %278 : vector<2x128xf32>
    %280 = arith.mulf %271, %228 : vector<2x128xf32>
    %281 = arith.mulf %265, %273 : vector<2x128xf32>
    %282 = arith.addf %280, %281 : vector<2x128xf32>
    %283 = math.tanh %282 : vector<2x128xf32>
    %284 = arith.mulf %279, %283 : vector<2x128xf32>
    %cst_57 = arith.constant dense<0.000000e+00> : vector<2x512xf32>
    %285 = tpu.matmul %257, %4, %cst_57 {dimension_numbers = #tpu.dot_dimension_numbers<[1], [0], [0], [1], [0, 0, 1, 1], [], []>} : vector<2x128xf32>, vector<128x512xf32>, vector<2x512xf32> -> vector<2x512xf32>
    %286 = arith.addf %1, %285 : vector<2x512xf32>
    %287 = vector.extract_strided_slice %286 {offsets = [0, 0], sizes = [2, 128], strides = [1, 1]} : vector<2x512xf32> to vector<2x128xf32>
    %288 = arith.negf %287 : vector<2x128xf32>
    %289 = math.exp %288 : vector<2x128xf32>
    %cst_58 = arith.constant 1.000000e+00 : f32
    %290 = vector.broadcast %cst_58 : f32 to vector<2x128xf32>
    %291 = arith.addf %290, %289 : vector<2x128xf32>
    %292 = arith.divf %290, %291 : vector<2x128xf32>
    %293 = vector.extract_strided_slice %286 {offsets = [0, 128], sizes = [2, 128], strides = [1, 1]} : vector<2x512xf32> to vector<2x128xf32>
    %294 = arith.negf %293 : vector<2x128xf32>
    %295 = math.exp %294 : vector<2x128xf32>
    %cst_59 = arith.constant 1.000000e+00 : f32
    %296 = vector.broadcast %cst_59 : f32 to vector<2x128xf32>
    %297 = arith.addf %296, %295 : vector<2x128xf32>
    %298 = arith.divf %296, %297 : vector<2x128xf32>
    %299 = vector.extract_strided_slice %286 {offsets = [0, 256], sizes = [2, 128], strides = [1, 1]} : vector<2x512xf32> to vector<2x128xf32>
    %300 = math.tanh %299 : vector<2x128xf32>
    %301 = vector.extract_strided_slice %286 {offsets = [0, 384], sizes = [2, 128], strides = [1, 1]} : vector<2x512xf32> to vector<2x128xf32>
    %302 = arith.negf %301 : vector<2x128xf32>
    %303 = math.exp %302 : vector<2x128xf32>
    %cst_60 = arith.constant 1.000000e+00 : f32
    %304 = vector.broadcast %cst_60 : f32 to vector<2x128xf32>
    %305 = arith.addf %304, %303 : vector<2x128xf32>
    %306 = arith.divf %304, %305 : vector<2x128xf32>
    %307 = arith.mulf %298, %255 : vector<2x128xf32>
    %308 = arith.mulf %292, %300 : vector<2x128xf32>
    %309 = arith.addf %307, %308 : vector<2x128xf32>
    %310 = math.tanh %309 : vector<2x128xf32>
    %311 = arith.mulf %306, %310 : vector<2x128xf32>
    %cst_61 = arith.constant dense<0.000000e+00> : vector<2x512xf32>
    %312 = tpu.matmul %284, %6, %cst_61 {dimension_numbers = #tpu.dot_dimension_numbers<[1], [0], [0], [1], [0, 0, 1, 1], [], []>} : vector<2x128xf32>, vector<128x512xf32>, vector<2x512xf32> -> vector<2x512xf32>
    %313 = arith.addf %2, %312 : vector<2x512xf32>
    %314 = vector.extract_strided_slice %313 {offsets = [0, 0], sizes = [2, 128], strides = [1, 1]} : vector<2x512xf32> to vector<2x128xf32>
    %315 = arith.negf %314 : vector<2x128xf32>
    %316 = math.exp %315 : vector<2x128xf32>
    %cst_62 = arith.constant 1.000000e+00 : f32
    %317 = vector.broadcast %cst_62 : f32 to vector<2x128xf32>
    %318 = arith.addf %317, %316 : vector<2x128xf32>
    %319 = arith.divf %317, %318 : vector<2x128xf32>
    %320 = vector.extract_strided_slice %313 {offsets = [0, 128], sizes = [2, 128], strides = [1, 1]} : vector<2x512xf32> to vector<2x128xf32>
    %321 = arith.negf %320 : vector<2x128xf32>
    %322 = math.exp %321 : vector<2x128xf32>
    %cst_63 = arith.constant 1.000000e+00 : f32
    %323 = vector.broadcast %cst_63 : f32 to vector<2x128xf32>
    %324 = arith.addf %323, %322 : vector<2x128xf32>
    %325 = arith.divf %323, %324 : vector<2x128xf32>
    %326 = vector.extract_strided_slice %313 {offsets = [0, 256], sizes = [2, 128], strides = [1, 1]} : vector<2x512xf32> to vector<2x128xf32>
    %327 = math.tanh %326 : vector<2x128xf32>
    %328 = vector.extract_strided_slice %313 {offsets = [0, 384], sizes = [2, 128], strides = [1, 1]} : vector<2x512xf32> to vector<2x128xf32>
    %329 = arith.negf %328 : vector<2x128xf32>
    %330 = math.exp %329 : vector<2x128xf32>
    %cst_64 = arith.constant 1.000000e+00 : f32
    %331 = vector.broadcast %cst_64 : f32 to vector<2x128xf32>
    %332 = arith.addf %331, %330 : vector<2x128xf32>
    %333 = arith.divf %331, %332 : vector<2x128xf32>
    %334 = arith.mulf %325, %282 : vector<2x128xf32>
    %335 = arith.mulf %319, %327 : vector<2x128xf32>
    %336 = arith.addf %334, %335 : vector<2x128xf32>
    %337 = math.tanh %336 : vector<2x128xf32>
    %338 = arith.mulf %333, %337 : vector<2x128xf32>
    %c0_65 = arith.constant 0 : index
    %c0_66 = arith.constant 0 : index
    %339 = vector.load %arg4[%c0_65, %c0_66] : memref<256x128xf32, #tpu.memory_space<vmem>>, vector<256x128xf32>
    %c0_67 = arith.constant 0 : index
    %c0_68 = arith.constant 0 : index
    %340 = vector.load %arg5[%c0_67, %c0_68] : memref<1x128xf32, #tpu.memory_space<vmem>>, vector<1x128xf32>
    %341 = tpu.concatenate %41, %338 in 1 : vector<2x128xf32>, vector<2x128xf32> -> vector<2x256xf32>
    %cst_69 = arith.constant dense<0.000000e+00> : vector<2x128xf32>
    %342 = tpu.matmul %341, %339, %cst_69 {dimension_numbers = #tpu.dot_dimension_numbers<[1], [0], [0], [1], [0, 0, 1, 1], [], []>} : vector<2x256xf32>, vector<256x128xf32>, vector<2x128xf32> -> vector<2x128xf32>
    %343 = vector.broadcast %340 : vector<1x128xf32> to vector<2x128xf32>
    %344 = arith.addf %342, %343 : vector<2x128xf32>
    %c0_70 = arith.constant 0 : index
    %c0_71 = arith.constant 0 : index
    %c0_72 = arith.constant 0 : index
    %345 = vector.load %arg6[%c0_70, %c0_71, %c0_72] : memref<6x2x128xf32, #tpu.memory_space<vmem>>, vector<1x2x128xf32>
    %346 = vector.shape_cast %345 : vector<1x2x128xf32> to vector<2x128xf32>
    %347 = vector.shape_cast %344 : vector<2x128xf32> to vector<1x2x128xf32>
    tpu.vector_store %arg6[%c0_70, %c0_71, %c0_72], %347 {strides = array<i32>} : memref<6x2x128xf32, #tpu.memory_space<vmem>>, vector<1x2x128xf32>,
    %348 = tpu.concatenate %95, %284 in 1 : vector<2x128xf32>, vector<2x128xf32> -> vector<2x256xf32>
    %cst_73 = arith.constant dense<0.000000e+00> : vector<2x128xf32>
    %349 = tpu.matmul %348, %339, %cst_73 {dimension_numbers = #tpu.dot_dimension_numbers<[1], [0], [0], [1], [0, 0, 1, 1], [], []>} : vector<2x256xf32>, vector<256x128xf32>, vector<2x128xf32> -> vector<2x128xf32>
    %350 = vector.broadcast %340 : vector<1x128xf32> to vector<2x128xf32>
    %351 = arith.addf %349, %350 : vector<2x128xf32>
    %c1_74 = arith.constant 1 : index
    %c0_75 = arith.constant 0 : index
    %c0_76 = arith.constant 0 : index
    %352 = vector.load %arg6[%c1_74, %c0_75, %c0_76] : memref<6x2x128xf32, #tpu.memory_space<vmem>>, vector<1x2x128xf32>
    %353 = vector.shape_cast %352 : vector<1x2x128xf32> to vector<2x128xf32>
    %354 = vector.shape_cast %351 : vector<2x128xf32> to vector<1x2x128xf32>
    tpu.vector_store %arg6[%c1_74, %c0_75, %c0_76], %354 {strides = array<i32>} : memref<6x2x128xf32, #tpu.memory_space<vmem>>, vector<1x2x128xf32>,
    %355 = tpu.concatenate %149, %230 in 1 : vector<2x128xf32>, vector<2x128xf32> -> vector<2x256xf32>
    %cst_77 = arith.constant dense<0.000000e+00> : vector<2x128xf32>
    %356 = tpu.matmul %355, %339, %cst_77 {dimension_numbers = #tpu.dot_dimension_numbers<[1], [0], [0], [1], [0, 0, 1, 1], [], []>} : vector<2x256xf32>, vector<256x128xf32>, vector<2x128xf32> -> vector<2x128xf32>
    %357 = vector.broadcast %340 : vector<1x128xf32> to vector<2x128xf32>
    %358 = arith.addf %356, %357 : vector<2x128xf32>
    %c2 = arith.constant 2 : index
    %c0_78 = arith.constant 0 : index
    %c0_79 = arith.constant 0 : index
    %359 = vector.load %arg6[%c2, %c0_78, %c0_79] : memref<6x2x128xf32, #tpu.memory_space<vmem>>, vector<1x2x128xf32>
    %360 = vector.shape_cast %359 : vector<1x2x128xf32> to vector<2x128xf32>
    %361 = vector.shape_cast %358 : vector<2x128xf32> to vector<1x2x128xf32>
    tpu.vector_store %arg6[%c2, %c0_78, %c0_79], %361 {strides = array<i32>} : memref<6x2x128xf32, #tpu.memory_space<vmem>>, vector<1x2x128xf32>,
    %362 = tpu.concatenate %203, %176 in 1 : vector<2x128xf32>, vector<2x128xf32> -> vector<2x256xf32>
    %cst_80 = arith.constant dense<0.000000e+00> : vector<2x128xf32>
    %363 = tpu.matmul %362, %339, %cst_80 {dimension_numbers = #tpu.dot_dimension_numbers<[1], [0], [0], [1], [0, 0, 1, 1], [], []>} : vector<2x256xf32>, vector<256x128xf32>, vector<2x128xf32> -> vector<2x128xf32>
    %364 = vector.broadcast %340 : vector<1x128xf32> to vector<2x128xf32>
    %365 = arith.addf %363, %364 : vector<2x128xf32>
    %c3 = arith.constant 3 : index
    %c0_81 = arith.constant 0 : index
    %c0_82 = arith.constant 0 : index
    %366 = vector.load %arg6[%c3, %c0_81, %c0_82] : memref<6x2x128xf32, #tpu.memory_space<vmem>>, vector<1x2x128xf32>
    %367 = vector.shape_cast %366 : vector<1x2x128xf32> to vector<2x128xf32>
    %368 = vector.shape_cast %365 : vector<2x128xf32> to vector<1x2x128xf32>
    tpu.vector_store %arg6[%c3, %c0_81, %c0_82], %368 {strides = array<i32>} : memref<6x2x128xf32, #tpu.memory_space<vmem>>, vector<1x2x128xf32>,
    %369 = tpu.concatenate %257, %122 in 1 : vector<2x128xf32>, vector<2x128xf32> -> vector<2x256xf32>
    %cst_83 = arith.constant dense<0.000000e+00> : vector<2x128xf32>
    %370 = tpu.matmul %369, %339, %cst_83 {dimension_numbers = #tpu.dot_dimension_numbers<[1], [0], [0], [1], [0, 0, 1, 1], [], []>} : vector<2x256xf32>, vector<256x128xf32>, vector<2x128xf32> -> vector<2x128xf32>
    %371 = vector.broadcast %340 : vector<1x128xf32> to vector<2x128xf32>
    %372 = arith.addf %370, %371 : vector<2x128xf32>
    %c4 = arith.constant 4 : index
    %c0_84 = arith.constant 0 : index
    %c0_85 = arith.constant 0 : index
    %373 = vector.load %arg6[%c4, %c0_84, %c0_85] : memref<6x2x128xf32, #tpu.memory_space<vmem>>, vector<1x2x128xf32>
    %374 = vector.shape_cast %373 : vector<1x2x128xf32> to vector<2x128xf32>
    %375 = vector.shape_cast %372 : vector<2x128xf32> to vector<1x2x128xf32>
    tpu.vector_store %arg6[%c4, %c0_84, %c0_85], %375 {strides = array<i32>} : memref<6x2x128xf32, #tpu.memory_space<vmem>>, vector<1x2x128xf32>,
    %376 = tpu.concatenate %311, %68 in 1 : vector<2x128xf32>, vector<2x128xf32> -> vector<2x256xf32>
    %cst_86 = arith.constant dense<0.000000e+00> : vector<2x128xf32>
    %377 = tpu.matmul %376, %339, %cst_86 {dimension_numbers = #tpu.dot_dimension_numbers<[1], [0], [0], [1], [0, 0, 1, 1], [], []>} : vector<2x256xf32>, vector<256x128xf32>, vector<2x128xf32> -> vector<2x128xf32>
    %378 = vector.broadcast %340 : vector<1x128xf32> to vector<2x128xf32>
    %379 = arith.addf %377, %378 : vector<2x128xf32>
    %c5 = arith.constant 5 : index
    %c0_87 = arith.constant 0 : index
    %c0_88 = arith.constant 0 : index
    %380 = vector.load %arg6[%c5, %c0_87, %c0_88] : memref<6x2x128xf32, #tpu.memory_space<vmem>>, vector<1x2x128xf32>
    %381 = vector.shape_cast %380 : vector<1x2x128xf32> to vector<2x128xf32>
    %382 = vector.shape_cast %379 : vector<2x128xf32> to vector<1x2x128xf32>
    tpu.vector_store %arg6[%c5, %c0_87, %c0_88], %382 {strides = array<i32>} : memref<6x2x128xf32, #tpu.memory_space<vmem>>, vector<1x2x128xf32>,
    return
  }
}

</mosaic_0001>

<bundles_post_ra>
// kernel: mtvae_forward.4
= control target key start
LH: loop header
LB: loop body
LE: loop exit
PB: predicated region body
PF: predicated region fallthrough
CT: control target
= control target key end

     0   :  { %vm81_vm0 = vcmask 1043456   ;;  %v451_v3 = vmov 0.0   ;;  %vm74_vm1 = vcmask 97280   ;;  %v34_v19 = vlaneseq  ;;  %s593_s1 = inlined_call_operand.vmem [shape: f32[12,1024], index: 1, kind: input, shape index: {}]   ;;  %s594_s0 = inlined_call_operand.vmem [shape: f32[16,12], index: 0, kind: input, shape index: {}]   ;;  %s595_s2 = inlined_call_operand.vmem [shape: f32[1,1024], index: 2, kind: input, shape index: {}]   ;;  %s596_s3 = inlined_call_operand.vmem [shape: f32[16,1024], index: 3, kind: output, shape index: {}]  }
   0x1   :  { %v25_v0 = vld [vmem:[%s593_s1 + $0x48] sm:$0xf]  ;;  %v27_v1 = vld [vmem:[%s593_s1 + $0x58] sm:$0xf]  ;;  %v24_v2 = vld [vmem:[%s593_s1 + $0x40] sm:$0xf]  ;;  %170 = vmatprep.mubr.f32.mxu0 %v451_v3  ;;  %247 = vmatprep.mubr.f32.mxu1 %v451_v3 }
   0x2   :  { %434 = vmatprep.subr.msk.mxu0 %vm81_vm0, %v25_v0  ;;  %438 = vmatprep.subr.msk.mxu1 %vm81_vm0, %v27_v1  ;;  %v26_v4 = vld [vmem:[%s593_s1 + $0x50] sm:$0xf]  ;;  %v17_v5 = vld [vmem:[%s593_s1 + $0x8] sm:$0xff]  ;;  %v19_v6 = vld [vmem:[%s593_s1 + $0x18] sm:$0xff]  ;;  %v35_v20 = vshrl.u32 %v34_v19, 7 }
   0x3   :  { %435 = vmatpush1.msk.msra.mxu0 %vm81_vm0, %v24_v2  ;;  %439 = vmatpush1.msk.msra.mxu1 %vm81_vm0, %v26_v4  ;;  %v16_v7 = vld [vmem:[%s593_s1] sm:$0xff]  ;;  %v18_v8 = vld [vmem:[%s593_s1 + $0x10] sm:$0xff]  ;;  %v29_v10 = vld [vmem:[%s593_s1 + $0x68] sm:$0xf] }
   0x4   :  { %v14_v9 = vld [vmem:[%s594_s0] sm:$0xff]  ;;  %136 = vmatprep.subr.mxu0 %v17_v5  ;;  %213 = vmatprep.subr.mxu1 %v19_v6  ;;  %v31_v11 = vld [vmem:[%s593_s1 + $0x78] sm:$0xf]  ;;  %v30_v13 = vld [vmem:[%s593_s1 + $0x70] sm:$0xf]  ;;  %v36_v21 = vsub.s32 0, %v35_v20 }
   0x5   :  { %137 = vmatpush1.msra.mxu0 %v16_v7  ;;  %214 = vmatpush1.msra.mxu1 %v18_v8  ;;  %v28_v12 = vld [vmem:[%s593_s1 + $0x60] sm:$0xf]  ;;  %v15_v14 = vld [vmem:[%s594_s0 + $0x8] sm:$0xff]  ;;  %v23_v16 = vld [vmem:[%s593_s1 + $0x38] sm:$0xff]  ;;  %v44_v22 = vsub.s32 2, %v35_v20  ;;  %v40_v24 = vsub.s32 1, %v35_v20 }
   0x6   :  { %436 = vmatmul.mubr.msk.f32.vlgmr.msra.gmra.mxu0 %vm74_vm1, %v14_v9  ;;  %440 = vmatmul.mubr.msk.f32.vlgmr.msra.gmra.mxu1 %vm74_vm1, %v14_v9  ;;  %v21_v15 = vld [vmem:[%s593_s1 + $0x28] sm:$0xff]  ;;  %v20_v17 = vld [vmem:[%s593_s1 + $0x20] sm:$0xff]  ;;  %v22_v18 = vld [vmem:[%s593_s1 + $0x30] sm:$0xff]  ;;  %v48_v25 = vsub.s32 3, %v35_v20  ;;  %v52_v34 = vsub.s32 4, %v35_v20  ;;  %v60_v35 = vsub.s32 6, %v35_v20 }
   0x7   :  { %442 = vmatprep.subr.msk.mxu0 %vm81_vm0, %v29_v10  ;;  %446 = vmatprep.subr.msk.mxu1 %vm81_vm0, %v31_v11  ;;  %v32_v23 = vld [vmem:[%s595_s2] sm:$0xff]  ;;  %v56_v40 = vsub.s32 5, %v35_v20  ;;  %v64_v41 = vsub.s32 7, %v35_v20 }
   0x8   :  { %443 = vmatpush1.msk.msra.mxu0 %vm81_vm0, %v28_v12  ;;  %447 = vmatpush1.msk.msra.mxu1 %vm81_vm0, %v30_v13  ;;  %v37_v26 = vrot.slane %v32_v23, %v36_v21  ;;  %v45_v27 = vrot.slane %v32_v23, %v44_v22  ;;  %v41_v28 = vrot.slane %v32_v23, %v40_v24 }
   0x9   :  { %176 = vmatprep.mubr.f32.mxu0 %v451_v3  ;;  %253 = vmatprep.mubr.f32.mxu1 %v451_v3  ;;  %v49_v29 = vrot.slane %v32_v23, %v48_v25  ;;  %v53_v46 = vrot.slane %v32_v23, %v52_v34  ;;  %v61_v47 = vrot.slane %v32_v23, %v60_v35 }
   0xa   :  { %437 = vmatmul.mubr.msk.f32.gmra.mxu0 %vm74_vm1, %v15_v14  ;;  %441 = vmatmul.mubr.msk.f32.gmra.mxu1 %vm74_vm1, %v15_v14  ;;  %v57_v52 = vrot.slane %v32_v23, %v56_v40  ;;  %v65_v53 = vrot.slane %v32_v23, %v64_v41 }
   0xb   :  { %290 = vmatprep.subr.mxu0 %v21_v15  ;;  %367 = vmatprep.subr.mxu1 %v23_v16 }
   0xc   :  { %291 = vmatpush1.msra.mxu0 %v20_v17  ;;  %368 = vmatpush1.msra.mxu1 %v22_v18 }
   0xd   :  { %324 = vmatprep.mubr.f32.mxu0 %v451_v3  ;;  %401 = vmatprep.mubr.f32.mxu1 %v451_v3 }
   0xe   :  { %444 = vmatmul.mubr.msk.f32.vlgmr.msra.gmra.mxu0 %vm74_vm1, %v14_v9  ;;  %448 = vmatmul.mubr.msk.f32.vlgmr.msra.gmra.mxu1 %vm74_vm1, %v14_v9 }
   0xf   :  { %330 = vmatprep.mubr.f32.mxu0 %v451_v3  ;;  %407 = vmatprep.mubr.f32.mxu1 %v451_v3 }
  0x12   :  { %445 = vmatmul.mubr.msk.f32.gmra.mxu0 %vm74_vm1, %v15_v14  ;;  %449 = vmatmul.mubr.msk.f32.gmra.mxu1 %vm74_vm1, %v15_v14 }
  0xc6   :  { %v172_v30 = vpop.f32.mrf.mxu0  ;;  %v249_v31 = vpop.f32.mrf.mxu1 }
  0xc7   :  { %v173_v32 = vadd.f32 %v172_v30, %v37_v26  ;;  %v250_v33 = vadd.f32 %v249_v31, %v45_v27 }
  0xc8   :  { %v174_v36 = vpop.f32.mrf.mxu0  ;;  %v251_v37 = vpop.f32.mrf.mxu1 }
  0xc9   :  { %414 = vst [vmem:[%s596_s3] sm:$0xff] %v173_v32  ;;  %416 = vst [vmem:[%s596_s3 + $0x10] sm:$0xff] %v250_v33  ;;  %v175_v38 = vadd.f32 %v174_v36, %v41_v28  ;;  %v252_v39 = vadd.f32 %v251_v37, %v49_v29 }
  0xca   :  { %v178_v42 = vpop.f32.mrf.mxu0  ;;  %v255_v43 = vpop.f32.mrf.mxu1 }
  0xcb   :  { %415 = vst [vmem:[%s596_s3 + $0x8] sm:$0xff] %v175_v38  ;;  %417 = vst [vmem:[%s596_s3 + $0x18] sm:$0xff] %v252_v39  ;;  %v179_v44 = vadd.f32 %v178_v42, %v37_v26  ;;  %v256_v45 = vadd.f32 %v255_v43, %v45_v27 }
  0xcc   :  { %v180_v48 = vpop.f32.mrf.mxu0  ;;  %v257_v49 = vpop.f32.mrf.mxu1 }
  0xcd   :  { %422 = vst [vmem:[%s596_s3 + $0x40] sm:$0xff] %v179_v44  ;;  %424 = vst [vmem:[%s596_s3 + $0x50] sm:$0xff] %v256_v45  ;;  %v181_v50 = vadd.f32 %v180_v48, %v41_v28  ;;  %v258_v51 = vadd.f32 %v257_v49, %v49_v29 }
  0xce   :  { %v326_v54 = vpop.f32.mrf.mxu0  ;;  %v403_v55 = vpop.f32.mrf.mxu1 }
  0xcf   :  { %423 = vst [vmem:[%s596_s3 + $0x48] sm:$0xff] %v181_v50  ;;  %425 = vst [vmem:[%s596_s3 + $0x58] sm:$0xff] %v258_v51  ;;  %v327_v56 = vadd.f32 %v326_v54, %v53_v46  ;;  %v404_v57 = vadd.f32 %v403_v55, %v61_v47 }
  0xd0   :  { %v328_v58 = vpop.f32.mrf.mxu0  ;;  %v405_v59 = vpop.f32.mrf.mxu1 }
  0xd1   :  { %418 = vst [vmem:[%s596_s3 + $0x20] sm:$0xff] %v327_v56  ;;  %420 = vst [vmem:[%s596_s3 + $0x30] sm:$0xff] %v404_v57  ;;  %v329_v60 = vadd.f32 %v328_v58, %v57_v52  ;;  %v406_v61 = vadd.f32 %v405_v59, %v65_v53 }
  0xd2   :  { %v332_v62 = vpop.f32.mrf.mxu0  ;;  %v409_v63 = vpop.f32.mrf.mxu1 }
  0xd3   :  { %419 = vst [vmem:[%s596_s3 + $0x28] sm:$0xff] %v329_v60  ;;  %421 = vst [vmem:[%s596_s3 + $0x38] sm:$0xff] %v406_v61  ;;  %v333_v0 = vadd.f32 %v332_v62, %v53_v46  ;;  %v410_v1 = vadd.f32 %v409_v63, %v61_v47 }
  0xd4   :  { %v334_v2 = vpop.f32.mrf.mxu0  ;;  %v411_v3 = vpop.f32.mrf.mxu1 }
  0xd5   :  { %426 = vst [vmem:[%s596_s3 + $0x60] sm:$0xff] %v333_v0  ;;  %428 = vst [vmem:[%s596_s3 + $0x70] sm:$0xff] %v410_v1  ;;  %v335_v4 = vadd.f32 %v334_v2, %v57_v52  ;;  %v412_v5 = vadd.f32 %v411_v3, %v65_v53 }
  0xd7   :  { %427 = vst [vmem:[%s596_s3 + $0x68] sm:$0xff] %v335_v4  ;;  %429 = vst [vmem:[%s596_s3 + $0x78] sm:$0xff] %v412_v5 }

// kernel: mtvae_forward.6
= control target key start
LH: loop header
LB: loop body
LE: loop exit
PB: predicated region body
PF: predicated region fallthrough
CT: control target
= control target key end

     0   :  { %s2751_s0 = inlined_call_operand.vmem [shape: f32[2,64], index: 0, kind: input, shape index: {}]   ;;  %s2752_s1 = inlined_call_operand.vmem [shape: f32[8,256], index: 1, kind: input, shape index: {}]   ;;  %s2753_s2 = inlined_call_operand.vmem [shape: f32[2,32], index: 2, kind: input, shape index: {}]   ;;  %s2754_s3 = inlined_call_operand.vmem [shape: f32[64,32], index: 3, kind: input, shape index: {}]   ;;  %s2755_s4 = inlined_call_operand.vmem [shape: f32[1,32], index: 4, kind: input, shape index: {}]   ;;  %s2756_s5 = inlined_call_operand.vmem [shape: f32[256,128], index: 5, kind: input, shape index: {}]   ;;  %s2757_s6 = inlined_call_operand.vmem [shape: f32[1,128], index: 6, kind: input, shape index: {}]   ;;  %s2758_s7 = inlined_call_operand.vmem [shape: f32[32,128], index: 7, kind: input, shape index: {}]   ;;  %s2759_s8 = inlined_call_operand.vmem [shape: f32[1,128], index: 8, kind: input, shape index: {}]   ;;  %s2760_s9 = inlined_call_operand.vmem [shape: f32[128,128], index: 9, kind: input, shape index: {}]   ;;  %s2761_s10 = inlined_call_operand.vmem [shape: f32[1,128], index: 10, kind: input, shape index: {}]   ;;  %s2762_s11 = inlined_call_operand.vmem [shape: f32[128,128], index: 11, kind: input, shape index: {}]   ;;  %s2763_s12 = inlined_call_operand.vmem [shape: f32[1,128], index: 12, kind: input, shape index: {}]   ;;  %s2764_s13 = inlined_call_operand.vmem [shape: f32[128,32], index: 13, kind: input, shape index: {}]   ;;  %s2765_s14 = inlined_call_operand.vmem [shape: f32[1,32], index: 14, kind: input, shape index: {}]   ;;  %s2766_s15 = inlined_call_operand.vmem [shape: f32[128,32], index: 15, kind: input, shape index: {}]   ;;  %s2767_s16 = inlined_call_operand.vmem [shape: f32[1,32], index: 16, kind: input, shape index: {}]   ;;  %s2768_s17 = inlined_call_operand.vmem [shape: f32[32,32], index: 17, kind: input, shape index: {}]   ;;  %s2769_s18 = inlined_call_operand.vmem [shape: f32[1,32], index: 18, kind: input, shape index: {}]   ;;  %s2770_s19 = inlined_call_operand.vmem [shape: f32[64,32], index: 19, kind: input, shape index: {}]   ;;  %s2771_s20 = inlined_call_operand.vmem [shape: f32[1,32], index: 20, kind: input, shape index: {}]   ;;  %s2772_s21 = inlined_call_operand.vmem [shape: f32[32,1024], index: 21, kind: input, shape index: {}]   ;;  %s2773_s22 = inlined_call_operand.vmem [shape: f32[1,1024], index: 22, kind: input, shape index: {}]   ;;  %s2774_s23 = inlined_call_operand.vmem [shape: f32[8,128], index: 23, kind: output, shape index: {0}]   ;;  %s2775_s24 = inlined_call_operand.hbm [shape: f32[2,32], index: 24, kind: output, shape index: {1}]   ;;  %s2776_s25 = inlined_call_operand.hbm [shape: f32[2,32], index: 25, kind: output, shape index: {2}]   ;;  %s2777_s26 = inlined_call_operand.vmem [shape: f32[2,1024], index: 26, kind: output, shape index: {3}]  }
   0x1   :  { %2783 = sst [smem:[#allocation8_spill]] %s2751_s0 }
   0x2   :  { %2784 = sst [smem:[#allocation9_spill]] %s2752_s1 }
   0x3   :  { %2785 = sst [smem:[#allocation10_spill]] %s2753_s2 }
   0x4   :  { %2786 = sst [smem:[#allocation11_spill]] %s2754_s3 }
   0x5   :  { %2787 = sst [smem:[#allocation12_spill]] %s2755_s4 }
   0x6   :  { %2788 = sst [smem:[#allocation13_spill]] %s2756_s5 }
   0x7   :  { %2789 = sst [smem:[#allocation14_spill]] %s2757_s6 }
   0x8   :  { %2790 = sst [smem:[#allocation15_spill]] %s2758_s7 }
   0x9   :  { %2791 = sst [smem:[#allocation16_spill]] %s2759_s8 }
   0xa   :  { %2792 = sst [smem:[#allocation17_spill]] %s2760_s9 }
   0xb   :  { %2793 = sst [smem:[#allocation18_spill]] %s2761_s10 }
   0xc   :  { %32 = vsyncpa [#allocation3], 0  ;;  %s2794_s7 = sld [smem:[#allocation11_spill]]  ;;  %v1955_v1 = vmov 0.0   ;;  %vm1956_vm0 = vmmov 0  }
   0xd   :  { %1681 = vmatprep.subr.mxu0 %v1955_v1  ;;  %1697 = vmatprep.mubr.msk.f32.mxu0 %vm1956_vm0, %v1955_v1 }
  0x12   :  { %v88_v0 = vld [vmem:[%s2794_s7 + $0x38] sm:$0xff]  ;;  %v87_v2 = vld [vmem:[%s2794_s7 + $0x30] sm:$0xff]  ;;  %v86_v3 = vld [vmem:[%s2794_s7 + $0x28] sm:$0xff] }
  0x13   :  { %1682 = vmatpush3.msra.mxu0 %v88_v0 }
  0x14   :  { %1683 = vmatprep.subr.mxu0 %v1955_v1 }
  0x15   :  { %1684 = vmatpush3.msra.mxu0 %v87_v2 }
  0x16   :  { %33 = vsyncpa [#allocation5], 0  ;;  %1685 = vmatprep.subr.mxu0 %v1955_v1  ;;  %v85_v4 = vld [vmem:[%s2794_s7 + $0x20] sm:$0xff]  ;;  %v84_v5 = vld [vmem:[%s2794_s7 + $0x18] sm:$0xff]  ;;  %s2795_s4 = sld [smem:[#allocation8_spill]]  ;;  %vm96_vm1 = vcmask 523264  }
  0x17   :  { %1686 = vmatpush3.msra.mxu0 %v86_v3  ;;  %v83_v6 = vld [vmem:[%s2794_s7 + $0x10] sm:$0xff]  ;;  %v82_v7 = vld [vmem:[%s2794_s7 + $0x8] sm:$0xff]  ;;  %v81_v8 = vld [vmem:[%s2794_s7] sm:$0xff]  ;;  %s2796_s9 = sld [smem:[#allocation15_spill]]  ;;  %vm293_vm2 = vcmask 261120   ;;  %vm749_vm3 = vcmask 254976  }
  0x18   :  { %1687 = vmatprep.subr.mxu0 %v1955_v1  ;;  %s2797_s3 = sld [smem:[#allocation12_spill]]  ;;  %s1957_s28 = smov 32  }
  0x19   :  { %1688 = vmatpush3.msra.mxu0 %v85_v4  ;;  %s2799_s2 = sld [smem:[#allocation13_spill]] }
  0x1a   :  { %1689 = vmatprep.subr.mxu0 %v1955_v1  ;;  %s2801_s0 = sld [smem:[#allocation16_spill]] }
  0x1b   :  { %1690 = vmatpush3.msra.mxu0 %v84_v5  ;;  %v477_v5 = vld [vmem:[%s2762_s11 + $0x78] sm:$0xff]  ;;  %s2802_s30 = sld [smem:[#allocation14_spill]] }
  0x1c   :  { %1691 = vmatprep.subr.mxu0 %v1955_v1  ;;  %v80_v9 = vld [vmem:[%s2795_s4] sm:$0x3]  ;;  %s2798_s4 = sld [smem:[#allocation17_spill]] }
  0x1d   :  { %1692 = vmatpush3.msra.mxu0 %v83_v6  ;;  %v285_v10 = vld [vmem:[%s2796_s9 + $0x18] sm:$0xff]  ;;  %v284_v11 = vld [vmem:[%s2796_s9 + $0x10] sm:$0xff]  ;;  %v283_v12 = vld [vmem:[%s2796_s9 + $0x8] sm:$0xff]  ;;  %s2804_s1 = sld [smem:[#allocation10_spill]] }
  0x1e   :  { %1693 = vmatprep.subr.mxu0 %v1955_v1  ;;  %v282_v13 = vld [vmem:[%s2796_s9] sm:$0xff]  ;;  %s2800_s9 = sld [smem:[#allocation9_spill]]  ;;  %v476_v6 = vld [vmem:[%s2762_s11 + $0x70] sm:$0xff] }
  0x1f   :  { %1694 = vmatpush3.msra.mxu0 %v82_v7  ;;  %v1521_v14 = vld [vmem:[%s2797_s3] ss:$0 sm:$0xff]  ;;  %v203_v34 = vld [vmem:[%s2799_s2 + $0xf8] sm:$0xff]  ;;  %v202_v36 = vld [vmem:[%s2799_s2 + $0xf0] sm:$0xff] }
  0x20   :  { %1695 = vmatprep.subr.mxu0 %v1955_v1  ;;  %v187_v35 = vld [vmem:[%s2799_s2 + $0x78] sm:$0xff]  ;;  %1549 = vmatprep.subr.mxu1 %v203_v34  ;;  %v186_v37 = vld [vmem:[%s2799_s2 + $0x70] sm:$0xff]  ;;  %v201_v38 = vld [vmem:[%s2799_s2 + $0xe8] sm:$0xff] }
  0x21   :  { %1696 = vmatpush3.msra.mxu0 %v81_v8  ;;  %1550 = vmatpush3.msra.mxu1 %v187_v35  ;;  %v185_v39 = vld [vmem:[%s2799_s2 + $0x68] sm:$0xff]  ;;  %v200_v40 = vld [vmem:[%s2799_s2 + $0xe0] sm:$0xff]  ;;  %v199_v42 = vld [vmem:[%s2799_s2 + $0xd8] sm:$0xff] }
  0x22   :  { %1698 = vmatmul.mubr.msk.f32.vlgmr.msra.gmra.mxu0 %vm96_vm1, %v80_v9  ;;  %1700 = vmatprep.subr.mxu0 %v1955_v1  ;;  %v383_v17 = vld [vmem:[%s2798_s4 + $0x78] sm:$0xff]  ;;  %v382_v19 = vld [vmem:[%s2798_s4 + $0x70] sm:$0xff]  ;;  %v381_v20 = vld [vmem:[%s2798_s4 + $0x68] sm:$0xff] }
  0x23   :  { %1701 = vmatpush3.msra.mxu0 %v285_v10  ;;  %1708 = vmatprep.mubr.msk.f32.mxu0 %vm1956_vm0, %v1955_v1  ;;  %v380_v21 = vld [vmem:[%s2798_s4 + $0x60] sm:$0xff]  ;;  %v379_v22 = vld [vmem:[%s2798_s4 + $0x58] sm:$0xff]  ;;  %v378_v23 = vld [vmem:[%s2798_s4 + $0x50] sm:$0xff] }
  0x24   :  { %1702 = vmatprep.subr.mxu0 %v1955_v1  ;;  %v377_v24 = vld [vmem:[%s2798_s4 + $0x48] sm:$0xff]  ;;  %v376_v25 = vld [vmem:[%s2798_s4 + $0x40] sm:$0xff]  ;;  %v375_v26 = vld [vmem:[%s2798_s4 + $0x38] sm:$0xff]  ;;  %1551 = vmatprep.subr.mxu1 %v202_v36 }
  0x25   :  { %1703 = vmatpush3.msra.mxu0 %v284_v11  ;;  %v374_v27 = vld [vmem:[%s2798_s4 + $0x30] sm:$0xff]  ;;  %v373_v28 = vld [vmem:[%s2798_s4 + $0x28] sm:$0xff]  ;;  %v372_v29 = vld [vmem:[%s2798_s4 + $0x20] sm:$0xff]  ;;  %1552 = vmatpush3.msra.mxu1 %v186_v37 }
  0x26   :  { %1704 = vmatprep.subr.mxu0 %v1955_v1  ;;  %v371_v30 = vld [vmem:[%s2798_s4 + $0x18] sm:$0xff]  ;;  %v370_v31 = vld [vmem:[%s2798_s4 + $0x10] sm:$0xff]  ;;  %v369_v32 = vld [vmem:[%s2798_s4 + $0x8] sm:$0xff]  ;;  %1553 = vmatprep.subr.mxu1 %v201_v38 }
  0x27   :  { %1705 = vmatpush3.msra.mxu0 %v283_v12  ;;  %v368_v33 = vld [vmem:[%s2798_s4] sm:$0xff]  ;;  %1554 = vmatpush3.msra.mxu1 %v185_v39  ;;  %v183_v43 = vld [vmem:[%s2799_s2 + $0x58] sm:$0xff]  ;;  %v198_v44 = vld [vmem:[%s2799_s2 + $0xd0] sm:$0xff] }
  0x28   :  { %1706 = vmatprep.subr.mxu0 %v1955_v1  ;;  %v184_v41 = vld [vmem:[%s2799_s2 + $0x60] sm:$0xff]  ;;  %1555 = vmatprep.subr.mxu1 %v200_v40  ;;  %v182_v45 = vld [vmem:[%s2799_s2 + $0x50] sm:$0xff]  ;;  %v197_v46 = vld [vmem:[%s2799_s2 + $0xc8] sm:$0xff] }
  0x29   :  { %1707 = vmatpush3.msra.mxu0 %v282_v13  ;;  %1556 = vmatpush3.msra.mxu1 %v184_v41  ;;  %v171_v47 = vld [vmem:[%s2800_s9 + $0x8] sm:$0xff]  ;;  %v196_v49 = vld [vmem:[%s2799_s2 + $0xc0] sm:$0xff]  ;;  %v195_v51 = vld [vmem:[%s2799_s2 + $0xb8] sm:$0xff] }
  0x2a   :  { %1711 = vmatprep.subr.mxu0 %v1955_v1  ;;  %1557 = vmatprep.subr.mxu1 %v199_v42  ;;  %v181_v48 = vld [vmem:[%s2799_s2 + $0x48] sm:$0xff]  ;;  %v180_v50 = vld [vmem:[%s2799_s2 + $0x40] sm:$0xff]  ;;  %v179_v52 = vld [vmem:[%s2799_s2 + $0x38] sm:$0xff] }
  0x2b   :  { %1558 = vmatpush3.msra.mxu1 %v183_v43  ;;  %275 = vmatprep.mubr.f32.mxu1 %v171_v47  ;;  %v194_v53 = vld [vmem:[%s2799_s2 + $0xb0] sm:$0xff]  ;;  %v193_v55 = vld [vmem:[%s2799_s2 + $0xa8] sm:$0xff]  ;;  %v192_v57 = vld [vmem:[%s2799_s2 + $0xa0] sm:$0xff] }
  0x2c   :  { %1559 = vmatprep.subr.mxu1 %v198_v44  ;;  %v178_v54 = vld [vmem:[%s2799_s2 + $0x30] sm:$0xff]  ;;  %v177_v56 = vld [vmem:[%s2799_s2 + $0x28] sm:$0xff]  ;;  %v176_v58 = vld [vmem:[%s2799_s2 + $0x20] sm:$0xff] }
  0x2d   :  { %1560 = vmatpush3.msra.mxu1 %v182_v45  ;;  %v191_v59 = vld [vmem:[%s2799_s2 + $0x98] sm:$0xff]  ;;  %v190_v61 = vld [vmem:[%s2799_s2 + $0x90] sm:$0xff]  ;;  %v189_v63 = vld [vmem:[%s2799_s2 + $0x88] sm:$0xff] }
  0x2e   :  { %1561 = vmatprep.subr.mxu1 %v197_v46  ;;  %v175_v60 = vld [vmem:[%s2799_s2 + $0x18] sm:$0xff]  ;;  %v174_v62 = vld [vmem:[%s2799_s2 + $0x10] sm:$0xff]  ;;  %v173_v0 = vld [vmem:[%s2799_s2 + $0x8] sm:$0xff] }
  0x2f   :  { %1562 = vmatpush3.msra.mxu1 %v181_v48  ;;  %v188_v2 = vld [vmem:[%s2799_s2 + $0x80] sm:$0xff]  ;;  %v475_v7 = vld [vmem:[%s2762_s11 + $0x68] sm:$0xff]  ;;  %v473_v9 = vld [vmem:[%s2762_s11 + $0x58] sm:$0xff] }
  0x30   :  { %1563 = vmatprep.subr.mxu1 %v196_v49  ;;  %v172_v3 = vld [vmem:[%s2799_s2] sm:$0xff]  ;;  %v472_v10 = vld [vmem:[%s2762_s11 + $0x50] sm:$0xff]  ;;  %v471_v11 = vld [vmem:[%s2762_s11 + $0x48] sm:$0xff]  ;;  %s2803_s2 = sld [smem:[#allocation18_spill]] }
  0x31   :  { %1564 = vmatpush3.msra.mxu1 %v180_v50  ;;  %v170_v4 = vld [vmem:[%s2800_s9] sm:$0xff]  ;;  %v469_v13 = vld [vmem:[%s2762_s11 + $0x38] sm:$0xff]  ;;  %v563_v36 = vld [vmem:[%s2764_s13 + $0x30] sm:$0xff] }
  0x32   :  { %1565 = vmatprep.subr.mxu1 %v195_v51  ;;  %v474_v8 = vld [vmem:[%s2762_s11 + $0x60] sm:$0xff]  ;;  %v564_v35 = vld [vmem:[%s2764_s13 + $0x38] sm:$0xff]  ;;  %v562_v37 = vld [vmem:[%s2764_s13 + $0x28] sm:$0xff] }
  0x33   :  { %1566 = vmatpush3.msra.mxu1 %v179_v52  ;;  %v470_v12 = vld [vmem:[%s2762_s11 + $0x40] sm:$0xff]  ;;  %v665_v49 = vld [vmem:[%s2766_s15 + $0x78] sm:$0xff]  ;;  %v664_v50 = vld [vmem:[%s2766_s15 + $0x70] sm:$0xff] }
  0x34   :  { %1567 = vmatprep.subr.mxu1 %v194_v53  ;;  %v565_v34 = vld [vmem:[%s2764_s13 + $0x40] sm:$0xff]  ;;  %v663_v51 = vld [vmem:[%s2766_s15 + $0x68] sm:$0xff]  ;;  %v661_v53 = vld [vmem:[%s2766_s15 + $0x58] sm:$0xff] }
  0x35   :  { %1568 = vmatpush3.msra.mxu1 %v178_v54  ;;  %v561_v38 = vld [vmem:[%s2764_s13 + $0x20] sm:$0xff]  ;;  %v660_v54 = vld [vmem:[%s2766_s15 + $0x50] sm:$0xff] }
  0x36   :  { %1569 = vmatprep.subr.mxu1 %v193_v55  ;;  %v1523_v40 = vld [vmem:[%s2802_s30] ss:$0 sm:$0xff]  ;;  %v659_v55 = vld [vmem:[%s2766_s15 + $0x48] sm:$0xff] }
  0x37   :  { %1570 = vmatpush3.msra.mxu1 %v177_v56  ;;  %v1526_v44 = vld [vmem:[%s2803_s2] ss:$0 sm:$0xff] }
  0x38   :  { %1571 = vmatprep.subr.mxu1 %v192_v57  ;;  %v662_v52 = vld [vmem:[%s2766_s15 + $0x60] sm:$0xff]  ;;  %v657_v57 = vld [vmem:[%s2766_s15 + $0x38] sm:$0xff] }
  0x39   :  { %1572 = vmatpush3.msra.mxu1 %v176_v58  ;;  %v658_v56 = vld [vmem:[%s2766_s15 + $0x40] sm:$0xff]  ;;  %v656_v58 = vld [vmem:[%s2766_s15 + $0x30] sm:$0xff] }
  0x3a   :  { %1573 = vmatprep.subr.mxu1 %v191_v59  ;;  %v655_v59 = vld [vmem:[%s2766_s15 + $0x28] sm:$0xff] }
  0x3b   :  { %1574 = vmatpush3.msra.mxu1 %v175_v60  ;;  %v654_v60 = vld [vmem:[%s2766_s15 + $0x20] sm:$0xff] }
  0x3c   :  { %1575 = vmatprep.subr.mxu1 %v190_v61  ;;  %v560_v61 = vld [vmem:[%s2764_s13 + $0x18] sm:$0xff] }
  0x3d   :  { %1576 = vmatpush3.msra.mxu1 %v174_v62  ;;  %v653_v62 = vld [vmem:[%s2766_s15 + $0x18] sm:$0xff] }
  0x3e   :  { %1577 = vmatprep.subr.mxu1 %v189_v63  ;;  %v559_v63 = vld [vmem:[%s2764_s13 + $0x10] sm:$0xff] }
  0x3f   :  { %1578 = vmatpush3.msra.mxu1 %v173_v0  ;;  %v652_v0 = vld [vmem:[%s2766_s15 + $0x10] sm:$0xff] }
  0x40   :  { %1579 = vmatprep.subr.mxu1 %v188_v2  ;;  %v558_v2 = vld [vmem:[%s2764_s13 + $0x8] sm:$0xff] }
  0x41   :  { %1580 = vmatpush3.msra.mxu1 %v172_v3  ;;  %v651_v3 = vld [vmem:[%s2766_s15 + $0x8] sm:$0xff] }
  0x42   :  { %276 = vmatmul.mubr.f32.vlgmr.msra.gmra.mxu1 %v170_v4  ;;  %1746 = vmatprep.subr.mxu1 %v1955_v1  ;;  %v557_v4 = vld [vmem:[%s2764_s13] sm:$0xff] }
  0x43   :  { %1747 = vmatpush3.msra.mxu1 %v477_v5  ;;  %1778 = vmatprep.mubr.msk.f32.mxu1 %vm1956_vm0, %v1955_v1  ;;  %v650_v5 = vld [vmem:[%s2766_s15] sm:$0xff] }
  0x44   :  { %1748 = vmatprep.subr.mxu1 %v1955_v1 }
  0x45   :  { %1749 = vmatpush3.msra.mxu1 %v476_v6  ;;  %v1527_v6 = vld [vmem:[%s2763_s12] ss:$0 sm:$0xff] }
  0x46   :  { %1750 = vmatprep.subr.mxu1 %v1955_v1 }
  0x47   :  { %1751 = vmatpush3.msra.mxu1 %v475_v7 }
  0x48   :  { %1752 = vmatprep.subr.mxu1 %v1955_v1 }
  0x49   :  { %1753 = vmatpush3.msra.mxu1 %v474_v8 }
  0x4a   :  { %1754 = vmatprep.subr.mxu1 %v1955_v1 }
  0x4b   :  { %1755 = vmatpush3.msra.mxu1 %v473_v9 }
  0x4c   :  { %1756 = vmatprep.subr.mxu1 %v1955_v1 }
  0x4d   :  { %1757 = vmatpush3.msra.mxu1 %v472_v10 }
  0x4e   :  { %1758 = vmatprep.subr.mxu1 %v1955_v1 }
  0x4f   :  { %1759 = vmatpush3.msra.mxu1 %v471_v11 }
  0x50   :  { %1760 = vmatprep.subr.mxu1 %v1955_v1 }
  0x51   :  { %1761 = vmatpush3.msra.mxu1 %v470_v12  ;;  %v755_v12 = vld [vmem:[%s2768_s17 + $0x18] sm:$0xff] }
  0x52   :  { %1762 = vmatprep.subr.mxu1 %v1955_v1 }
  0x53   :  { %1763 = vmatpush3.msra.mxu1 %v469_v13  ;;  %v754_v13 = vld [vmem:[%s2768_s17 + $0x10] sm:$0xff] }
  0x54   :  { %1764 = vmatprep.subr.mxu1 %v1955_v1 }
  0xe2   :  { %v166_v15 = vpop.f32.mrf.mxu0 }
  0xe3   :  { %v2156_v16 = vadd.f32 %v1521_v14, %v166_v15  ;;  %v468_v14 = vld [vmem:[%s2762_s11 + $0x30] sm:$0xff]  ;;  %v467_v15 = vld [vmem:[%s2762_s11 + $0x28] sm:$0xff] }
  0xe4   :  { %v1699_v18 = vpop.f32.mrf.mxu0  ;;  %1765 = vmatpush3.msra.mxu1 %v468_v14  ;;  %v753_v14 = vld [vmem:[%s2768_s17 + $0x8] sm:$0xff] }
  0xe5   :  { %1709 = vmatmul.mubr.msk.f32.vlgmr.msra.gmra.mxu0 %vm293_vm2, %v2156_v16  ;;  %1766 = vmatprep.subr.mxu1 %v1955_v1  ;;  %v465_v18 = vld [vmem:[%s2762_s11 + $0x18] sm:$0xff] }
  0xe6   :  { %1712 = vmatpush3.msra.mxu0 %v383_v17  ;;  %1743 = vmatprep.mubr.msk.f32.mxu0 %vm1956_vm0, %v1955_v1  ;;  %v466_v17 = vld [vmem:[%s2762_s11 + $0x20] sm:$0xff] }
  0xe7   :  { %1713 = vmatprep.subr.mxu0 %v1955_v1  ;;  %1767 = vmatpush3.msra.mxu1 %v467_v15  ;;  %v752_v15 = vld [vmem:[%s2768_s17] sm:$0xff] }
  0xe8   :  { %1714 = vmatpush3.msra.mxu0 %v382_v19  ;;  %1768 = vmatprep.subr.mxu1 %v1955_v1  ;;  %v1524_v19 = vld [vmem:[%s2801_s0] ss:$0 sm:$0xff] }
  0xe9   :  { %1715 = vmatprep.subr.mxu0 %v1955_v1  ;;  %1769 = vmatpush3.msra.mxu1 %v466_v17  ;;  %v1528_v17 = vld [vmem:[%s2765_s14] ss:$0 sm:$0xff] }
  0xea   :  { %1716 = vmatpush3.msra.mxu0 %v381_v20  ;;  %1770 = vmatprep.subr.mxu1 %v1955_v1 }
  0xeb   :  { %1717 = vmatprep.subr.mxu0 %v1955_v1  ;;  %1771 = vmatpush3.msra.mxu1 %v465_v18  ;;  %v1529_v18 = vld [vmem:[%s2767_s16] ss:$0 sm:$0xff] }
  0xec   :  { %1718 = vmatpush3.msra.mxu0 %v380_v21  ;;  %1772 = vmatprep.subr.mxu1 %v1955_v1 }
  0xed   :  { %1719 = vmatprep.subr.mxu0 %v1955_v1 }
  0xee   :  { %1720 = vmatpush3.msra.mxu0 %v379_v22 }
  0xef   :  { %1721 = vmatprep.subr.mxu0 %v1955_v1 }
  0xf0   :  { %1722 = vmatpush3.msra.mxu0 %v378_v23 }
  0xf1   :  { %1723 = vmatprep.subr.mxu0 %v1955_v1 }
  0xf2   :  { %1724 = vmatpush3.msra.mxu0 %v377_v24  ;;  %v464_v24 = vld [vmem:[%s2762_s11 + $0x10] sm:$0xff] }
  0xf3   :  { %1725 = vmatprep.subr.mxu0 %v1955_v1  ;;  %1773 = vmatpush3.msra.mxu1 %v464_v24 }
  0xf4   :  { %1726 = vmatpush3.msra.mxu0 %v376_v25  ;;  %1774 = vmatprep.subr.mxu1 %v1955_v1  ;;  %v463_v25 = vld [vmem:[%s2762_s11 + $0x8] sm:$0xff] }
  0xf5   :  { %1727 = vmatprep.subr.mxu0 %v1955_v1  ;;  %1775 = vmatpush3.msra.mxu1 %v463_v25 }
  0xf6   :  { %1728 = vmatpush3.msra.mxu0 %v375_v26  ;;  %1776 = vmatprep.subr.mxu1 %v1955_v1  ;;  %v462_v26 = vld [vmem:[%s2762_s11] sm:$0xff] }
  0xf7   :  { %1729 = vmatprep.subr.mxu0 %v1955_v1  ;;  %1777 = vmatpush3.msra.mxu1 %v462_v26 }
  0xf8   :  { %1730 = vmatpush3.msra.mxu0 %v374_v27  ;;  %1816 = vmatprep.subr.mxu1 %v1955_v1  ;;  %v572_v27 = vld [vmem:[%s2764_s13 + $0x78] sm:$0xff] }
  0xf9   :  { %1731 = vmatprep.subr.mxu0 %v1955_v1 }
  0xfa   :  { %1732 = vmatpush3.msra.mxu0 %v373_v28  ;;  %v571_v28 = vld [vmem:[%s2764_s13 + $0x70] sm:$0xff] }
  0xfb   :  { %1733 = vmatprep.subr.mxu0 %v1955_v1 }
  0xfc   :  { %1734 = vmatpush3.msra.mxu0 %v372_v29  ;;  %v570_v29 = vld [vmem:[%s2764_s13 + $0x68] sm:$0xff] }
  0xfd   :  { %1735 = vmatprep.subr.mxu0 %v1955_v1 }
  0xfe   :  { %1736 = vmatpush3.msra.mxu0 %v371_v30  ;;  %v569_v30 = vld [vmem:[%s2764_s13 + $0x60] sm:$0xff] }
  0xff   :  { %1737 = vmatprep.subr.mxu0 %v1955_v1 }
 0x100   :  { %1738 = vmatpush3.msra.mxu0 %v370_v31  ;;  %v568_v31 = vld [vmem:[%s2764_s13 + $0x58] sm:$0xff] }
 0x101   :  { %1739 = vmatprep.subr.mxu0 %v1955_v1 }
 0x102   :  { %1740 = vmatpush3.msra.mxu0 %v369_v32  ;;  %v567_v32 = vld [vmem:[%s2764_s13 + $0x50] sm:$0xff]  ;;  %v1581_v39 = vpop.f32.mrf.mxu1 }
 0x103   :  { %1741 = vmatprep.subr.mxu0 %v1955_v1 }
 0x104   :  { %1742 = vmatpush3.msra.mxu0 %v368_v33  ;;  %v566_v33 = vld [vmem:[%s2764_s13 + $0x48] sm:$0xff]  ;;  %v1582_v41 = vpop.f32.mrf.mxu1  ;;  %s1958_s13 = smov [#allocation2]  }
 0x105   :  { %1781 = vmatprep.subr.mxu0 %v1955_v1  ;;  %v1583_v42 = vadd.f32 %v1582_v41, %v1581_v39  ;;  %v996_v41 = vld [vmem:[%s2770_s19 + $0x30] sm:$0xff]  ;;  %s1493_s15 = sshll.u32 %s1958_s13, 4  ;;  %s1494_s15 = int_to_ptr.vmem [resolvable:$true] %s1493_s15 }
 0x106   :  { %s1911_s8 = scalar_lea.vmem %s1494_s15, 32  ;;  %p1916_p1 = scmp.lt.s32.totalorder %s1494_s15, %s1494_s15 }
 0x107   :  { %v278_v43 = vadd.f32 %v1583_v42, %v1523_v40  ;;  %v997_v40 = vld [vmem:[%s2770_s19 + $0x38] sm:$0xff]  ;;  %v995_v42 = vld [vmem:[%s2770_s19 + $0x28] sm:$0xff]  ;;  %p1912_p0 = scmp.ne.s32.totalorder %s1494_s15, %s1911_s8  ;;  %p1917_p2 = scmp.lt.s32.totalorder %s1911_s8, %s1911_s8 }
 0x109   :  { %281 = vst [vmem:[%s2774_s23] sm:$0xff] %v278_v43  ;;  %v994_v43 = vld [vmem:[%s2770_s19 + $0x20] sm:$0xff]  ;;  %p1918_p3 = por %p1917_p2, %p1916_p1 }
 0x10b   :  { %p1919_p4 = pnand %p1918_p3, %p1912_p0 }
 0x1a5   :  { %v363_v20 = vpop.f32.mrf.mxu0 }
 0x1a6   :  { %v2386_v21 = vadd.f32 %v1524_v19, %v363_v20 }
 0x1a7   :  { %v1710_v22 = vpop.f32.mrf.mxu0 }
 0x1a8   :  { %v367_v23 = vmax.f32 %v2386_v21, 0.0 }
 0x1aa   :  { %1744 = vmatmul.mubr.f32.vlgmr.msra.gmra.mxu0 %v367_v23 }
 0x1ab   :  { %1813 = vmatprep.mubr.msk.f32.mxu0 %vm1956_vm0, %v1955_v1  ;;  %1782 = vmatpush3.msra.mxu0 %v572_v27  ;;  %v746_v27 = vld [vmem:[%s2804_s1] sm:$0x3] }
 0x1ac   :  { %1783 = vmatprep.subr.mxu0 %v1955_v1 }
 0x1ad   :  { %1784 = vmatpush3.msra.mxu0 %v571_v28 }
 0x1ae   :  { %1785 = vmatprep.subr.mxu0 %v1955_v1 }
 0x1af   :  { %1786 = vmatpush3.msra.mxu0 %v570_v29 }
 0x1b0   :  { %1787 = vmatprep.subr.mxu0 %v1955_v1 }
 0x1b1   :  { %1788 = vmatpush3.msra.mxu0 %v569_v30 }
 0x1b2   :  { %1789 = vmatprep.subr.mxu0 %v1955_v1 }
 0x1b3   :  { %1790 = vmatpush3.msra.mxu0 %v568_v31  ;;  %v1530_v31 = vld [vmem:[%s2769_s18] ss:$0 sm:$0xff] }
 0x1b4   :  { %1791 = vmatprep.subr.mxu0 %v1955_v1 }
 0x1b5   :  { %1792 = vmatpush3.msra.mxu0 %v567_v32 }
 0x1b6   :  { %1793 = vmatprep.subr.mxu0 %v1955_v1 }
 0x1b7   :  { %1794 = vmatpush3.msra.mxu0 %v566_v33 }
 0x1b8   :  { %1795 = vmatprep.subr.mxu0 %v1955_v1 }
 0x1b9   :  { %1796 = vmatpush3.msra.mxu0 %v565_v34 }
 0x1ba   :  { %1797 = vmatprep.subr.mxu0 %v1955_v1 }
 0x1bb   :  { %1798 = vmatpush3.msra.mxu0 %v564_v35 }
 0x1bc   :  { %1799 = vmatprep.subr.mxu0 %v1955_v1 }
 0x1bd   :  { %1800 = vmatpush3.msra.mxu0 %v563_v36 }
 0x1be   :  { %1801 = vmatprep.subr.mxu0 %v1955_v1 }
 0x1bf   :  { %1802 = vmatpush3.msra.mxu0 %v562_v37 }
 0x1c0   :  { %1803 = vmatprep.subr.mxu0 %v1955_v1 }
 0x1c1   :  { %1804 = vmatpush3.msra.mxu0 %v561_v38 }
 0x1c2   :  { %1805 = vmatprep.subr.mxu0 %v1955_v1 }
 0x1c3   :  { %1806 = vmatpush3.msra.mxu0 %v560_v61 }
 0x1c4   :  { %1807 = vmatprep.subr.mxu0 %v1955_v1 }
 0x1c5   :  { %1808 = vmatpush3.msra.mxu0 %v559_v63  ;;  %v1098_v63 = vld [vmem:[%s2772_s21 + $0xa0] sm:$0xff] }
 0x1c6   :  { %1809 = vmatprep.subr.mxu0 %v1955_v1 }
 0x1c7   :  { %1810 = vmatpush3.msra.mxu0 %v558_v2  ;;  %v1090_v2 = vld [vmem:[%s2772_s21 + $0x60] sm:$0xff] }
 0x1c8   :  { %1811 = vmatprep.subr.mxu0 %v1955_v1 }
 0x1c9   :  { %1812 = vmatpush3.msra.mxu0 %v557_v4  ;;  %v1083_v4 = vld [vmem:[%s2772_s21 + $0x28] sm:$0xff] }
 0x1ca   :  { %1851 = vmatprep.subr.mxu0 %v1955_v1 }
 0x26a   :  { %v457_v45 = vpop.f32.mrf.mxu0 }
 0x26b   :  { %v458_v46 = vadd.f32 %v1526_v44, %v457_v45  ;;  %v993_v44 = vld [vmem:[%s2770_s19 + $0x18] sm:$0xff]  ;;  %v992_v45 = vld [vmem:[%s2770_s19 + $0x10] sm:$0xff] }
 0x26c   :  { %v1745_v47 = vpop.f32.mrf.mxu0 }
 0x26d   :  { %v461_v48 = vmax.f32 %v458_v46, 0.0  ;;  %v991_v46 = vld [vmem:[%s2770_s19 + $0x8] sm:$0xff]  ;;  %v990_v47 = vld [vmem:[%s2770_s19] sm:$0xff] }
 0x26f   :  { %1779 = vmatmul.mubr.f32.vlgmr.msra.gmra.mxu1 %v461_v48  ;;  %v1103_v48 = vld [vmem:[%s2772_s21 + $0xc8] sm:$0xff] }
 0x270   :  { %1817 = vmatpush3.msra.mxu1 %v665_v49  ;;  %1848 = vmatprep.mubr.msk.f32.mxu1 %vm1956_vm0, %v1955_v1  ;;  %v1102_v49 = vld [vmem:[%s2772_s21 + $0xc0] sm:$0xff] }
 0x271   :  { %1818 = vmatprep.subr.mxu1 %v1955_v1 }
 0x272   :  { %1819 = vmatpush3.msra.mxu1 %v664_v50  ;;  %v1107_v50 = vld [vmem:[%s2772_s21 + $0xe8] sm:$0xff] }
 0x273   :  { %1820 = vmatprep.subr.mxu1 %v1955_v1 }
 0x274   :  { %1821 = vmatpush3.msra.mxu1 %v663_v51  ;;  %v1095_v51 = vld [vmem:[%s2772_s21 + $0x88] sm:$0xff] }
 0x275   :  { %1822 = vmatprep.subr.mxu1 %v1955_v1 }
 0x276   :  { %1823 = vmatpush3.msra.mxu1 %v662_v52  ;;  %v1094_v52 = vld [vmem:[%s2772_s21 + $0x80] sm:$0xff] }
 0x277   :  { %1824 = vmatprep.subr.mxu1 %v1955_v1 }
 0x278   :  { %1825 = vmatpush3.msra.mxu1 %v661_v53  ;;  %v1087_v53 = vld [vmem:[%s2772_s21 + $0x48] sm:$0xff] }
 0x279   :  { %1826 = vmatprep.subr.mxu1 %v1955_v1 }
 0x27a   :  { %1827 = vmatpush3.msra.mxu1 %v660_v54  ;;  %v1086_v54 = vld [vmem:[%s2772_s21 + $0x40] sm:$0xff] }
 0x27b   :  { %1828 = vmatprep.subr.mxu1 %v1955_v1 }
 0x27c   :  { %1829 = vmatpush3.msra.mxu1 %v659_v55 }
 0x27d   :  { %1830 = vmatprep.subr.mxu1 %v1955_v1 }
 0x27e   :  { %1831 = vmatpush3.msra.mxu1 %v658_v56 }
 0x27f   :  { %1832 = vmatprep.subr.mxu1 %v1955_v1 }
 0x280   :  { %1833 = vmatpush3.msra.mxu1 %v657_v57 }
 0x281   :  { %1834 = vmatprep.subr.mxu1 %v1955_v1 }
 0x282   :  { %1835 = vmatpush3.msra.mxu1 %v656_v58 }
 0x283   :  { %1836 = vmatprep.subr.mxu1 %v1955_v1 }
 0x284   :  { %1837 = vmatpush3.msra.mxu1 %v655_v59 }
 0x285   :  { %1838 = vmatprep.subr.mxu1 %v1955_v1 }
 0x286   :  { %1839 = vmatpush3.msra.mxu1 %v654_v60  ;;  %v1106_v60 = vld [vmem:[%s2772_s21 + $0xe0] sm:$0xff] }
 0x287   :  { %1840 = vmatprep.subr.mxu1 %v1955_v1 }
 0x288   :  { %1841 = vmatpush3.msra.mxu1 %v653_v62  ;;  %v1099_v62 = vld [vmem:[%s2772_s21 + $0xa8] sm:$0xff] }
 0x289   :  { %1842 = vmatprep.subr.mxu1 %v1955_v1 }
 0x28a   :  { %1843 = vmatpush3.msra.mxu1 %v652_v0  ;;  %v1091_v0 = vld [vmem:[%s2772_s21 + $0x68] sm:$0xff] }
 0x28b   :  { %1844 = vmatprep.subr.mxu1 %v1955_v1 }
 0x28c   :  { %1845 = vmatpush3.msra.mxu1 %v651_v3  ;;  %v1078_v3 = vld [vmem:[%s2772_s21] sm:$0xff] }
 0x28d   :  { %1846 = vmatprep.subr.mxu1 %v1955_v1 }
 0x28e   :  { %1847 = vmatpush3.msra.mxu1 %v650_v5  ;;  %v1105_v5 = vld [vmem:[%s2772_s21 + $0xd8] sm:$0xff] }
 0x28f   :  { %1873 = vmatprep.subr.mxu1 %v1955_v1 }
 0x32f   :  { %v551_v7 = vpop.f32.mrf.mxu1 }
 0x330   :  { %v552_v8 = vadd.f32 %v1527_v6, %v551_v7  ;;  %v1082_v6 = vld [vmem:[%s2772_s21 + $0x20] sm:$0xff] }
 0x331   :  { %v1780_v9 = vpop.f32.mrf.mxu1  ;;  %v1534_v7 = vld [vmem:[%s2771_s20] ss:$0 sm:$0xff]  ;;  %s1959_s20 = smov [#allocation4]  }
 0x332   :  { %v555_v10 = vmax.f32 %v552_v8, 0.0  ;;  %s1503_s12 = sshll.u32 %s1959_s20, 4  ;;  %s1504_s12 = int_to_ptr.vmem [resolvable:$true] %s1503_s12 }
 0x334   :  { %v556_v11 = vadd.f32 %v555_v10, %v367_v23  ;;  %v1104_v10 = vld [vmem:[%s2772_s21 + $0xd0] sm:$0xff] }
 0x336   :  { %1814 = vmatmul.mubr.f32.vlgmr.msra.gmra.mxu0 %v556_v11  ;;  %1849 = vmatmul.mubr.f32.vlgmr.msra.gmra.mxu1 %v556_v11 }
 0x337   :  { %1859 = vmatprep.mubr.msk.f32.mxu0 %vm1956_vm0, %v1955_v1  ;;  %1881 = vmatprep.mubr.msk.f32.mxu1 %vm1956_vm0, %v1955_v1 }
 0x338   :  { %1852 = vmatpush3.msra.mxu0 %v755_v12  ;;  %1874 = vmatpush3.msra.mxu1 %v755_v12 }
 0x339   :  { %1853 = vmatprep.subr.mxu0 %v1955_v1  ;;  %1875 = vmatprep.subr.mxu1 %v1955_v1 }
 0x33a   :  { %1854 = vmatpush3.msra.mxu0 %v754_v13  ;;  %1876 = vmatpush3.msra.mxu1 %v754_v13 }
 0x33b   :  { %1855 = vmatprep.subr.mxu0 %v1955_v1  ;;  %1877 = vmatprep.subr.mxu1 %v1955_v1 }
 0x33c   :  { %1856 = vmatpush3.msra.mxu0 %v753_v14  ;;  %1878 = vmatpush3.msra.mxu1 %v753_v14 }
 0x33d   :  { %1857 = vmatprep.subr.mxu0 %v1955_v1  ;;  %1879 = vmatprep.subr.mxu1 %v1955_v1 }
 0x33e   :  { %1858 = vmatpush3.msra.mxu0 %v752_v15  ;;  %1880 = vmatpush3.msra.mxu1 %v752_v15 }
 0x33f   :  { %1862 = vmatprep.subr.mxu0 %v1955_v1  ;;  %1179 = vmatprep.subr.mxu1 %v1103_v48 }
 0x3f6   :  { %v646_v19 = vpop.f32.mrf.mxu0  ;;  %v739_v20 = vpop.f32.mrf.mxu1 }
 0x3f7   :  { %v647_v21 = vadd.f32 %v1528_v17, %v646_v19  ;;  %v740_v22 = vadd.f32 %v1529_v18, %v739_v20  ;;  %v1081_v17 = vld [vmem:[%s2772_s21 + $0x18] sm:$0xff]  ;;  %v1080_v18 = vld [vmem:[%s2772_s21 + $0x10] sm:$0xff] }
 0x3f8   :  { %v1815_v23 = vpop.f32.mrf.mxu0  ;;  %v1850_v24 = vpop.f32.mrf.mxu1  ;;  %v1109_v19 = vld [vmem:[%s2772_s21 + $0xf8] sm:$0xff]  ;;  %v1108_v20 = vld [vmem:[%s2772_s21 + $0xf0] sm:$0xff] }
 0x3f9   :  { %v743_v25 = vmul.f32 0.5, %v740_v22  ;;  %750 = vst.msk [vmem:[#allocation2] sm:$0x3] %vm749_vm3, %v647_v21  ;;  %751 = vst.msk [vmem:[#allocation4] sm:$0x3] %vm749_vm3, %v740_v22  ;;  %v1100_v22 = vld [vmem:[%s2772_s21 + $0xb0] sm:$0xff] }
 0x3fa   :  { %v1093_v23 = vld [vmem:[%s2772_s21 + $0x78] sm:$0xff]  ;;  %v1092_v24 = vld [vmem:[%s2772_s21 + $0x70] sm:$0xff] }
 0x3fb   :  { %v744_v26 = vmul.f32 1.442695, %v743_v25  ;;  %v1085_v25 = vld [vmem:[%s2772_s21 + $0x38] sm:$0xff] }
 0x3fd   :  { %1909 = vpow2.f32 %v744_v26  ;;  %v1084_v26 = vld [vmem:[%s2772_s21 + $0x30] sm:$0xff] }
 0x40a   :  { %v1910_v28 = vpop.eup %1909 }
 0x40b   :  { %v747_v29 = vmul.f32 %v1910_v28, %v746_v27 }
 0x40d   :  { %v748_v30 = vadd.f32 %v747_v29, %v647_v21  ;;  %v1101_v21 = vld [vmem:[%s2772_s21 + $0xb8] sm:$0xff] }
 0x40f   :  { %1860 = vmatmul.mubr.msk.f32.vlgmr.msra.gmra.mxu0 %vm293_vm2, %v748_v30 }
 0x410   :  { %1863 = vmatpush3.msra.mxu0 %v755_v12  ;;  %1870 = vmatprep.mubr.msk.f32.mxu0 %vm1956_vm0, %v1955_v1  ;;  %v1097_v12 = vld [vmem:[%s2772_s21 + $0x98] sm:$0xff] }
 0x411   :  { %1864 = vmatprep.subr.mxu0 %v1955_v1 }
 0x412   :  { %1865 = vmatpush3.msra.mxu0 %v754_v13  ;;  %v1096_v13 = vld [vmem:[%s2772_s21 + $0x90] sm:$0xff] }
 0x413   :  { %1866 = vmatprep.subr.mxu0 %v1955_v1 }
 0x414   :  { %1867 = vmatpush3.msra.mxu0 %v753_v14  ;;  %v1089_v14 = vld [vmem:[%s2772_s21 + $0x58] sm:$0xff] }
 0x415   :  { %1868 = vmatprep.subr.mxu0 %v1955_v1 }
 0x416   :  { %1869 = vmatpush3.msra.mxu0 %v752_v15  ;;  %v1088_v15 = vld [vmem:[%s2772_s21 + $0x50] sm:$0xff] }
 0x417   :  { %1884 = vmatprep.subr.mxu0 %v1955_v1 }
 0x4cf   :  { %v832_v32 = vpop.f32.mrf.mxu0 }
 0x4d0   :  { %v833_v33 = vadd.f32 %v1530_v31, %v832_v32 }
 0x4d1   :  { %v1861_v34 = vpop.f32.mrf.mxu0 }
 0x4d2   :  { %v836_v35 = vmax.f32 %v833_v33, 0.0 }
 0x4d4   :  { %1871 = vmatmul.mubr.msk.f32.vlgmr.msra.gmra.mxu0 %vm293_vm2, %v836_v35 }
 0x4d5   :  { %1900 = vmatprep.mubr.msk.f32.mxu0 %vm1956_vm0, %v1955_v1  ;;  %1885 = vmatpush3.msra.mxu0 %v997_v40 }
 0x4d6   :  { %1886 = vmatprep.subr.mxu0 %v1955_v1 }
 0x4d7   :  { %1887 = vmatpush3.msra.mxu0 %v996_v41 }
 0x4d8   :  { %1888 = vmatprep.subr.mxu0 %v1955_v1 }
 0x4d9   :  { %1889 = vmatpush3.msra.mxu0 %v995_v42 }
 0x4da   :  { %1890 = vmatprep.subr.mxu0 %v1955_v1 }
 0x4db   :  { %1891 = vmatpush3.msra.mxu0 %v994_v43 }
 0x4dc   :  { %1892 = vmatprep.subr.mxu0 %v1955_v1 }
 0x4dd   :  { %1893 = vmatpush3.msra.mxu0 %v993_v44 }
 0x4de   :  { %1894 = vmatprep.subr.mxu0 %v1955_v1 }
 0x4df   :  { %1895 = vmatpush3.msra.mxu0 %v992_v45 }
 0x4e0   :  { %1896 = vmatprep.subr.mxu0 %v1955_v1 }
 0x4e1   :  { %1897 = vmatpush3.msra.mxu0 %v991_v46 }
 0x4e2   :  { %1898 = vmatprep.subr.mxu0 %v1955_v1 }
 0x4e3   :  { %1899 = vmatpush3.msra.mxu0 %v990_v47 }
 0x4e4   :  { %1321 = vmatprep.subr.mxu0 %v1107_v50 }
 0x594   :  { %v906_v36 = vpop.f32.mrf.mxu0 }
 0x595   :  { %v907_v37 = vadd.f32 %v1530_v31, %v906_v36 }
 0x596   :  { %v1872_v38 = vpop.f32.mrf.mxu0 }
 0x597   :  { %v910_v39 = vmax.f32 %v907_v37, 0.0 }
 0x599   :  { %1882 = vmatmul.mubr.msk.f32.vlgmr.msra.gmra.mxu1 %vm293_vm2, %v910_v39 }
 0x59a   :  { %1219 = vmatprep.mubr.f32.mxu1 %v1955_v1  ;;  %1180 = vmatpush1.msra.mxu1 %v1102_v49 }
 0x59b   :  { %1181 = vmatprep.subr.mxu1 %v1095_v51 }
 0x59c   :  { %1182 = vmatpush1.msra.mxu1 %v1094_v52 }
 0x59d   :  { %1183 = vmatprep.subr.mxu1 %v1087_v53 }
 0x59e   :  { %1184 = vmatpush1.msra.mxu1 %v1086_v54 }
 0x659   :  { %v980_v55 = vpop.f32.mrf.mxu1 }
 0x65a   :  { %v981_v56 = vadd.f32 %v1530_v31, %v980_v55 }
 0x65b   :  { %v1883_v57 = vpop.f32.mrf.mxu1 }
 0x65c   :  { %v984_v58 = vmax.f32 %v981_v56, 0.0 }
 0x65e   :  { %986 = vrot.lane.b32.xlu0 %v984_v58, %s1957_s28 }
 0x6d0   :  { %v987_v59 = vpop.permute.xlu0 %986 }
 0x6d1   :  { %v989_v61 = vsel %vm293_vm2, %v2156_v16, %v987_v59  ;;  %v1079_v16 = vld [vmem:[%s2772_s21 + $0x8] sm:$0xff] }
 0x6d2   :  { %1901 = vmatmul.mubr.msk.f32.vlgmr.msra.gmra.mxu0 %vm96_vm1, %v989_v61  ;;  %1185 = vmatprep.subr.mxu1 %v1079_v16 }
 0x6d3   :  { %1322 = vmatpush1.msra.mxu0 %v1106_v60  ;;  %1361 = vmatprep.mubr.f32.mxu0 %v1955_v1 }
 0x6d4   :  { %1323 = vmatprep.subr.mxu0 %v1099_v62  ;;  %1186 = vmatpush1.msra.mxu1 %v1078_v3 }
 0x6d5   :  { %1324 = vmatpush1.msra.mxu0 %v1098_v63  ;;  %1250 = vmatprep.subr.mxu1 %v1105_v5 }
 0x6d6   :  { %1325 = vmatprep.subr.mxu0 %v1091_v0 }
 0x6d7   :  { %1326 = vmatpush1.msra.mxu0 %v1090_v2 }
 0x6d8   :  { %1327 = vmatprep.subr.mxu0 %v1083_v4 }
 0x6d9   :  { %1328 = vmatpush1.msra.mxu0 %v1082_v6 }
 0x792   :  { %v1074_v8 = vpop.f32.mrf.mxu0 }
 0x793   :  { %v1075_v9 = vadd.f32 %v1534_v7, %v1074_v8 }
 0x794   :  { %v1902_v11 = vpop.f32.mrf.mxu0 }
 0x795   :  { %1536 = vmatmul.mubr.msk.f32.vlgmr.msra.gmra.mxu1 %vm293_vm2, %v1075_v9  ;;  %1538 = vmatmul.mubr.msk.f32.vlgmr.msra.gmra.mxu0 %vm293_vm2, %v1075_v9 }
 0x796   :  { %1251 = vmatpush1.msra.mxu1 %v1104_v10  ;;  %1290 = vmatprep.mubr.f32.mxu1 %v1955_v1 }
 0x797   :  { %1252 = vmatprep.subr.mxu1 %v1097_v12 }
 0x798   :  { %1253 = vmatpush1.msra.mxu1 %v1096_v13 }
 0x799   :  { %1254 = vmatprep.subr.mxu1 %v1089_v14 }
 0x79a   :  { %1255 = vmatpush1.msra.mxu1 %v1088_v15 }
 0x79b   :  { %1256 = vmatprep.subr.mxu1 %v1081_v17 }
 0x79c   :  { %1257 = vmatpush1.msra.mxu1 %v1080_v18 }
 0x79d   :  { %1537 = vmatmul.mubr.msk.f32.vlgmr.msra.gmra.mxu1 %vm293_vm2, %v1075_v9  ;;  %1392 = vmatprep.subr.mxu1 %v1109_v19 }
 0x79e   :  { %1393 = vmatpush1.msra.mxu1 %v1108_v20  ;;  %1432 = vmatprep.mubr.f32.mxu1 %v1955_v1 }
 0x79f   :  { %1394 = vmatprep.subr.mxu1 %v1101_v21 }
 0x7a0   :  { %1395 = vmatpush1.msra.mxu1 %v1100_v22 }
 0x7a1   :  { %1396 = vmatprep.subr.mxu1 %v1093_v23 }
 0x7a2   :  { %1397 = vmatpush1.msra.mxu1 %v1092_v24 }
 0x7a3   :  { %1398 = vmatprep.subr.mxu1 %v1085_v25 }
 0x7a4   :  { %1399 = vmatpush1.msra.mxu1 %v1084_v26 }
 0x7a5   :  { %1539 = vmatmul.mubr.msk.f32.vlgmr.msra.gmra.mxu1 %vm293_vm2, %v1075_v9 }
 0x7a6   :  { %1922 = shalt.err (!%p1919_p4)
}
 0x7a7   :  { %1496 = dma.vmem_to_hbm [thread:$0]  %s1494_s15, 32, %s2775_s24, [#allocation3]  }
 0x7a8   :  { %s1931_s0 = scalar_lea.vmem %s1504_s12, 32  ;;  %p1936_p6 = scmp.lt.s32.totalorder %s1504_s12, %s1504_s12 }
 0x7a9   :  { %p1932_p5 = scmp.ne.s32.totalorder %s1504_s12, %s1931_s0  ;;  %p1937_p7 = scmp.lt.s32.totalorder %s1931_s0, %s1931_s0 }
 0x7ab   :  { %p1938_p8 = por %p1937_p7, %p1936_p6 }
 0x7ad   :  { %p1939_p9 = pnand %p1938_p8, %p1932_p5 }
 0x7af   :  { %1942 = shalt.err (!%p1939_p9)
}
 0x7b0   :  { %1506 = dma.vmem_to_hbm [thread:$0]  %s1504_s12, 32, %s2776_s25, [#allocation5]   ;;  %v1112_v1 = vlaneseq  ;;  %v1110_v31 = vld [vmem:[%s2773_s22] sm:$0xff]  ;;  %v1960_v32 = vmov 1983009808  }
 0x7b1   :  { %v1450_v33 = vunpack.c.l.s4 %v1960_v32 }
 0x7b2   :  { %v1113_v27 = vshrl.u32 %v1112_v1, 7 }
 0x7b3   :  { %v1451_v39 = vunpack.c.0.s8 %v1450_v33 }
 0x7b4   :  { %v1118_v28 = vsub.s32 1, %v1113_v27  ;;  %v1114_v30 = vsub.s32 0, %v1113_v27  ;;  %v1122_v35 = vsub.s32 2, %v1113_v27  ;;  %v1126_v36 = vsub.s32 3, %v1113_v27 }
 0x7b5   :  { %v1134_v40 = vsub.s32 5, %v1113_v27  ;;  %v1130_v47 = vsub.s32 4, %v1113_v27  ;;  %v1454_v48 = vsub.s32 %v1451_v39, %v1113_v27  ;;  %v1138_v51 = vsub.s32 6, %v1113_v27 }
 0x7b6   :  { %v1119_v34 = vrot.slane %v1110_v31, %v1118_v28  ;;  %v1115_v38 = vrot.slane %v1110_v31, %v1114_v30  ;;  %v1123_v42 = vrot.slane %v1110_v31, %v1122_v35  ;;  %v1127_v43 = vrot.slane %v1110_v31, %v1126_v36 }
 0x7b7   :  { %v1135_v49 = vrot.slane %v1110_v31, %v1134_v40  ;;  %v1142_v55 = vsub.s32 7, %v1113_v27  ;;  %v1131_v57 = vrot.slane %v1110_v31, %v1130_v47  ;;  %v1139_v59 = vrot.slane %v1110_v31, %v1138_v51 }
 0x7b9   :  { %v1143_v63 = vrot.slane %v1110_v31, %v1142_v55 }
 0x855   :  { %v1221_v29 = vpop.f32.mrf.mxu1  ;;  %v1363_v44 = vpop.f32.mrf.mxu0 }
 0x856   :  { %v1222_v46 = vadd.f32 %v1221_v29, %v1115_v38  ;;  %v1364_v16 = vadd.f32 %v1363_v44, %v1131_v57 }
 0x857   :  { %v1223_v37 = vpop.f32.mrf.mxu1  ;;  %v1365_v56 = vpop.f32.mrf.mxu0 }
 0x858   :  { %v1224_v41 = vadd.f32 %v1223_v37, %v1119_v34  ;;  %v1366_v61 = vadd.f32 %v1365_v56, %v1135_v49 }
 0x85a   :  { %v1447_v52 = vcombine.low %v1222_v46, %v1224_v41  ;;  %v1464_v4 = vcombine.low %v1364_v16, %v1366_v61 }
 0x85c   :  { %v1455_v60 = vrot.slane %v1447_v52, %v1454_v48  ;;  %v1472_v8 = vrot.slane %v1464_v4, %v1454_v48 }
 0x85d   :  { %v1292_v45 = vpop.f32.mrf.mxu1 }
 0x85e   :  { %v1293_v53 = vadd.f32 %v1292_v45, %v1123_v42 }
 0x85f   :  { %v1294_v50 = vpop.f32.mrf.mxu1 }
 0x860   :  { %v1295_v54 = vadd.f32 %v1294_v50, %v1127_v43 }
 0x862   :  { %v1448_v58 = vcombine.low %v1293_v53, %v1295_v54 }
 0x864   :  { %v1462_v62 = vrot.slane %v1448_v58, %v1454_v48 }
 0x865   :  { %v1434_v0 = vpop.f32.mrf.mxu1 }
 0x866   :  { %v1463_v2 = vcombine.low %v1455_v60, %v1462_v62  ;;  %v1435_v5 = vadd.f32 %v1434_v0, %v1139_v59 }
 0x867   :  { %v1436_v3 = vpop.f32.mrf.mxu1 }
 0x868   :  { %1483 = vst [vmem:[%s2777_s26] sm:$0xff] %v1463_v2  ;;  %v1437_v6 = vadd.f32 %v1436_v3, %v1143_v63 }
 0x86a   :  { %v1465_v7 = vcombine.low %v1435_v5, %v1437_v6 }
 0x86c   :  { %v1479_v9 = vrot.slane %v1465_v7, %v1454_v48 }
 0x86e   :  { %v1480_v10 = vcombine.low %v1472_v8, %v1479_v9 }
 0x870   :  { %1484 = vst [vmem:[%s2777_s26 + $0x8] sm:$0xff] %v1480_v10 }
 0x871   :  { %1951 = dma.done.wait [#allocation3], 32  }
 0x872   :  { %1952 = vsyncadd [#allocation3], 4294967264 }
 0x873   :  { %1953 = dma.done.wait [#allocation5], 32  }
 0x874   :  { %1954 = vsyncadd [#allocation5], 4294967264 }
 0x875   :  { %1519 = vsyncpa [#allocation3], 1 }
 0x876   :  { %1520 = vsyncpa [#allocation5], 1 }

// kernel: mtvae_forward.5
= control target key start
LH: loop header
LB: loop body
LE: loop exit
PB: predicated region body
PF: predicated region fallthrough
CT: control target
= control target key end

     0   :  { %12 = vsyncpa [#allocation3], 0  ;;  %s2124_s21 = smov [#allocation2]   ;;  %s3017_s0 = inlined_call_operand.vmem [shape: f32[4,4,1024], index: 0, kind: input, shape index: {}]   ;;  %s3018_s1 = inlined_call_operand.hbm [shape: f32[2,128,512], index: 1, kind: input, shape index: {}]   ;;  %s3019_s2 = inlined_call_operand.vmem [shape: f32[256,32], index: 2, kind: input, shape index: {}]   ;;  %s3020_s3 = inlined_call_operand.vmem [shape: f32[1,32], index: 3, kind: input, shape index: {}]   ;;  %s3021_s4 = inlined_call_operand.vmem [shape: f32[4,32], index: 4, kind: output, shape index: {0}]   ;;  %s3022_s5 = inlined_call_operand.vmem [shape: f32[2,4,128], index: 5, kind: output, shape index: {1}]   ;;  %s3023_s6 = inlined_call_operand.vmem [shape: f32[2,4,128], index: 6, kind: output, shape index: {2}]  }
   0x1   :  { %s20_s22 = sshll.u32 %s2124_s21, 4  ;;  %s21_s22 = int_to_ptr.vmem [resolvable:$true] %s20_s22 }
   0x2   :  { %s2110_s23 = scalar_lea.vmem %s21_s22, 16384  ;;  %p2115_p1 = scmp.lt.s32.totalorder %s21_s22, %s21_s22 }
   0x3   :  { %p2111_p0 = scmp.ne.s32.totalorder %s21_s22, %s2110_s23  ;;  %p2116_p2 = scmp.lt.s32.totalorder %s2110_s23, %s2110_s23 }
   0x5   :  { %p2117_p3 = por %p2116_p2, %p2115_p1 }
   0x7   :  { %p2118_p4 = pnand %p2117_p3, %p2111_p0 }
   0x9   :  { %2121 = shalt.err (!%p2118_p4)
}
   0xa   :  { %s2125_s24 = smov 512   ;;  %s2126_s25 = smov 32  }
   0xb   :  { %26 = dma.hbm_to_vmem [thread:$0]  %s3018_s1, 16384, %s21_s22, [#allocation3], %s2125_s24, %s2125_s24, %s2126_s25  }
   0xc   :  { %2122 = dma.done.wait [#allocation3], 16384  }
   0xd   :  { %2123 = vsyncadd [#allocation3], 4294950912  ;;  %v3024_v0 = vmov 0.0   ;;  %v2168_v1 = vld [vmem:[#allocation2 + $0x1e8] sm:$0xff]  ;;  %v2170_v2 = vld [vmem:[#allocation2 + $0x1e0] sm:$0xff]  ;;  %vm1747_vm0 = vcmask 257024  }
   0xe   :  { %231 = vmatprep.mubr.f32.mxu0 %v3024_v0  ;;  %302 = vmatprep.mubr.f32.mxu1 %v3024_v0  ;;  %v2172_v3 = vld [vmem:[#allocation2 + $0x1c8] sm:$0xff]  ;;  %v2175_v4 = vld [vmem:[#allocation2 + $0x1c0] sm:$0xff]  ;;  %v2189_v9 = vld [vmem:[#allocation2 + $0x1f8] sm:$0xff] }
   0xf   :  { %167 = vmatprep.subr.mxu0 %v2168_v1  ;;  %v2178_v5 = vld [vmem:[#allocation2 + $0x1a8] sm:$0xff]  ;;  %v2181_v6 = vld [vmem:[#allocation2 + $0x1a0] sm:$0xff]  ;;  %238 = vmatprep.subr.mxu1 %v2189_v9  ;;  %v2195_v11 = vld [vmem:[#allocation2 + $0x1f0] sm:$0xff] }
  0x10   :  { %168 = vmatpush1.msra.mxu0 %v2170_v2  ;;  %v2184_v7 = vld [vmem:[#allocation2 + $0x188] sm:$0xff]  ;;  %v2187_v8 = vld [vmem:[#allocation2 + $0x180] sm:$0xff]  ;;  %239 = vmatpush1.msra.mxu1 %v2195_v11  ;;  %v2201_v13 = vld [vmem:[#allocation2 + $0x1d8] sm:$0xff] }
  0x11   :  { %169 = vmatprep.subr.mxu0 %v2172_v3  ;;  %v2192_v10 = vld [vmem:[#allocation2 + $0x168] sm:$0xff]  ;;  %v2198_v12 = vld [vmem:[#allocation2 + $0x160] sm:$0xff]  ;;  %v2203_v14 = vld [vmem:[#allocation2 + $0x1d0] sm:$0xff]  ;;  %240 = vmatprep.subr.mxu1 %v2201_v13 }
  0x12   :  { %170 = vmatpush1.msra.mxu0 %v2175_v4  ;;  %v2206_v15 = vld [vmem:[#allocation2 + $0x148] sm:$0xff]  ;;  %v2209_v16 = vld [vmem:[#allocation2 + $0x1b8] sm:$0xff]  ;;  %v2212_v17 = vld [vmem:[#allocation2 + $0x140] sm:$0xff]  ;;  %241 = vmatpush1.msra.mxu1 %v2203_v14 }
  0x13   :  { %171 = vmatprep.subr.mxu0 %v2178_v5  ;;  %v2215_v18 = vld [vmem:[#allocation2 + $0x1b0] sm:$0xff]  ;;  %v2217_v19 = vld [vmem:[#allocation2 + $0x198] sm:$0xff]  ;;  %v2220_v20 = vld [vmem:[#allocation2 + $0x128] sm:$0xff]  ;;  %242 = vmatprep.subr.mxu1 %v2209_v16 }
  0x14   :  { %172 = vmatpush1.msra.mxu0 %v2181_v6  ;;  %v2223_v21 = vld [vmem:[#allocation2 + $0x190] sm:$0xff]  ;;  %v2226_v22 = vld [vmem:[#allocation2 + $0x120] sm:$0xff]  ;;  %243 = vmatpush1.msra.mxu1 %v2215_v18  ;;  %v2229_v23 = vld [vmem:[#allocation2 + $0x178] sm:$0xff] }
  0x15   :  { %173 = vmatprep.subr.mxu0 %v2184_v7  ;;  %v2232_v24 = vld [vmem:[#allocation2 + $0x108] sm:$0xff]  ;;  %244 = vmatprep.subr.mxu1 %v2217_v19  ;;  %v2235_v25 = vld [vmem:[#allocation2 + $0x170] sm:$0xff]  ;;  %v2238_v26 = vld [vmem:[#allocation2 + $0x100] sm:$0xff] }
  0x16   :  { %174 = vmatpush1.msra.mxu0 %v2187_v8  ;;  %245 = vmatpush1.msra.mxu1 %v2223_v21  ;;  %v2241_v27 = vld [vmem:[#allocation2 + $0x158] sm:$0xff]  ;;  %v2244_v28 = vld [vmem:[#allocation2 + $0xe8] sm:$0xff]  ;;  %v2247_v29 = vld [vmem:[#allocation2 + $0x150] sm:$0xff] }
  0x17   :  { %175 = vmatprep.subr.mxu0 %v2192_v10  ;;  %246 = vmatprep.subr.mxu1 %v2229_v23  ;;  %v2250_v30 = vld [vmem:[#allocation2 + $0xe0] sm:$0xff]  ;;  %v2253_v31 = vld [vmem:[#allocation2 + $0x138] sm:$0xff]  ;;  %v2256_v32 = vld [vmem:[#allocation2 + $0xc8] sm:$0xff] }
  0x18   :  { %176 = vmatpush1.msra.mxu0 %v2198_v12  ;;  %3177 = vst [vmem:[#allocation5_spill] sm:$0xff] %v2250_v30  ;;  %247 = vmatpush1.msra.mxu1 %v2235_v25  ;;  %3178 = vst [vmem:[#allocation6_spill] sm:$0xff] %v2256_v32  ;;  %v2259_v33 = vld [vmem:[#allocation2 + $0x130] sm:$0xff]  ;;  %v2262_v34 = vld [vmem:[#allocation2 + $0xc0] sm:$0xff] }
  0x19   :  { %177 = vmatprep.subr.mxu0 %v2206_v15  ;;  %248 = vmatprep.subr.mxu1 %v2241_v27  ;;  %3179 = vst [vmem:[#allocation7_spill] sm:$0xff] %v2262_v34  ;;  %v2265_v35 = vld [vmem:[#allocation2 + $0x118] sm:$0xff]  ;;  %v2268_v36 = vld [vmem:[#allocation2 + $0xa8] sm:$0xff]  ;;  %v2271_v37 = vld [vmem:[#allocation2 + $0x110] sm:$0xff] }
  0x1a   :  { %178 = vmatpush1.msra.mxu0 %v2212_v17  ;;  %249 = vmatpush1.msra.mxu1 %v2247_v29  ;;  %3180 = vst [vmem:[#allocation8_spill] sm:$0xff] %v2268_v36  ;;  %v2274_v38 = vld [vmem:[#allocation2 + $0xa0] sm:$0xff]  ;;  %v2277_v39 = vld [vmem:[#allocation2 + $0xf8] sm:$0xff]  ;;  %v2280_v40 = vld [vmem:[#allocation2 + $0x88] sm:$0xff] }
  0x1b   :  { %179 = vmatprep.subr.mxu0 %v2220_v20  ;;  %250 = vmatprep.subr.mxu1 %v2253_v31  ;;  %3181 = vst [vmem:[#allocation9_spill] sm:$0xff] %v2274_v38  ;;  %3182 = vst [vmem:[#allocation10_spill] sm:$0xff] %v2277_v39  ;;  %v2283_v41 = vld [vmem:[#allocation2 + $0xf0] sm:$0xff]  ;;  %v2286_v42 = vld [vmem:[#allocation2 + $0x80] sm:$0xff] }
  0x1c   :  { %180 = vmatpush1.msra.mxu0 %v2226_v22  ;;  %251 = vmatpush1.msra.mxu1 %v2259_v33  ;;  %3183 = vst [vmem:[#allocation11_spill] sm:$0xff] %v2280_v40  ;;  %3184 = vst [vmem:[#allocation12_spill] sm:$0xff] %v2283_v41  ;;  %v2289_v43 = vld [vmem:[#allocation2 + $0xd8] sm:$0xff]  ;;  %v2292_v44 = vld [vmem:[#allocation2 + $0x68] sm:$0xff] }
  0x1d   :  { %181 = vmatprep.subr.mxu0 %v2232_v24  ;;  %252 = vmatprep.subr.mxu1 %v2265_v35  ;;  %3185 = vst [vmem:[#allocation13_spill] sm:$0xff] %v2286_v42  ;;  %3186 = vst [vmem:[#allocation14_spill] sm:$0xff] %v2289_v43  ;;  %v2295_v45 = vld [vmem:[#allocation2 + $0xd0] sm:$0xff]  ;;  %v2298_v46 = vld [vmem:[#allocation2 + $0x60] sm:$0xff] }
  0x1e   :  { %182 = vmatpush1.msra.mxu0 %v2238_v26  ;;  %253 = vmatpush1.msra.mxu1 %v2271_v37  ;;  %3187 = vst [vmem:[#allocation15_spill] sm:$0xff] %v2292_v44  ;;  %3188 = vst [vmem:[#allocation16_spill] sm:$0xff] %v2295_v45  ;;  %v2301_v47 = vld [vmem:[#allocation2 + $0xb8] sm:$0xff]  ;;  %v2304_v48 = vld [vmem:[#allocation2 + $0x48] sm:$0xff] }
  0x1f   :  { %183 = vmatprep.subr.mxu0 %v2244_v28  ;;  %254 = vmatprep.subr.mxu1 %v2277_v39  ;;  %3189 = vst [vmem:[#allocation17_spill] sm:$0xff] %v2298_v46  ;;  %3190 = vst [vmem:[#allocation18_spill] sm:$0xff] %v2301_v47  ;;  %v2307_v49 = vld [vmem:[#allocation2 + $0xb0] sm:$0xff]  ;;  %v2310_v50 = vld [vmem:[#allocation2 + $0x40] sm:$0xff] }
  0x20   :  { %184 = vmatpush1.msra.mxu0 %v2250_v30  ;;  %255 = vmatpush1.msra.mxu1 %v2283_v41  ;;  %3191 = vst [vmem:[#allocation19_spill] sm:$0xff] %v2304_v48  ;;  %3192 = vst [vmem:[#allocation20_spill] sm:$0xff] %v2307_v49  ;;  %v2313_v51 = vld [vmem:[#allocation2 + $0x98] sm:$0xff]  ;;  %v2316_v52 = vld [vmem:[#allocation2 + $0x28] sm:$0xff] }
  0x21   :  { %185 = vmatprep.subr.mxu0 %v2256_v32  ;;  %256 = vmatprep.subr.mxu1 %v2289_v43  ;;  %3193 = vst [vmem:[#allocation21_spill] sm:$0xff] %v2310_v50  ;;  %3194 = vst [vmem:[#allocation22_spill] sm:$0xff] %v2313_v51  ;;  %v2319_v53 = vld [vmem:[#allocation2 + $0x90] sm:$0xff]  ;;  %v2322_v54 = vld [vmem:[#allocation2 + $0x20] sm:$0xff] }
  0x22   :  { %186 = vmatpush1.msra.mxu0 %v2262_v34  ;;  %257 = vmatpush1.msra.mxu1 %v2295_v45  ;;  %3195 = vst [vmem:[#allocation23_spill] sm:$0xff] %v2316_v52  ;;  %3196 = vst [vmem:[#allocation24_spill] sm:$0xff] %v2319_v53  ;;  %v2325_v55 = vld [vmem:[#allocation2 + $0x78] sm:$0xff]  ;;  %v2328_v56 = vld [vmem:[#allocation2 + $0x8] sm:$0xff] }
  0x23   :  { %187 = vmatprep.subr.mxu0 %v2268_v36  ;;  %258 = vmatprep.subr.mxu1 %v2301_v47  ;;  %3197 = vst [vmem:[#allocation25_spill] sm:$0xff] %v2322_v54  ;;  %3198 = vst [vmem:[#allocation26_spill] sm:$0xff] %v2325_v55  ;;  %v2331_v57 = vld [vmem:[#allocation2 + $0x70] sm:$0xff]  ;;  %v2334_v58 = vld [vmem:[#allocation2] sm:$0xff] }
  0x24   :  { %188 = vmatpush1.msra.mxu0 %v2274_v38  ;;  %259 = vmatpush1.msra.mxu1 %v2307_v49  ;;  %3199 = vst [vmem:[#allocation27_spill] sm:$0xff] %v2328_v56  ;;  %3200 = vst [vmem:[#allocation28_spill] sm:$0xff] %v2331_v57  ;;  %v2337_v59 = vld [vmem:[#allocation2 + $0x58] sm:$0xff]  ;;  %v2340_v60 = vld [vmem:[#allocation2 + $0x3e8] sm:$0xff] }
  0x25   :  { %189 = vmatprep.subr.mxu0 %v2280_v40  ;;  %260 = vmatprep.subr.mxu1 %v2313_v51  ;;  %3201 = vst [vmem:[#allocation29_spill] sm:$0xff] %v2334_v58  ;;  %3202 = vst [vmem:[#allocation30_spill] sm:$0xff] %v2337_v59  ;;  %v2344_v61 = vld [vmem:[#allocation2 + $0x3e0] sm:$0xff]  ;;  %v2347_v62 = vld [vmem:[#allocation2 + $0x50] sm:$0xff] }
  0x26   :  { %190 = vmatpush1.msra.mxu0 %v2286_v42  ;;  %261 = vmatpush1.msra.mxu1 %v2319_v53  ;;  %3203 = vst [vmem:[#allocation31_spill] sm:$0xff] %v2340_v60  ;;  %3204 = vst [vmem:[#allocation32_spill] sm:$0xff] %v2344_v61  ;;  %v2350_v63 = vld [vmem:[#allocation2 + $0x3c8] sm:$0xff]  ;;  %v2353_v0 = vld [vmem:[#allocation2 + $0x38] sm:$0xff] }
  0x27   :  { %191 = vmatprep.subr.mxu0 %v2292_v44  ;;  %262 = vmatprep.subr.mxu1 %v2325_v55  ;;  %3205 = vst [vmem:[#allocation33_spill] sm:$0xff] %v2347_v62  ;;  %3206 = vst [vmem:[#allocation34_spill] sm:$0xff] %v2350_v63  ;;  %v2357_v55 = vld [vmem:[#allocation2 + $0x3c0] sm:$0xff] }
  0x28   :  { %192 = vmatpush1.msra.mxu0 %v2298_v46  ;;  %263 = vmatpush1.msra.mxu1 %v2331_v57  ;;  %3207 = vst [vmem:[#allocation35_spill] sm:$0xff] %v2353_v0  ;;  %3209 = vst [vmem:[#allocation36_spill] sm:$0xff] %v2357_v55  ;;  %v2362_v57 = vld [vmem:[#allocation2 + $0x3a8] sm:$0xff] }
  0x29   :  { %193 = vmatprep.subr.mxu0 %v2304_v48  ;;  %264 = vmatprep.subr.mxu1 %v2337_v59  ;;  %3211 = vst [vmem:[#allocation38_spill] sm:$0xff] %v2362_v57  ;;  %v2368_v59 = vld [vmem:[#allocation2 + $0x3a0] sm:$0xff] }
  0x2a   :  { %194 = vmatpush1.msra.mxu0 %v2310_v50  ;;  %265 = vmatpush1.msra.mxu1 %v2347_v62  ;;  %3213 = vst [vmem:[#allocation40_spill] sm:$0xff] %v2368_v59  ;;  %v2381_v62 = vld [vmem:[#allocation2 + $0x3f8] sm:$0xff] }
  0x2b   :  { %195 = vmatprep.subr.mxu0 %v2316_v52  ;;  %266 = vmatprep.subr.mxu1 %v2353_v0  ;;  %v2371_v52 = vld [vmem:[#allocation2 + $0x10] sm:$0xff]  ;;  %3217 = vst [vmem:[#allocation44_spill] sm:$0xff] %v2381_v62 }
  0x2c   :  { %196 = vmatpush1.msra.mxu0 %v2322_v54  ;;  %v3208_v54 = vmov 0.0   ;;  %3214 = vst [vmem:[#allocation41_spill] sm:$0xff] %v2371_v52  ;;  %v2387_v0 = vld [vmem:[#allocation2 + $0x3f0] sm:$0xff] }
  0x2d   :  { %197 = vmatprep.subr.mxu0 %v2328_v56  ;;  %v2359_v56 = vld [vmem:[#allocation2 + $0x30] sm:$0xff]  ;;  %3219 = vst [vmem:[#allocation46_spill] sm:$0xff] %v2387_v0 }
  0x2e   :  { %198 = vmatpush1.msra.mxu0 %v2334_v58  ;;  %3210 = vst [vmem:[#allocation37_spill] sm:$0xff] %v2359_v56  ;;  %v2365_v58 = vld [vmem:[#allocation2 + $0x18] sm:$0xff]  ;;  %267 = vmatpush1.msra.mxu1 %v2359_v56  ;;  %v2408_v56 = vld [vmem:[#allocation2 + $0x328] sm:$0xff] }
  0x2f   :  { %232 = vmatmul.mubr.f32.vlgmr.msra.gmra.mxu0 %v3208_v54  ;;  %354 = vmatprep.subr.mxu0 %v2340_v60  ;;  %3212 = vst [vmem:[#allocation39_spill] sm:$0xff] %v2365_v58  ;;  %v2374_v60 = vld [vmem:[#allocation2 + $0x388] sm:$0xff]  ;;  %3226 = vst [vmem:[#allocation53_spill] sm:$0xff] %v2408_v56 }
  0x30   :  { %355 = vmatpush1.msra.mxu0 %v2344_v61  ;;  %3215 = vst [vmem:[#allocation42_spill] sm:$0xff] %v2374_v60  ;;  %v2378_v61 = vld [vmem:[#allocation2 + $0x380] sm:$0xff]  ;;  %268 = vmatprep.subr.mxu1 %v2365_v58  ;;  %v2396_v58 = vld [vmem:[#allocation2 + $0x348] sm:$0xff] }
  0x31   :  { %356 = vmatprep.subr.mxu0 %v2350_v63  ;;  %3216 = vst [vmem:[#allocation43_spill] sm:$0xff] %v2378_v61  ;;  %v2384_v63 = vld [vmem:[#allocation2 + $0x368] sm:$0xff]  ;;  %269 = vmatpush1.msra.mxu1 %v2371_v52  ;;  %3222 = vst [vmem:[#allocation49_spill] sm:$0xff] %v2396_v58  ;;  %v2402_v52 = vld [vmem:[#allocation2 + $0x340] sm:$0xff] }
  0x32   :  { %357 = vmatpush1.msra.mxu0 %v2357_v55  ;;  %3218 = vst [vmem:[#allocation45_spill] sm:$0xff] %v2384_v63  ;;  %v2390_v55 = vld [vmem:[#allocation2 + $0x360] sm:$0xff]  ;;  %303 = vmatmul.mubr.f32.vlgmr.msra.gmra.mxu1 %v3208_v54  ;;  %3224 = vst [vmem:[#allocation51_spill] sm:$0xff] %v2402_v52 }
  0x33   :  { %358 = vmatprep.subr.mxu0 %v2362_v57  ;;  %3220 = vst [vmem:[#allocation47_spill] sm:$0xff] %v2390_v55  ;;  %v2393_v57 = vld [vmem:[#allocation2 + $0x3d8] sm:$0xff]  ;;  %425 = vmatprep.subr.mxu1 %v2381_v62  ;;  %v2414_v62 = vld [vmem:[#allocation2 + $0x320] sm:$0xff] }
  0x34   :  { %359 = vmatpush1.msra.mxu0 %v2368_v59  ;;  %3221 = vst [vmem:[#allocation48_spill] sm:$0xff] %v2393_v57  ;;  %v2399_v59 = vld [vmem:[#allocation2 + $0x3d0] sm:$0xff]  ;;  %426 = vmatpush1.msra.mxu1 %v2387_v0  ;;  %3228 = vst [vmem:[#allocation55_spill] sm:$0xff] %v2414_v62  ;;  %v2420_v0 = vld [vmem:[#allocation2 + $0x308] sm:$0xff] }
  0x35   :  { %360 = vmatprep.subr.mxu0 %v2374_v60  ;;  %3223 = vst [vmem:[#allocation50_spill] sm:$0xff] %v2399_v59  ;;  %v2405_v60 = vld [vmem:[#allocation2 + $0x3b8] sm:$0xff]  ;;  %427 = vmatprep.subr.mxu1 %v2393_v57  ;;  %3230 = vst [vmem:[#allocation57_spill] sm:$0xff] %v2420_v0  ;;  %v2426_v57 = vld [vmem:[#allocation2 + $0x300] sm:$0xff] }
  0x36   :  { %361 = vmatpush1.msra.mxu0 %v2378_v61  ;;  %3225 = vst [vmem:[#allocation52_spill] sm:$0xff] %v2405_v60  ;;  %v2411_v61 = vld [vmem:[#allocation2 + $0x3b0] sm:$0xff]  ;;  %428 = vmatpush1.msra.mxu1 %v2399_v59  ;;  %3232 = vst [vmem:[#allocation59_spill] sm:$0xff] %v2426_v57  ;;  %v2432_v59 = vld [vmem:[#allocation2 + $0x2e8] sm:$0xff] }
  0x37   :  { %362 = vmatprep.subr.mxu0 %v2384_v63  ;;  %3227 = vst [vmem:[#allocation54_spill] sm:$0xff] %v2411_v61  ;;  %v2417_v63 = vld [vmem:[#allocation2 + $0x398] sm:$0xff]  ;;  %429 = vmatprep.subr.mxu1 %v2405_v60  ;;  %3234 = vst [vmem:[#allocation61_spill] sm:$0xff] %v2432_v59  ;;  %v2438_v60 = vld [vmem:[#allocation2 + $0x2e0] sm:$0xff] }
  0x38   :  { %363 = vmatpush1.msra.mxu0 %v2390_v55  ;;  %3229 = vst [vmem:[#allocation56_spill] sm:$0xff] %v2417_v63  ;;  %v2423_v55 = vld [vmem:[#allocation2 + $0x390] sm:$0xff]  ;;  %430 = vmatpush1.msra.mxu1 %v2411_v61  ;;  %3236 = vst [vmem:[#allocation63_spill] sm:$0xff] %v2438_v60  ;;  %v2444_v61 = vld [vmem:[#allocation2 + $0x2c8] sm:$0xff] }
  0x39   :  { %364 = vmatprep.subr.mxu0 %v2396_v58  ;;  %3231 = vst [vmem:[#allocation58_spill] sm:$0xff] %v2423_v55  ;;  %v2429_v58 = vld [vmem:[#allocation2 + $0x378] sm:$0xff]  ;;  %431 = vmatprep.subr.mxu1 %v2417_v63  ;;  %3238 = vst [vmem:[#allocation65_spill] sm:$0xff] %v2444_v61  ;;  %v2450_v63 = vld [vmem:[#allocation2 + $0x2c0] sm:$0xff] }
  0x3a   :  { %365 = vmatpush1.msra.mxu0 %v2402_v52  ;;  %3233 = vst [vmem:[#allocation60_spill] sm:$0xff] %v2429_v58  ;;  %v2435_v52 = vld [vmem:[#allocation2 + $0x370] sm:$0xff]  ;;  %432 = vmatpush1.msra.mxu1 %v2423_v55  ;;  %3240 = vst [vmem:[#allocation67_spill] sm:$0xff] %v2450_v63  ;;  %v2456_v55 = vld [vmem:[#allocation2 + $0x2a8] sm:$0xff] }
  0x3b   :  { %366 = vmatprep.subr.mxu0 %v2408_v56  ;;  %3235 = vst [vmem:[#allocation62_spill] sm:$0xff] %v2435_v52  ;;  %v2441_v56 = vld [vmem:[#allocation2 + $0x358] sm:$0xff]  ;;  %433 = vmatprep.subr.mxu1 %v2429_v58  ;;  %3242 = vst [vmem:[#allocation69_spill] sm:$0xff] %v2456_v55  ;;  %v2463_v58 = vld [vmem:[#allocation2 + $0x330] sm:$0xff] }
  0x3c   :  { %367 = vmatpush1.msra.mxu0 %v2414_v62  ;;  %3237 = vst [vmem:[#allocation64_spill] sm:$0xff] %v2441_v56  ;;  %v2447_v62 = vld [vmem:[#allocation2 + $0x350] sm:$0xff]  ;;  %434 = vmatpush1.msra.mxu1 %v2435_v52  ;;  %3244 = vst [vmem:[#allocation71_spill] sm:$0xff] %v2463_v58  ;;  %v2469_v52 = vld [vmem:[#allocation2 + $0x318] sm:$0xff] }
  0x3d   :  { %368 = vmatprep.subr.mxu0 %v2420_v0  ;;  %3239 = vst [vmem:[#allocation66_spill] sm:$0xff] %v2447_v62  ;;  %v2453_v0 = vld [vmem:[#allocation2 + $0x338] sm:$0xff]  ;;  %435 = vmatprep.subr.mxu1 %v2441_v56  ;;  %3246 = vst [vmem:[#allocation73_spill] sm:$0xff] %v2469_v52  ;;  %v2490_v56 = vld [vmem:[#allocation2 + $0x248] sm:$0xff] }
  0x3e   :  { %369 = vmatpush1.msra.mxu0 %v2426_v57  ;;  %3241 = vst [vmem:[#allocation68_spill] sm:$0xff] %v2453_v0  ;;  %v2460_v57 = vld [vmem:[#allocation2 + $0x2a0] sm:$0xff]  ;;  %436 = vmatpush1.msra.mxu1 %v2447_v62  ;;  %v2478_v62 = vld [vmem:[#allocation2 + $0x268] sm:$0xff]  ;;  %3253 = vst [vmem:[#allocation80_spill] sm:$0xff] %v2490_v56 }
  0x3f   :  { %370 = vmatprep.subr.mxu0 %v2432_v59  ;;  %3243 = vst [vmem:[#allocation70_spill] sm:$0xff] %v2460_v57  ;;  %v2466_v59 = vld [vmem:[#allocation2 + $0x288] sm:$0xff]  ;;  %437 = vmatprep.subr.mxu1 %v2453_v0  ;;  %3249 = vst [vmem:[#allocation76_spill] sm:$0xff] %v2478_v62  ;;  %v2484_v0 = vld [vmem:[#allocation2 + $0x260] sm:$0xff] }
  0x40   :  { %371 = vmatpush1.msra.mxu0 %v2438_v60  ;;  %3245 = vst [vmem:[#allocation72_spill] sm:$0xff] %v2466_v59  ;;  %v2472_v60 = vld [vmem:[#allocation2 + $0x280] sm:$0xff]  ;;  %418 = vmatprep.mubr.f32.mxu0 %v3208_v54  ;;  %3251 = vst [vmem:[#allocation78_spill] sm:$0xff] %v2484_v0 }
  0x41   :  { %372 = vmatprep.subr.mxu0 %v2444_v61  ;;  %3247 = vst [vmem:[#allocation74_spill] sm:$0xff] %v2472_v60  ;;  %v2475_v61 = vld [vmem:[#allocation2 + $0x310] sm:$0xff]  ;;  %438 = vmatpush1.msra.mxu1 %v2463_v58  ;;  %v2496_v58 = vld [vmem:[#allocation2 + $0x240] sm:$0xff] }
  0x42   :  { %373 = vmatpush1.msra.mxu0 %v2450_v63  ;;  %3248 = vst [vmem:[#allocation75_spill] sm:$0xff] %v2475_v61  ;;  %v2481_v63 = vld [vmem:[#allocation2 + $0x2f8] sm:$0xff]  ;;  %439 = vmatprep.subr.mxu1 %v2469_v52  ;;  %3255 = vst [vmem:[#allocation82_spill] sm:$0xff] %v2496_v58  ;;  %v2502_v52 = vld [vmem:[#allocation2 + $0x228] sm:$0xff] }
  0x43   :  { %374 = vmatprep.subr.mxu0 %v2456_v55  ;;  %3250 = vst [vmem:[#allocation77_spill] sm:$0xff] %v2481_v63  ;;  %v2487_v55 = vld [vmem:[#allocation2 + $0x2f0] sm:$0xff]  ;;  %440 = vmatpush1.msra.mxu1 %v2475_v61  ;;  %3257 = vst [vmem:[#allocation84_spill] sm:$0xff] %v2502_v52  ;;  %v2508_v61 = vld [vmem:[#allocation2 + $0x220] sm:$0xff] }
  0x44   :  { %375 = vmatpush1.msra.mxu0 %v2460_v57  ;;  %3252 = vst [vmem:[#allocation79_spill] sm:$0xff] %v2487_v55  ;;  %v2493_v57 = vld [vmem:[#allocation2 + $0x2d8] sm:$0xff]  ;;  %441 = vmatprep.subr.mxu1 %v2481_v63  ;;  %3258 = vst [vmem:[#allocation85_spill] sm:$0xff] %v2508_v61  ;;  %v2514_v63 = vld [vmem:[#allocation2 + $0x208] sm:$0xff] }
  0x45   :  { %376 = vmatprep.subr.mxu0 %v2466_v59  ;;  %3254 = vst [vmem:[#allocation81_spill] sm:$0xff] %v2493_v57  ;;  %v2499_v59 = vld [vmem:[#allocation2 + $0x2d0] sm:$0xff]  ;;  %442 = vmatpush1.msra.mxu1 %v2487_v55  ;;  %3260 = vst [vmem:[#allocation87_spill] sm:$0xff] %v2514_v63  ;;  %v2520_v55 = vld [vmem:[#allocation2 + $0x200] sm:$0xff] }
  0x46   :  { %377 = vmatpush1.msra.mxu0 %v2472_v60  ;;  %3256 = vst [vmem:[#allocation83_spill] sm:$0xff] %v2499_v59  ;;  %v2505_v60 = vld [vmem:[#allocation2 + $0x2b8] sm:$0xff]  ;;  %443 = vmatprep.subr.mxu1 %v2493_v57  ;;  %3262 = vst [vmem:[#allocation89_spill] sm:$0xff] %v2520_v55 }
  0x47   :  { %378 = vmatprep.subr.mxu0 %v2478_v62  ;;  %v2511_v62 = vld [vmem:[#allocation2 + $0x2b0] sm:$0xff]  ;;  %444 = vmatpush1.msra.mxu1 %v2499_v59  ;;  %v2527_v57 = vld [vmem:[#allocation2 + $0x278] sm:$0xff] }
  0x48   :  { %379 = vmatpush1.msra.mxu0 %v2484_v0  ;;  %3259 = vst [vmem:[#allocation86_spill] sm:$0xff] %v2511_v62  ;;  %v2517_v0 = vld [vmem:[#allocation2 + $0x298] sm:$0xff]  ;;  %445 = vmatprep.subr.mxu1 %v2505_v60  ;;  %3263 = vst [vmem:[#allocation90_spill] sm:$0xff] %v2527_v57 }
  0x49   :  { %380 = vmatprep.subr.mxu0 %v2490_v56  ;;  %3261 = vst [vmem:[#allocation88_spill] sm:$0xff] %v2517_v0  ;;  %v2523_v56 = vld [vmem:[#allocation2 + $0x290] sm:$0xff]  ;;  %446 = vmatpush1.msra.mxu1 %v2511_v62  ;;  %v2542_v62 = vld [vmem:[#allocation2 + $0x238] sm:$0xff] }
  0x4a   :  { %381 = vmatpush1.msra.mxu0 %v2496_v58  ;;  %447 = vmatprep.subr.mxu1 %v2517_v0  ;;  %v2531_v58 = vld [vmem:[#allocation2 + $0x270] sm:$0xff] }
  0x4b   :  { %382 = vmatprep.subr.mxu0 %v2502_v52  ;;  %448 = vmatpush1.msra.mxu1 %v2523_v56  ;;  %v2535_v52 = vld [vmem:[#allocation2 + $0x258] sm:$0xff] }
  0x4c   :  { %383 = vmatpush1.msra.mxu0 %v2508_v61  ;;  %449 = vmatprep.subr.mxu1 %v2527_v57  ;;  %v2539_v61 = vld [vmem:[#allocation2 + $0x250] sm:$0xff] }
  0x4d   :  { %384 = vmatprep.subr.mxu0 %v2514_v63  ;;  %450 = vmatpush1.msra.mxu1 %v2531_v58  ;;  %v2546_v63 = vld [vmem:[#allocation2 + $0x230] sm:$0xff] }
  0x4e   :  { %385 = vmatpush1.msra.mxu0 %v2520_v55  ;;  %489 = vmatprep.mubr.f32.mxu1 %v3208_v54  ;;  %v2550_v55 = vld [vmem:[#allocation2 + $0x218] sm:$0xff]  ;;  %v2554_v57 = vld [vmem:[#allocation2 + $0x210] sm:$0xff] }
  0x4f   :  { %419 = vmatmul.mubr.f32.vlgmr.msra.gmra.mxu0 %v3208_v54  ;;  %451 = vmatprep.subr.mxu1 %v2535_v52 }
  0x50   :  { %541 = vmatprep.subr.mxu0 %v2168_v1  ;;  %452 = vmatpush1.msra.mxu1 %v2539_v61 }
  0x51   :  { %542 = vmatpush1.msra.mxu0 %v2170_v2  ;;  %453 = vmatprep.subr.mxu1 %v2542_v62 }
  0x52   :  { %543 = vmatprep.subr.mxu0 %v2172_v3  ;;  %454 = vmatpush1.msra.mxu1 %v2546_v63 }
  0x53   :  { %544 = vmatpush1.msra.mxu0 %v2175_v4  ;;  %455 = vmatprep.subr.mxu1 %v2550_v55 }
  0x54   :  { %545 = vmatprep.subr.mxu0 %v2178_v5  ;;  %456 = vmatpush1.msra.mxu1 %v2554_v57 }
  0x55   :  { %546 = vmatpush1.msra.mxu0 %v2181_v6  ;;  %490 = vmatmul.mubr.f32.vlgmr.msra.gmra.mxu1 %v3208_v54 }
  0x56   :  { %612 = vmatprep.subr.mxu1 %v2189_v9  ;;  %547 = vmatprep.subr.mxu0 %v2184_v7 }
  0x57   :  { %613 = vmatpush1.msra.mxu1 %v2195_v11  ;;  %548 = vmatpush1.msra.mxu0 %v2187_v8 }
  0x58   :  { %614 = vmatprep.subr.mxu1 %v2201_v13  ;;  %549 = vmatprep.subr.mxu0 %v2192_v10 }
  0x59   :  { %615 = vmatpush1.msra.mxu1 %v2203_v14  ;;  %550 = vmatpush1.msra.mxu0 %v2198_v12 }
  0x5a   :  { %616 = vmatprep.subr.mxu1 %v2209_v16  ;;  %551 = vmatprep.subr.mxu0 %v2206_v15 }
  0x5b   :  { %617 = vmatpush1.msra.mxu1 %v2215_v18  ;;  %552 = vmatpush1.msra.mxu0 %v2212_v17 }
  0x5c   :  { %618 = vmatprep.subr.mxu1 %v2217_v19  ;;  %553 = vmatprep.subr.mxu0 %v2220_v20 }
  0x5d   :  { %619 = vmatpush1.msra.mxu1 %v2223_v21  ;;  %554 = vmatpush1.msra.mxu0 %v2226_v22 }
  0x5e   :  { %620 = vmatprep.subr.mxu1 %v2229_v23  ;;  %555 = vmatprep.subr.mxu0 %v2232_v24 }
  0x5f   :  { %621 = vmatpush1.msra.mxu1 %v2235_v25  ;;  %556 = vmatpush1.msra.mxu0 %v2238_v26 }
  0x60   :  { %622 = vmatprep.subr.mxu1 %v2241_v27  ;;  %557 = vmatprep.subr.mxu0 %v2244_v28 }
  0x61   :  { %623 = vmatpush1.msra.mxu1 %v2247_v29  ;;  %558 = vmatpush1.msra.mxu0 %v2250_v30 }
  0x62   :  { %624 = vmatprep.subr.mxu1 %v2253_v31  ;;  %559 = vmatprep.subr.mxu0 %v2256_v32 }
  0x63   :  { %625 = vmatpush1.msra.mxu1 %v2259_v33  ;;  %560 = vmatpush1.msra.mxu0 %v2262_v34 }
  0x64   :  { %626 = vmatprep.subr.mxu1 %v2265_v35  ;;  %561 = vmatprep.subr.mxu0 %v2268_v36 }
  0x65   :  { %627 = vmatpush1.msra.mxu1 %v2271_v37  ;;  %562 = vmatpush1.msra.mxu0 %v2274_v38  ;;  %v3266_v38 = vld [vmem:[#allocation25_spill] sm:$0xff] }
  0x66   :  { %628 = vmatprep.subr.mxu1 %v2277_v39  ;;  %563 = vmatprep.subr.mxu0 %v2280_v40  ;;  %v3264_v40 = vld [vmem:[#allocation23_spill] sm:$0xff] }
  0x67   :  { %629 = vmatpush1.msra.mxu1 %v2283_v41  ;;  %564 = vmatpush1.msra.mxu0 %v2286_v42  ;;  %v3265_v42 = vld [vmem:[#allocation26_spill] sm:$0xff] }
  0x68   :  { %630 = vmatprep.subr.mxu1 %v2289_v43  ;;  %565 = vmatprep.subr.mxu0 %v2292_v44  ;;  %v3267_v44 = vld [vmem:[#allocation28_spill] sm:$0xff] }
  0x69   :  { %631 = vmatpush1.msra.mxu1 %v2295_v45  ;;  %566 = vmatpush1.msra.mxu0 %v2298_v46  ;;  %v3269_v46 = vld [vmem:[#allocation30_spill] sm:$0xff] }
  0x6a   :  { %632 = vmatprep.subr.mxu1 %v2301_v47  ;;  %567 = vmatprep.subr.mxu0 %v2304_v48  ;;  %v3268_v47 = vld [vmem:[#allocation27_spill] sm:$0xff]  ;;  %v3271_v48 = vld [vmem:[#allocation33_spill] sm:$0xff] }
  0x6b   :  { %633 = vmatpush1.msra.mxu1 %v2307_v49  ;;  %568 = vmatpush1.msra.mxu0 %v2310_v50  ;;  %v3270_v49 = vld [vmem:[#allocation29_spill] sm:$0xff]  ;;  %v3272_v50 = vld [vmem:[#allocation35_spill] sm:$0xff] }
  0x6c   :  { %634 = vmatprep.subr.mxu1 %v2313_v51  ;;  %569 = vmatprep.subr.mxu0 %v3264_v40  ;;  %v3273_v40 = vld [vmem:[#allocation37_spill] sm:$0xff] }
  0x6d   :  { %635 = vmatpush1.msra.mxu1 %v2319_v53  ;;  %570 = vmatpush1.msra.mxu0 %v3266_v38  ;;  %v3275_v38 = vld [vmem:[#allocation39_spill] sm:$0xff] }
  0x6e   :  { %636 = vmatprep.subr.mxu1 %v3265_v42  ;;  %571 = vmatprep.subr.mxu0 %v3268_v47  ;;  %v3274_v42 = vld [vmem:[#allocation31_spill] sm:$0xff]  ;;  %v3277_v47 = vld [vmem:[#allocation44_spill] sm:$0xff] }
  0x6f   :  { %637 = vmatpush1.msra.mxu1 %v3267_v44  ;;  %572 = vmatpush1.msra.mxu0 %v3270_v49  ;;  %v3276_v44 = vld [vmem:[#allocation41_spill] sm:$0xff] }
  0x70   :  { %638 = vmatprep.subr.mxu1 %v3269_v46  ;;  %605 = vmatprep.mubr.f32.mxu0 %v3208_v54  ;;  %v163_v49 = vld [vmem:[%s3017_s0] sm:$0xff] }
  0x71   :  { %639 = vmatpush1.msra.mxu1 %v3271_v48  ;;  %676 = vmatprep.mubr.f32.mxu1 %v3208_v54 }
  0x72   :  { %640 = vmatprep.subr.mxu1 %v3272_v50  ;;  %728 = vmatprep.subr.mxu0 %v3274_v42 }
  0x73   :  { %641 = vmatpush1.msra.mxu1 %v3273_v40 }
  0x74   :  { %642 = vmatprep.subr.mxu1 %v3275_v38 }
  0x75   :  { %643 = vmatpush1.msra.mxu1 %v3276_v44  ;;  %v164_v44 = vld [vmem:[%s3017_s0 + $0x8] sm:$0xff] }
  0x76   :  { %799 = vmatprep.subr.mxu1 %v3277_v47 }
  0xef   :  { %v233_v46 = vpop.f32.mrf.mxu0 }
  0xf1   :  { %v235_v48 = vpop.f32.mrf.mxu0 }
  0xf2   :  { %v313_v53 = vcombine.low %v233_v46, %v235_v48  ;;  %v304_v51 = vpop.f32.mrf.mxu1 }
  0xf4   :  { %v317_v50 = vadd.f32 %v313_v53, %v163_v49  ;;  %v306_v40 = vpop.f32.mrf.mxu1  ;;  %v1774_v53 = vld [vmem:[%s3017_s0 + $0x78] sm:$0xff] }
  0xf5   :  { %v314_v38 = vcombine.low %v304_v51, %v306_v40 }
  0xf6   :  { %v1768_v36 = vmul.f32 -1.442695, %v317_v50  ;;  %v326_v45 = vrot.slane %v317_v50, 4 }
  0xf7   :  { %v318_v47 = vadd.f32 %v314_v38, %v164_v44 }
  0xf8   :  { %1846 = vpow2.f32 %v1768_v36  ;;  %v1769_v42 = vmul.f32 -1.442695, %v326_v45  ;;  %v1773_v36 = vld [vmem:[%s3017_s0 + $0x70] sm:$0xff] }
  0xf9   :  { %v336_v34 = vrot.slane %v318_v47, 4 }
  0xfa   :  { %1848 = vpow2.f32 %v1769_v42 }
  0xfb   :  { %v1770_v43 = vmul.f32 -1.442695, %v336_v34 }
  0xfd   :  { %1850 = vpow2.f32 %v1770_v43 }
 0x105   :  { %v1847_v32 = vpop.eup %1846 }
 0x106   :  { %v322_v41 = vadd.f32 1.0, %v1847_v32 }
 0x107   :  { %v1849_v30 = vpop.eup %1848 }
 0x108   :  { %1852 = vrcp.f32 %v322_v41  ;;  %v331_v46 = vadd.f32 1.0, %v1849_v30 }
 0x109   :  { %1854 = vtanh.f32 %v318_v47 }
 0x10a   :  { %1856 = vrcp.f32 %v331_v46  ;;  %v1851_v40 = vpop.eup %1850 }
 0x10b   :  { %v341_v51 = vadd.f32 1.0, %v1851_v40 }
 0x10f   :  { %v420_v48 = vpop.f32.mrf.mxu0 }
 0x111   :  { %v422_v45 = vpop.f32.mrf.mxu0 }
 0x112   :  { %v500_v49 = vcombine.low %v420_v48, %v422_v45 }
 0x114   :  { %v504_v42 = vadd.f32 %v1773_v36, %v500_v49 }
 0x115   :  { %v1853_v38 = vpop.eup %1852  ;;  %v491_v43 = vpop.f32.mrf.mxu1 }
 0x116   :  { %v1855_v44 = vpop.eup %1854  ;;  %v1775_v34 = vmul.f32 -1.442695, %v504_v42  ;;  %v513_v50 = vrot.slane %v504_v42, 4 }
 0x117   :  { %v1857_v32 = vpop.eup %1856  ;;  %v345_v30 = vmul.f32 %v1855_v44, %v1853_v38  ;;  %v493_v46 = vpop.f32.mrf.mxu1 }
 0x118   :  { %v344_v41 = vmul.f32 0.0, %v1857_v32  ;;  %1858 = vpow2.f32 %v1775_v34  ;;  %v1776_v47 = vmul.f32 -1.442695, %v513_v50  ;;  %v501_v48 = vcombine.low %v491_v43, %v493_v46  ;;  %v3278_v43 = vld [vmem:[#allocation32_spill] sm:$0xff]  ;;  %v3284_v46 = vld [vmem:[#allocation38_spill] sm:$0xff] }
 0x11a   :  { %v2638_v39 = vadd.f32 %v345_v30, %v344_v41  ;;  %1860 = vpow2.f32 %v1776_v47  ;;  %v505_v36 = vadd.f32 %v1774_v53, %v501_v48  ;;  %v3280_v41 = vld [vmem:[#allocation34_spill] sm:$0xff]  ;;  %v3281_v30 = vld [vmem:[#allocation48_spill] sm:$0xff] }
 0x11b   :  { %1862 = vrcp.f32 %v341_v51  ;;  %v3279_v51 = vld [vmem:[#allocation46_spill] sm:$0xff]  ;;  %v3282_v47 = vld [vmem:[#allocation36_spill] sm:$0xff] }
 0x11c   :  { %1864 = vtanh.f32 %v2638_v39  ;;  %v523_v45 = vrot.slane %v505_v36, 4  ;;  %v3283_v53 = vld [vmem:[#allocation50_spill] sm:$0xff]  ;;  %v3285_v48 = vld [vmem:[#allocation52_spill] sm:$0xff] }
 0x11d   :  { %1866 = vtanh.f32 %v505_v36  ;;  %v3286_v36 = vld [vmem:[#allocation40_spill] sm:$0xff] }
 0x11e   :  { %v1777_v49 = vmul.f32 -1.442695, %v523_v45  ;;  %v3287_v45 = vld [vmem:[#allocation54_spill] sm:$0xff] }
 0x120   :  { %1868 = vpow2.f32 %v1777_v49 }
 0x125   :  { %v1859_v40 = vpop.eup %1858 }
 0x126   :  { %v509_v42 = vadd.f32 1.0, %v1859_v40  ;;  %v3288_v40 = vld [vmem:[#allocation42_spill] sm:$0xff] }
 0x127   :  { %v1861_v38 = vpop.eup %1860 }
 0x128   :  { %v1863_v44 = vpop.eup %1862  ;;  %1870 = vrcp.f32 %v509_v42  ;;  %v518_v34 = vadd.f32 1.0, %v1861_v38  ;;  %v3289_v42 = vld [vmem:[#allocation56_spill] sm:$0xff] }
 0x129   :  { %v1865_v50 = vpop.eup %1864 }
 0x12a   :  { %1872 = vrcp.f32 %v518_v34  ;;  %v348_v32 = vmul.f32 %v1865_v50, %v1863_v44  ;;  %v1867_v49 = vpop.eup %1866  ;;  %v3290_v44 = vld [vmem:[#allocation43_spill] sm:$0xff]  ;;  %v3291_v34 = vld [vmem:[#allocation58_spill] sm:$0xff]  ;;  %v3292_v50 = vld [vmem:[#allocation45_spill] sm:$0xff] }
 0x12c   :  { %606 = vmatmul.mubr.f32.vlgmr.msra.gmra.mxu0 %v348_v32  ;;  %677 = vmatmul.mubr.f32.vlgmr.msra.gmra.mxu1 %v348_v32  ;;  %v3293_v32 = vld [vmem:[#allocation60_spill] sm:$0xff] }
 0x12d   :  { %729 = vmatpush1.msra.mxu0 %v3278_v43  ;;  %800 = vmatpush1.msra.mxu1 %v3279_v51  ;;  %v1869_v38 = vpop.eup %1868 }
 0x12e   :  { %730 = vmatprep.subr.mxu0 %v3280_v41  ;;  %801 = vmatprep.subr.mxu1 %v3281_v30  ;;  %v3298_v30 = vld [vmem:[#allocation51_spill] sm:$0xff] }
 0x12f   :  { %731 = vmatpush1.msra.mxu0 %v3282_v47  ;;  %802 = vmatpush1.msra.mxu1 %v3283_v53  ;;  %v3296_v47 = vld [vmem:[#allocation49_spill] sm:$0xff]  ;;  %v3302_v41 = vld [vmem:[#allocation55_spill] sm:$0xff] }
 0x130   :  { %732 = vmatprep.subr.mxu0 %v3284_v46  ;;  %803 = vmatprep.subr.mxu1 %v3285_v48  ;;  %v3294_v48 = vld [vmem:[#allocation47_spill] sm:$0xff] }
 0x131   :  { %733 = vmatpush1.msra.mxu0 %v3286_v36  ;;  %804 = vmatpush1.msra.mxu1 %v3287_v45  ;;  %v3295_v36 = vld [vmem:[#allocation62_spill] sm:$0xff]  ;;  %v528_v45 = vadd.f32 1.0, %v1869_v38  ;;  %v3304_v38 = vld [vmem:[#allocation71_spill] sm:$0xff] }
 0x132   :  { %734 = vmatprep.subr.mxu0 %v3288_v40  ;;  %805 = vmatprep.subr.mxu1 %v3289_v42  ;;  %v3297_v40 = vld [vmem:[#allocation64_spill] sm:$0xff] }
 0x133   :  { %735 = vmatpush1.msra.mxu0 %v3290_v44  ;;  %806 = vmatpush1.msra.mxu1 %v3291_v34  ;;  %v3299_v44 = vld [vmem:[#allocation66_spill] sm:$0xff]  ;;  %1874 = vrcp.f32 %v528_v45  ;;  %v3312_v45 = vld [vmem:[#allocation79_spill] sm:$0xff] }
 0x134   :  { %736 = vmatprep.subr.mxu0 %v3292_v50  ;;  %807 = vmatprep.subr.mxu1 %v3293_v32  ;;  %v3300_v50 = vld [vmem:[#allocation53_spill] sm:$0xff]  ;;  %v3301_v32 = vld [vmem:[#allocation68_spill] sm:$0xff] }
 0x135   :  { %v1871_v46 = vpop.eup %1870  ;;  %737 = vmatpush1.msra.mxu0 %v3294_v48  ;;  %808 = vmatpush1.msra.mxu1 %v3295_v36 }
 0x136   :  { %v532_v53 = vmul.f32 %v1871_v46, %v1867_v49  ;;  %738 = vmatprep.subr.mxu0 %v3296_v47  ;;  %809 = vmatprep.subr.mxu1 %v3297_v40  ;;  %v3303_v49 = vld [vmem:[#allocation57_spill] sm:$0xff]  ;;  %v3305_v40 = vld [vmem:[#allocation59_spill] sm:$0xff] }
 0x137   :  { %v1873_v42 = vpop.eup %1872  ;;  %739 = vmatpush1.msra.mxu0 %v3298_v30  ;;  %810 = vmatpush1.msra.mxu1 %v3299_v44  ;;  %v3306_v30 = vld [vmem:[#allocation73_spill] sm:$0xff] }
 0x138   :  { %v531_v34 = vmul.f32 0.0, %v1873_v42  ;;  %740 = vmatprep.subr.mxu0 %v3300_v50  ;;  %811 = vmatprep.subr.mxu1 %v3301_v32  ;;  %v3307_v42 = vld [vmem:[#allocation61_spill] sm:$0xff]  ;;  %v3308_v32 = vld [vmem:[#allocation75_spill] sm:$0xff] }
 0x139   :  { %741 = vmatpush1.msra.mxu0 %v3302_v41  ;;  %792 = vmatprep.mubr.f32.mxu0 %v3208_v54  ;;  %v3309_v41 = vld [vmem:[#allocation63_spill] sm:$0xff]  ;;  %v3310_v50 = vld [vmem:[#allocation77_spill] sm:$0xff] }
 0x13a   :  { %v2667_v46 = vadd.f32 %v532_v53, %v531_v34  ;;  %742 = vmatprep.subr.mxu0 %v3303_v49  ;;  %812 = vmatpush1.msra.mxu1 %v3304_v38  ;;  %v3311_v53 = vld [vmem:[#allocation65_spill] sm:$0xff]  ;;  %v3313_v34 = vld [vmem:[#allocation67_spill] sm:$0xff] }
 0x13b   :  { %743 = vmatpush1.msra.mxu0 %v3305_v40  ;;  %813 = vmatprep.subr.mxu1 %v3306_v30  ;;  %v3314_v49 = vld [vmem:[#allocation81_spill] sm:$0xff] }
 0x13c   :  { %744 = vmatprep.subr.mxu0 %v3307_v42  ;;  %1876 = vtanh.f32 %v2667_v46  ;;  %814 = vmatpush1.msra.mxu1 %v3308_v32  ;;  %v3315_v40 = vld [vmem:[#allocation69_spill] sm:$0xff]  ;;  %v3316_v42 = vld [vmem:[#allocation70_spill] sm:$0xff]  ;;  %v3317_v32 = vld [vmem:[#allocation72_spill] sm:$0xff] }
 0x13d   :  { %745 = vmatpush1.msra.mxu0 %v3309_v41  ;;  %815 = vmatprep.subr.mxu1 %v3310_v50  ;;  %v3318_v41 = vld [vmem:[#allocation86_spill] sm:$0xff] }
 0x13e   :  { %746 = vmatprep.subr.mxu0 %v3311_v53  ;;  %816 = vmatpush1.msra.mxu1 %v3312_v45  ;;  %v3319_v50 = vld [vmem:[#allocation74_spill] sm:$0xff]  ;;  %v3320_v53 = vld [vmem:[#allocation76_spill] sm:$0xff] }
 0x13f   :  { %747 = vmatpush1.msra.mxu0 %v3313_v34  ;;  %817 = vmatprep.subr.mxu1 %v3314_v49  ;;  %v3321_v34 = vld [vmem:[#allocation78_spill] sm:$0xff] }
 0x140   :  { %748 = vmatprep.subr.mxu0 %v3315_v40  ;;  %818 = vmatpush1.msra.mxu1 %v2499_v59  ;;  %v3322_v40 = vld [vmem:[#allocation90_spill] sm:$0xff]  ;;  %v3323_v59 = vld [vmem:[#allocation80_spill] sm:$0xff] }
 0x141   :  { %749 = vmatpush1.msra.mxu0 %v3316_v42  ;;  %819 = vmatprep.subr.mxu1 %v2505_v60  ;;  %v1875_v42 = vpop.eup %1874 }
 0x142   :  { %750 = vmatprep.subr.mxu0 %v3317_v32  ;;  %820 = vmatpush1.msra.mxu1 %v3318_v41  ;;  %v3324_v32 = vld [vmem:[#allocation82_spill] sm:$0xff] }
 0x143   :  { %751 = vmatpush1.msra.mxu0 %v3319_v50  ;;  %821 = vmatprep.subr.mxu1 %v2517_v0  ;;  %v3325_v50 = vld [vmem:[#allocation84_spill] sm:$0xff]  ;;  %v3326_v0 = vld [vmem:[#allocation85_spill] sm:$0xff] }
 0x144   :  { %752 = vmatprep.subr.mxu0 %v3320_v53  ;;  %822 = vmatpush1.msra.mxu1 %v2523_v56 }
 0x145   :  { %753 = vmatpush1.msra.mxu0 %v3321_v34  ;;  %823 = vmatprep.subr.mxu1 %v3322_v40  ;;  %v3327_v34 = vld [vmem:[#allocation87_spill] sm:$0xff] }
 0x146   :  { %754 = vmatprep.subr.mxu0 %v3323_v59  ;;  %824 = vmatpush1.msra.mxu1 %v2531_v58  ;;  %v3328_v59 = vld [vmem:[#allocation89_spill] sm:$0xff] }
 0x147   :  { %755 = vmatpush1.msra.mxu0 %v3324_v32  ;;  %825 = vmatprep.subr.mxu1 %v2535_v52 }
 0x148   :  { %756 = vmatprep.subr.mxu0 %v3325_v50  ;;  %826 = vmatpush1.msra.mxu1 %v2539_v61 }
 0x149   :  { %v1877_v53 = vpop.eup %1876  ;;  %757 = vmatpush1.msra.mxu0 %v3326_v0  ;;  %827 = vmatprep.subr.mxu1 %v2542_v62 }
 0x14a   :  { %758 = vmatprep.subr.mxu0 %v3327_v34  ;;  %v2703_v40 = vmul.f32 %v1877_v53, %v1875_v42  ;;  %828 = vmatpush1.msra.mxu1 %v2546_v63 }
 0x14b   :  { %759 = vmatpush1.msra.mxu0 %v3328_v59  ;;  %829 = vmatprep.subr.mxu1 %v2550_v55 }
 0x14c   :  { %793 = vmatmul.mubr.f32.vlgmr.msra.gmra.mxu0 %v2703_v40  ;;  %830 = vmatpush1.msra.mxu1 %v2554_v57 }
 0x14d   :  { %863 = vmatprep.mubr.f32.mxu1 %v3208_v54  ;;  %910 = vmatprep.subr.mxu0 %v2168_v1  ;;  %v3329_v1 = vld [vmem:[#allocation10_spill] sm:$0xff] }
 0x14e   :  { %864 = vmatmul.mubr.f32.vlgmr.msra.gmra.mxu1 %v2703_v40  ;;  %981 = vmatprep.subr.mxu1 %v2189_v9  ;;  %v3337_v9 = vld [vmem:[#allocation18_spill] sm:$0xff] }
 0x14f   :  { %911 = vmatpush1.msra.mxu0 %v2170_v2  ;;  %982 = vmatpush1.msra.mxu1 %v2195_v11  ;;  %v3330_v2 = vld [vmem:[#allocation5_spill] sm:$0xff]  ;;  %v3339_v11 = vld [vmem:[#allocation20_spill] sm:$0xff] }
 0x150   :  { %912 = vmatprep.subr.mxu0 %v2172_v3  ;;  %983 = vmatprep.subr.mxu1 %v2201_v13  ;;  %v3331_v3 = vld [vmem:[#allocation12_spill] sm:$0xff]  ;;  %v3341_v13 = vld [vmem:[#allocation22_spill] sm:$0xff] }
 0x151   :  { %913 = vmatpush1.msra.mxu0 %v2175_v4  ;;  %984 = vmatpush1.msra.mxu1 %v2203_v14  ;;  %v3332_v4 = vld [vmem:[#allocation6_spill] sm:$0xff]  ;;  %v3342_v14 = vld [vmem:[#allocation13_spill] sm:$0xff] }
 0x152   :  { %914 = vmatprep.subr.mxu0 %v2178_v5  ;;  %985 = vmatprep.subr.mxu1 %v2209_v16  ;;  %v3333_v5 = vld [vmem:[#allocation14_spill] sm:$0xff]  ;;  %v3344_v16 = vld [vmem:[#allocation15_spill] sm:$0xff] }
 0x153   :  { %915 = vmatpush1.msra.mxu0 %v2181_v6  ;;  %986 = vmatpush1.msra.mxu1 %v2215_v18  ;;  %v3334_v6 = vld [vmem:[#allocation7_spill] sm:$0xff]  ;;  %v3346_v18 = vld [vmem:[#allocation17_spill] sm:$0xff] }
 0x154   :  { %916 = vmatprep.subr.mxu0 %v2184_v7  ;;  %987 = vmatprep.subr.mxu1 %v2217_v19  ;;  %v3335_v7 = vld [vmem:[#allocation16_spill] sm:$0xff] }
 0x155   :  { %917 = vmatpush1.msra.mxu0 %v2187_v8  ;;  %988 = vmatpush1.msra.mxu1 %v2223_v21  ;;  %v3336_v8 = vld [vmem:[#allocation8_spill] sm:$0xff]  ;;  %v3349_v21 = vld [vmem:[#allocation30_spill] sm:$0xff] }
 0x156   :  { %918 = vmatprep.subr.mxu0 %v2192_v10  ;;  %989 = vmatprep.subr.mxu1 %v2229_v23  ;;  %v3338_v10 = vld [vmem:[#allocation9_spill] sm:$0xff]  ;;  %v3347_v19 = vld [vmem:[#allocation28_spill] sm:$0xff] }
 0x157   :  { %919 = vmatpush1.msra.mxu0 %v2198_v12  ;;  %990 = vmatpush1.msra.mxu1 %v2235_v25  ;;  %v3340_v12 = vld [vmem:[#allocation11_spill] sm:$0xff]  ;;  %v3351_v23 = vld [vmem:[#allocation33_spill] sm:$0xff] }
 0x158   :  { %920 = vmatprep.subr.mxu0 %v2206_v15  ;;  %991 = vmatprep.subr.mxu1 %v2241_v27  ;;  %v3343_v15 = vld [vmem:[#allocation24_spill] sm:$0xff]  ;;  %v3353_v25 = vld [vmem:[#allocation35_spill] sm:$0xff]  ;;  %v3355_v27 = vld [vmem:[#allocation37_spill] sm:$0xff] }
 0x159   :  { %921 = vmatpush1.msra.mxu0 %v2212_v17  ;;  %992 = vmatpush1.msra.mxu1 %v2247_v29  ;;  %v3345_v17 = vld [vmem:[#allocation26_spill] sm:$0xff]  ;;  %v3357_v29 = vld [vmem:[#allocation39_spill] sm:$0xff] }
 0x15a   :  { %922 = vmatprep.subr.mxu0 %v2220_v20  ;;  %993 = vmatprep.subr.mxu1 %v2253_v31  ;;  %v3348_v20 = vld [vmem:[#allocation19_spill] sm:$0xff]  ;;  %v3358_v31 = vld [vmem:[#allocation29_spill] sm:$0xff] }
 0x15b   :  { %923 = vmatpush1.msra.mxu0 %v2226_v22  ;;  %994 = vmatpush1.msra.mxu1 %v2259_v33  ;;  %v3350_v22 = vld [vmem:[#allocation21_spill] sm:$0xff] }
 0x15c   :  { %924 = vmatprep.subr.mxu0 %v2232_v24  ;;  %995 = vmatprep.subr.mxu1 %v2265_v35  ;;  %v3352_v24 = vld [vmem:[#allocation23_spill] sm:$0xff]  ;;  %v3359_v33 = vld [vmem:[#allocation41_spill] sm:$0xff] }
 0x15d   :  { %925 = vmatpush1.msra.mxu0 %v2238_v26  ;;  %996 = vmatpush1.msra.mxu1 %v2271_v37  ;;  %v3354_v26 = vld [vmem:[#allocation25_spill] sm:$0xff]  ;;  %v3360_v35 = vld [vmem:[#allocation31_spill] sm:$0xff]  ;;  %v3361_v37 = vld [vmem:[#allocation44_spill] sm:$0xff] }
 0x15e   :  { %926 = vmatprep.subr.mxu0 %v2244_v28  ;;  %997 = vmatprep.subr.mxu1 %v3329_v1  ;;  %v3356_v28 = vld [vmem:[#allocation27_spill] sm:$0xff]  ;;  %v1778_v1 = vld [vmem:[%s3017_s0 + $0x20] sm:$0xff] }
 0x15f   :  { %927 = vmatpush1.msra.mxu0 %v3330_v2  ;;  %998 = vmatpush1.msra.mxu1 %v3331_v3 }
 0x160   :  { %928 = vmatprep.subr.mxu0 %v3332_v4  ;;  %999 = vmatprep.subr.mxu1 %v3333_v5 }
 0x161   :  { %929 = vmatpush1.msra.mxu0 %v3334_v6  ;;  %1000 = vmatpush1.msra.mxu1 %v3335_v7 }
 0x162   :  { %930 = vmatprep.subr.mxu0 %v3336_v8  ;;  %1001 = vmatprep.subr.mxu1 %v3337_v9 }
 0x163   :  { %931 = vmatpush1.msra.mxu0 %v3338_v10  ;;  %1002 = vmatpush1.msra.mxu1 %v3339_v11  ;;  %v1779_v10 = vld [vmem:[%s3017_s0 + $0x28] sm:$0xff] }
 0x164   :  { %932 = vmatprep.subr.mxu0 %v3340_v12  ;;  %1003 = vmatprep.subr.mxu1 %v3341_v13 }
 0x165   :  { %933 = vmatpush1.msra.mxu0 %v3342_v14  ;;  %1004 = vmatpush1.msra.mxu1 %v3343_v15 }
 0x166   :  { %934 = vmatprep.subr.mxu0 %v3344_v16  ;;  %1005 = vmatprep.subr.mxu1 %v3345_v17 }
 0x167   :  { %935 = vmatpush1.msra.mxu0 %v3346_v18  ;;  %1006 = vmatpush1.msra.mxu1 %v3347_v19  ;;  %v1787_v19 = vld [vmem:[%s3017_s0 + $0x50] sm:$0xff] }
 0x168   :  { %936 = vmatprep.subr.mxu0 %v3348_v20  ;;  %1007 = vmatprep.subr.mxu1 %v3349_v21 }
 0x169   :  { %937 = vmatpush1.msra.mxu0 %v3350_v22  ;;  %1008 = vmatpush1.msra.mxu1 %v3351_v23 }
 0x16a   :  { %938 = vmatprep.subr.mxu0 %v3352_v24  ;;  %1009 = vmatprep.subr.mxu1 %v3353_v25 }
 0x16b   :  { %939 = vmatpush1.msra.mxu0 %v3354_v26  ;;  %1010 = vmatpush1.msra.mxu1 %v3355_v27 }
 0x16c   :  { %940 = vmatprep.subr.mxu0 %v3356_v28  ;;  %1011 = vmatprep.subr.mxu1 %v3357_v29 }
 0x16d   :  { %941 = vmatpush1.msra.mxu0 %v3358_v31  ;;  %974 = vmatprep.mubr.f32.mxu0 %v3208_v54 }
 0x16e   :  { %1012 = vmatpush1.msra.mxu1 %v3359_v33  ;;  %1045 = vmatprep.mubr.f32.mxu1 %v3208_v54 }
 0x16f   :  { %1092 = vmatprep.subr.mxu0 %v3360_v35  ;;  %1163 = vmatprep.subr.mxu1 %v3361_v37  ;;  %v1788_v37 = vld [vmem:[%s3017_s0 + $0x58] sm:$0xff] }
 0x1ec   :  { %v607_v42 = vpop.f32.mrf.mxu0  ;;  %v678_v53 = vpop.f32.mrf.mxu1 }
 0x1ee   :  { %v609_v2 = vpop.f32.mrf.mxu0  ;;  %v680_v5 = vpop.f32.mrf.mxu1 }
 0x1ef   :  { %v687_v3 = vcombine.low %v607_v42, %v609_v2  ;;  %v688_v8 = vcombine.low %v678_v53, %v680_v5 }
 0x1f1   :  { %v691_v4 = vadd.f32 %v1778_v1, %v687_v3  ;;  %v692_v11 = vadd.f32 %v1779_v10, %v688_v8 }
 0x1f3   :  { %v1782_v6 = vmul.f32 -1.442695, %v691_v4  ;;  %v700_v7 = vrot.slane %v691_v4, 4  ;;  %v710_v12 = vrot.slane %v692_v11, 4 }
 0x1f5   :  { %1878 = vpow2.f32 %v1782_v6  ;;  %v1783_v9 = vmul.f32 -1.442695, %v700_v7  ;;  %v1784_v13 = vmul.f32 -1.442695, %v710_v12  ;;  %v3362_v12 = vld [vmem:[#allocation34_spill] sm:$0xff] }
 0x1f7   :  { %1880 = vpow2.f32 %v1783_v9 }
 0x1f8   :  { %1882 = vpow2.f32 %v1784_v13  ;;  %v3363_v13 = vld [vmem:[#allocation48_spill] sm:$0xff] }
 0x202   :  { %v1879_v14 = vpop.eup %1878 }
 0x203   :  { %v696_v15 = vadd.f32 1.0, %v1879_v14  ;;  %v3364_v14 = vld [vmem:[#allocation36_spill] sm:$0xff] }
 0x204   :  { %v1881_v16 = vpop.eup %1880 }
 0x205   :  { %1884 = vrcp.f32 %v696_v15  ;;  %v705_v17 = vadd.f32 1.0, %v1881_v16  ;;  %v1883_v24 = vpop.eup %1882  ;;  %v3365_v15 = vld [vmem:[#allocation50_spill] sm:$0xff] }
 0x206   :  { %1886 = vtanh.f32 %v692_v11  ;;  %v715_v35 = vadd.f32 1.0, %v1883_v24  ;;  %v3366_v16 = vld [vmem:[#allocation38_spill] sm:$0xff] }
 0x207   :  { %1888 = vrcp.f32 %v705_v17  ;;  %v3367_v17 = vld [vmem:[#allocation52_spill] sm:$0xff] }
 0x20c   :  { %v794_v18 = vpop.f32.mrf.mxu0 }
 0x20e   :  { %v796_v20 = vpop.f32.mrf.mxu0  ;;  %v865_v21 = vpop.f32.mrf.mxu1 }
 0x20f   :  { %v874_v22 = vcombine.low %v794_v18, %v796_v20  ;;  %v3369_v20 = vld [vmem:[#allocation54_spill] sm:$0xff] }
 0x210   :  { %v867_v23 = vpop.f32.mrf.mxu1 }
 0x211   :  { %v878_v25 = vadd.f32 %v1787_v19, %v874_v22  ;;  %v875_v31 = vcombine.low %v865_v21, %v867_v23  ;;  %v3368_v19 = vld [vmem:[#allocation40_spill] sm:$0xff]  ;;  %v3370_v21 = vld [vmem:[#allocation42_spill] sm:$0xff]  ;;  %v3372_v22 = vld [vmem:[#allocation43_spill] sm:$0xff] }
 0x212   :  { %v1885_v26 = vpop.eup %1884  ;;  %v3373_v23 = vld [vmem:[#allocation58_spill] sm:$0xff] }
 0x213   :  { %v1887_v27 = vpop.eup %1886  ;;  %v1789_v28 = vmul.f32 -1.442695, %v878_v25  ;;  %v887_v29 = vrot.slane %v878_v25, 4  ;;  %v879_v3 = vadd.f32 %v1788_v37, %v875_v31  ;;  %v3374_v25 = vld [vmem:[#allocation45_spill] sm:$0xff]  ;;  %v3376_v31 = vld [vmem:[#allocation64_spill] sm:$0xff] }
 0x214   :  { %v1889_v33 = vpop.eup %1888  ;;  %v719_v53 = vmul.f32 %v1887_v27, %v1885_v26  ;;  %v3375_v26 = vld [vmem:[#allocation60_spill] sm:$0xff]  ;;  %v3378_v37 = vld [vmem:[#allocation53_spill] sm:$0xff] }
 0x215   :  { %v718_v42 = vmul.f32 %v1889_v33, %v2638_v39  ;;  %1890 = vpow2.f32 %v1789_v28  ;;  %v1790_v1 = vmul.f32 -1.442695, %v887_v29  ;;  %v897_v4 = vrot.slane %v879_v3, 4 }
 0x217   :  { %v2793_v2 = vadd.f32 %v719_v53, %v718_v42  ;;  %1892 = vpow2.f32 %v1790_v1  ;;  %v1791_v5 = vmul.f32 -1.442695, %v897_v4  ;;  %v3379_v42 = vld [vmem:[#allocation68_spill] sm:$0xff]  ;;  %v3385_v1 = vld [vmem:[#allocation77_spill] sm:$0xff] }
 0x218   :  { %1894 = vrcp.f32 %v715_v35  ;;  %v3377_v35 = vld [vmem:[#allocation51_spill] sm:$0xff]  ;;  %v3387_v4 = vld [vmem:[#allocation65_spill] sm:$0xff] }
 0x219   :  { %1896 = vtanh.f32 %v2793_v2 }
 0x21a   :  { %1898 = vtanh.f32 %v879_v3  ;;  %v3386_v3 = vld [vmem:[#allocation63_spill] sm:$0xff] }
 0x21b   :  { %1900 = vpow2.f32 %v1791_v5  ;;  %v3390_v5 = vld [vmem:[#allocation69_spill] sm:$0xff] }
 0x222   :  { %v1891_v6 = vpop.eup %1890 }
 0x223   :  { %v883_v7 = vadd.f32 1.0, %v1891_v6  ;;  %v3391_v6 = vld [vmem:[#allocation70_spill] sm:$0xff] }
 0x224   :  { %v1893_v8 = vpop.eup %1892 }
 0x225   :  { %1902 = vrcp.f32 %v883_v7  ;;  %v892_v9 = vadd.f32 1.0, %v1893_v8  ;;  %v1895_v39 = vpop.eup %1894  ;;  %v3392_v7 = vld [vmem:[#allocation72_spill] sm:$0xff] }
 0x226   :  { %v1897_v10 = vpop.eup %1896  ;;  %v3393_v8 = vld [vmem:[#allocation88_spill] sm:$0xff] }
 0x227   :  { %1904 = vrcp.f32 %v892_v9  ;;  %v722_v11 = vmul.f32 %v1897_v10, %v1895_v39  ;;  %v1899_v18 = vpop.eup %1898  ;;  %v3396_v9 = vld [vmem:[#allocation90_spill] sm:$0xff]  ;;  %v3398_v10 = vld [vmem:[#allocation80_spill] sm:$0xff] }
 0x228   :  { %v3397_v39 = vld [vmem:[#allocation78_spill] sm:$0xff] }
 0x229   :  { %975 = vmatmul.mubr.f32.vlgmr.msra.gmra.mxu0 %v722_v11  ;;  %1046 = vmatmul.mubr.f32.vlgmr.msra.gmra.mxu1 %v722_v11  ;;  %v1986_v11 = vld [vmem:[#allocation2 + $0x188] sm:$0xff] }
 0x22a   :  { %1093 = vmatpush1.msra.mxu0 %v3278_v43  ;;  %1164 = vmatpush1.msra.mxu1 %v3279_v51  ;;  %v1901_v43 = vpop.eup %1900  ;;  %v3371_v51 = vld [vmem:[#allocation56_spill] sm:$0xff] }
 0x22b   :  { %1094 = vmatprep.subr.mxu0 %v3362_v12  ;;  %1165 = vmatprep.subr.mxu1 %v3363_v13  ;;  %v902_v27 = vadd.f32 1.0, %v1901_v43  ;;  %v1987_v12 = vld [vmem:[#allocation2 + $0x198] sm:$0xff]  ;;  %v1988_v13 = vld [vmem:[#allocation2 + $0x180] sm:$0xff] }
 0x22c   :  { %1095 = vmatpush1.msra.mxu0 %v3364_v14  ;;  %1166 = vmatpush1.msra.mxu1 %v3365_v15  ;;  %v1989_v14 = vld [vmem:[#allocation2 + $0x190] sm:$0xff]  ;;  %v1990_v15 = vld [vmem:[#allocation2 + $0x168] sm:$0xff]  ;;  %v1996_v43 = vld [vmem:[#allocation2 + $0x140] sm:$0xff] }
 0x22d   :  { %1096 = vmatprep.subr.mxu0 %v3366_v16  ;;  %1167 = vmatprep.subr.mxu1 %v3367_v17  ;;  %1906 = vrcp.f32 %v902_v27  ;;  %v1991_v16 = vld [vmem:[#allocation2 + $0x178] sm:$0xff]  ;;  %v1992_v17 = vld [vmem:[#allocation2 + $0x160] sm:$0xff] }
 0x22e   :  { %1097 = vmatpush1.msra.mxu0 %v3368_v19  ;;  %1168 = vmatpush1.msra.mxu1 %v3369_v20  ;;  %v1994_v19 = vld [vmem:[#allocation2 + $0x148] sm:$0xff]  ;;  %v1995_v20 = vld [vmem:[#allocation2 + $0x158] sm:$0xff]  ;;  %v2004_v27 = vld [vmem:[#allocation2 + $0x100] sm:$0xff] }
 0x22f   :  { %1098 = vmatprep.subr.mxu0 %v3370_v21  ;;  %1169 = vmatprep.subr.mxu1 %v3371_v51  ;;  %v1997_v21 = vld [vmem:[#allocation2 + $0x150] sm:$0xff]  ;;  %v1998_v51 = vld [vmem:[#allocation2 + $0x128] sm:$0xff] }
 0x230   :  { %1099 = vmatpush1.msra.mxu0 %v3372_v22  ;;  %1170 = vmatpush1.msra.mxu1 %v3373_v23  ;;  %v1999_v22 = vld [vmem:[#allocation2 + $0x138] sm:$0xff]  ;;  %v2000_v23 = vld [vmem:[#allocation2 + $0x120] sm:$0xff] }
 0x231   :  { %1100 = vmatprep.subr.mxu0 %v3374_v25  ;;  %1171 = vmatprep.subr.mxu1 %v3375_v26  ;;  %v2002_v25 = vld [vmem:[#allocation2 + $0x108] sm:$0xff]  ;;  %v2003_v26 = vld [vmem:[#allocation2 + $0x118] sm:$0xff] }
 0x232   :  { %v1903_v24 = vpop.eup %1902  ;;  %1101 = vmatpush1.msra.mxu0 %v3294_v48  ;;  %1172 = vmatpush1.msra.mxu1 %v3295_v36  ;;  %v3380_v48 = vld [vmem:[#allocation55_spill] sm:$0xff] }
 0x233   :  { %v906_v28 = vmul.f32 %v1903_v24, %v1899_v18  ;;  %1102 = vmatprep.subr.mxu0 %v3296_v47  ;;  %1173 = vmatprep.subr.mxu1 %v3376_v31  ;;  %v3381_v47 = vld [vmem:[#allocation57_spill] sm:$0xff]  ;;  %v3382_v36 = vld [vmem:[#allocation59_spill] sm:$0xff]  ;;  %v2007_v31 = vld [vmem:[#allocation2 + $0xf8] sm:$0xff] }
 0x234   :  { %v1905_v29 = vpop.eup %1904  ;;  %1103 = vmatpush1.msra.mxu0 %v3377_v35  ;;  %1174 = vmatpush1.msra.mxu1 %v3299_v44  ;;  %v3384_v44 = vld [vmem:[#allocation61_spill] sm:$0xff]  ;;  %v1993_v18 = vld [vmem:[#allocation2 + $0x170] sm:$0xff] }
 0x235   :  { %v905_v33 = vmul.f32 %v1905_v29, %v2667_v46  ;;  %1104 = vmatprep.subr.mxu0 %v3378_v37  ;;  %1175 = vmatprep.subr.mxu1 %v3379_v42  ;;  %v3383_v46 = vld [vmem:[#allocation75_spill] sm:$0xff]  ;;  %v2006_v29 = vld [vmem:[#allocation2 + $0xe8] sm:$0xff]  ;;  %v2011_v42 = vld [vmem:[#allocation2 + $0xd8] sm:$0xff] }
 0x236   :  { %1105 = vmatpush1.msra.mxu0 %v3380_v48  ;;  %1176 = vmatpush1.msra.mxu1 %v3304_v38  ;;  %v3388_v38 = vld [vmem:[#allocation67_spill] sm:$0xff]  ;;  %v2010_v37 = vld [vmem:[#allocation2 + $0xc8] sm:$0xff]  ;;  %v2012_v48 = vld [vmem:[#allocation2 + $0xc0] sm:$0xff] }
 0x237   :  { %v2821_v53 = vadd.f32 %v906_v28, %v905_v33  ;;  %1106 = vmatprep.subr.mxu0 %v3381_v47  ;;  %1177 = vmatprep.subr.mxu1 %v3306_v30  ;;  %v3389_v30 = vld [vmem:[#allocation83_spill] sm:$0xff]  ;;  %v2008_v33 = vld [vmem:[#allocation2 + $0xe0] sm:$0xff] }
 0x238   :  { %1107 = vmatpush1.msra.mxu0 %v3382_v36  ;;  %1178 = vmatpush1.msra.mxu1 %v3383_v46  ;;  %v2001_v24 = vld [vmem:[#allocation2 + $0x130] sm:$0xff]  ;;  %v2014_v36 = vld [vmem:[#allocation2 + $0xa8] sm:$0xff]  ;;  %v2015_v46 = vld [vmem:[#allocation2 + $0xb8] sm:$0xff] }
 0x239   :  { %1908 = vtanh.f32 %v2821_v53  ;;  %1108 = vmatprep.subr.mxu0 %v3384_v44  ;;  %1179 = vmatprep.subr.mxu1 %v3385_v1  ;;  %v2005_v28 = vld [vmem:[#allocation2 + $0x110] sm:$0xff]  ;;  %v2016_v44 = vld [vmem:[#allocation2 + $0xa0] sm:$0xff] }
 0x23a   :  { %1109 = vmatpush1.msra.mxu0 %v3386_v3  ;;  %1180 = vmatpush1.msra.mxu1 %v3312_v45  ;;  %v3394_v45 = vld [vmem:[#allocation74_spill] sm:$0xff]  ;;  %v2009_v35 = vld [vmem:[#allocation2 + $0xf0] sm:$0xff] }
 0x23b   :  { %1110 = vmatprep.subr.mxu0 %v3387_v4  ;;  %1181 = vmatprep.subr.mxu1 %v3314_v49  ;;  %v3395_v49 = vld [vmem:[#allocation76_spill] sm:$0xff]  ;;  %v2013_v47 = vld [vmem:[#allocation2 + $0xd0] sm:$0xff]  ;;  %v2018_v3 = vld [vmem:[#allocation2 + $0x88] sm:$0xff] }
 0x23c   :  { %1111 = vmatpush1.msra.mxu0 %v3388_v38  ;;  %1182 = vmatpush1.msra.mxu1 %v3389_v30  ;;  %v2017_v1 = vld [vmem:[#allocation2 + $0xb0] sm:$0xff]  ;;  %v2019_v4 = vld [vmem:[#allocation2 + $0x98] sm:$0xff]  ;;  %v2020_v38 = vld [vmem:[#allocation2 + $0x80] sm:$0xff] }
 0x23d   :  { %1112 = vmatprep.subr.mxu0 %v3390_v5  ;;  %1183 = vmatprep.subr.mxu1 %v2505_v60  ;;  %v1907_v60 = vpop.eup %1906  ;;  %v2021_v30 = vld [vmem:[#allocation2 + $0x90] sm:$0xff]  ;;  %v2022_v5 = vld [vmem:[#allocation2 + $0x68] sm:$0xff] }
 0x23e   :  { %1113 = vmatpush1.msra.mxu0 %v3391_v6  ;;  %1184 = vmatpush1.msra.mxu1 %v3318_v41  ;;  %v2023_v6 = vld [vmem:[#allocation2 + $0x78] sm:$0xff] }
 0x23f   :  { %1114 = vmatprep.subr.mxu0 %v3392_v7  ;;  %1185 = vmatprep.subr.mxu1 %v3393_v8  ;;  %v2024_v7 = vld [vmem:[#allocation2 + $0x60] sm:$0xff]  ;;  %v2025_v8 = vld [vmem:[#allocation2 + $0x70] sm:$0xff] }
 0x240   :  { %1115 = vmatpush1.msra.mxu0 %v3394_v45  ;;  %1186 = vmatpush1.msra.mxu1 %v2523_v56  ;;  %v2026_v45 = vld [vmem:[#allocation2 + $0x48] sm:$0xff] }
 0x241   :  { %1116 = vmatprep.subr.mxu0 %v3395_v49  ;;  %1187 = vmatprep.subr.mxu1 %v3396_v9  ;;  %v2027_v49 = vld [vmem:[#allocation2 + $0x58] sm:$0xff]  ;;  %v2028_v9 = vld [vmem:[#allocation2 + $0x40] sm:$0xff] }
 0x242   :  { %1117 = vmatpush1.msra.mxu0 %v3397_v39  ;;  %1188 = vmatpush1.msra.mxu1 %v2531_v58  ;;  %v1976_v58 = vld [vmem:[#allocation2 + $0x1e0] sm:$0xff]  ;;  %v2029_v39 = vld [vmem:[#allocation2 + $0x50] sm:$0xff] }
 0x243   :  { %1118 = vmatprep.subr.mxu0 %v3398_v10  ;;  %1189 = vmatprep.subr.mxu1 %v2535_v52  ;;  %v1974_v52 = vld [vmem:[#allocation2 + $0x1e8] sm:$0xff]  ;;  %v2031_v10 = vld [vmem:[#allocation2 + $0x38] sm:$0xff] }
 0x244   :  { %1119 = vmatpush1.msra.mxu0 %v3324_v32  ;;  %1190 = vmatpush1.msra.mxu1 %v2539_v61  ;;  %v1977_v61 = vld [vmem:[#allocation2 + $0x1f0] sm:$0xff]  ;;  %v1984_v32 = vld [vmem:[#allocation2 + $0x1a0] sm:$0xff] }
 0x245   :  { %1120 = vmatprep.subr.mxu0 %v3325_v50  ;;  %1191 = vmatprep.subr.mxu1 %v2542_v62  ;;  %v1978_v62 = vld [vmem:[#allocation2 + $0x1c8] sm:$0xff]  ;;  %v1983_v50 = vld [vmem:[#allocation2 + $0x1b8] sm:$0xff] }
 0x246   :  { %v1909_v41 = vpop.eup %1908  ;;  %1121 = vmatpush1.msra.mxu0 %v3326_v0  ;;  %1192 = vmatpush1.msra.mxu1 %v2546_v63  ;;  %v1975_v0 = vld [vmem:[#allocation2 + $0x1f8] sm:$0xff]  ;;  %v1981_v63 = vld [vmem:[#allocation2 + $0x1d0] sm:$0xff] }
 0x247   :  { %v909_v56 = vmul.f32 %v1909_v41, %v1907_v60  ;;  %1122 = vmatprep.subr.mxu0 %v3327_v34  ;;  %1193 = vmatprep.subr.mxu1 %v2550_v55  ;;  %v1979_v55 = vld [vmem:[#allocation2 + $0x1d8] sm:$0xff]  ;;  %v1985_v34 = vld [vmem:[#allocation2 + $0x1b0] sm:$0xff]  ;;  %v2030_v60 = vld [vmem:[#allocation2 + $0x28] sm:$0xff] }
 0x248   :  { %1123 = vmatpush1.msra.mxu0 %v3328_v59  ;;  %1156 = vmatprep.mubr.f32.mxu0 %v3208_v54  ;;  %v1980_v59 = vld [vmem:[#allocation2 + $0x1c0] sm:$0xff] }
 0x249   :  { %1194 = vmatpush1.msra.mxu1 %v2554_v57  ;;  %1227 = vmatprep.mubr.f32.mxu1 %v3208_v54  ;;  %v1982_v57 = vld [vmem:[#allocation2 + $0x1a8] sm:$0xff]  ;;  %v2032_v41 = vld [vmem:[#allocation2 + $0x20] sm:$0xff] }
 0x24a   :  { %1157 = vmatmul.mubr.f32.vlgmr.msra.gmra.mxu0 %v909_v56  ;;  %1228 = vmatmul.mubr.f32.vlgmr.msra.gmra.mxu1 %v909_v56  ;;  %v2033_v56 = vld [vmem:[#allocation2 + $0x30] sm:$0xff] }
 0x24b   :  { %1274 = vmatprep.subr.mxu0 %v1974_v52  ;;  %1345 = vmatprep.subr.mxu1 %v1975_v0  ;;  %v2034_v52 = vld [vmem:[#allocation2 + $0x8] sm:$0xff]  ;;  %v2035_v0 = vld [vmem:[#allocation2 + $0x18] sm:$0xff] }
 0x24c   :  { %1275 = vmatpush1.msra.mxu0 %v1976_v58  ;;  %1346 = vmatpush1.msra.mxu1 %v1977_v61  ;;  %v2036_v58 = vld [vmem:[#allocation2] sm:$0xff]  ;;  %v2037_v61 = vld [vmem:[#allocation2 + $0x10] sm:$0xff] }
 0x24d   :  { %1276 = vmatprep.subr.mxu0 %v1978_v62  ;;  %1347 = vmatprep.subr.mxu1 %v1979_v55  ;;  %v2038_v62 = vld [vmem:[#allocation2 + $0x3e8] sm:$0xff]  ;;  %v2039_v55 = vld [vmem:[#allocation2 + $0x3f8] sm:$0xff] }
 0x24e   :  { %1277 = vmatpush1.msra.mxu0 %v1980_v59  ;;  %1348 = vmatpush1.msra.mxu1 %v1981_v63 }
 0x24f   :  { %1278 = vmatprep.subr.mxu0 %v1982_v57  ;;  %1349 = vmatprep.subr.mxu1 %v1983_v50  ;;  %v1785_v57 = vld [vmem:[%s3017_s0 + $0x40] sm:$0xff] }
 0x250   :  { %1279 = vmatpush1.msra.mxu0 %v1984_v32  ;;  %1350 = vmatpush1.msra.mxu1 %v1985_v34 }
 0x251   :  { %1280 = vmatprep.subr.mxu0 %v1986_v11  ;;  %1351 = vmatprep.subr.mxu1 %v1987_v12 }
 0x252   :  { %1281 = vmatpush1.msra.mxu0 %v1988_v13  ;;  %1352 = vmatpush1.msra.mxu1 %v1989_v14 }
 0x253   :  { %1282 = vmatprep.subr.mxu0 %v1990_v15  ;;  %1353 = vmatprep.subr.mxu1 %v1991_v16  ;;  %v1786_v16 = vld [vmem:[%s3017_s0 + $0x48] sm:$0xff] }
 0x254   :  { %1283 = vmatpush1.msra.mxu0 %v1992_v17  ;;  %1354 = vmatpush1.msra.mxu1 %v1993_v18 }
 0x255   :  { %1284 = vmatprep.subr.mxu0 %v1994_v19  ;;  %1355 = vmatprep.subr.mxu1 %v1995_v20 }
 0x256   :  { %1285 = vmatpush1.msra.mxu0 %v1996_v43  ;;  %1356 = vmatpush1.msra.mxu1 %v1997_v21 }
 0x257   :  { %1286 = vmatprep.subr.mxu0 %v1998_v51  ;;  %1357 = vmatprep.subr.mxu1 %v1999_v22 }
 0x258   :  { %1287 = vmatpush1.msra.mxu0 %v2000_v23  ;;  %1358 = vmatpush1.msra.mxu1 %v2001_v24  ;;  %v1780_v24 = vld [vmem:[%s3017_s0 + $0x30] sm:$0xff] }
 0x259   :  { %1288 = vmatprep.subr.mxu0 %v2002_v25  ;;  %1359 = vmatprep.subr.mxu1 %v2003_v26 }
 0x25a   :  { %1289 = vmatpush1.msra.mxu0 %v2004_v27  ;;  %1360 = vmatpush1.msra.mxu1 %v2005_v28 }
 0x25b   :  { %1290 = vmatprep.subr.mxu0 %v2006_v29  ;;  %1361 = vmatprep.subr.mxu1 %v2007_v31 }
 0x25c   :  { %1291 = vmatpush1.msra.mxu0 %v2008_v33  ;;  %1362 = vmatpush1.msra.mxu1 %v2009_v35 }
 0x25d   :  { %1292 = vmatprep.subr.mxu0 %v2010_v37  ;;  %1363 = vmatprep.subr.mxu1 %v2011_v42 }
 0x25e   :  { %1293 = vmatpush1.msra.mxu0 %v2012_v48  ;;  %1364 = vmatpush1.msra.mxu1 %v2013_v47 }
 0x25f   :  { %1294 = vmatprep.subr.mxu0 %v2014_v36  ;;  %1365 = vmatprep.subr.mxu1 %v2015_v46 }
 0x260   :  { %1295 = vmatpush1.msra.mxu0 %v2016_v44  ;;  %1366 = vmatpush1.msra.mxu1 %v2017_v1  ;;  %v1781_v1 = vld [vmem:[%s3017_s0 + $0x38] sm:$0xff] }
 0x261   :  { %1296 = vmatprep.subr.mxu0 %v2018_v3  ;;  %1367 = vmatprep.subr.mxu1 %v2019_v4 }
 0x262   :  { %1297 = vmatpush1.msra.mxu0 %v2020_v38  ;;  %1368 = vmatpush1.msra.mxu1 %v2021_v30 }
 0x263   :  { %1298 = vmatprep.subr.mxu0 %v2022_v5  ;;  %1369 = vmatprep.subr.mxu1 %v2023_v6 }
 0x264   :  { %1299 = vmatpush1.msra.mxu0 %v2024_v7  ;;  %1370 = vmatpush1.msra.mxu1 %v2025_v8 }
 0x265   :  { %1300 = vmatprep.subr.mxu0 %v2026_v45  ;;  %1371 = vmatprep.subr.mxu1 %v2027_v49 }
 0x266   :  { %1301 = vmatpush1.msra.mxu0 %v2028_v9  ;;  %1372 = vmatpush1.msra.mxu1 %v2029_v39  ;;  %v2040_v9 = vld [vmem:[#allocation2 + $0x3e0] sm:$0xff]  ;;  %v2041_v39 = vld [vmem:[#allocation2 + $0x3f0] sm:$0xff] }
 0x267   :  { %1302 = vmatprep.subr.mxu0 %v2030_v60  ;;  %1373 = vmatprep.subr.mxu1 %v2031_v10  ;;  %v2042_v60 = vld [vmem:[#allocation2 + $0x3c8] sm:$0xff]  ;;  %v2043_v10 = vld [vmem:[#allocation2 + $0x3d8] sm:$0xff] }
 0x268   :  { %1303 = vmatpush1.msra.mxu0 %v2032_v41  ;;  %1374 = vmatpush1.msra.mxu1 %v2033_v56  ;;  %v2044_v41 = vld [vmem:[#allocation2 + $0x3c0] sm:$0xff]  ;;  %v2045_v56 = vld [vmem:[#allocation2 + $0x3d0] sm:$0xff] }
 0x269   :  { %1304 = vmatprep.subr.mxu0 %v2034_v52  ;;  %1375 = vmatprep.subr.mxu1 %v2035_v0  ;;  %v2046_v52 = vld [vmem:[#allocation2 + $0x3a8] sm:$0xff]  ;;  %v2047_v0 = vld [vmem:[#allocation2 + $0x3b8] sm:$0xff] }
 0x26a   :  { %1305 = vmatpush1.msra.mxu0 %v2036_v58  ;;  %1338 = vmatprep.mubr.f32.mxu0 %v3208_v54  ;;  %v2048_v58 = vld [vmem:[#allocation2 + $0x3a0] sm:$0xff] }
 0x26b   :  { %1376 = vmatpush1.msra.mxu1 %v2037_v61  ;;  %1409 = vmatprep.mubr.f32.mxu1 %v3208_v54  ;;  %v2049_v61 = vld [vmem:[#allocation2 + $0x3b0] sm:$0xff] }
 0x26c   :  { %1456 = vmatprep.subr.mxu0 %v2038_v62  ;;  %1527 = vmatprep.subr.mxu1 %v2039_v55  ;;  %v2050_v62 = vld [vmem:[#allocation2 + $0x388] sm:$0xff]  ;;  %v2051_v55 = vld [vmem:[#allocation2 + $0x398] sm:$0xff] }
 0x2e9   :  { %v976_v59 = vpop.f32.mrf.mxu0  ;;  %v1047_v63 = vpop.f32.mrf.mxu1 }
 0x2eb   :  { %v978_v50 = vpop.f32.mrf.mxu0  ;;  %v1049_v11 = vpop.f32.mrf.mxu1 }
 0x2ec   :  { %v1056_v32 = vcombine.low %v976_v59, %v978_v50  ;;  %v1057_v14 = vcombine.low %v1047_v63, %v1049_v11  ;;  %v2052_v59 = vld [vmem:[#allocation2 + $0x380] sm:$0xff]  ;;  %v2053_v63 = vld [vmem:[#allocation2 + $0x390] sm:$0xff]  ;;  %v2054_v50 = vld [vmem:[#allocation2 + $0x368] sm:$0xff] }
 0x2ed   :  { %v2056_v11 = vld [vmem:[#allocation2 + $0x360] sm:$0xff] }
 0x2ee   :  { %v1060_v34 = vadd.f32 %v1785_v57, %v1056_v32  ;;  %v1061_v17 = vadd.f32 %v1786_v16, %v1057_v14  ;;  %v2055_v32 = vld [vmem:[#allocation2 + $0x378] sm:$0xff]  ;;  %v2058_v14 = vld [vmem:[#allocation2 + $0x348] sm:$0xff] }
 0x2f0   :  { %v1792_v12 = vmul.f32 -1.442695, %v1060_v34  ;;  %v1069_v13 = vrot.slane %v1060_v34, 4  ;;  %v1079_v18 = vrot.slane %v1061_v17, 4 }
 0x2f2   :  { %1910 = vpow2.f32 %v1792_v12  ;;  %v1793_v15 = vmul.f32 -1.442695, %v1069_v13  ;;  %v1794_v19 = vmul.f32 -1.442695, %v1079_v18  ;;  %v2057_v12 = vld [vmem:[#allocation2 + $0x370] sm:$0xff]  ;;  %v2060_v18 = vld [vmem:[#allocation2 + $0x340] sm:$0xff] }
 0x2f4   :  { %1912 = vpow2.f32 %v1793_v15  ;;  %v2059_v15 = vld [vmem:[#allocation2 + $0x358] sm:$0xff] }
 0x2f5   :  { %1914 = vpow2.f32 %v1794_v19  ;;  %v2061_v19 = vld [vmem:[#allocation2 + $0x350] sm:$0xff] }
 0x2ff   :  { %v1911_v20 = vpop.eup %1910 }
 0x300   :  { %v1065_v43 = vadd.f32 1.0, %v1911_v20 }
 0x301   :  { %v1913_v21 = vpop.eup %1912 }
 0x302   :  { %1916 = vrcp.f32 %v1065_v43  ;;  %v1074_v51 = vadd.f32 1.0, %v1913_v21  ;;  %v1915_v27 = vpop.eup %1914  ;;  %v2062_v21 = vld [vmem:[#allocation2 + $0x328] sm:$0xff] }
 0x303   :  { %1918 = vtanh.f32 %v1061_v17  ;;  %v1084_v48 = vadd.f32 1.0, %v1915_v27  ;;  %v2068_v27 = vld [vmem:[#allocation2 + $0x300] sm:$0xff] }
 0x304   :  { %1920 = vrcp.f32 %v1074_v51  ;;  %v2063_v51 = vld [vmem:[#allocation2 + $0x338] sm:$0xff] }
 0x30a   :  { %v1158_v22 = vpop.f32.mrf.mxu0  ;;  %v1229_v23 = vpop.f32.mrf.mxu1 }
 0x30c   :  { %v1160_v25 = vpop.f32.mrf.mxu0  ;;  %v1231_v31 = vpop.f32.mrf.mxu1 }
 0x30d   :  { %v1238_v26 = vcombine.low %v1158_v22, %v1160_v25  ;;  %v1239_v46 = vcombine.low %v1229_v23, %v1231_v31  ;;  %v2064_v22 = vld [vmem:[#allocation2 + $0x320] sm:$0xff]  ;;  %v2065_v23 = vld [vmem:[#allocation2 + $0x330] sm:$0xff]  ;;  %v2066_v25 = vld [vmem:[#allocation2 + $0x308] sm:$0xff] }
 0x30e   :  { %v2072_v31 = vld [vmem:[#allocation2 + $0x2e0] sm:$0xff] }
 0x30f   :  { %v1917_v28 = vpop.eup %1916  ;;  %v1242_v29 = vadd.f32 %v1780_v24, %v1238_v26  ;;  %v1243_v4 = vadd.f32 %v1781_v1, %v1239_v46  ;;  %v2067_v26 = vld [vmem:[#allocation2 + $0x318] sm:$0xff]  ;;  %v2080_v46 = vld [vmem:[#allocation2 + $0x2a0] sm:$0xff]  ;;  %v2082_v1 = vld [vmem:[#allocation2 + $0x288] sm:$0xff] }
 0x310   :  { %v1919_v33 = vpop.eup %1918 }
 0x311   :  { %v1921_v35 = vpop.eup %1920  ;;  %v1795_v37 = vmul.f32 -1.442695, %v1242_v29  ;;  %v1251_v42 = vrot.slane %v1242_v29, 4  ;;  %v1088_v36 = vmul.f32 %v1919_v33, %v1917_v28  ;;  %v1261_v38 = vrot.slane %v1243_v4, 4  ;;  %v2069_v28 = vld [vmem:[#allocation2 + $0x310] sm:$0xff]  ;;  %v2071_v29 = vld [vmem:[#allocation2 + $0x2f8] sm:$0xff] }
 0x312   :  { %v1087_v47 = vmul.f32 %v1921_v35, %v2793_v2  ;;  %v2073_v33 = vld [vmem:[#allocation2 + $0x2f0] sm:$0xff]  ;;  %v2074_v35 = vld [vmem:[#allocation2 + $0x2c8] sm:$0xff] }
 0x313   :  { %1922 = vpow2.f32 %v1795_v37  ;;  %v1796_v44 = vmul.f32 -1.442695, %v1251_v42  ;;  %v1797_v30 = vmul.f32 -1.442695, %v1261_v38  ;;  %v2075_v37 = vld [vmem:[#allocation2 + $0x2d8] sm:$0xff]  ;;  %v2076_v42 = vld [vmem:[#allocation2 + $0x2c0] sm:$0xff] }
 0x314   :  { %v2879_v3 = vadd.f32 %v1088_v36, %v1087_v47  ;;  %v2078_v47 = vld [vmem:[#allocation2 + $0x2a8] sm:$0xff]  ;;  %v2079_v36 = vld [vmem:[#allocation2 + $0x2b8] sm:$0xff]  ;;  %v2084_v38 = vld [vmem:[#allocation2 + $0x280] sm:$0xff] }
 0x315   :  { %1924 = vpow2.f32 %v1796_v44  ;;  %v2081_v44 = vld [vmem:[#allocation2 + $0x2b0] sm:$0xff] }
 0x316   :  { %1926 = vrcp.f32 %v1084_v48  ;;  %v2077_v48 = vld [vmem:[#allocation2 + $0x2d0] sm:$0xff] }
 0x317   :  { %1928 = vtanh.f32 %v2879_v3 }
 0x318   :  { %1930 = vpow2.f32 %v1797_v30  ;;  %v2085_v30 = vld [vmem:[#allocation2 + $0x290] sm:$0xff] }
 0x320   :  { %v1923_v5 = vpop.eup %1922 }
 0x321   :  { %v1247_v6 = vadd.f32 1.0, %v1923_v5  ;;  %v2086_v5 = vld [vmem:[#allocation2 + $0x268] sm:$0xff] }
 0x322   :  { %v1925_v2 = vpop.eup %1924 }
 0x323   :  { %v1927_v7 = vpop.eup %1926  ;;  %1932 = vrcp.f32 %v1247_v6  ;;  %v1256_v8 = vadd.f32 1.0, %v1925_v2  ;;  %v2087_v6 = vld [vmem:[#allocation2 + $0x278] sm:$0xff]  ;;  %v2088_v2 = vld [vmem:[#allocation2 + $0x260] sm:$0xff] }
 0x324   :  { %v1929_v45 = vpop.eup %1928  ;;  %1934 = vtanh.f32 %v1243_v4  ;;  %v2083_v4 = vld [vmem:[#allocation2 + $0x298] sm:$0xff] }
 0x325   :  { %1936 = vrcp.f32 %v1256_v8  ;;  %v1091_v49 = vmul.f32 %v1929_v45, %v1927_v7  ;;  %v1931_v57 = vpop.eup %1930  ;;  %v2089_v7 = vld [vmem:[#allocation2 + $0x270] sm:$0xff]  ;;  %v2090_v8 = vld [vmem:[#allocation2 + $0x248] sm:$0xff]  ;;  %v2091_v45 = vld [vmem:[#allocation2 + $0x258] sm:$0xff] }
 0x326   :  { %v1266_v17 = vadd.f32 1.0, %v1931_v57  ;;  %v1668_v57 = vld [vmem:[%s3019_s2 + $0xf0] sm:$0xff] }
 0x327   :  { %1339 = vmatmul.mubr.f32.vlgmr.msra.gmra.mxu0 %v1091_v49  ;;  %1410 = vmatmul.mubr.f32.vlgmr.msra.gmra.mxu1 %v1091_v49  ;;  %v2092_v49 = vld [vmem:[#allocation2 + $0x240] sm:$0xff] }
 0x328   :  { %1457 = vmatpush1.msra.mxu0 %v2040_v9  ;;  %1528 = vmatpush1.msra.mxu1 %v2041_v39  ;;  %1938 = vrcp.f32 %v1266_v17  ;;  %v2093_v9 = vld [vmem:[#allocation2 + $0x250] sm:$0xff]  ;;  %v1662_v17 = vld [vmem:[%s3019_s2 + $0xc0] sm:$0xff] }
 0x329   :  { %1458 = vmatprep.subr.mxu0 %v2042_v60  ;;  %1529 = vmatprep.subr.mxu1 %v2043_v10  ;;  %v2094_v60 = vld [vmem:[#allocation2 + $0x228] sm:$0xff]  ;;  %v2095_v10 = vld [vmem:[#allocation2 + $0x238] sm:$0xff] }
 0x32a   :  { %1459 = vmatpush1.msra.mxu0 %v2044_v41  ;;  %1530 = vmatpush1.msra.mxu1 %v2045_v56  ;;  %v2096_v56 = vld [vmem:[#allocation2 + $0x220] sm:$0xff] }
 0x32b   :  { %1460 = vmatprep.subr.mxu0 %v2046_v52  ;;  %1531 = vmatprep.subr.mxu1 %v2047_v0  ;;  %v2097_v52 = vld [vmem:[#allocation2 + $0x230] sm:$0xff]  ;;  %v2098_v0 = vld [vmem:[#allocation2 + $0x208] sm:$0xff] }
 0x32c   :  { %1461 = vmatpush1.msra.mxu0 %v2048_v58  ;;  %1532 = vmatpush1.msra.mxu1 %v2049_v61  ;;  %v2099_v58 = vld [vmem:[#allocation2 + $0x218] sm:$0xff] }
 0x32d   :  { %1462 = vmatprep.subr.mxu0 %v2050_v62  ;;  %1533 = vmatprep.subr.mxu1 %v2051_v55  ;;  %v2100_v62 = vld [vmem:[#allocation2 + $0x200] sm:$0xff]  ;;  %v2101_v55 = vld [vmem:[#allocation2 + $0x210] sm:$0xff] }
 0x32e   :  { %1463 = vmatpush1.msra.mxu0 %v2052_v59  ;;  %1534 = vmatpush1.msra.mxu1 %v2053_v63  ;;  %v1669_v59 = vld [vmem:[%s3019_s2 + $0xf8] sm:$0xff] }
 0x32f   :  { %1464 = vmatprep.subr.mxu0 %v2054_v50  ;;  %1535 = vmatprep.subr.mxu1 %v2055_v32  ;;  %v1653_v63 = vld [vmem:[%s3019_s2 + $0x78] sm:$0xff]  ;;  %v1651_v50 = vld [vmem:[%s3019_s2 + $0x68] sm:$0xff]  ;;  %v1666_v32 = vld [vmem:[%s3019_s2 + $0xe0] sm:$0xff] }
 0x330   :  { %v1933_v34 = vpop.eup %1932  ;;  %1465 = vmatpush1.msra.mxu0 %v2056_v11  ;;  %1536 = vmatpush1.msra.mxu1 %v2057_v12  ;;  %v1665_v11 = vld [vmem:[%s3019_s2 + $0xd8] sm:$0xff] }
 0x331   :  { %v1935_v13 = vpop.eup %1934  ;;  %1466 = vmatprep.subr.mxu0 %v2058_v14  ;;  %1537 = vmatprep.subr.mxu1 %v2059_v15  ;;  %v1649_v12 = vld [vmem:[%s3019_s2 + $0x58] sm:$0xff]  ;;  %v1648_v14 = vld [vmem:[%s3019_s2 + $0x50] sm:$0xff]  ;;  %v1663_v15 = vld [vmem:[%s3019_s2 + $0xc8] sm:$0xff] }
 0x332   :  { %v1937_v16 = vpop.eup %1936  ;;  %1467 = vmatpush1.msra.mxu0 %v2060_v18  ;;  %1538 = vmatpush1.msra.mxu1 %v2061_v19  ;;  %v1270_v43 = vmul.f32 %v1935_v13, %v1933_v34  ;;  %v1650_v34 = vld [vmem:[%s3019_s2 + $0x60] sm:$0xff]  ;;  %v1664_v13 = vld [vmem:[%s3019_s2 + $0xd0] sm:$0xff]  ;;  %v1661_v19 = vld [vmem:[%s3019_s2 + $0xb8] sm:$0xff] }
 0x333   :  { %v1269_v20 = vmul.f32 %v1937_v16, %v2821_v53  ;;  %1468 = vmatprep.subr.mxu0 %v2062_v21  ;;  %1539 = vmatprep.subr.mxu1 %v2063_v51  ;;  %v2070_v53 = vld [vmem:[#allocation2 + $0x2e8] sm:$0xff]  ;;  %v1646_v18 = vld [vmem:[%s3019_s2 + $0x40] sm:$0xff]  ;;  %v1644_v21 = vld [vmem:[%s3019_s2 + $0x30] sm:$0xff] }
 0x334   :  { %1469 = vmatpush1.msra.mxu0 %v2064_v22  ;;  %1540 = vmatpush1.msra.mxu1 %v2065_v23  ;;  %v1647_v16 = vld [vmem:[%s3019_s2 + $0x48] sm:$0xff]  ;;  %v1658_v23 = vld [vmem:[%s3019_s2 + $0xa0] sm:$0xff] }
 0x335   :  { %v2883_v24 = vadd.f32 %v1270_v43, %v1269_v20  ;;  %1470 = vmatprep.subr.mxu0 %v2066_v25  ;;  %1541 = vmatprep.subr.mxu1 %v2067_v26  ;;  %v1939_v39 = vpop.eup %1938  ;;  %v1645_v20 = vld [vmem:[%s3019_s2 + $0x38] sm:$0xff]  ;;  %v1660_v43 = vld [vmem:[%s3019_s2 + $0xb0] sm:$0xff]  ;;  %v1659_v51 = vld [vmem:[%s3019_s2 + $0xa8] sm:$0xff] }
 0x336   :  { %1471 = vmatpush1.msra.mxu0 %v2068_v27  ;;  %1542 = vmatpush1.msra.mxu1 %v2069_v28  ;;  %v1643_v22 = vld [vmem:[%s3019_s2 + $0x28] sm:$0xff]  ;;  %v1642_v25 = vld [vmem:[%s3019_s2 + $0x20] sm:$0xff]  ;;  %v1657_v26 = vld [vmem:[%s3019_s2 + $0x98] sm:$0xff] }
 0x337   :  { %1472 = vmatprep.subr.mxu0 %v2070_v53  ;;  %1543 = vmatprep.subr.mxu1 %v2071_v29  ;;  %1940 = vtanh.f32 %v2883_v24  ;;  %v1641_v27 = vld [vmem:[%s3019_s2 + $0x18] sm:$0xff]  ;;  %v1656_v28 = vld [vmem:[%s3019_s2 + $0x90] sm:$0xff]  ;;  %v1655_v29 = vld [vmem:[%s3019_s2 + $0x88] sm:$0xff] }
 0x338   :  { %1473 = vmatpush1.msra.mxu0 %v2072_v31  ;;  %1544 = vmatpush1.msra.mxu1 %v2073_v33  ;;  %v1640_v53 = vld [vmem:[%s3019_s2 + $0x10] sm:$0xff]  ;;  %v1639_v31 = vld [vmem:[%s3019_s2 + $0x8] sm:$0xff]  ;;  %v1654_v33 = vld [vmem:[%s3019_s2 + $0x80] sm:$0xff] }
 0x339   :  { %1474 = vmatprep.subr.mxu0 %v2074_v35  ;;  %1545 = vmatprep.subr.mxu1 %v2075_v37  ;;  %v1638_v35 = vld [vmem:[%s3019_s2] sm:$0xff] }
 0x33a   :  { %1475 = vmatpush1.msra.mxu0 %v2076_v42  ;;  %1546 = vmatpush1.msra.mxu1 %v2077_v48  ;;  %v1771_v48 = vld [vmem:[%s3017_s0 + $0x60] sm:$0xff] }
 0x33b   :  { %1476 = vmatprep.subr.mxu0 %v2078_v47  ;;  %1547 = vmatprep.subr.mxu1 %v2079_v36 }
 0x33c   :  { %1477 = vmatpush1.msra.mxu0 %v2080_v46  ;;  %1548 = vmatpush1.msra.mxu1 %v2081_v44 }
 0x33d   :  { %1478 = vmatprep.subr.mxu0 %v2082_v1  ;;  %1549 = vmatprep.subr.mxu1 %v2083_v4 }
 0x33e   :  { %1479 = vmatpush1.msra.mxu0 %v2084_v38  ;;  %1550 = vmatpush1.msra.mxu1 %v2085_v30 }
 0x33f   :  { %1480 = vmatprep.subr.mxu0 %v2086_v5  ;;  %1551 = vmatprep.subr.mxu1 %v2087_v6  ;;  %v1772_v5 = vld [vmem:[%s3017_s0 + $0x68] sm:$0xff] }
 0x340   :  { %1481 = vmatpush1.msra.mxu0 %v2088_v2  ;;  %1552 = vmatpush1.msra.mxu1 %v2089_v7 }
 0x341   :  { %1482 = vmatprep.subr.mxu0 %v2090_v8  ;;  %1553 = vmatprep.subr.mxu1 %v2091_v45 }
 0x342   :  { %1483 = vmatpush1.msra.mxu0 %v2092_v49  ;;  %1554 = vmatpush1.msra.mxu1 %v2093_v9 }
 0x343   :  { %1484 = vmatprep.subr.mxu0 %v2094_v60  ;;  %1555 = vmatprep.subr.mxu1 %v2095_v10  ;;  %v165_v10 = vld [vmem:[%s3017_s0 + $0x10] sm:$0xff] }
 0x344   :  { %v1941_v41 = vpop.eup %1940  ;;  %1485 = vmatpush1.msra.mxu0 %v2096_v56  ;;  %1556 = vmatpush1.msra.mxu1 %v2097_v52 }
 0x345   :  { %1486 = vmatprep.subr.mxu0 %v2098_v0  ;;  %1557 = vmatprep.subr.mxu1 %v2099_v58  ;;  %v1273_v61 = vmul.f32 %v1941_v41, %v1939_v39 }
 0x346   :  { %1487 = vmatpush1.msra.mxu0 %v2100_v62  ;;  %1520 = vmatprep.mubr.f32.mxu0 %v3208_v54 }
 0x347   :  { %1558 = vmatpush1.msra.mxu1 %v2101_v55  ;;  %1591 = vmatprep.mubr.f32.mxu1 %v3208_v54  ;;  %v1652_v54 = vld [vmem:[%s3019_s2 + $0x70] sm:$0xff] }
 0x348   :  { %1521 = vmatmul.mubr.f32.vlgmr.msra.gmra.mxu0 %v1273_v61  ;;  %1592 = vmatmul.mubr.f32.vlgmr.msra.gmra.mxu1 %v1273_v61 }
 0x349   :  { %1741 = vmatprep.mubr.f32.mxu0 %v2703_v40  ;;  %1807 = vmatprep.subr.mxu0 %v1669_v59  ;;  %v1667_v40 = vld [vmem:[%s3019_s2 + $0xe8] sm:$0xff] }
 0x34a   :  { %1808 = vmatpush3.msra.mxu0 %v1653_v63 }
 0x34b   :  { %1809 = vmatprep.subr.mxu0 %v1668_v57 }
 0x34c   :  { %1810 = vmatpush3.msra.mxu0 %v1652_v54 }
 0x34d   :  { %1811 = vmatprep.subr.mxu0 %v1667_v40 }
 0x34e   :  { %1812 = vmatpush3.msra.mxu0 %v1651_v50 }
 0x34f   :  { %1813 = vmatprep.subr.mxu0 %v1666_v32 }
 0x350   :  { %1814 = vmatpush3.msra.mxu0 %v1650_v34  ;;  %v166_v34 = vld [vmem:[%s3017_s0 + $0x18] sm:$0xff] }
 0x351   :  { %1815 = vmatprep.subr.mxu0 %v1665_v11 }
 0x352   :  { %1816 = vmatpush3.msra.mxu0 %v1649_v12 }
 0x353   :  { %1817 = vmatprep.subr.mxu0 %v1664_v13 }
 0x354   :  { %1818 = vmatpush3.msra.mxu0 %v1648_v14 }
 0x355   :  { %1819 = vmatprep.subr.mxu0 %v1663_v15 }
 0x356   :  { %1820 = vmatpush3.msra.mxu0 %v1647_v16 }
 0x357   :  { %1821 = vmatprep.subr.mxu0 %v1662_v17 }
 0x358   :  { %1822 = vmatpush3.msra.mxu0 %v1646_v18 }
 0x359   :  { %1823 = vmatprep.subr.mxu0 %v1661_v19 }
 0x35a   :  { %1824 = vmatpush3.msra.mxu0 %v1645_v20 }
 0x35b   :  { %1825 = vmatprep.subr.mxu0 %v1660_v43 }
 0x35c   :  { %1826 = vmatpush3.msra.mxu0 %v1644_v21 }
 0x35d   :  { %1827 = vmatprep.subr.mxu0 %v1659_v51 }
 0x35e   :  { %1828 = vmatpush3.msra.mxu0 %v1643_v22 }
 0x35f   :  { %1829 = vmatprep.subr.mxu0 %v1658_v23 }
 0x360   :  { %1830 = vmatpush3.msra.mxu0 %v1642_v25 }
 0x361   :  { %1831 = vmatprep.subr.mxu0 %v1657_v26 }
 0x362   :  { %1832 = vmatpush3.msra.mxu0 %v1641_v27 }
 0x363   :  { %1833 = vmatprep.subr.mxu0 %v1656_v28 }
 0x364   :  { %1834 = vmatpush3.msra.mxu0 %v1640_v53 }
 0x365   :  { %1835 = vmatprep.subr.mxu0 %v1655_v29 }
 0x366   :  { %1836 = vmatpush3.msra.mxu0 %v1639_v31 }
 0x367   :  { %1837 = vmatprep.subr.mxu0 %v1654_v33 }
 0x368   :  { %1838 = vmatpush3.msra.mxu0 %v1638_v35 }
 0x3e7   :  { %v1340_v37 = vpop.f32.mrf.mxu0  ;;  %v1411_v42 = vpop.f32.mrf.mxu1 }
 0x3e9   :  { %v1342_v47 = vpop.f32.mrf.mxu0  ;;  %v1413_v44 = vpop.f32.mrf.mxu1 }
 0x3ea   :  { %v1420_v36 = vcombine.low %v1340_v37, %v1342_v47  ;;  %v1421_v38 = vcombine.low %v1411_v42, %v1413_v44 }
 0x3ec   :  { %v1424_v46 = vadd.f32 %v1771_v48, %v1420_v36  ;;  %v1425_v6 = vadd.f32 %v1772_v5, %v1421_v38 }
 0x3ee   :  { %v1798_v1 = vmul.f32 -1.442695, %v1424_v46  ;;  %v1433_v4 = vrot.slane %v1424_v46, 4  ;;  %v1443_v2 = vrot.slane %v1425_v6, 4 }
 0x3f0   :  { %1942 = vpow2.f32 %v1798_v1  ;;  %v1799_v30 = vmul.f32 -1.442695, %v1433_v4  ;;  %v1800_v7 = vmul.f32 -1.442695, %v1443_v2 }
 0x3f2   :  { %1944 = vpow2.f32 %v1799_v30 }
 0x3f3   :  { %1946 = vpow2.f32 %v1800_v7 }
 0x3fd   :  { %v1943_v8 = vpop.eup %1942 }
 0x3fe   :  { %v1429_v45 = vadd.f32 1.0, %v1943_v8 }
 0x3ff   :  { %v1945_v49 = vpop.eup %1944 }
 0x400   :  { %1948 = vrcp.f32 %v1429_v45  ;;  %v1438_v9 = vadd.f32 1.0, %v1945_v49  ;;  %v1947_v52 = vpop.eup %1946 }
 0x401   :  { %1950 = vtanh.f32 %v1425_v6  ;;  %v1448_v57 = vadd.f32 1.0, %v1947_v52 }
 0x402   :  { %1952 = vrcp.f32 %v1438_v9 }
 0x408   :  { %v1522_v39 = vpop.f32.mrf.mxu0  ;;  %v1593_v60 = vpop.f32.mrf.mxu1 }
 0x40a   :  { %v1524_v41 = vpop.f32.mrf.mxu0  ;;  %v1595_v61 = vpop.f32.mrf.mxu1 }
 0x40b   :  { %v1602_v56 = vcombine.low %v1522_v39, %v1524_v41  ;;  %v1603_v50 = vcombine.low %v1593_v60, %v1595_v61 }
 0x40d   :  { %v1949_v0 = vpop.eup %1948  ;;  %v1606_v58 = vadd.f32 %v1602_v56, %v165_v10  ;;  %v1607_v12 = vadd.f32 %v1603_v50, %v166_v34 }
 0x40e   :  { %v1951_v62 = vpop.eup %1950 }
 0x40f   :  { %v1953_v55 = vpop.eup %1952  ;;  %v1801_v59 = vmul.f32 -1.442695, %v1606_v58  ;;  %v1615_v63 = vrot.slane %v1606_v58, 4  ;;  %v1452_v40 = vmul.f32 %v1951_v62, %v1949_v0  ;;  %v1625_v13 = vrot.slane %v1607_v12, 4 }
 0x410   :  { %v1451_v54 = vmul.f32 %v1953_v55, %v2879_v3 }
 0x411   :  { %1954 = vpow2.f32 %v1801_v59  ;;  %v1802_v32 = vmul.f32 -1.442695, %v1615_v63  ;;  %v1803_v14 = vmul.f32 -1.442695, %v1625_v13 }
 0x412   :  { %v1453_v11 = vadd.f32 %v1452_v40, %v1451_v54 }
 0x413   :  { %1956 = vpow2.f32 %v1802_v32 }
 0x414   :  { %1958 = vrcp.f32 %v1448_v57  ;;  %1752 = vst [vmem:[%s3023_s6] sm:$0xf] %v1453_v11 }
 0x415   :  { %1960 = vtanh.f32 %v1453_v11 }
 0x416   :  { %1962 = vpow2.f32 %v1803_v14 }
 0x41e   :  { %v1955_v3 = vpop.eup %1954 }
 0x41f   :  { %v1611_v15 = vadd.f32 1.0, %v1955_v3 }
 0x420   :  { %v1957_v16 = vpop.eup %1956 }
 0x421   :  { %v1959_v17 = vpop.eup %1958  ;;  %1964 = vrcp.f32 %v1611_v15  ;;  %v1620_v18 = vadd.f32 1.0, %v1957_v16 }
 0x422   :  { %v1961_v19 = vpop.eup %1960  ;;  %1966 = vtanh.f32 %v1607_v12 }
 0x423   :  { %1968 = vrcp.f32 %v1620_v18  ;;  %v1455_v20 = vmul.f32 %v1961_v19, %v1959_v17  ;;  %v1963_v43 = vpop.eup %1962 }
 0x424   :  { %v1630_v23 = vadd.f32 1.0, %v1963_v43 }
 0x425   :  { %1742 = vmatmul.mubr.f32.vlgmr.msra.gmra.mxu0 %v1455_v20  ;;  %1749 = vst [vmem:[%s3022_s5] sm:$0xf] %v1455_v20 }
 0x426   :  { %1970 = vrcp.f32 %v1630_v23 }
 0x42e   :  { %v1965_v21 = vpop.eup %1964 }
 0x42f   :  { %v1967_v51 = vpop.eup %1966 }
 0x430   :  { %v1969_v22 = vpop.eup %1968  ;;  %v1634_v26 = vmul.f32 %v1967_v51, %v1965_v21 }
 0x431   :  { %v1633_v25 = vmul.f32 %v1969_v22, %v2883_v24  ;;  %v1804_v24 = vld [vmem:[%s3020_s3] ss:$0 sm:$0xff] }
 0x433   :  { %v1635_v27 = vadd.f32 %v1634_v26, %v1633_v25  ;;  %v1971_v28 = vpop.eup %1970 }
 0x435   :  { %1972 = vtanh.f32 %v1635_v27  ;;  %1806 = vst [vmem:[%s3023_s6 + $0x4] sm:$0xf] %v1635_v27 }
 0x442   :  { %v1973_v53 = vpop.eup %1972 }
 0x443   :  { %v1637_v29 = vmul.f32 %v1973_v53, %v1971_v28 }
 0x445   :  { %1805 = vst [vmem:[%s3022_s5 + $0x4] sm:$0xf] %v1637_v29 }
 0x4e5   :  { %v1839_v31 = vpop.f32.mrf.mxu0 }
 0x4e7   :  { %v1840_v33 = vpop.f32.mrf.mxu0 }
 0x4e8   :  { %v1841_v35 = vadd.f32 %v1840_v33, %v1839_v31 }
 0x4ea   :  { %v1744_v37 = vadd.f32 %v1841_v35, %v1804_v24 }
 0x4ec   :  { %1748 = vst.msk [vmem:[%s3021_s4] sm:$0xf] %vm1747_vm0, %v1744_v37 }
 0x4ed   :  { %1767 = vsyncpa [#allocation3], 1 }

// kernel: mtvae_forward.7
= control target key start
LH: loop header
LB: loop body
LE: loop exit
PB: predicated region body
PF: predicated region fallthrough
CT: control target
= control target key end

     0   :  { %v6286_v3 = vmov 0.0   ;;  %s6279_s3 = inlined_call_operand.vmem [shape: f32[2,128,512], index: 3, kind: input, shape index: {}]   ;;  %s6280_s1 = inlined_call_operand.vmem [shape: f32[2,2,128], index: 1, kind: input, shape index: {}]   ;;  %s6281_s0 = inlined_call_operand.vmem [shape: f32[2,1024], index: 0, kind: input, shape index: {}]   ;;  %s6282_s2 = inlined_call_operand.vmem [shape: f32[2,2,128], index: 2, kind: input, shape index: {}]   ;;  %s6283_s4 = inlined_call_operand.vmem [shape: f32[256,128], index: 4, kind: input, shape index: {}]   ;;  %s6284_s5 = inlined_call_operand.vmem [shape: f32[1,128], index: 5, kind: input, shape index: {}]   ;;  %s6285_s6 = inlined_call_operand.vmem [shape: f32[6,2,128], index: 6, kind: output, shape index: {}]  }
   0x1   :  { %v3670_v0 = vld [vmem:[%s6279_s3 + $0x1e8] sm:$0xff]  ;;  %v3675_v1 = vld [vmem:[%s6279_s3 + $0x1f8] sm:$0xff]  ;;  %v3680_v2 = vld [vmem:[%s6279_s3 + $0x1e0] sm:$0xff]  ;;  %224 = vmatprep.mubr.f32.mxu0 %v6286_v3  ;;  %295 = vmatprep.mubr.f32.mxu1 %v6286_v3 }
   0x2   :  { %160 = vmatprep.subr.mxu0 %v3670_v0  ;;  %231 = vmatprep.subr.mxu1 %v3675_v1  ;;  %v3689_v4 = vld [vmem:[%s6279_s3 + $0x1f0] sm:$0xff]  ;;  %v3694_v5 = vld [vmem:[%s6279_s3 + $0x1c8] sm:$0xff]  ;;  %v3699_v6 = vld [vmem:[%s6279_s3 + $0x1d8] sm:$0xff] }
   0x3   :  { %161 = vmatpush1.msra.mxu0 %v3680_v2  ;;  %232 = vmatpush1.msra.mxu1 %v3689_v4  ;;  %v3706_v7 = vld [vmem:[%s6279_s3 + $0x1c0] sm:$0xff]  ;;  %v3711_v8 = vld [vmem:[%s6279_s3 + $0x1d0] sm:$0xff]  ;;  %v3716_v9 = vld [vmem:[%s6279_s3 + $0x1a8] sm:$0xff] }
   0x4   :  { %162 = vmatprep.subr.mxu0 %v3694_v5  ;;  %233 = vmatprep.subr.mxu1 %v3699_v6  ;;  %v3723_v10 = vld [vmem:[%s6279_s3 + $0x1b8] sm:$0xff]  ;;  %v3728_v11 = vld [vmem:[%s6279_s3 + $0x1a0] sm:$0xff]  ;;  %v3733_v12 = vld [vmem:[%s6279_s3 + $0x1b0] sm:$0xff] }
   0x5   :  { %163 = vmatpush1.msra.mxu0 %v3706_v7  ;;  %234 = vmatpush1.msra.mxu1 %v3711_v8  ;;  %v3740_v13 = vld [vmem:[%s6279_s3 + $0x188] sm:$0xff]  ;;  %v3745_v14 = vld [vmem:[%s6279_s3 + $0x198] sm:$0xff]  ;;  %v3752_v15 = vld [vmem:[%s6279_s3 + $0x180] sm:$0xff] }
   0x6   :  { %164 = vmatprep.subr.mxu0 %v3716_v9  ;;  %235 = vmatprep.subr.mxu1 %v3723_v10  ;;  %v3757_v16 = vld [vmem:[%s6279_s3 + $0x190] sm:$0xff]  ;;  %v3764_v17 = vld [vmem:[%s6279_s3 + $0x168] sm:$0xff]  ;;  %v3769_v18 = vld [vmem:[%s6279_s3 + $0x178] sm:$0xff] }
   0x7   :  { %165 = vmatpush1.msra.mxu0 %v3728_v11  ;;  %236 = vmatpush1.msra.mxu1 %v3733_v12  ;;  %v3776_v19 = vld [vmem:[%s6279_s3 + $0x160] sm:$0xff]  ;;  %v3781_v20 = vld [vmem:[%s6279_s3 + $0x170] sm:$0xff]  ;;  %v3788_v21 = vld [vmem:[%s6279_s3 + $0x148] sm:$0xff] }
   0x8   :  { %166 = vmatprep.subr.mxu0 %v3740_v13  ;;  %237 = vmatprep.subr.mxu1 %v3745_v14  ;;  %v3793_v22 = vld [vmem:[%s6279_s3 + $0x158] sm:$0xff]  ;;  %v3800_v23 = vld [vmem:[%s6279_s3 + $0x140] sm:$0xff]  ;;  %v3805_v24 = vld [vmem:[%s6279_s3 + $0x150] sm:$0xff] }
   0x9   :  { %167 = vmatpush1.msra.mxu0 %v3752_v15  ;;  %238 = vmatpush1.msra.mxu1 %v3757_v16  ;;  %v3812_v25 = vld [vmem:[%s6279_s3 + $0x128] sm:$0xff]  ;;  %v3817_v26 = vld [vmem:[%s6279_s3 + $0x138] sm:$0xff]  ;;  %v3824_v27 = vld [vmem:[%s6279_s3 + $0x120] sm:$0xff] }
   0xa   :  { %168 = vmatprep.subr.mxu0 %v3764_v17  ;;  %239 = vmatprep.subr.mxu1 %v3769_v18  ;;  %v3829_v28 = vld [vmem:[%s6279_s3 + $0x130] sm:$0xff]  ;;  %v3836_v29 = vld [vmem:[%s6279_s3 + $0x108] sm:$0xff]  ;;  %v3841_v30 = vld [vmem:[%s6279_s3 + $0x118] sm:$0xff] }
   0xb   :  { %169 = vmatpush1.msra.mxu0 %v3776_v19  ;;  %240 = vmatpush1.msra.mxu1 %v3781_v20  ;;  %v3848_v31 = vld [vmem:[%s6279_s3 + $0x100] sm:$0xff]  ;;  %v3853_v32 = vld [vmem:[%s6279_s3 + $0x110] sm:$0xff]  ;;  %v3860_v33 = vld [vmem:[%s6279_s3 + $0xe8] sm:$0xff] }
   0xc   :  { %170 = vmatprep.subr.mxu0 %v3788_v21  ;;  %241 = vmatprep.subr.mxu1 %v3793_v22  ;;  %v3865_v34 = vld [vmem:[%s6279_s3 + $0xf8] sm:$0xff]  ;;  %v3872_v35 = vld [vmem:[%s6279_s3 + $0xe0] sm:$0xff]  ;;  %v3877_v36 = vld [vmem:[%s6279_s3 + $0xf0] sm:$0xff] }
   0xd   :  { %171 = vmatpush1.msra.mxu0 %v3800_v23  ;;  %242 = vmatpush1.msra.mxu1 %v3805_v24  ;;  %v3884_v37 = vld [vmem:[%s6279_s3 + $0xc8] sm:$0xff]  ;;  %v3889_v38 = vld [vmem:[%s6279_s3 + $0xd8] sm:$0xff]  ;;  %v3896_v39 = vld [vmem:[%s6279_s3 + $0xc0] sm:$0xff] }
   0xe   :  { %172 = vmatprep.subr.mxu0 %v3812_v25  ;;  %243 = vmatprep.subr.mxu1 %v3817_v26  ;;  %6613 = vst [vmem:[#allocation2_spill] sm:$0xff] %v3889_v38  ;;  %6614 = vst [vmem:[#allocation3_spill] sm:$0xff] %v3896_v39  ;;  %v3901_v40 = vld [vmem:[%s6279_s3 + $0xd0] sm:$0xff]  ;;  %v3908_v41 = vld [vmem:[%s6279_s3 + $0xa8] sm:$0xff] }
   0xf   :  { %173 = vmatpush1.msra.mxu0 %v3824_v27  ;;  %244 = vmatpush1.msra.mxu1 %v3829_v28  ;;  %6615 = vst [vmem:[#allocation4_spill] sm:$0xff] %v3901_v40  ;;  %6616 = vst [vmem:[#allocation5_spill] sm:$0xff] %v3908_v41  ;;  %v3913_v42 = vld [vmem:[%s6279_s3 + $0xb8] sm:$0xff]  ;;  %v3920_v43 = vld [vmem:[%s6279_s3 + $0xa0] sm:$0xff] }
  0x10   :  { %174 = vmatprep.subr.mxu0 %v3836_v29  ;;  %245 = vmatprep.subr.mxu1 %v3841_v30  ;;  %6617 = vst [vmem:[#allocation6_spill] sm:$0xff] %v3913_v42  ;;  %6618 = vst [vmem:[#allocation7_spill] sm:$0xff] %v3920_v43  ;;  %v3925_v44 = vld [vmem:[%s6279_s3 + $0xb0] sm:$0xff]  ;;  %v3932_v45 = vld [vmem:[%s6279_s3 + $0x88] sm:$0xff] }
  0x11   :  { %175 = vmatpush1.msra.mxu0 %v3848_v31  ;;  %246 = vmatpush1.msra.mxu1 %v3853_v32  ;;  %6619 = vst [vmem:[#allocation8_spill] sm:$0xff] %v3925_v44  ;;  %6620 = vst [vmem:[#allocation9_spill] sm:$0xff] %v3932_v45  ;;  %v3937_v46 = vld [vmem:[%s6279_s3 + $0x98] sm:$0xff]  ;;  %v3944_v47 = vld [vmem:[%s6279_s3 + $0x80] sm:$0xff] }
  0x12   :  { %176 = vmatprep.subr.mxu0 %v3860_v33  ;;  %247 = vmatprep.subr.mxu1 %v3865_v34  ;;  %6621 = vst [vmem:[#allocation10_spill] sm:$0xff] %v3937_v46  ;;  %6622 = vst [vmem:[#allocation11_spill] sm:$0xff] %v3944_v47  ;;  %v3949_v48 = vld [vmem:[%s6279_s3 + $0x90] sm:$0xff]  ;;  %v3956_v49 = vld [vmem:[%s6279_s3 + $0x68] sm:$0xff] }
  0x13   :  { %177 = vmatpush1.msra.mxu0 %v3872_v35  ;;  %248 = vmatpush1.msra.mxu1 %v3877_v36  ;;  %6623 = vst [vmem:[#allocation12_spill] sm:$0xff] %v3949_v48  ;;  %6624 = vst [vmem:[#allocation13_spill] sm:$0xff] %v3956_v49  ;;  %v3961_v50 = vld [vmem:[%s6279_s3 + $0x78] sm:$0xff]  ;;  %v3968_v51 = vld [vmem:[%s6279_s3 + $0x60] sm:$0xff] }
  0x14   :  { %178 = vmatprep.subr.mxu0 %v3884_v37  ;;  %249 = vmatprep.subr.mxu1 %v3889_v38  ;;  %6625 = vst [vmem:[#allocation14_spill] sm:$0xff] %v3961_v50  ;;  %6626 = vst [vmem:[#allocation15_spill] sm:$0xff] %v3968_v51  ;;  %v3973_v52 = vld [vmem:[%s6279_s3 + $0x70] sm:$0xff]  ;;  %v3980_v53 = vld [vmem:[%s6279_s3 + $0x48] sm:$0xff] }
  0x15   :  { %179 = vmatpush1.msra.mxu0 %v3896_v39  ;;  %250 = vmatpush1.msra.mxu1 %v3901_v40  ;;  %6627 = vst [vmem:[#allocation16_spill] sm:$0xff] %v3973_v52  ;;  %6628 = vst [vmem:[#allocation17_spill] sm:$0xff] %v3980_v53  ;;  %v3985_v54 = vld [vmem:[%s6279_s3 + $0x58] sm:$0xff]  ;;  %v3992_v55 = vld [vmem:[%s6279_s3 + $0x40] sm:$0xff] }
  0x16   :  { %180 = vmatprep.subr.mxu0 %v3908_v41  ;;  %251 = vmatprep.subr.mxu1 %v3913_v42  ;;  %6629 = vst [vmem:[#allocation18_spill] sm:$0xff] %v3985_v54  ;;  %6630 = vst [vmem:[#allocation19_spill] sm:$0xff] %v3992_v55  ;;  %v3997_v56 = vld [vmem:[%s6279_s3 + $0x50] sm:$0xff]  ;;  %v4004_v57 = vld [vmem:[%s6279_s3 + $0x28] sm:$0xff] }
  0x17   :  { %181 = vmatpush1.msra.mxu0 %v3920_v43  ;;  %252 = vmatpush1.msra.mxu1 %v3925_v44  ;;  %6631 = vst [vmem:[#allocation20_spill] sm:$0xff] %v3997_v56  ;;  %6632 = vst [vmem:[#allocation21_spill] sm:$0xff] %v4004_v57  ;;  %v4009_v58 = vld [vmem:[%s6279_s3 + $0x38] sm:$0xff]  ;;  %v4016_v59 = vld [vmem:[%s6279_s3 + $0x20] sm:$0xff] }
  0x18   :  { %182 = vmatprep.subr.mxu0 %v3932_v45  ;;  %253 = vmatprep.subr.mxu1 %v3937_v46  ;;  %6633 = vst [vmem:[#allocation22_spill] sm:$0xff] %v4009_v58  ;;  %6634 = vst [vmem:[#allocation23_spill] sm:$0xff] %v4016_v59  ;;  %v4021_v60 = vld [vmem:[%s6279_s3 + $0x30] sm:$0xff]  ;;  %v4028_v61 = vld [vmem:[%s6279_s3 + $0x8] sm:$0xff] }
  0x19   :  { %183 = vmatpush1.msra.mxu0 %v3944_v47  ;;  %254 = vmatpush1.msra.mxu1 %v3949_v48  ;;  %6635 = vst [vmem:[#allocation24_spill] sm:$0xff] %v4021_v60  ;;  %6636 = vst [vmem:[#allocation25_spill] sm:$0xff] %v4028_v61  ;;  %v4033_v62 = vld [vmem:[%s6279_s3 + $0x18] sm:$0xff]  ;;  %v4040_v63 = vld [vmem:[%s6279_s3] sm:$0xff] }
  0x1a   :  { %184 = vmatprep.subr.mxu0 %v3956_v49  ;;  %255 = vmatprep.subr.mxu1 %v3961_v50  ;;  %6637 = vst [vmem:[#allocation26_spill] sm:$0xff] %v4033_v62  ;;  %6638 = vst [vmem:[#allocation27_spill] sm:$0xff] %v4040_v63  ;;  %v4045_v3 = vld [vmem:[%s6279_s3 + $0x10] sm:$0xff] }
  0x1b   :  { %185 = vmatpush1.msra.mxu0 %v3968_v51  ;;  %256 = vmatpush1.msra.mxu1 %v3973_v52  ;;  %6639 = vst [vmem:[#allocation28_spill] sm:$0xff] %v4045_v3 }
  0x1c   :  { %186 = vmatprep.subr.mxu0 %v3980_v53  ;;  %257 = vmatprep.subr.mxu1 %v3985_v54 }
  0x1d   :  { %187 = vmatpush1.msra.mxu0 %v3992_v55  ;;  %258 = vmatpush1.msra.mxu1 %v3997_v56  ;;  %v4062_v56 = vld [vmem:[%s6279_s3 + $0x3f8] sm:$0xff] }
  0x1e   :  { %188 = vmatprep.subr.mxu0 %v4004_v57  ;;  %259 = vmatprep.subr.mxu1 %v4009_v58  ;;  %v154_v57 = vld [vmem:[%s6280_s1] sm:$0x3]  ;;  %v4057_v58 = vld [vmem:[%s6279_s3 + $0x3e8] sm:$0xff]  ;;  %6641 = vst [vmem:[#allocation30_spill] sm:$0xff] %v4062_v56 }
  0x1f   :  { %189 = vmatpush1.msra.mxu0 %v4016_v59  ;;  %260 = vmatpush1.msra.mxu1 %v4021_v60  ;;  %6640 = vst [vmem:[#allocation29_spill] sm:$0xff] %v4057_v58  ;;  %v4079_v60 = vld [vmem:[%s6279_s3 + $0x3c8] sm:$0xff] }
  0x20   :  { %190 = vmatprep.subr.mxu0 %v4028_v61  ;;  %261 = vmatprep.subr.mxu1 %v4033_v62  ;;  %v4069_v61 = vld [vmem:[%s6279_s3 + $0x3e0] sm:$0xff]  ;;  %v4074_v62 = vld [vmem:[%s6279_s3 + $0x3f0] sm:$0xff]  ;;  %6644 = vst [vmem:[#allocation33_spill] sm:$0xff] %v4079_v60 }
  0x21   :  { %191 = vmatpush1.msra.mxu0 %v4040_v63  ;;  %262 = vmatpush1.msra.mxu1 %v4045_v3  ;;  %6642 = vst [vmem:[#allocation31_spill] sm:$0xff] %v4069_v61  ;;  %6643 = vst [vmem:[#allocation32_spill] sm:$0xff] %v4074_v62  ;;  %v4084_v3 = vld [vmem:[%s6279_s3 + $0x3d8] sm:$0xff]  ;;  %v4091_v63 = vld [vmem:[%s6279_s3 + $0x3c0] sm:$0xff] }
  0x22   :  { %225 = vmatmul.mubr.f32.vlgmr.msra.gmra.mxu0 %v154_v57  ;;  %296 = vmatmul.mubr.f32.vlgmr.msra.gmra.mxu1 %v154_v57  ;;  %6645 = vst [vmem:[#allocation34_spill] sm:$0xff] %v4084_v3  ;;  %6646 = vst [vmem:[#allocation35_spill] sm:$0xff] %v4091_v63  ;;  %v4096_v57 = vld [vmem:[%s6279_s3 + $0x3d0] sm:$0xff] }
  0x23   :  { %356 = vmatprep.subr.mxu0 %v4057_v58  ;;  %427 = vmatprep.subr.mxu1 %v4062_v56  ;;  %6647 = vst [vmem:[#allocation36_spill] sm:$0xff] %v4096_v57  ;;  %v4103_v58 = vld [vmem:[%s6279_s3 + $0x3a8] sm:$0xff]  ;;  %v4108_v56 = vld [vmem:[%s6279_s3 + $0x3b8] sm:$0xff] }
  0x24   :  { %357 = vmatpush1.msra.mxu0 %v4069_v61  ;;  %428 = vmatpush1.msra.mxu1 %v4074_v62  ;;  %6648 = vst [vmem:[#allocation37_spill] sm:$0xff] %v4103_v58  ;;  %6649 = vst [vmem:[#allocation38_spill] sm:$0xff] %v4108_v56  ;;  %v4115_v61 = vld [vmem:[%s6279_s3 + $0x3a0] sm:$0xff]  ;;  %v4120_v62 = vld [vmem:[%s6279_s3 + $0x3b0] sm:$0xff] }
  0x25   :  { %358 = vmatprep.subr.mxu0 %v4079_v60  ;;  %429 = vmatprep.subr.mxu1 %v4084_v3  ;;  %6650 = vst [vmem:[#allocation39_spill] sm:$0xff] %v4115_v61  ;;  %6651 = vst [vmem:[#allocation40_spill] sm:$0xff] %v4120_v62  ;;  %v4127_v60 = vld [vmem:[%s6279_s3 + $0x388] sm:$0xff]  ;;  %v4132_v3 = vld [vmem:[%s6279_s3 + $0x398] sm:$0xff] }
  0x26   :  { %359 = vmatpush1.msra.mxu0 %v4091_v63  ;;  %430 = vmatpush1.msra.mxu1 %v4096_v57  ;;  %6652 = vst [vmem:[#allocation41_spill] sm:$0xff] %v4127_v60  ;;  %6653 = vst [vmem:[#allocation42_spill] sm:$0xff] %v4132_v3  ;;  %v4139_v63 = vld [vmem:[%s6279_s3 + $0x380] sm:$0xff]  ;;  %v4144_v57 = vld [vmem:[%s6279_s3 + $0x390] sm:$0xff] }
  0x27   :  { %360 = vmatprep.subr.mxu0 %v4103_v58  ;;  %431 = vmatprep.subr.mxu1 %v4108_v56  ;;  %6654 = vst [vmem:[#allocation43_spill] sm:$0xff] %v4139_v63  ;;  %6655 = vst [vmem:[#allocation44_spill] sm:$0xff] %v4144_v57  ;;  %v4151_v58 = vld [vmem:[%s6279_s3 + $0x368] sm:$0xff]  ;;  %v4156_v56 = vld [vmem:[%s6279_s3 + $0x378] sm:$0xff] }
  0x28   :  { %361 = vmatpush1.msra.mxu0 %v4115_v61  ;;  %432 = vmatpush1.msra.mxu1 %v4120_v62  ;;  %6656 = vst [vmem:[#allocation45_spill] sm:$0xff] %v4151_v58  ;;  %6657 = vst [vmem:[#allocation46_spill] sm:$0xff] %v4156_v56  ;;  %v4163_v61 = vld [vmem:[%s6279_s3 + $0x360] sm:$0xff]  ;;  %v4168_v62 = vld [vmem:[%s6279_s3 + $0x370] sm:$0xff] }
  0x29   :  { %362 = vmatprep.subr.mxu0 %v4127_v60  ;;  %433 = vmatprep.subr.mxu1 %v4132_v3  ;;  %6658 = vst [vmem:[#allocation47_spill] sm:$0xff] %v4163_v61  ;;  %6659 = vst [vmem:[#allocation48_spill] sm:$0xff] %v4168_v62  ;;  %v4175_v60 = vld [vmem:[%s6279_s3 + $0x348] sm:$0xff]  ;;  %v4180_v3 = vld [vmem:[%s6279_s3 + $0x358] sm:$0xff] }
  0x2a   :  { %363 = vmatpush1.msra.mxu0 %v4139_v63  ;;  %434 = vmatpush1.msra.mxu1 %v4144_v57  ;;  %6660 = vst [vmem:[#allocation49_spill] sm:$0xff] %v4175_v60  ;;  %6661 = vst [vmem:[#allocation50_spill] sm:$0xff] %v4180_v3  ;;  %v4187_v63 = vld [vmem:[%s6279_s3 + $0x340] sm:$0xff]  ;;  %v4192_v57 = vld [vmem:[%s6279_s3 + $0x350] sm:$0xff] }
  0x2b   :  { %364 = vmatprep.subr.mxu0 %v4151_v58  ;;  %435 = vmatprep.subr.mxu1 %v4156_v56  ;;  %6662 = vst [vmem:[#allocation51_spill] sm:$0xff] %v4187_v63  ;;  %6663 = vst [vmem:[#allocation52_spill] sm:$0xff] %v4192_v57  ;;  %v4199_v58 = vld [vmem:[%s6279_s3 + $0x328] sm:$0xff]  ;;  %v4204_v56 = vld [vmem:[%s6279_s3 + $0x338] sm:$0xff] }
  0x2c   :  { %365 = vmatpush1.msra.mxu0 %v4163_v61  ;;  %436 = vmatpush1.msra.mxu1 %v4168_v62  ;;  %6664 = vst [vmem:[#allocation53_spill] sm:$0xff] %v4199_v58  ;;  %6665 = vst [vmem:[#allocation54_spill] sm:$0xff] %v4204_v56  ;;  %v4211_v61 = vld [vmem:[%s6279_s3 + $0x320] sm:$0xff]  ;;  %v4216_v62 = vld [vmem:[%s6279_s3 + $0x330] sm:$0xff] }
  0x2d   :  { %366 = vmatprep.subr.mxu0 %v4175_v60  ;;  %437 = vmatprep.subr.mxu1 %v4180_v3  ;;  %6666 = vst [vmem:[#allocation55_spill] sm:$0xff] %v4211_v61  ;;  %6667 = vst [vmem:[#allocation56_spill] sm:$0xff] %v4216_v62  ;;  %v4223_v60 = vld [vmem:[%s6279_s3 + $0x308] sm:$0xff]  ;;  %v4228_v3 = vld [vmem:[%s6279_s3 + $0x318] sm:$0xff] }
  0x2e   :  { %367 = vmatpush1.msra.mxu0 %v4187_v63  ;;  %438 = vmatpush1.msra.mxu1 %v4192_v57  ;;  %6668 = vst [vmem:[#allocation57_spill] sm:$0xff] %v4223_v60  ;;  %6669 = vst [vmem:[#allocation58_spill] sm:$0xff] %v4228_v3  ;;  %v4235_v63 = vld [vmem:[%s6279_s3 + $0x300] sm:$0xff]  ;;  %v4240_v57 = vld [vmem:[%s6279_s3 + $0x310] sm:$0xff] }
  0x2f   :  { %368 = vmatprep.subr.mxu0 %v4199_v58  ;;  %439 = vmatprep.subr.mxu1 %v4204_v56  ;;  %6670 = vst [vmem:[#allocation59_spill] sm:$0xff] %v4235_v63  ;;  %6671 = vst [vmem:[#allocation60_spill] sm:$0xff] %v4240_v57  ;;  %v4247_v58 = vld [vmem:[%s6279_s3 + $0x2e8] sm:$0xff]  ;;  %v4252_v56 = vld [vmem:[%s6279_s3 + $0x2f8] sm:$0xff] }
  0x30   :  { %369 = vmatpush1.msra.mxu0 %v4211_v61  ;;  %440 = vmatpush1.msra.mxu1 %v4216_v62  ;;  %6672 = vst [vmem:[#allocation61_spill] sm:$0xff] %v4247_v58  ;;  %6673 = vst [vmem:[#allocation62_spill] sm:$0xff] %v4252_v56  ;;  %v4259_v61 = vld [vmem:[%s6279_s3 + $0x2e0] sm:$0xff]  ;;  %v4264_v62 = vld [vmem:[%s6279_s3 + $0x2f0] sm:$0xff] }
  0x31   :  { %370 = vmatprep.subr.mxu0 %v4223_v60  ;;  %441 = vmatprep.subr.mxu1 %v4228_v3  ;;  %6674 = vst [vmem:[#allocation63_spill] sm:$0xff] %v4259_v61  ;;  %6675 = vst [vmem:[#allocation64_spill] sm:$0xff] %v4264_v62  ;;  %v4271_v60 = vld [vmem:[%s6279_s3 + $0x2c8] sm:$0xff]  ;;  %v4276_v3 = vld [vmem:[%s6279_s3 + $0x2d8] sm:$0xff] }
  0x32   :  { %371 = vmatpush1.msra.mxu0 %v4235_v63  ;;  %442 = vmatpush1.msra.mxu1 %v4240_v57  ;;  %6676 = vst [vmem:[#allocation65_spill] sm:$0xff] %v4271_v60  ;;  %6677 = vst [vmem:[#allocation66_spill] sm:$0xff] %v4276_v3  ;;  %v4283_v63 = vld [vmem:[%s6279_s3 + $0x2c0] sm:$0xff]  ;;  %v4288_v57 = vld [vmem:[%s6279_s3 + $0x2d0] sm:$0xff] }
  0x33   :  { %372 = vmatprep.subr.mxu0 %v4247_v58  ;;  %443 = vmatprep.subr.mxu1 %v4252_v56  ;;  %6678 = vst [vmem:[#allocation67_spill] sm:$0xff] %v4283_v63  ;;  %6679 = vst [vmem:[#allocation68_spill] sm:$0xff] %v4288_v57  ;;  %v4295_v58 = vld [vmem:[%s6279_s3 + $0x2a8] sm:$0xff]  ;;  %v4300_v56 = vld [vmem:[%s6279_s3 + $0x2b8] sm:$0xff] }
  0x34   :  { %373 = vmatpush1.msra.mxu0 %v4259_v61  ;;  %444 = vmatpush1.msra.mxu1 %v4264_v62  ;;  %6680 = vst [vmem:[#allocation69_spill] sm:$0xff] %v4295_v58  ;;  %6681 = vst [vmem:[#allocation70_spill] sm:$0xff] %v4300_v56  ;;  %v4307_v61 = vld [vmem:[%s6279_s3 + $0x2a0] sm:$0xff]  ;;  %v4312_v62 = vld [vmem:[%s6279_s3 + $0x2b0] sm:$0xff] }
  0x35   :  { %374 = vmatprep.subr.mxu0 %v4271_v60  ;;  %445 = vmatprep.subr.mxu1 %v4276_v3  ;;  %6682 = vst [vmem:[#allocation71_spill] sm:$0xff] %v4307_v61  ;;  %6683 = vst [vmem:[#allocation72_spill] sm:$0xff] %v4312_v62  ;;  %v4319_v60 = vld [vmem:[%s6279_s3 + $0x288] sm:$0xff]  ;;  %v4324_v3 = vld [vmem:[%s6279_s3 + $0x298] sm:$0xff] }
  0x36   :  { %375 = vmatpush1.msra.mxu0 %v4283_v63  ;;  %446 = vmatpush1.msra.mxu1 %v4288_v57  ;;  %6684 = vst [vmem:[#allocation73_spill] sm:$0xff] %v4319_v60  ;;  %6685 = vst [vmem:[#allocation74_spill] sm:$0xff] %v4324_v3  ;;  %v4331_v63 = vld [vmem:[%s6279_s3 + $0x280] sm:$0xff]  ;;  %v4336_v57 = vld [vmem:[%s6279_s3 + $0x290] sm:$0xff] }
  0x37   :  { %376 = vmatprep.subr.mxu0 %v4295_v58  ;;  %447 = vmatprep.subr.mxu1 %v4300_v56  ;;  %6686 = vst [vmem:[#allocation75_spill] sm:$0xff] %v4331_v63  ;;  %6687 = vst [vmem:[#allocation76_spill] sm:$0xff] %v4336_v57  ;;  %v4343_v58 = vld [vmem:[%s6279_s3 + $0x268] sm:$0xff]  ;;  %v4348_v56 = vld [vmem:[%s6279_s3 + $0x278] sm:$0xff] }
  0x38   :  { %377 = vmatpush1.msra.mxu0 %v4307_v61  ;;  %448 = vmatpush1.msra.mxu1 %v4312_v62  ;;  %6688 = vst [vmem:[#allocation77_spill] sm:$0xff] %v4343_v58  ;;  %6689 = vst [vmem:[#allocation78_spill] sm:$0xff] %v4348_v56  ;;  %v4355_v61 = vld [vmem:[%s6279_s3 + $0x260] sm:$0xff]  ;;  %v4360_v62 = vld [vmem:[%s6279_s3 + $0x270] sm:$0xff] }
  0x39   :  { %378 = vmatprep.subr.mxu0 %v4319_v60  ;;  %449 = vmatprep.subr.mxu1 %v4324_v3  ;;  %6690 = vst [vmem:[#allocation79_spill] sm:$0xff] %v4355_v61  ;;  %6691 = vst [vmem:[#allocation80_spill] sm:$0xff] %v4360_v62  ;;  %v4367_v60 = vld [vmem:[%s6279_s3 + $0x248] sm:$0xff]  ;;  %v4372_v3 = vld [vmem:[%s6279_s3 + $0x258] sm:$0xff] }
  0x3a   :  { %379 = vmatpush1.msra.mxu0 %v4331_v63  ;;  %450 = vmatpush1.msra.mxu1 %v4336_v57  ;;  %6692 = vst [vmem:[#allocation81_spill] sm:$0xff] %v4367_v60  ;;  %6693 = vst [vmem:[#allocation82_spill] sm:$0xff] %v4372_v3  ;;  %v4379_v63 = vld [vmem:[%s6279_s3 + $0x240] sm:$0xff]  ;;  %v4384_v57 = vld [vmem:[%s6279_s3 + $0x250] sm:$0xff] }
  0x3b   :  { %380 = vmatprep.subr.mxu0 %v4343_v58  ;;  %451 = vmatprep.subr.mxu1 %v4348_v56  ;;  %6694 = vst [vmem:[#allocation83_spill] sm:$0xff] %v4379_v63  ;;  %6695 = vst [vmem:[#allocation84_spill] sm:$0xff] %v4384_v57  ;;  %v4391_v58 = vld [vmem:[%s6279_s3 + $0x228] sm:$0xff]  ;;  %v4396_v56 = vld [vmem:[%s6279_s3 + $0x238] sm:$0xff] }
  0x3c   :  { %381 = vmatpush1.msra.mxu0 %v4355_v61  ;;  %452 = vmatpush1.msra.mxu1 %v4360_v62  ;;  %6696 = vst [vmem:[#allocation85_spill] sm:$0xff] %v4391_v58  ;;  %6697 = vst [vmem:[#allocation86_spill] sm:$0xff] %v4396_v56  ;;  %v4403_v61 = vld [vmem:[%s6279_s3 + $0x220] sm:$0xff]  ;;  %v4408_v62 = vld [vmem:[%s6279_s3 + $0x230] sm:$0xff] }
  0x3d   :  { %382 = vmatprep.subr.mxu0 %v4367_v60  ;;  %453 = vmatprep.subr.mxu1 %v4372_v3  ;;  %v4415_v60 = vld [vmem:[%s6279_s3 + $0x208] sm:$0xff]  ;;  %v4420_v3 = vld [vmem:[%s6279_s3 + $0x218] sm:$0xff] }
  0x3e   :  { %383 = vmatpush1.msra.mxu0 %v4379_v63  ;;  %454 = vmatpush1.msra.mxu1 %v4384_v57  ;;  %v4427_v63 = vld [vmem:[%s6279_s3 + $0x200] sm:$0xff]  ;;  %v4434_v57 = vld [vmem:[%s6279_s3 + $0x210] sm:$0xff] }
  0x3f   :  { %384 = vmatprep.subr.mxu0 %v4391_v58  ;;  %455 = vmatprep.subr.mxu1 %v4396_v56  ;;  %v3050_v56 = vld [vmem:[%s6280_s1 + $0x2] sm:$0x3]  ;;  %v6698_v58 = vmov 0.0  }
  0x40   :  { %385 = vmatpush1.msra.mxu0 %v4403_v61  ;;  %456 = vmatpush1.msra.mxu1 %v4408_v62 }
  0x41   :  { %386 = vmatprep.subr.mxu0 %v4415_v60  ;;  %457 = vmatprep.subr.mxu1 %v4420_v3 }
  0x42   :  { %387 = vmatpush1.msra.mxu0 %v4427_v63  ;;  %420 = vmatprep.mubr.f32.mxu0 %v6698_v58 }
  0x43   :  { %458 = vmatpush1.msra.mxu1 %v4434_v57  ;;  %491 = vmatprep.mubr.f32.mxu1 %v6698_v58 }
  0x44   :  { %421 = vmatmul.mubr.f32.vlgmr.msra.gmra.mxu0 %v3050_v56  ;;  %492 = vmatmul.mubr.f32.vlgmr.msra.gmra.mxu1 %v3050_v56  ;;  %v6699_v56 = vld [vmem:[#allocation20_spill] sm:$0xff] }
  0x45   :  { %552 = vmatprep.subr.mxu0 %v3670_v0  ;;  %623 = vmatprep.subr.mxu1 %v3675_v1 }
  0x46   :  { %553 = vmatpush1.msra.mxu0 %v3680_v2  ;;  %624 = vmatpush1.msra.mxu1 %v3689_v4 }
  0x47   :  { %554 = vmatprep.subr.mxu0 %v3694_v5  ;;  %625 = vmatprep.subr.mxu1 %v3699_v6 }
  0x48   :  { %555 = vmatpush1.msra.mxu0 %v3706_v7  ;;  %626 = vmatpush1.msra.mxu1 %v3711_v8 }
  0x49   :  { %556 = vmatprep.subr.mxu0 %v3716_v9  ;;  %627 = vmatprep.subr.mxu1 %v3723_v10 }
  0x4a   :  { %557 = vmatpush1.msra.mxu0 %v3728_v11  ;;  %628 = vmatpush1.msra.mxu1 %v3733_v12 }
  0x4b   :  { %558 = vmatprep.subr.mxu0 %v3740_v13  ;;  %629 = vmatprep.subr.mxu1 %v3745_v14 }
  0x4c   :  { %559 = vmatpush1.msra.mxu0 %v3752_v15  ;;  %630 = vmatpush1.msra.mxu1 %v3757_v16 }
  0x4d   :  { %560 = vmatprep.subr.mxu0 %v3764_v17  ;;  %631 = vmatprep.subr.mxu1 %v3769_v18 }
  0x4e   :  { %561 = vmatpush1.msra.mxu0 %v3776_v19  ;;  %632 = vmatpush1.msra.mxu1 %v3781_v20 }
  0x4f   :  { %562 = vmatprep.subr.mxu0 %v3788_v21  ;;  %633 = vmatprep.subr.mxu1 %v3793_v22 }
  0x50   :  { %563 = vmatpush1.msra.mxu0 %v3800_v23  ;;  %634 = vmatpush1.msra.mxu1 %v3805_v24 }
  0x51   :  { %564 = vmatprep.subr.mxu0 %v3812_v25  ;;  %635 = vmatprep.subr.mxu1 %v3817_v26 }
  0x52   :  { %565 = vmatpush1.msra.mxu0 %v3824_v27  ;;  %636 = vmatpush1.msra.mxu1 %v3829_v28 }
  0x53   :  { %566 = vmatprep.subr.mxu0 %v3836_v29  ;;  %637 = vmatprep.subr.mxu1 %v3841_v30 }
  0x54   :  { %567 = vmatpush1.msra.mxu0 %v3848_v31  ;;  %638 = vmatpush1.msra.mxu1 %v3853_v32 }
  0x55   :  { %568 = vmatprep.subr.mxu0 %v3860_v33  ;;  %639 = vmatprep.subr.mxu1 %v3865_v34 }
  0x56   :  { %569 = vmatpush1.msra.mxu0 %v3872_v35  ;;  %640 = vmatpush1.msra.mxu1 %v3877_v36 }
  0x57   :  { %570 = vmatprep.subr.mxu0 %v3884_v37  ;;  %641 = vmatprep.subr.mxu1 %v3889_v38 }
  0x58   :  { %571 = vmatpush1.msra.mxu0 %v3896_v39  ;;  %642 = vmatpush1.msra.mxu1 %v3901_v40 }
  0x59   :  { %572 = vmatprep.subr.mxu0 %v3908_v41  ;;  %643 = vmatprep.subr.mxu1 %v3913_v42 }
  0x5a   :  { %573 = vmatpush1.msra.mxu0 %v3920_v43  ;;  %644 = vmatpush1.msra.mxu1 %v3925_v44 }
  0x5b   :  { %574 = vmatprep.subr.mxu0 %v3932_v45  ;;  %645 = vmatprep.subr.mxu1 %v3937_v46  ;;  %v6700_v46 = vld [vmem:[#allocation21_spill] sm:$0xff] }
  0x5c   :  { %575 = vmatpush1.msra.mxu0 %v3944_v47  ;;  %646 = vmatpush1.msra.mxu1 %v3949_v48  ;;  %v6701_v47 = vld [vmem:[#allocation22_spill] sm:$0xff] }
  0x5d   :  { %576 = vmatprep.subr.mxu0 %v3956_v49  ;;  %647 = vmatprep.subr.mxu1 %v3961_v50  ;;  %v6702_v49 = vld [vmem:[#allocation24_spill] sm:$0xff]  ;;  %v6703_v50 = vld [vmem:[#allocation25_spill] sm:$0xff] }
  0x5e   :  { %577 = vmatpush1.msra.mxu0 %v3968_v51  ;;  %648 = vmatpush1.msra.mxu1 %v3973_v52  ;;  %v6704_v51 = vld [vmem:[#allocation26_spill] sm:$0xff]  ;;  %v6705_v52 = vld [vmem:[#allocation27_spill] sm:$0xff] }
  0x5f   :  { %578 = vmatprep.subr.mxu0 %v3980_v53  ;;  %649 = vmatprep.subr.mxu1 %v3985_v54  ;;  %v6706_v54 = vld [vmem:[#allocation28_spill] sm:$0xff] }
  0x60   :  { %579 = vmatpush1.msra.mxu0 %v3992_v55  ;;  %650 = vmatpush1.msra.mxu1 %v6699_v56  ;;  %v6707_v56 = vld [vmem:[#allocation29_spill] sm:$0xff]  ;;  %v311_v55 = vlaneseq }
  0x61   :  { %580 = vmatprep.subr.mxu0 %v6700_v46  ;;  %651 = vmatprep.subr.mxu1 %v6701_v47  ;;  %v6708_v46 = vld [vmem:[#allocation30_spill] sm:$0xff]  ;;  %v3631_v47 = vmov 1983009808  }
  0x62   :  { %581 = vmatpush1.msra.mxu0 %v4016_v59  ;;  %652 = vmatpush1.msra.mxu1 %v6702_v49  ;;  %v309_v59 = vunpack.c.l.s4 %v3631_v47  ;;  %v312_v53 = vshrl.u32 %v311_v55, 7 }
  0x63   :  { %582 = vmatprep.subr.mxu0 %v6703_v50  ;;  %653 = vmatprep.subr.mxu1 %v6704_v51 }
  0x64   :  { %583 = vmatpush1.msra.mxu0 %v6705_v52  ;;  %616 = vmatprep.mubr.f32.mxu0 %v6698_v58  ;;  %v310_v49 = vunpack.c.0.s8 %v309_v59 }
  0x65   :  { %654 = vmatpush1.msra.mxu1 %v6706_v54  ;;  %687 = vmatprep.mubr.f32.mxu1 %v6698_v58 }
  0x66   :  { %748 = vmatprep.subr.mxu0 %v6707_v56  ;;  %819 = vmatprep.subr.mxu1 %v6708_v46  ;;  %v4513_v51 = vsub.s32 %v310_v49, %v312_v53  ;;  %v4520_v46 = vld [vmem:[%s6281_s0] sm:$0xff] }
  0x67   :  { %6710 = vst [vmem:[#allocation88_spill] sm:$0xff] %v4520_v46 }
  0x68   :  { %6709 = vst [vmem:[#allocation87_spill] sm:$0xff] %v4513_v51 }
  0xe2   :  { %v226_v50 = vpop.f32.mrf.mxu0  ;;  %v297_v48 = vpop.f32.mrf.mxu1 }
  0xe4   :  { %v228_v52 = vpop.f32.mrf.mxu0  ;;  %v299_v45 = vpop.f32.mrf.mxu1 }
  0xe5   :  { %v306_v44 = vcombine.low %v226_v50, %v228_v52  ;;  %v307_v43 = vcombine.low %v297_v48, %v299_v45 }
  0xe7   :  { %v314_v54 = vrot.slane %v306_v44, %v4513_v51  ;;  %v321_v42 = vrot.slane %v307_v43, %v4513_v51 }
  0xe9   :  { %v322_v47 = vcombine.low %v314_v54, %v321_v42 }
  0xeb   :  { %v324_v55 = vadd.f32 %v322_v47, %v4520_v46 }
  0xed   :  { %v3052_v59 = vmul.f32 -1.442695, %v324_v55  ;;  %v332_v56 = vrot.slane %v324_v55, 2  ;;  %v343_v53 = vrot.slane %v324_v55, 6  ;;  %v340_v52 = vrot.slane %v324_v55, 4 }
  0xef   :  { %3306 = vpow2.f32 %v3052_v59  ;;  %v3053_v49 = vmul.f32 -1.442695, %v332_v56  ;;  %v3054_v50 = vmul.f32 -1.442695, %v343_v53 }
  0xf1   :  { %3308 = vpow2.f32 %v3053_v49  ;;  %v4528_v49 = vld [vmem:[%s6281_s0 + $0x8] sm:$0xff] }
  0xf2   :  { %3310 = vpow2.f32 %v3054_v50  ;;  %6711 = vst [vmem:[#allocation89_spill] sm:$0xff] %v4528_v49 }
  0xfc   :  { %v3307_v45 = vpop.eup %3306 }
  0xfd   :  { %v328_v48 = vadd.f32 1.0, %v3307_v45 }
  0xfe   :  { %v3309_v44 = vpop.eup %3308 }
  0xff   :  { %v337_v43 = vadd.f32 1.0, %v3309_v44  ;;  %3312 = vrcp.f32 %v328_v48  ;;  %v3311_v53 = vpop.eup %3310  ;;  %v155_v48 = vld [vmem:[%s6282_s2] sm:$0x3] }
 0x101   :  { %3314 = vrcp.f32 %v337_v43  ;;  %v348_v43 = vadd.f32 1.0, %v3311_v53 }
 0x102   :  { %3316 = vtanh.f32 %v340_v52 }
 0x104   :  { %v422_v41 = vpop.f32.mrf.mxu0  ;;  %v493_v42 = vpop.f32.mrf.mxu1 }
 0x106   :  { %v424_v54 = vpop.f32.mrf.mxu0  ;;  %v495_v47 = vpop.f32.mrf.mxu1 }
 0x107   :  { %v502_v46 = vcombine.low %v422_v41, %v424_v54  ;;  %v503_v40 = vcombine.low %v493_v42, %v495_v47 }
 0x109   :  { %v510_v56 = vrot.slane %v502_v46, %v4513_v51  ;;  %v517_v59 = vrot.slane %v503_v40, %v4513_v51 }
 0x10b   :  { %v518_v55 = vcombine.low %v510_v56, %v517_v59 }
 0x10c   :  { %v3313_v50 = vpop.eup %3312 }
 0x10d   :  { %v520_v45 = vadd.f32 %v518_v55, %v4528_v49 }
 0x10e   :  { %v3315_v41 = vpop.eup %3314 }
 0x10f   :  { %v3317_v44 = vpop.eup %3316  ;;  %v3055_v52 = vmul.f32 -1.442695, %v520_v45  ;;  %v528_v46 = vrot.slane %v520_v45, 2  ;;  %v351_v40 = vmul.f32 %v3315_v41, %v155_v48  ;;  %v539_v56 = vrot.slane %v520_v45, 6  ;;  %v6713_v41 = vld [vmem:[#allocation31_spill] sm:$0xff] }
 0x110   :  { %v352_v42 = vmul.f32 %v3317_v44, %v3313_v50  ;;  %v536_v49 = vrot.slane %v520_v45, 4  ;;  %v6714_v44 = vld [vmem:[#allocation32_spill] sm:$0xff]  ;;  %v6715_v45 = vld [vmem:[#allocation33_spill] sm:$0xff] }
 0x111   :  { %3318 = vpow2.f32 %v3055_v52  ;;  %v3056_v54 = vmul.f32 -1.442695, %v528_v46  ;;  %v3057_v59 = vmul.f32 -1.442695, %v539_v56  ;;  %v6716_v52 = vld [vmem:[#allocation34_spill] sm:$0xff]  ;;  %v6717_v46 = vld [vmem:[#allocation35_spill] sm:$0xff] }
 0x112   :  { %v4534_v47 = vadd.f32 %v352_v42, %v351_v40  ;;  %v6723_v40 = vld [vmem:[#allocation41_spill] sm:$0xff]  ;;  %v6724_v42 = vld [vmem:[#allocation42_spill] sm:$0xff]  ;;  %v6726_v56 = vld [vmem:[#allocation44_spill] sm:$0xff] }
 0x113   :  { %3320 = vpow2.f32 %v3056_v54  ;;  %v6725_v54 = vld [vmem:[#allocation43_spill] sm:$0xff] }
 0x114   :  { %3322 = vrcp.f32 %v348_v43  ;;  %v6722_v43 = vld [vmem:[#allocation40_spill] sm:$0xff] }
 0x115   :  { %3324 = vtanh.f32 %v4534_v47 }
 0x116   :  { %3326 = vpow2.f32 %v3057_v59 }
 0x11e   :  { %v3319_v55 = vpop.eup %3318 }
 0x11f   :  { %v524_v51 = vadd.f32 1.0, %v3319_v55  ;;  %v6727_v55 = vld [vmem:[#allocation45_spill] sm:$0xff] }
 0x120   :  { %v3321_v39 = vpop.eup %3320 }
 0x121   :  { %v3323_v38 = vpop.eup %3322  ;;  %3328 = vrcp.f32 %v524_v51  ;;  %v533_v53 = vadd.f32 1.0, %v3321_v39  ;;  %v6718_v39 = vld [vmem:[#allocation36_spill] sm:$0xff]  ;;  %v6719_v51 = vld [vmem:[#allocation37_spill] sm:$0xff] }
 0x122   :  { %v3325_v48 = vpop.eup %3324  ;;  %3330 = vtanh.f32 %v536_v49  ;;  %v6721_v49 = vld [vmem:[#allocation39_spill] sm:$0xff] }
 0x123   :  { %3332 = vrcp.f32 %v533_v53  ;;  %v4537_v50 = vmul.f32 %v3325_v48, %v3323_v38  ;;  %v6720_v38 = vld [vmem:[#allocation38_spill] sm:$0xff]  ;;  %v3327_v59 = vpop.eup %3326 }
 0x124   :  { %v6728_v53 = vld [vmem:[#allocation46_spill] sm:$0xff] }
 0x125   :  { %6712 = vst [vmem:[#allocation90_spill] sm:$0xff] %v4537_v50  ;;  %617 = vmatmul.mubr.f32.vlgmr.msra.gmra.mxu0 %v4537_v50  ;;  %688 = vmatmul.mubr.f32.vlgmr.msra.gmra.mxu1 %v4537_v50  ;;  %v6729_v50 = vld [vmem:[#allocation47_spill] sm:$0xff] }
 0x126   :  { %749 = vmatpush1.msra.mxu0 %v6713_v41  ;;  %820 = vmatpush1.msra.mxu1 %v6714_v44 }
 0x127   :  { %750 = vmatprep.subr.mxu0 %v6715_v45  ;;  %821 = vmatprep.subr.mxu1 %v6716_v52  ;;  %v6738_v52 = vld [vmem:[#allocation56_spill] sm:$0xff]  ;;  %v6739_v45 = vld [vmem:[#allocation57_spill] sm:$0xff] }
 0x128   :  { %751 = vmatpush1.msra.mxu0 %v6717_v46  ;;  %822 = vmatpush1.msra.mxu1 %v6718_v39  ;;  %v6737_v46 = vld [vmem:[#allocation55_spill] sm:$0xff] }
 0x129   :  { %752 = vmatprep.subr.mxu0 %v6719_v51  ;;  %823 = vmatprep.subr.mxu1 %v6720_v38  ;;  %v6730_v38 = vld [vmem:[#allocation48_spill] sm:$0xff]  ;;  %v6733_v51 = vld [vmem:[#allocation51_spill] sm:$0xff] }
 0x12a   :  { %753 = vmatpush1.msra.mxu0 %v6721_v49  ;;  %824 = vmatpush1.msra.mxu1 %v6722_v43  ;;  %v544_v49 = vadd.f32 1.0, %v3327_v59  ;;  %v6741_v59 = vld [vmem:[#allocation59_spill] sm:$0xff] }
 0x12b   :  { %754 = vmatprep.subr.mxu0 %v6723_v40  ;;  %825 = vmatprep.subr.mxu1 %v6724_v42  ;;  %v3051_v40 = vld [vmem:[%s6282_s2 + $0x2] sm:$0x3]  ;;  %v6731_v42 = vld [vmem:[#allocation49_spill] sm:$0xff] }
 0x12c   :  { %755 = vmatpush1.msra.mxu0 %v6725_v54  ;;  %826 = vmatpush1.msra.mxu1 %v6726_v56  ;;  %v6732_v54 = vld [vmem:[#allocation50_spill] sm:$0xff]  ;;  %3334 = vrcp.f32 %v544_v49  ;;  %v6751_v49 = vld [vmem:[#allocation69_spill] sm:$0xff] }
 0x12d   :  { %756 = vmatprep.subr.mxu0 %v6727_v55  ;;  %827 = vmatprep.subr.mxu1 %v6728_v53  ;;  %v6734_v55 = vld [vmem:[#allocation52_spill] sm:$0xff]  ;;  %v6735_v53 = vld [vmem:[#allocation53_spill] sm:$0xff] }
 0x12e   :  { %v3329_v48 = vpop.eup %3328  ;;  %757 = vmatpush1.msra.mxu0 %v6729_v50  ;;  %828 = vmatpush1.msra.mxu1 %v6730_v38  ;;  %v6736_v50 = vld [vmem:[#allocation54_spill] sm:$0xff] }
 0x12f   :  { %v3331_v43 = vpop.eup %3330  ;;  %758 = vmatprep.subr.mxu0 %v6731_v42  ;;  %829 = vmatprep.subr.mxu1 %v6732_v54  ;;  %v6740_v42 = vld [vmem:[#allocation58_spill] sm:$0xff] }
 0x130   :  { %v3333_v56 = vpop.eup %3332  ;;  %759 = vmatpush1.msra.mxu0 %v6733_v51  ;;  %830 = vmatpush1.msra.mxu1 %v6734_v55  ;;  %v548_v39 = vmul.f32 %v3331_v43, %v3329_v48  ;;  %v6742_v55 = vld [vmem:[#allocation60_spill] sm:$0xff]  ;;  %v6745_v43 = vld [vmem:[#allocation63_spill] sm:$0xff]  ;;  %v6748_v48 = vld [vmem:[#allocation66_spill] sm:$0xff] }
 0x131   :  { %760 = vmatprep.subr.mxu0 %v6735_v53  ;;  %831 = vmatprep.subr.mxu1 %v6736_v50  ;;  %v547_v38 = vmul.f32 %v3333_v56, %v3051_v40  ;;  %v6743_v53 = vld [vmem:[#allocation61_spill] sm:$0xff]  ;;  %v6744_v50 = vld [vmem:[#allocation62_spill] sm:$0xff]  ;;  %v6746_v40 = vld [vmem:[#allocation64_spill] sm:$0xff] }
 0x132   :  { %761 = vmatpush1.msra.mxu0 %v6737_v46  ;;  %832 = vmatpush1.msra.mxu1 %v6738_v52  ;;  %v6747_v56 = vld [vmem:[#allocation65_spill] sm:$0xff] }
 0x133   :  { %762 = vmatprep.subr.mxu0 %v6739_v45  ;;  %833 = vmatprep.subr.mxu1 %v6740_v42  ;;  %v4572_v54 = vadd.f32 %v548_v39, %v547_v38  ;;  %v6749_v39 = vld [vmem:[#allocation67_spill] sm:$0xff]  ;;  %v6750_v38 = vld [vmem:[#allocation68_spill] sm:$0xff] }
 0x134   :  { %763 = vmatpush1.msra.mxu0 %v6741_v59  ;;  %834 = vmatpush1.msra.mxu1 %v6742_v55  ;;  %v6752_v55 = vld [vmem:[#allocation70_spill] sm:$0xff]  ;;  %v6755_v59 = vld [vmem:[#allocation73_spill] sm:$0xff] }
 0x135   :  { %764 = vmatprep.subr.mxu0 %v6743_v53  ;;  %835 = vmatprep.subr.mxu1 %v6744_v50  ;;  %3336 = vtanh.f32 %v4572_v54  ;;  %v6753_v53 = vld [vmem:[#allocation71_spill] sm:$0xff]  ;;  %v6754_v50 = vld [vmem:[#allocation72_spill] sm:$0xff] }
 0x136   :  { %765 = vmatpush1.msra.mxu0 %v6745_v43  ;;  %836 = vmatpush1.msra.mxu1 %v6746_v40  ;;  %v6756_v43 = vld [vmem:[#allocation74_spill] sm:$0xff]  ;;  %v6757_v40 = vld [vmem:[#allocation75_spill] sm:$0xff] }
 0x137   :  { %766 = vmatprep.subr.mxu0 %v6747_v56  ;;  %837 = vmatprep.subr.mxu1 %v6748_v48  ;;  %v6758_v56 = vld [vmem:[#allocation76_spill] sm:$0xff]  ;;  %v6759_v48 = vld [vmem:[#allocation77_spill] sm:$0xff] }
 0x138   :  { %767 = vmatpush1.msra.mxu0 %v6749_v39  ;;  %838 = vmatpush1.msra.mxu1 %v6750_v38  ;;  %v6760_v39 = vld [vmem:[#allocation78_spill] sm:$0xff]  ;;  %v6761_v38 = vld [vmem:[#allocation79_spill] sm:$0xff] }
 0x139   :  { %768 = vmatprep.subr.mxu0 %v6751_v49  ;;  %839 = vmatprep.subr.mxu1 %v6752_v55  ;;  %v6762_v49 = vld [vmem:[#allocation80_spill] sm:$0xff]  ;;  %v6763_v55 = vld [vmem:[#allocation81_spill] sm:$0xff] }
 0x13a   :  { %769 = vmatpush1.msra.mxu0 %v6753_v53  ;;  %840 = vmatpush1.msra.mxu1 %v6754_v50  ;;  %v6764_v53 = vld [vmem:[#allocation82_spill] sm:$0xff]  ;;  %v6765_v50 = vld [vmem:[#allocation83_spill] sm:$0xff] }
 0x13b   :  { %770 = vmatprep.subr.mxu0 %v6755_v59  ;;  %841 = vmatprep.subr.mxu1 %v6756_v43  ;;  %v6766_v59 = vld [vmem:[#allocation84_spill] sm:$0xff]  ;;  %v3335_v43 = vpop.eup %3334 }
 0x13c   :  { %771 = vmatpush1.msra.mxu0 %v6757_v40  ;;  %842 = vmatpush1.msra.mxu1 %v6758_v56  ;;  %v6767_v40 = vld [vmem:[#allocation85_spill] sm:$0xff]  ;;  %v6768_v56 = vld [vmem:[#allocation86_spill] sm:$0xff] }
 0x13d   :  { %772 = vmatprep.subr.mxu0 %v6759_v48  ;;  %843 = vmatprep.subr.mxu1 %v6760_v39 }
 0x13e   :  { %773 = vmatpush1.msra.mxu0 %v6761_v38  ;;  %844 = vmatpush1.msra.mxu1 %v6762_v49 }
 0x13f   :  { %774 = vmatprep.subr.mxu0 %v6763_v55  ;;  %845 = vmatprep.subr.mxu1 %v6764_v53 }
 0x140   :  { %775 = vmatpush1.msra.mxu0 %v6765_v50  ;;  %846 = vmatpush1.msra.mxu1 %v6766_v59 }
 0x141   :  { %776 = vmatprep.subr.mxu0 %v6767_v40  ;;  %847 = vmatprep.subr.mxu1 %v6768_v56 }
 0x142   :  { %v3337_v48 = vpop.eup %3336  ;;  %777 = vmatpush1.msra.mxu0 %v4403_v61  ;;  %848 = vmatpush1.msra.mxu1 %v4408_v62 }
 0x143   :  { %778 = vmatprep.subr.mxu0 %v4415_v60  ;;  %849 = vmatprep.subr.mxu1 %v4420_v3  ;;  %v4607_v55 = vmul.f32 %v3337_v48, %v3335_v43 }
 0x144   :  { %779 = vmatpush1.msra.mxu0 %v4427_v63  ;;  %812 = vmatprep.mubr.f32.mxu0 %v6698_v58 }
 0x145   :  { %6769 = vst [vmem:[#allocation31_spill] sm:$0xff] %v4607_v55  ;;  %850 = vmatpush1.msra.mxu1 %v4434_v57  ;;  %883 = vmatprep.mubr.f32.mxu1 %v6698_v58 }
 0x146   :  { %813 = vmatmul.mubr.f32.vlgmr.msra.gmra.mxu0 %v4607_v55  ;;  %884 = vmatmul.mubr.f32.vlgmr.msra.gmra.mxu1 %v4607_v55  ;;  %v5108_v55 = vld [vmem:[%s6279_s3 + $0x28] sm:$0xff] }
 0x147   :  { %944 = vmatprep.subr.mxu0 %v3670_v0  ;;  %1015 = vmatprep.subr.mxu1 %v3675_v1  ;;  %v6770_v0 = vld [vmem:[#allocation2_spill] sm:$0xff]  ;;  %v6771_v1 = vld [vmem:[#allocation3_spill] sm:$0xff] }
 0x148   :  { %945 = vmatpush1.msra.mxu0 %v3680_v2  ;;  %1016 = vmatpush1.msra.mxu1 %v3689_v4  ;;  %v6772_v2 = vld [vmem:[#allocation4_spill] sm:$0xff]  ;;  %v6773_v4 = vld [vmem:[#allocation5_spill] sm:$0xff] }
 0x149   :  { %946 = vmatprep.subr.mxu0 %v3694_v5  ;;  %1017 = vmatprep.subr.mxu1 %v3699_v6  ;;  %v6774_v5 = vld [vmem:[#allocation6_spill] sm:$0xff]  ;;  %v6775_v6 = vld [vmem:[#allocation7_spill] sm:$0xff] }
 0x14a   :  { %947 = vmatpush1.msra.mxu0 %v3706_v7  ;;  %1018 = vmatpush1.msra.mxu1 %v3711_v8  ;;  %v6776_v7 = vld [vmem:[#allocation8_spill] sm:$0xff]  ;;  %v6777_v8 = vld [vmem:[#allocation9_spill] sm:$0xff] }
 0x14b   :  { %948 = vmatprep.subr.mxu0 %v3716_v9  ;;  %1019 = vmatprep.subr.mxu1 %v3723_v10  ;;  %v6778_v9 = vld [vmem:[#allocation10_spill] sm:$0xff]  ;;  %v6779_v10 = vld [vmem:[#allocation11_spill] sm:$0xff] }
 0x14c   :  { %949 = vmatpush1.msra.mxu0 %v3728_v11  ;;  %1020 = vmatpush1.msra.mxu1 %v3733_v12  ;;  %v6780_v11 = vld [vmem:[#allocation12_spill] sm:$0xff]  ;;  %v6781_v12 = vld [vmem:[#allocation13_spill] sm:$0xff] }
 0x14d   :  { %950 = vmatprep.subr.mxu0 %v3740_v13  ;;  %1021 = vmatprep.subr.mxu1 %v3745_v14  ;;  %v6782_v13 = vld [vmem:[#allocation14_spill] sm:$0xff]  ;;  %v6783_v14 = vld [vmem:[#allocation15_spill] sm:$0xff] }
 0x14e   :  { %951 = vmatpush1.msra.mxu0 %v3752_v15  ;;  %1022 = vmatpush1.msra.mxu1 %v3757_v16  ;;  %v6784_v15 = vld [vmem:[#allocation16_spill] sm:$0xff]  ;;  %v6785_v16 = vld [vmem:[#allocation17_spill] sm:$0xff] }
 0x14f   :  { %952 = vmatprep.subr.mxu0 %v3764_v17  ;;  %1023 = vmatprep.subr.mxu1 %v3769_v18  ;;  %v6786_v17 = vld [vmem:[#allocation18_spill] sm:$0xff]  ;;  %v6787_v18 = vld [vmem:[#allocation19_spill] sm:$0xff] }
 0x150   :  { %953 = vmatpush1.msra.mxu0 %v3776_v19  ;;  %1024 = vmatpush1.msra.mxu1 %v3781_v20  ;;  %v6788_v19 = vld [vmem:[#allocation20_spill] sm:$0xff]  ;;  %v6789_v20 = vld [vmem:[#allocation21_spill] sm:$0xff] }
 0x151   :  { %954 = vmatprep.subr.mxu0 %v3788_v21  ;;  %1025 = vmatprep.subr.mxu1 %v3793_v22  ;;  %v6790_v21 = vld [vmem:[#allocation22_spill] sm:$0xff]  ;;  %v6791_v22 = vld [vmem:[#allocation23_spill] sm:$0xff] }
 0x152   :  { %955 = vmatpush1.msra.mxu0 %v3800_v23  ;;  %1026 = vmatpush1.msra.mxu1 %v3805_v24  ;;  %v6792_v23 = vld [vmem:[#allocation24_spill] sm:$0xff]  ;;  %v6793_v24 = vld [vmem:[#allocation25_spill] sm:$0xff]  ;;  %6877 = vst [vmem:[#allocation22_spill] sm:$0xff] %v5108_v55 }
 0x153   :  { %956 = vmatprep.subr.mxu0 %v3812_v25  ;;  %1027 = vmatprep.subr.mxu1 %v3817_v26  ;;  %v6794_v25 = vld [vmem:[#allocation26_spill] sm:$0xff]  ;;  %v6795_v26 = vld [vmem:[#allocation27_spill] sm:$0xff] }
 0x154   :  { %957 = vmatpush1.msra.mxu0 %v3824_v27  ;;  %1028 = vmatpush1.msra.mxu1 %v3829_v28  ;;  %v6796_v27 = vld [vmem:[#allocation28_spill] sm:$0xff]  ;;  %v6797_v28 = vld [vmem:[#allocation29_spill] sm:$0xff] }
 0x155   :  { %958 = vmatprep.subr.mxu0 %v3836_v29  ;;  %1029 = vmatprep.subr.mxu1 %v3841_v30  ;;  %v6798_v29 = vld [vmem:[#allocation30_spill] sm:$0xff] }
 0x156   :  { %959 = vmatpush1.msra.mxu0 %v3848_v31  ;;  %1030 = vmatpush1.msra.mxu1 %v3853_v32 }
 0x157   :  { %960 = vmatprep.subr.mxu0 %v3860_v33  ;;  %1031 = vmatprep.subr.mxu1 %v3865_v34 }
 0x158   :  { %961 = vmatpush1.msra.mxu0 %v3872_v35  ;;  %1032 = vmatpush1.msra.mxu1 %v3877_v36  ;;  %v6799_v36 = vld [vmem:[#allocation87_spill] sm:$0xff] }
 0x159   :  { %962 = vmatprep.subr.mxu0 %v3884_v37  ;;  %1033 = vmatprep.subr.mxu1 %v6770_v0  ;;  %v6800_v0 = vld [vmem:[#allocation88_spill] sm:$0xff] }
 0x15a   :  { %963 = vmatpush1.msra.mxu0 %v6771_v1  ;;  %1034 = vmatpush1.msra.mxu1 %v6772_v2 }
 0x15b   :  { %964 = vmatprep.subr.mxu0 %v6773_v4  ;;  %1035 = vmatprep.subr.mxu1 %v6774_v5 }
 0x15c   :  { %965 = vmatpush1.msra.mxu0 %v6775_v6  ;;  %1036 = vmatpush1.msra.mxu1 %v6776_v7 }
 0x15d   :  { %966 = vmatprep.subr.mxu0 %v6777_v8  ;;  %1037 = vmatprep.subr.mxu1 %v6778_v9 }
 0x15e   :  { %967 = vmatpush1.msra.mxu0 %v6779_v10  ;;  %1038 = vmatpush1.msra.mxu1 %v6780_v11 }
 0x15f   :  { %968 = vmatprep.subr.mxu0 %v6781_v12  ;;  %1039 = vmatprep.subr.mxu1 %v6782_v13 }
 0x160   :  { %969 = vmatpush1.msra.mxu0 %v6783_v14  ;;  %1040 = vmatpush1.msra.mxu1 %v6784_v15 }
 0x161   :  { %970 = vmatprep.subr.mxu0 %v6785_v16  ;;  %1041 = vmatprep.subr.mxu1 %v6786_v17 }
 0x162   :  { %971 = vmatpush1.msra.mxu0 %v6787_v18  ;;  %1042 = vmatpush1.msra.mxu1 %v6788_v19 }
 0x163   :  { %972 = vmatprep.subr.mxu0 %v6789_v20  ;;  %1043 = vmatprep.subr.mxu1 %v6790_v21 }
 0x164   :  { %973 = vmatpush1.msra.mxu0 %v6791_v22  ;;  %1044 = vmatpush1.msra.mxu1 %v6792_v23 }
 0x165   :  { %974 = vmatprep.subr.mxu0 %v6793_v24  ;;  %1045 = vmatprep.subr.mxu1 %v6794_v25  ;;  %v6801_v24 = vld [vmem:[#allocation89_spill] sm:$0xff] }
 0x166   :  { %975 = vmatpush1.msra.mxu0 %v6795_v26  ;;  %1008 = vmatprep.mubr.f32.mxu0 %v6698_v58 }
 0x167   :  { %1046 = vmatpush1.msra.mxu1 %v6796_v27  ;;  %1079 = vmatprep.mubr.f32.mxu1 %v6698_v58 }
 0x168   :  { %1140 = vmatprep.subr.mxu0 %v6797_v28  ;;  %1211 = vmatprep.subr.mxu1 %v6798_v29 }
 0x1e5   :  { %v618_v30 = vpop.f32.mrf.mxu0  ;;  %v689_v31 = vpop.f32.mrf.mxu1 }
 0x1e7   :  { %v620_v32 = vpop.f32.mrf.mxu0  ;;  %v691_v33 = vpop.f32.mrf.mxu1 }
 0x1e8   :  { %v698_v34 = vcombine.low %v618_v30, %v620_v32  ;;  %v699_v35 = vcombine.low %v689_v31, %v691_v33 }
 0x1ea   :  { %v706_v37 = vrot.slane %v698_v34, %v6799_v36  ;;  %v713_v43 = vrot.slane %v699_v35, %v6799_v36 }
 0x1ec   :  { %v714_v48 = vcombine.low %v706_v37, %v713_v43 }
 0x1ee   :  { %v716_v1 = vadd.f32 %v714_v48, %v6800_v0 }
 0x1f0   :  { %v3058_v2 = vmul.f32 -1.442695, %v716_v1  ;;  %v724_v4 = vrot.slane %v716_v1, 2  ;;  %v735_v6 = vrot.slane %v716_v1, 6  ;;  %v732_v9 = vrot.slane %v716_v1, 4 }
 0x1f2   :  { %3338 = vpow2.f32 %v3058_v2  ;;  %v3059_v5 = vmul.f32 -1.442695, %v724_v4  ;;  %v3060_v7 = vmul.f32 -1.442695, %v735_v6 }
 0x1f4   :  { %3340 = vpow2.f32 %v3059_v5 }
 0x1f5   :  { %3342 = vpow2.f32 %v3060_v7  ;;  %v6803_v7 = vld [vmem:[#allocation33_spill] sm:$0xff] }
 0x1ff   :  { %v3339_v8 = vpop.eup %3338 }
 0x200   :  { %v720_v10 = vadd.f32 1.0, %v3339_v8  ;;  %v6804_v8 = vld [vmem:[#allocation34_spill] sm:$0xff] }
 0x201   :  { %v3341_v11 = vpop.eup %3340 }
 0x202   :  { %3344 = vrcp.f32 %v720_v10  ;;  %v729_v12 = vadd.f32 1.0, %v3341_v11  ;;  %v3343_v22 = vpop.eup %3342  ;;  %v6806_v10 = vld [vmem:[#allocation36_spill] sm:$0xff]  ;;  %v6807_v11 = vld [vmem:[#allocation37_spill] sm:$0xff] }
 0x203   :  { %3346 = vtanh.f32 %v732_v9  ;;  %v740_v30 = vadd.f32 1.0, %v3343_v22  ;;  %v6805_v9 = vld [vmem:[#allocation35_spill] sm:$0xff]  ;;  %v6818_v22 = vld [vmem:[#allocation48_spill] sm:$0xff] }
 0x204   :  { %3348 = vrcp.f32 %v729_v12  ;;  %v6808_v12 = vld [vmem:[#allocation38_spill] sm:$0xff] }
 0x206   :  { %v814_v13 = vpop.f32.mrf.mxu0  ;;  %v885_v14 = vpop.f32.mrf.mxu1 }
 0x208   :  { %v816_v15 = vpop.f32.mrf.mxu0  ;;  %v887_v16 = vpop.f32.mrf.mxu1 }
 0x209   :  { %v894_v17 = vcombine.low %v814_v13, %v816_v15  ;;  %v895_v18 = vcombine.low %v885_v14, %v887_v16  ;;  %v6809_v13 = vld [vmem:[#allocation39_spill] sm:$0xff]  ;;  %v6810_v14 = vld [vmem:[#allocation40_spill] sm:$0xff]  ;;  %v6811_v15 = vld [vmem:[#allocation41_spill] sm:$0xff] }
 0x20a   :  { %v6814_v16 = vld [vmem:[#allocation44_spill] sm:$0xff] }
 0x20b   :  { %v902_v19 = vrot.slane %v894_v17, %v6799_v36  ;;  %v909_v20 = vrot.slane %v895_v18, %v6799_v36  ;;  %v6815_v18 = vld [vmem:[#allocation45_spill] sm:$0xff] }
 0x20d   :  { %v910_v21 = vcombine.low %v902_v19, %v909_v20  ;;  %v6816_v19 = vld [vmem:[#allocation46_spill] sm:$0xff] }
 0x20f   :  { %v3345_v23 = vpop.eup %3344  ;;  %v912_v25 = vadd.f32 %v910_v21, %v6801_v24  ;;  %v6817_v21 = vld [vmem:[#allocation47_spill] sm:$0xff] }
 0x210   :  { %v3347_v26 = vpop.eup %3346 }
 0x211   :  { %v3349_v27 = vpop.eup %3348  ;;  %v3061_v28 = vmul.f32 -1.442695, %v912_v25  ;;  %v920_v29 = vrot.slane %v912_v25, 2  ;;  %v744_v32 = vmul.f32 %v3347_v26, %v3345_v23  ;;  %v931_v35 = vrot.slane %v912_v25, 6  ;;  %v6820_v26 = vld [vmem:[#allocation50_spill] sm:$0xff] }
 0x212   :  { %v743_v31 = vmul.f32 %v3349_v27, %v4534_v47  ;;  %v928_v48 = vrot.slane %v912_v25, 4  ;;  %v6819_v25 = vld [vmem:[#allocation49_spill] sm:$0xff] }
 0x213   :  { %3350 = vpow2.f32 %v3061_v28  ;;  %v3062_v33 = vmul.f32 -1.442695, %v920_v29  ;;  %v3063_v37 = vmul.f32 -1.442695, %v931_v35  ;;  %v6821_v29 = vld [vmem:[#allocation52_spill] sm:$0xff] }
 0x214   :  { %v4690_v34 = vadd.f32 %v744_v32, %v743_v31  ;;  %v6823_v31 = vld [vmem:[#allocation54_spill] sm:$0xff] }
 0x215   :  { %3352 = vpow2.f32 %v3062_v33 }
 0x216   :  { %3354 = vrcp.f32 %v740_v30  ;;  %v6822_v30 = vld [vmem:[#allocation53_spill] sm:$0xff] }
 0x217   :  { %3356 = vtanh.f32 %v4690_v34 }
 0x218   :  { %3358 = vpow2.f32 %v3063_v37  ;;  %v6825_v37 = vld [vmem:[#allocation60_spill] sm:$0xff] }
 0x220   :  { %v3351_v43 = vpop.eup %3350 }
 0x221   :  { %v916_v1 = vadd.f32 1.0, %v3351_v43  ;;  %v6826_v43 = vld [vmem:[#allocation61_spill] sm:$0xff] }
 0x222   :  { %v3353_v2 = vpop.eup %3352 }
 0x223   :  { %v3355_v4 = vpop.eup %3354  ;;  %3360 = vrcp.f32 %v916_v1  ;;  %v925_v5 = vadd.f32 1.0, %v3353_v2  ;;  %v6833_v1 = vld [vmem:[#allocation68_spill] sm:$0xff]  ;;  %v6834_v2 = vld [vmem:[#allocation69_spill] sm:$0xff] }
 0x224   :  { %v3357_v47 = vpop.eup %3356  ;;  %3362 = vtanh.f32 %v928_v48  ;;  %v6827_v48 = vld [vmem:[#allocation62_spill] sm:$0xff] }
 0x225   :  { %3364 = vrcp.f32 %v925_v5  ;;  %v4693_v6 = vmul.f32 %v3357_v47, %v3355_v4  ;;  %v3359_v17 = vpop.eup %3358  ;;  %v6835_v4 = vld [vmem:[#allocation70_spill] sm:$0xff]  ;;  %v6836_v5 = vld [vmem:[#allocation71_spill] sm:$0xff]  ;;  %v6837_v47 = vld [vmem:[#allocation72_spill] sm:$0xff] }
 0x226   :  { %v936_v28 = vadd.f32 1.0, %v3359_v17  ;;  %v4874_v17 = vld [vmem:[%s6279_s3 + $0x178] sm:$0xff] }
 0x227   :  { %6802 = vst [vmem:[#allocation32_spill] sm:$0xff] %v4693_v6  ;;  %1009 = vmatmul.mubr.f32.vlgmr.msra.gmra.mxu0 %v4693_v6  ;;  %1080 = vmatmul.mubr.f32.vlgmr.msra.gmra.mxu1 %v4693_v6  ;;  %v5114_v6 = vld [vmem:[%s6279_s3 + $0x38] sm:$0xff] }
 0x228   :  { %1141 = vmatpush1.msra.mxu0 %v6713_v41  ;;  %1212 = vmatpush1.msra.mxu1 %v6714_v44  ;;  %v6812_v41 = vld [vmem:[#allocation42_spill] sm:$0xff]  ;;  %v6813_v44 = vld [vmem:[#allocation43_spill] sm:$0xff]  ;;  %3366 = vrcp.f32 %v936_v28  ;;  %v4934_v28 = vld [vmem:[%s6279_s3 + $0x130] sm:$0xff]  ;;  %6878 = vst [vmem:[#allocation23_spill] sm:$0xff] %v5114_v6 }
 0x229   :  { %1142 = vmatprep.subr.mxu0 %v6803_v7  ;;  %1213 = vmatprep.subr.mxu1 %v6804_v8  ;;  %v6838_v7 = vld [vmem:[#allocation73_spill] sm:$0xff]  ;;  %v6839_v8 = vld [vmem:[#allocation74_spill] sm:$0xff]  ;;  %6848 = vst [vmem:[#allocation58_spill] sm:$0xff] %v4934_v28 }
 0x22a   :  { %1143 = vmatpush1.msra.mxu0 %v6805_v9  ;;  %1214 = vmatpush1.msra.mxu1 %v6806_v10  ;;  %v6840_v9 = vld [vmem:[#allocation75_spill] sm:$0xff]  ;;  %v6841_v10 = vld [vmem:[#allocation76_spill] sm:$0xff] }
 0x22b   :  { %1144 = vmatprep.subr.mxu0 %v6807_v11  ;;  %1215 = vmatprep.subr.mxu1 %v6808_v12  ;;  %v6842_v11 = vld [vmem:[#allocation77_spill] sm:$0xff] }
 0x22c   :  { %1145 = vmatpush1.msra.mxu0 %v6809_v13  ;;  %1216 = vmatpush1.msra.mxu1 %v6810_v14  ;;  %v6843_v12 = vld [vmem:[#allocation81_spill] sm:$0xff] }
 0x22d   :  { %1146 = vmatprep.subr.mxu0 %v6811_v15  ;;  %1217 = vmatprep.subr.mxu1 %v6812_v41  ;;  %v4850_v15 = vld [vmem:[%s6279_s3 + $0x198] sm:$0xff]  ;;  %v4856_v41 = vld [vmem:[%s6279_s3 + $0x180] sm:$0xff] }
 0x22e   :  { %1147 = vmatpush1.msra.mxu0 %v6813_v44  ;;  %1218 = vmatpush1.msra.mxu1 %v6814_v16  ;;  %v4862_v44 = vld [vmem:[%s6279_s3 + $0x190] sm:$0xff]  ;;  %v4868_v16 = vld [vmem:[%s6279_s3 + $0x168] sm:$0xff] }
 0x22f   :  { %1148 = vmatprep.subr.mxu0 %v6815_v18  ;;  %1219 = vmatprep.subr.mxu1 %v6816_v19  ;;  %v4880_v18 = vld [vmem:[%s6279_s3 + $0x160] sm:$0xff]  ;;  %v4886_v19 = vld [vmem:[%s6279_s3 + $0x170] sm:$0xff] }
 0x230   :  { %v3361_v20 = vpop.eup %3360  ;;  %1149 = vmatpush1.msra.mxu0 %v6817_v21  ;;  %1220 = vmatpush1.msra.mxu1 %v6818_v22  ;;  %v4898_v21 = vld [vmem:[%s6279_s3 + $0x158] sm:$0xff]  ;;  %v4904_v22 = vld [vmem:[%s6279_s3 + $0x140] sm:$0xff] }
 0x231   :  { %v3363_v23 = vpop.eup %3362  ;;  %1150 = vmatprep.subr.mxu0 %v6819_v25  ;;  %1221 = vmatprep.subr.mxu1 %v6820_v26  ;;  %v4916_v25 = vld [vmem:[%s6279_s3 + $0x128] sm:$0xff]  ;;  %v4922_v26 = vld [vmem:[%s6279_s3 + $0x138] sm:$0xff] }
 0x232   :  { %v3365_v27 = vpop.eup %3364  ;;  %1151 = vmatpush1.msra.mxu0 %v6733_v51  ;;  %1222 = vmatpush1.msra.mxu1 %v6821_v29  ;;  %v940_v33 = vmul.f32 %v3363_v23, %v3361_v20  ;;  %v6824_v51 = vld [vmem:[#allocation59_spill] sm:$0xff]  ;;  %v4910_v23 = vld [vmem:[%s6279_s3 + $0x150] sm:$0xff]  ;;  %6845 = vst [vmem:[#allocation55_spill] sm:$0xff] %v4916_v25  ;;  %6846 = vst [vmem:[#allocation56_spill] sm:$0xff] %v4922_v26 }
 0x233   :  { %1152 = vmatprep.subr.mxu0 %v6822_v30  ;;  %1223 = vmatprep.subr.mxu1 %v6823_v31  ;;  %v939_v32 = vmul.f32 %v3365_v27, %v4572_v54  ;;  %v6832_v54 = vld [vmem:[#allocation67_spill] sm:$0xff]  ;;  %v4928_v27 = vld [vmem:[%s6279_s3 + $0x120] sm:$0xff]  ;;  %v4946_v30 = vld [vmem:[%s6279_s3 + $0x118] sm:$0xff] }
 0x234   :  { %1153 = vmatpush1.msra.mxu0 %v6737_v46  ;;  %1224 = vmatpush1.msra.mxu1 %v6738_v52  ;;  %v6828_v46 = vld [vmem:[#allocation63_spill] sm:$0xff]  ;;  %v6829_v52 = vld [vmem:[#allocation64_spill] sm:$0xff]  ;;  %6847 = vst [vmem:[#allocation57_spill] sm:$0xff] %v4928_v27  ;;  %6850 = vst [vmem:[#allocation79_spill] sm:$0xff] %v4946_v30 }
 0x235   :  { %1154 = vmatprep.subr.mxu0 %v6739_v45  ;;  %1225 = vmatprep.subr.mxu1 %v6740_v42  ;;  %v4726_v35 = vadd.f32 %v940_v33, %v939_v32  ;;  %v6830_v45 = vld [vmem:[#allocation65_spill] sm:$0xff]  ;;  %v6831_v42 = vld [vmem:[#allocation66_spill] sm:$0xff]  ;;  %v3367_v13 = vpop.eup %3366  ;;  %v4892_v20 = vld [vmem:[%s6279_s3 + $0x148] sm:$0xff] }
 0x236   :  { %1155 = vmatpush1.msra.mxu0 %v6824_v51  ;;  %1226 = vmatpush1.msra.mxu1 %v6825_v37  ;;  %v4940_v29 = vld [vmem:[%s6279_s3 + $0x108] sm:$0xff]  ;;  %v4952_v31 = vld [vmem:[%s6279_s3 + $0x100] sm:$0xff]  ;;  %v4958_v32 = vld [vmem:[%s6279_s3 + $0x110] sm:$0xff] }
 0x237   :  { %1156 = vmatprep.subr.mxu0 %v6826_v43  ;;  %1227 = vmatprep.subr.mxu1 %v6827_v48  ;;  %3368 = vtanh.f32 %v4726_v35  ;;  %6849 = vst [vmem:[#allocation78_spill] sm:$0xff] %v4940_v29  ;;  %6851 = vst [vmem:[#allocation80_spill] sm:$0xff] %v4952_v31  ;;  %v4964_v33 = vld [vmem:[%s6279_s3 + $0xe8] sm:$0xff]  ;;  %v4970_v51 = vld [vmem:[%s6279_s3 + $0xf8] sm:$0xff] }
 0x238   :  { %1157 = vmatpush1.msra.mxu0 %v6828_v46  ;;  %1228 = vmatpush1.msra.mxu1 %v6829_v52  ;;  %6852 = vst [vmem:[#allocation82_spill] sm:$0xff] %v4958_v32  ;;  %6853 = vst [vmem:[#allocation83_spill] sm:$0xff] %v4964_v33  ;;  %v4976_v37 = vld [vmem:[%s6279_s3 + $0xe0] sm:$0xff]  ;;  %v4982_v43 = vld [vmem:[%s6279_s3 + $0xf0] sm:$0xff] }
 0x239   :  { %1158 = vmatprep.subr.mxu0 %v6830_v45  ;;  %1229 = vmatprep.subr.mxu1 %v6831_v42  ;;  %6854 = vst [vmem:[#allocation84_spill] sm:$0xff] %v4970_v51  ;;  %6855 = vst [vmem:[#allocation85_spill] sm:$0xff] %v4976_v37  ;;  %v4988_v48 = vld [vmem:[%s6279_s3 + $0xc8] sm:$0xff]  ;;  %v4994_v46 = vld [vmem:[%s6279_s3 + $0xd8] sm:$0xff] }
 0x23a   :  { %1159 = vmatpush1.msra.mxu0 %v6832_v54  ;;  %1230 = vmatpush1.msra.mxu1 %v6833_v1  ;;  %6856 = vst [vmem:[#allocation86_spill] sm:$0xff] %v4982_v43  ;;  %6857 = vst [vmem:[#allocation2_spill] sm:$0xff] %v4988_v48  ;;  %v5000_v52 = vld [vmem:[%s6279_s3 + $0xc0] sm:$0xff]  ;;  %v5006_v45 = vld [vmem:[%s6279_s3 + $0xd0] sm:$0xff] }
 0x23b   :  { %1160 = vmatprep.subr.mxu0 %v6834_v2  ;;  %1231 = vmatprep.subr.mxu1 %v6835_v4  ;;  %6858 = vst [vmem:[#allocation3_spill] sm:$0xff] %v4994_v46  ;;  %6859 = vst [vmem:[#allocation4_spill] sm:$0xff] %v5000_v52  ;;  %v5012_v42 = vld [vmem:[%s6279_s3 + $0xa8] sm:$0xff]  ;;  %v5018_v54 = vld [vmem:[%s6279_s3 + $0xb8] sm:$0xff] }
 0x23c   :  { %1161 = vmatpush1.msra.mxu0 %v6836_v5  ;;  %1232 = vmatpush1.msra.mxu1 %v6837_v47  ;;  %6860 = vst [vmem:[#allocation5_spill] sm:$0xff] %v5006_v45  ;;  %6861 = vst [vmem:[#allocation6_spill] sm:$0xff] %v5012_v42  ;;  %v5024_v1 = vld [vmem:[%s6279_s3 + $0xa0] sm:$0xff]  ;;  %v5030_v2 = vld [vmem:[%s6279_s3 + $0xb0] sm:$0xff] }
 0x23d   :  { %1162 = vmatprep.subr.mxu0 %v6838_v7  ;;  %1233 = vmatprep.subr.mxu1 %v6839_v8  ;;  %6862 = vst [vmem:[#allocation7_spill] sm:$0xff] %v5018_v54  ;;  %6863 = vst [vmem:[#allocation8_spill] sm:$0xff] %v5024_v1  ;;  %v5036_v4 = vld [vmem:[%s6279_s3 + $0x88] sm:$0xff]  ;;  %v5042_v5 = vld [vmem:[%s6279_s3 + $0x98] sm:$0xff] }
 0x23e   :  { %1163 = vmatpush1.msra.mxu0 %v6840_v9  ;;  %1234 = vmatpush1.msra.mxu1 %v6841_v10  ;;  %6864 = vst [vmem:[#allocation9_spill] sm:$0xff] %v5030_v2  ;;  %6865 = vst [vmem:[#allocation10_spill] sm:$0xff] %v5036_v4  ;;  %v5048_v47 = vld [vmem:[%s6279_s3 + $0x80] sm:$0xff]  ;;  %v5054_v7 = vld [vmem:[%s6279_s3 + $0x90] sm:$0xff] }
 0x23f   :  { %1164 = vmatprep.subr.mxu0 %v6842_v11  ;;  %1235 = vmatprep.subr.mxu1 %v6760_v39  ;;  %6866 = vst [vmem:[#allocation11_spill] sm:$0xff] %v5042_v5  ;;  %6867 = vst [vmem:[#allocation12_spill] sm:$0xff] %v5048_v47  ;;  %v5060_v8 = vld [vmem:[%s6279_s3 + $0x68] sm:$0xff]  ;;  %v5066_v9 = vld [vmem:[%s6279_s3 + $0x78] sm:$0xff] }
 0x240   :  { %1165 = vmatpush1.msra.mxu0 %v6761_v38  ;;  %1236 = vmatpush1.msra.mxu1 %v6762_v49  ;;  %v4838_v38 = vld [vmem:[%s6279_s3 + $0x1b0] sm:$0xff]  ;;  %v4844_v49 = vld [vmem:[%s6279_s3 + $0x188] sm:$0xff]  ;;  %6868 = vst [vmem:[#allocation13_spill] sm:$0xff] %v5054_v7  ;;  %6869 = vst [vmem:[#allocation14_spill] sm:$0xff] %v5060_v8 }
 0x241   :  { %1166 = vmatprep.subr.mxu0 %v6843_v12  ;;  %1237 = vmatprep.subr.mxu1 %v6764_v53  ;;  %v4814_v53 = vld [vmem:[%s6279_s3 + $0x1d0] sm:$0xff]  ;;  %6870 = vst [vmem:[#allocation15_spill] sm:$0xff] %v5066_v9  ;;  %v5072_v10 = vld [vmem:[%s6279_s3 + $0x60] sm:$0xff]  ;;  %v5084_v12 = vld [vmem:[%s6279_s3 + $0x48] sm:$0xff] }
 0x242   :  { %1167 = vmatpush1.msra.mxu0 %v6765_v50  ;;  %1238 = vmatpush1.msra.mxu1 %v6766_v59  ;;  %v4808_v50 = vld [vmem:[%s6279_s3 + $0x1c0] sm:$0xff]  ;;  %v4820_v59 = vld [vmem:[%s6279_s3 + $0x1a8] sm:$0xff]  ;;  %6871 = vst [vmem:[#allocation16_spill] sm:$0xff] %v5072_v10  ;;  %v5078_v11 = vld [vmem:[%s6279_s3 + $0x70] sm:$0xff] }
 0x243   :  { %1168 = vmatprep.subr.mxu0 %v6767_v40  ;;  %1239 = vmatprep.subr.mxu1 %v6768_v56  ;;  %v4826_v40 = vld [vmem:[%s6279_s3 + $0x1b8] sm:$0xff]  ;;  %v4832_v56 = vld [vmem:[%s6279_s3 + $0x1a0] sm:$0xff]  ;;  %6872 = vst [vmem:[#allocation17_spill] sm:$0xff] %v5078_v11  ;;  %6873 = vst [vmem:[#allocation18_spill] sm:$0xff] %v5084_v12 }
 0x244   :  { %v3369_v14 = vpop.eup %3368  ;;  %1169 = vmatpush1.msra.mxu0 %v4403_v61  ;;  %1240 = vmatpush1.msra.mxu1 %v4408_v62  ;;  %v4784_v61 = vld [vmem:[%s6279_s3 + $0x1e0] sm:$0xff]  ;;  %v4790_v62 = vld [vmem:[%s6279_s3 + $0x1f0] sm:$0xff] }
 0x245   :  { %1170 = vmatprep.subr.mxu0 %v4415_v60  ;;  %1241 = vmatprep.subr.mxu1 %v4420_v3  ;;  %v4761_v39 = vmul.f32 %v3369_v14, %v3367_v13  ;;  %v4772_v60 = vld [vmem:[%s6279_s3 + $0x1e8] sm:$0xff]  ;;  %v4778_v3 = vld [vmem:[%s6279_s3 + $0x1f8] sm:$0xff]  ;;  %v5096_v14 = vld [vmem:[%s6279_s3 + $0x40] sm:$0xff] }
 0x246   :  { %1171 = vmatpush1.msra.mxu0 %v4427_v63  ;;  %1204 = vmatprep.mubr.f32.mxu0 %v6698_v58  ;;  %v4796_v63 = vld [vmem:[%s6279_s3 + $0x1c8] sm:$0xff]  ;;  %v5090_v13 = vld [vmem:[%s6279_s3 + $0x58] sm:$0xff]  ;;  %6875 = vst [vmem:[#allocation20_spill] sm:$0xff] %v5096_v14 }
 0x247   :  { %6844 = vst [vmem:[#allocation51_spill] sm:$0xff] %v4761_v39  ;;  %1242 = vmatpush1.msra.mxu1 %v4434_v57  ;;  %1275 = vmatprep.mubr.f32.mxu1 %v6698_v58  ;;  %v4802_v57 = vld [vmem:[%s6279_s3 + $0x1d8] sm:$0xff]  ;;  %6874 = vst [vmem:[#allocation19_spill] sm:$0xff] %v5090_v13 }
 0x248   :  { %1205 = vmatmul.mubr.f32.vlgmr.msra.gmra.mxu0 %v4761_v39  ;;  %1276 = vmatmul.mubr.f32.vlgmr.msra.gmra.mxu1 %v4761_v39  ;;  %v5102_v39 = vld [vmem:[%s6279_s3 + $0x50] sm:$0xff] }
 0x249   :  { %1336 = vmatprep.subr.mxu0 %v4772_v60  ;;  %1407 = vmatprep.subr.mxu1 %v4778_v3  ;;  %6876 = vst [vmem:[#allocation21_spill] sm:$0xff] %v5102_v39 }
 0x24a   :  { %1337 = vmatpush1.msra.mxu0 %v4784_v61  ;;  %1408 = vmatpush1.msra.mxu1 %v4790_v62 }
 0x24b   :  { %1338 = vmatprep.subr.mxu0 %v4796_v63  ;;  %1409 = vmatprep.subr.mxu1 %v4802_v57 }
 0x24c   :  { %1339 = vmatpush1.msra.mxu0 %v4808_v50  ;;  %1410 = vmatpush1.msra.mxu1 %v4814_v53 }
 0x24d   :  { %1340 = vmatprep.subr.mxu0 %v4820_v59  ;;  %1411 = vmatprep.subr.mxu1 %v4826_v40 }
 0x24e   :  { %1341 = vmatpush1.msra.mxu0 %v4832_v56  ;;  %1412 = vmatpush1.msra.mxu1 %v4838_v38 }
 0x24f   :  { %1342 = vmatprep.subr.mxu0 %v4844_v49  ;;  %1413 = vmatprep.subr.mxu1 %v4850_v15 }
 0x250   :  { %1343 = vmatpush1.msra.mxu0 %v4856_v41  ;;  %1414 = vmatpush1.msra.mxu1 %v4862_v44 }
 0x251   :  { %1344 = vmatprep.subr.mxu0 %v4868_v16  ;;  %1415 = vmatprep.subr.mxu1 %v4874_v17 }
 0x252   :  { %1345 = vmatpush1.msra.mxu0 %v4880_v18  ;;  %1416 = vmatpush1.msra.mxu1 %v4886_v19 }
 0x253   :  { %1346 = vmatprep.subr.mxu0 %v4892_v20  ;;  %1417 = vmatprep.subr.mxu1 %v4898_v21 }
 0x254   :  { %1347 = vmatpush1.msra.mxu0 %v4904_v22  ;;  %1418 = vmatpush1.msra.mxu1 %v4910_v23 }
 0x255   :  { %1348 = vmatprep.subr.mxu0 %v4916_v25  ;;  %1419 = vmatprep.subr.mxu1 %v4922_v26 }
 0x256   :  { %1349 = vmatpush1.msra.mxu0 %v4928_v27  ;;  %1420 = vmatpush1.msra.mxu1 %v4934_v28 }
 0x257   :  { %1350 = vmatprep.subr.mxu0 %v4940_v29  ;;  %1421 = vmatprep.subr.mxu1 %v4946_v30 }
 0x258   :  { %1351 = vmatpush1.msra.mxu0 %v4952_v31  ;;  %1422 = vmatpush1.msra.mxu1 %v4958_v32 }
 0x259   :  { %1352 = vmatprep.subr.mxu0 %v4964_v33  ;;  %1423 = vmatprep.subr.mxu1 %v4970_v51 }
 0x25a   :  { %1353 = vmatpush1.msra.mxu0 %v4976_v37  ;;  %1424 = vmatpush1.msra.mxu1 %v4982_v43 }
 0x25b   :  { %1354 = vmatprep.subr.mxu0 %v4988_v48  ;;  %1425 = vmatprep.subr.mxu1 %v4994_v46 }
 0x25c   :  { %1355 = vmatpush1.msra.mxu0 %v5000_v52  ;;  %1426 = vmatpush1.msra.mxu1 %v5006_v45 }
 0x25d   :  { %1356 = vmatprep.subr.mxu0 %v5012_v42  ;;  %1427 = vmatprep.subr.mxu1 %v5018_v54 }
 0x25e   :  { %1357 = vmatpush1.msra.mxu0 %v5024_v1  ;;  %1428 = vmatpush1.msra.mxu1 %v5030_v2 }
 0x25f   :  { %1358 = vmatprep.subr.mxu0 %v5036_v4  ;;  %1429 = vmatprep.subr.mxu1 %v5042_v5 }
 0x260   :  { %1359 = vmatpush1.msra.mxu0 %v5048_v47  ;;  %1430 = vmatpush1.msra.mxu1 %v5054_v7 }
 0x261   :  { %1360 = vmatprep.subr.mxu0 %v5060_v8  ;;  %1431 = vmatprep.subr.mxu1 %v5066_v9 }
 0x262   :  { %1361 = vmatpush1.msra.mxu0 %v5072_v10  ;;  %1432 = vmatpush1.msra.mxu1 %v5078_v11 }
 0x263   :  { %1362 = vmatprep.subr.mxu0 %v5084_v12  ;;  %1433 = vmatprep.subr.mxu1 %v5090_v13 }
 0x264   :  { %1363 = vmatpush1.msra.mxu0 %v5096_v14  ;;  %1434 = vmatpush1.msra.mxu1 %v5102_v39  ;;  %v5120_v14 = vld [vmem:[%s6279_s3 + $0x20] sm:$0xff]  ;;  %v5126_v39 = vld [vmem:[%s6279_s3 + $0x30] sm:$0xff] }
 0x265   :  { %1364 = vmatprep.subr.mxu0 %v5108_v55  ;;  %1435 = vmatprep.subr.mxu1 %v5114_v6  ;;  %6879 = vst [vmem:[#allocation24_spill] sm:$0xff] %v5120_v14  ;;  %6880 = vst [vmem:[#allocation25_spill] sm:$0xff] %v5126_v39  ;;  %v5132_v55 = vld [vmem:[%s6279_s3 + $0x8] sm:$0xff]  ;;  %v5138_v6 = vld [vmem:[%s6279_s3 + $0x18] sm:$0xff] }
 0x266   :  { %1365 = vmatpush1.msra.mxu0 %v5120_v14  ;;  %1436 = vmatpush1.msra.mxu1 %v5126_v39  ;;  %6881 = vst [vmem:[#allocation26_spill] sm:$0xff] %v5132_v55  ;;  %6882 = vst [vmem:[#allocation27_spill] sm:$0xff] %v5138_v6  ;;  %v5144_v14 = vld [vmem:[%s6279_s3] sm:$0xff] }
 0x267   :  { %1366 = vmatprep.subr.mxu0 %v5132_v55  ;;  %1437 = vmatprep.subr.mxu1 %v5138_v6  ;;  %6883 = vst [vmem:[#allocation28_spill] sm:$0xff] %v5144_v14  ;;  %v5151_v55 = vld [vmem:[%s6279_s3 + $0x10] sm:$0xff]  ;;  %v5158_v6 = vld [vmem:[%s6279_s3 + $0x3e8] sm:$0xff] }
 0x268   :  { %1367 = vmatpush1.msra.mxu0 %v5144_v14  ;;  %1400 = vmatprep.mubr.f32.mxu0 %v6698_v58  ;;  %6884 = vst [vmem:[#allocation29_spill] sm:$0xff] %v5151_v55  ;;  %6885 = vst [vmem:[#allocation30_spill] sm:$0xff] %v5158_v6  ;;  %v5164_v14 = vld [vmem:[%s6279_s3 + $0x3f8] sm:$0xff] }
 0x269   :  { %1438 = vmatpush1.msra.mxu1 %v5151_v55  ;;  %1471 = vmatprep.mubr.f32.mxu1 %v6698_v58  ;;  %6886 = vst [vmem:[#allocation88_spill] sm:$0xff] %v5164_v14 }
 0x26a   :  { %1532 = vmatprep.subr.mxu0 %v5158_v6  ;;  %1603 = vmatprep.subr.mxu1 %v5164_v14 }
 0x2e7   :  { %v1010_v39 = vpop.f32.mrf.mxu0  ;;  %v1081_v13 = vpop.f32.mrf.mxu1 }
 0x2e9   :  { %v1012_v12 = vpop.f32.mrf.mxu0  ;;  %v1083_v55 = vpop.f32.mrf.mxu1 }
 0x2ea   :  { %v1090_v11 = vcombine.low %v1010_v39, %v1012_v12  ;;  %v1091_v10 = vcombine.low %v1081_v13, %v1083_v55 }
 0x2ec   :  { %v1098_v9 = vrot.slane %v1090_v11, %v6799_v36  ;;  %v1105_v8 = vrot.slane %v1091_v10, %v6799_v36 }
 0x2ee   :  { %v1106_v7 = vcombine.low %v1098_v9, %v1105_v8 }
 0x2f0   :  { %v1108_v6 = vadd.f32 %v1106_v7, %v6800_v0 }
 0x2f2   :  { %v3064_v47 = vmul.f32 -1.442695, %v1108_v6  ;;  %v1116_v5 = vrot.slane %v1108_v6, 2  ;;  %v1127_v2 = vrot.slane %v1108_v6, 6  ;;  %v1124_v54 = vrot.slane %v1108_v6, 4 }
 0x2f4   :  { %3370 = vpow2.f32 %v3064_v47  ;;  %v3065_v4 = vmul.f32 -1.442695, %v1116_v5  ;;  %v3066_v14 = vmul.f32 -1.442695, %v1127_v2 }
 0x2f6   :  { %3372 = vpow2.f32 %v3065_v4 }
 0x2f7   :  { %3374 = vpow2.f32 %v3066_v14 }
 0x301   :  { %v3371_v1 = vpop.eup %3370 }
 0x302   :  { %v1112_v42 = vadd.f32 1.0, %v3371_v1 }
 0x303   :  { %v3373_v45 = vpop.eup %3372 }
 0x304   :  { %3376 = vrcp.f32 %v1112_v42  ;;  %v1121_v55 = vadd.f32 1.0, %v3373_v45  ;;  %v3375_v47 = vpop.eup %3374 }
 0x305   :  { %3378 = vtanh.f32 %v1124_v54  ;;  %v1132_v12 = vadd.f32 1.0, %v3375_v47  ;;  %v5184_v47 = vld [vmem:[%s6279_s3 + $0x3e0] sm:$0xff] }
 0x306   :  { %3380 = vrcp.f32 %v1121_v55 }
 0x308   :  { %v1206_v39 = vpop.f32.mrf.mxu0  ;;  %v1277_v8 = vpop.f32.mrf.mxu1 }
 0x30a   :  { %v1208_v9 = vpop.f32.mrf.mxu0  ;;  %v1279_v0 = vpop.f32.mrf.mxu1 }
 0x30b   :  { %v1286_v7 = vcombine.low %v1206_v39, %v1208_v9  ;;  %v1287_v10 = vcombine.low %v1277_v8, %v1279_v0 }
 0x30d   :  { %v1294_v5 = vrot.slane %v1286_v7, %v6799_v36  ;;  %v1301_v4 = vrot.slane %v1287_v10, %v6799_v36 }
 0x30f   :  { %v1302_v2 = vcombine.low %v1294_v5, %v1301_v4 }
 0x311   :  { %v3377_v6 = vpop.eup %3376  ;;  %v1304_v1 = vadd.f32 %v1302_v2, %v6801_v24 }
 0x312   :  { %v3379_v11 = vpop.eup %3378 }
 0x313   :  { %v3381_v42 = vpop.eup %3380  ;;  %v3067_v45 = vmul.f32 -1.442695, %v1304_v1  ;;  %v1312_v54 = vrot.slane %v1304_v1, 2  ;;  %v1136_v14 = vmul.f32 %v3379_v11, %v3377_v6  ;;  %v1323_v8 = vrot.slane %v1304_v1, 6  ;;  %v5190_v6 = vld [vmem:[%s6279_s3 + $0x3f0] sm:$0xff]  ;;  %v5202_v11 = vld [vmem:[%s6279_s3 + $0x3d8] sm:$0xff] }
 0x314   :  { %v1135_v13 = vmul.f32 %v3381_v42, %v4690_v34  ;;  %v1320_v24 = vrot.slane %v1304_v1, 4  ;;  %v5196_v1 = vld [vmem:[%s6279_s3 + $0x3c8] sm:$0xff]  ;;  %v5208_v42 = vld [vmem:[%s6279_s3 + $0x3c0] sm:$0xff] }
 0x315   :  { %3382 = vpow2.f32 %v3067_v45  ;;  %v3068_v55 = vmul.f32 -1.442695, %v1312_v54  ;;  %v3069_v9 = vmul.f32 -1.442695, %v1323_v8  ;;  %v5214_v45 = vld [vmem:[%s6279_s3 + $0x3d0] sm:$0xff]  ;;  %v5220_v54 = vld [vmem:[%s6279_s3 + $0x3a8] sm:$0xff] }
 0x316   :  { %v5174_v39 = vadd.f32 %v1136_v14, %v1135_v13  ;;  %v5232_v13 = vld [vmem:[%s6279_s3 + $0x3a0] sm:$0xff]  ;;  %v5238_v14 = vld [vmem:[%s6279_s3 + $0x3b0] sm:$0xff]  ;;  %v5250_v8 = vld [vmem:[%s6279_s3 + $0x398] sm:$0xff] }
 0x317   :  { %3384 = vpow2.f32 %v3068_v55  ;;  %v5244_v55 = vld [vmem:[%s6279_s3 + $0x388] sm:$0xff] }
 0x318   :  { %3386 = vrcp.f32 %v1132_v12  ;;  %v5226_v12 = vld [vmem:[%s6279_s3 + $0x3b8] sm:$0xff] }
 0x319   :  { %3388 = vtanh.f32 %v5174_v39 }
 0x31a   :  { %3390 = vpow2.f32 %v3069_v9  ;;  %v5256_v9 = vld [vmem:[%s6279_s3 + $0x380] sm:$0xff] }
 0x31b   :  { %6888 = vst [vmem:[#allocation33_spill] sm:$0xff] %v5256_v9 }
 0x322   :  { %v3383_v0 = vpop.eup %3382 }
 0x323   :  { %v1308_v7 = vadd.f32 1.0, %v3383_v0  ;;  %v5262_v0 = vld [vmem:[%s6279_s3 + $0x390] sm:$0xff] }
 0x324   :  { %v3385_v10 = vpop.eup %3384  ;;  %6889 = vst [vmem:[#allocation34_spill] sm:$0xff] %v5262_v0 }
 0x325   :  { %v3387_v5 = vpop.eup %3386  ;;  %3392 = vrcp.f32 %v1308_v7  ;;  %v1317_v4 = vadd.f32 1.0, %v3385_v10  ;;  %v5268_v7 = vld [vmem:[%s6279_s3 + $0x368] sm:$0xff]  ;;  %v5274_v10 = vld [vmem:[%s6279_s3 + $0x378] sm:$0xff] }
 0x326   :  { %v3389_v34 = vpop.eup %3388  ;;  %3394 = vtanh.f32 %v1320_v24  ;;  %6890 = vst [vmem:[#allocation35_spill] sm:$0xff] %v5268_v7  ;;  %6891 = vst [vmem:[#allocation36_spill] sm:$0xff] %v5274_v10 }
 0x327   :  { %3396 = vrcp.f32 %v1317_v4  ;;  %v5177_v2 = vmul.f32 %v3389_v34, %v3387_v5  ;;  %v3391_v24 = vpop.eup %3390  ;;  %v5280_v4 = vld [vmem:[%s6279_s3 + $0x360] sm:$0xff]  ;;  %v5286_v34 = vld [vmem:[%s6279_s3 + $0x370] sm:$0xff] }
 0x328   :  { %6892 = vst [vmem:[#allocation37_spill] sm:$0xff] %v5280_v4  ;;  %6893 = vst [vmem:[#allocation38_spill] sm:$0xff] %v5286_v34 }
 0x329   :  { %6887 = vst [vmem:[#allocation89_spill] sm:$0xff] %v5177_v2  ;;  %1401 = vmatmul.mubr.f32.vlgmr.msra.gmra.mxu0 %v5177_v2  ;;  %1472 = vmatmul.mubr.f32.vlgmr.msra.gmra.mxu1 %v5177_v2 }
 0x32a   :  { %1533 = vmatpush1.msra.mxu0 %v5184_v47  ;;  %1604 = vmatpush1.msra.mxu1 %v5190_v6 }
 0x32b   :  { %1534 = vmatprep.subr.mxu0 %v5196_v1  ;;  %1605 = vmatprep.subr.mxu1 %v5202_v11 }
 0x32c   :  { %1535 = vmatpush1.msra.mxu0 %v5208_v42  ;;  %1606 = vmatpush1.msra.mxu1 %v5214_v45 }
 0x32d   :  { %1536 = vmatprep.subr.mxu0 %v5220_v54  ;;  %1607 = vmatprep.subr.mxu1 %v5226_v12 }
 0x32e   :  { %1537 = vmatpush1.msra.mxu0 %v5232_v13  ;;  %1608 = vmatpush1.msra.mxu1 %v5238_v14 }
 0x32f   :  { %1538 = vmatprep.subr.mxu0 %v5244_v55  ;;  %1609 = vmatprep.subr.mxu1 %v5250_v8 }
 0x330   :  { %1539 = vmatpush1.msra.mxu0 %v5256_v9  ;;  %1610 = vmatpush1.msra.mxu1 %v5262_v0  ;;  %v1328_v0 = vadd.f32 1.0, %v3391_v24  ;;  %v5322_v24 = vld [vmem:[%s6279_s3 + $0x338] sm:$0xff] }
 0x331   :  { %1540 = vmatprep.subr.mxu0 %v5268_v7  ;;  %1611 = vmatprep.subr.mxu1 %v5274_v10  ;;  %v5292_v10 = vld [vmem:[%s6279_s3 + $0x348] sm:$0xff]  ;;  %v5298_v7 = vld [vmem:[%s6279_s3 + $0x358] sm:$0xff]  ;;  %6899 = vst [vmem:[#allocation44_spill] sm:$0xff] %v5322_v24 }
 0x332   :  { %v3393_v5 = vpop.eup %3392  ;;  %1541 = vmatpush1.msra.mxu0 %v5280_v4  ;;  %1612 = vmatpush1.msra.mxu1 %v5286_v34  ;;  %6894 = vst [vmem:[#allocation39_spill] sm:$0xff] %v5292_v10  ;;  %6895 = vst [vmem:[#allocation40_spill] sm:$0xff] %v5298_v7  ;;  %v5304_v34 = vld [vmem:[%s6279_s3 + $0x340] sm:$0xff]  ;;  %3398 = vrcp.f32 %v1328_v0  ;;  %v5373_v0 = vld [vmem:[%s6279_s3 + $0x2f8] sm:$0xff] }
 0x333   :  { %v3395_v2 = vpop.eup %3394  ;;  %1542 = vmatprep.subr.mxu0 %v5292_v10  ;;  %1613 = vmatprep.subr.mxu1 %v5298_v7  ;;  %6896 = vst [vmem:[#allocation41_spill] sm:$0xff] %v5304_v34  ;;  %v5310_v10 = vld [vmem:[%s6279_s3 + $0x350] sm:$0xff]  ;;  %v5316_v7 = vld [vmem:[%s6279_s3 + $0x328] sm:$0xff]  ;;  %6905 = vst [vmem:[#allocation50_spill] sm:$0xff] %v5373_v0 }
 0x334   :  { %v3397_v4 = vpop.eup %3396  ;;  %1543 = vmatpush1.msra.mxu0 %v5304_v34  ;;  %6897 = vst [vmem:[#allocation42_spill] sm:$0xff] %v5310_v10  ;;  %1614 = vmatpush1.msra.mxu1 %v5310_v10  ;;  %6898 = vst [vmem:[#allocation43_spill] sm:$0xff] %v5316_v7  ;;  %v1332_v9 = vmul.f32 %v3395_v2, %v3393_v5  ;;  %v5329_v10 = vld [vmem:[%s6279_s3 + $0x320] sm:$0xff] }
 0x335   :  { %1544 = vmatprep.subr.mxu0 %v5316_v7  ;;  %1615 = vmatprep.subr.mxu1 %v5322_v24  ;;  %v1331_v34 = vmul.f32 %v3397_v4, %v4726_v35  ;;  %v5335_v7 = vld [vmem:[%s6279_s3 + $0x330] sm:$0xff]  ;;  %v5341_v24 = vld [vmem:[%s6279_s3 + $0x308] sm:$0xff]  ;;  %v5347_v35 = vld [vmem:[%s6279_s3 + $0x318] sm:$0xff] }
 0x336   :  { %1545 = vmatpush1.msra.mxu0 %v5329_v10  ;;  %1616 = vmatpush1.msra.mxu1 %v5335_v7  ;;  %6900 = vst [vmem:[#allocation45_spill] sm:$0xff] %v5341_v24  ;;  %6901 = vst [vmem:[#allocation46_spill] sm:$0xff] %v5347_v35  ;;  %v5355_v5 = vld [vmem:[%s6279_s3 + $0x300] sm:$0xff]  ;;  %v5361_v4 = vld [vmem:[%s6279_s3 + $0x310] sm:$0xff] }
 0x337   :  { %1546 = vmatprep.subr.mxu0 %v5341_v24  ;;  %1617 = vmatprep.subr.mxu1 %v5347_v35  ;;  %v5350_v2 = vadd.f32 %v1332_v9, %v1331_v34  ;;  %6902 = vst [vmem:[#allocation47_spill] sm:$0xff] %v5355_v5  ;;  %6903 = vst [vmem:[#allocation48_spill] sm:$0xff] %v5361_v4  ;;  %v5367_v9 = vld [vmem:[%s6279_s3 + $0x2e8] sm:$0xff]  ;;  %v5380_v34 = vld [vmem:[%s6279_s3 + $0x2e0] sm:$0xff] }
 0x338   :  { %1547 = vmatpush1.msra.mxu0 %v5355_v5  ;;  %1618 = vmatpush1.msra.mxu1 %v5361_v4  ;;  %6904 = vst [vmem:[#allocation49_spill] sm:$0xff] %v5367_v9  ;;  %6906 = vst [vmem:[#allocation52_spill] sm:$0xff] %v5380_v34  ;;  %v5398_v4 = vld [vmem:[%s6279_s3 + $0x2d8] sm:$0xff]  ;;  %v5512_v5 = vld [vmem:[%s6279_s3 + $0x228] sm:$0xff] }
 0x339   :  { %1548 = vmatprep.subr.mxu0 %v5367_v9  ;;  %1619 = vmatprep.subr.mxu1 %v5373_v0  ;;  %3400 = vtanh.f32 %v5350_v2  ;;  %v5386_v9 = vld [vmem:[%s6279_s3 + $0x2f0] sm:$0xff]  ;;  %v5392_v0 = vld [vmem:[%s6279_s3 + $0x2c8] sm:$0xff]  ;;  %6909 = vst [vmem:[#allocation59_spill] sm:$0xff] %v5398_v4  ;;  %6928 = vst [vmem:[#allocation81_spill] sm:$0xff] %v5512_v5 }
 0x33a   :  { %1549 = vmatpush1.msra.mxu0 %v5380_v34  ;;  %6907 = vst [vmem:[#allocation53_spill] sm:$0xff] %v5386_v9  ;;  %1620 = vmatpush1.msra.mxu1 %v5386_v9  ;;  %6908 = vst [vmem:[#allocation54_spill] sm:$0xff] %v5392_v0  ;;  %v5404_v34 = vld [vmem:[%s6279_s3 + $0x2c0] sm:$0xff]  ;;  %v5410_v9 = vld [vmem:[%s6279_s3 + $0x2d0] sm:$0xff] }
 0x33b   :  { %1550 = vmatprep.subr.mxu0 %v5392_v0  ;;  %1621 = vmatprep.subr.mxu1 %v5398_v4  ;;  %6910 = vst [vmem:[#allocation60_spill] sm:$0xff] %v5404_v34  ;;  %6911 = vst [vmem:[#allocation61_spill] sm:$0xff] %v5410_v9  ;;  %v5416_v0 = vld [vmem:[%s6279_s3 + $0x2a8] sm:$0xff]  ;;  %v5422_v4 = vld [vmem:[%s6279_s3 + $0x2b8] sm:$0xff] }
 0x33c   :  { %1551 = vmatpush1.msra.mxu0 %v5404_v34  ;;  %1622 = vmatpush1.msra.mxu1 %v5410_v9  ;;  %6912 = vst [vmem:[#allocation62_spill] sm:$0xff] %v5416_v0  ;;  %6913 = vst [vmem:[#allocation63_spill] sm:$0xff] %v5422_v4  ;;  %v5428_v34 = vld [vmem:[%s6279_s3 + $0x2a0] sm:$0xff]  ;;  %v5434_v9 = vld [vmem:[%s6279_s3 + $0x2b0] sm:$0xff] }
 0x33d   :  { %1552 = vmatprep.subr.mxu0 %v5416_v0  ;;  %1623 = vmatprep.subr.mxu1 %v5422_v4  ;;  %6914 = vst [vmem:[#allocation64_spill] sm:$0xff] %v5428_v34  ;;  %6915 = vst [vmem:[#allocation65_spill] sm:$0xff] %v5434_v9  ;;  %v5440_v0 = vld [vmem:[%s6279_s3 + $0x288] sm:$0xff]  ;;  %v5446_v4 = vld [vmem:[%s6279_s3 + $0x298] sm:$0xff] }
 0x33e   :  { %1553 = vmatpush1.msra.mxu0 %v5428_v34  ;;  %1624 = vmatpush1.msra.mxu1 %v5434_v9  ;;  %6916 = vst [vmem:[#allocation66_spill] sm:$0xff] %v5440_v0  ;;  %6917 = vst [vmem:[#allocation67_spill] sm:$0xff] %v5446_v4  ;;  %v5452_v34 = vld [vmem:[%s6279_s3 + $0x280] sm:$0xff]  ;;  %v5458_v9 = vld [vmem:[%s6279_s3 + $0x290] sm:$0xff] }
 0x33f   :  { %1554 = vmatprep.subr.mxu0 %v5440_v0  ;;  %1625 = vmatprep.subr.mxu1 %v5446_v4  ;;  %6918 = vst [vmem:[#allocation68_spill] sm:$0xff] %v5452_v34  ;;  %6919 = vst [vmem:[#allocation69_spill] sm:$0xff] %v5458_v9  ;;  %v5464_v0 = vld [vmem:[%s6279_s3 + $0x268] sm:$0xff]  ;;  %v5470_v4 = vld [vmem:[%s6279_s3 + $0x278] sm:$0xff] }
 0x340   :  { %1555 = vmatpush1.msra.mxu0 %v5452_v34  ;;  %1626 = vmatpush1.msra.mxu1 %v5458_v9  ;;  %6920 = vst [vmem:[#allocation70_spill] sm:$0xff] %v5464_v0  ;;  %6921 = vst [vmem:[#allocation71_spill] sm:$0xff] %v5470_v4  ;;  %v5476_v34 = vld [vmem:[%s6279_s3 + $0x260] sm:$0xff]  ;;  %v5482_v9 = vld [vmem:[%s6279_s3 + $0x270] sm:$0xff] }
 0x341   :  { %1556 = vmatprep.subr.mxu0 %v5464_v0  ;;  %1627 = vmatprep.subr.mxu1 %v5470_v4  ;;  %6922 = vst [vmem:[#allocation72_spill] sm:$0xff] %v5476_v34  ;;  %6923 = vst [vmem:[#allocation73_spill] sm:$0xff] %v5482_v9  ;;  %v5488_v0 = vld [vmem:[%s6279_s3 + $0x248] sm:$0xff]  ;;  %v5494_v4 = vld [vmem:[%s6279_s3 + $0x258] sm:$0xff] }
 0x342   :  { %1557 = vmatpush1.msra.mxu0 %v5476_v34  ;;  %1628 = vmatpush1.msra.mxu1 %v5482_v9  ;;  %6924 = vst [vmem:[#allocation74_spill] sm:$0xff] %v5488_v0  ;;  %6925 = vst [vmem:[#allocation75_spill] sm:$0xff] %v5494_v4  ;;  %v5500_v34 = vld [vmem:[%s6279_s3 + $0x240] sm:$0xff]  ;;  %v5506_v9 = vld [vmem:[%s6279_s3 + $0x250] sm:$0xff] }
 0x343   :  { %1558 = vmatprep.subr.mxu0 %v5488_v0  ;;  %1629 = vmatprep.subr.mxu1 %v5494_v4  ;;  %6926 = vst [vmem:[#allocation76_spill] sm:$0xff] %v5500_v34  ;;  %6927 = vst [vmem:[#allocation77_spill] sm:$0xff] %v5506_v9  ;;  %v3399_v0 = vpop.eup %3398  ;;  %v5518_v4 = vld [vmem:[%s6279_s3 + $0x238] sm:$0xff]  ;;  %v5530_v35 = vld [vmem:[%s6279_s3 + $0x230] sm:$0xff] }
 0x344   :  { %1559 = vmatpush1.msra.mxu0 %v5500_v34  ;;  %1630 = vmatpush1.msra.mxu1 %v5506_v9  ;;  %6929 = vst [vmem:[#allocation91_spill] sm:$0xff] %v5518_v4  ;;  %v5524_v9 = vld [vmem:[%s6279_s3 + $0x220] sm:$0xff]  ;;  %6931 = vst [vmem:[#allocation93_spill] sm:$0xff] %v5530_v35 }
 0x345   :  { %1560 = vmatprep.subr.mxu0 %v5512_v5  ;;  %1631 = vmatprep.subr.mxu1 %v5518_v4  ;;  %6930 = vst [vmem:[#allocation92_spill] sm:$0xff] %v5524_v9  ;;  %v5536_v5 = vld [vmem:[%s6279_s3 + $0x208] sm:$0xff]  ;;  %v5542_v4 = vld [vmem:[%s6279_s3 + $0x218] sm:$0xff] }
 0x346   :  { %v3401_v34 = vpop.eup %3400  ;;  %1561 = vmatpush1.msra.mxu0 %v5524_v9  ;;  %1632 = vmatpush1.msra.mxu1 %v5530_v35  ;;  %6932 = vst [vmem:[#allocation94_spill] sm:$0xff] %v5536_v5  ;;  %v5550_v35 = vld [vmem:[%s6279_s3 + $0x200] sm:$0xff] }
 0x347   :  { %1562 = vmatprep.subr.mxu0 %v5536_v5  ;;  %1633 = vmatprep.subr.mxu1 %v5542_v4  ;;  %v5545_v9 = vmul.f32 %v3401_v34, %v3399_v0  ;;  %v5557_v5 = vld [vmem:[%s6279_s3 + $0x210] sm:$0xff]  ;;  %v6934_v0 = vld [vmem:[#allocation5_spill] sm:$0xff]  ;;  %v6935_v34 = vld [vmem:[#allocation6_spill] sm:$0xff] }
 0x348   :  { %1563 = vmatpush1.msra.mxu0 %v5550_v35  ;;  %1596 = vmatprep.mubr.f32.mxu0 %v6698_v58 }
 0x349   :  { %6933 = vst [vmem:[#allocation95_spill] sm:$0xff] %v5545_v9  ;;  %1634 = vmatpush1.msra.mxu1 %v5557_v5  ;;  %1667 = vmatprep.mubr.f32.mxu1 %v6698_v58 }
 0x34a   :  { %1597 = vmatmul.mubr.f32.vlgmr.msra.gmra.mxu0 %v5545_v9  ;;  %1668 = vmatmul.mubr.f32.vlgmr.msra.gmra.mxu1 %v5545_v9  ;;  %v6936_v9 = vld [vmem:[#allocation7_spill] sm:$0xff] }
 0x34b   :  { %1728 = vmatprep.subr.mxu0 %v4772_v60  ;;  %1799 = vmatprep.subr.mxu1 %v4778_v3 }
 0x34c   :  { %1729 = vmatpush1.msra.mxu0 %v4784_v61  ;;  %1800 = vmatpush1.msra.mxu1 %v4790_v62 }
 0x34d   :  { %1730 = vmatprep.subr.mxu0 %v4796_v63  ;;  %1801 = vmatprep.subr.mxu1 %v4802_v57 }
 0x34e   :  { %1731 = vmatpush1.msra.mxu0 %v4808_v50  ;;  %1802 = vmatpush1.msra.mxu1 %v4814_v53 }
 0x34f   :  { %1732 = vmatprep.subr.mxu0 %v4820_v59  ;;  %1803 = vmatprep.subr.mxu1 %v4826_v40 }
 0x350   :  { %1733 = vmatpush1.msra.mxu0 %v4832_v56  ;;  %1804 = vmatpush1.msra.mxu1 %v4838_v38 }
 0x351   :  { %1734 = vmatprep.subr.mxu0 %v4844_v49  ;;  %1805 = vmatprep.subr.mxu1 %v4850_v15 }
 0x352   :  { %1735 = vmatpush1.msra.mxu0 %v4856_v41  ;;  %1806 = vmatpush1.msra.mxu1 %v4862_v44 }
 0x353   :  { %1736 = vmatprep.subr.mxu0 %v4868_v16  ;;  %1807 = vmatprep.subr.mxu1 %v4874_v17 }
 0x354   :  { %1737 = vmatpush1.msra.mxu0 %v4880_v18  ;;  %1808 = vmatpush1.msra.mxu1 %v4886_v19 }
 0x355   :  { %1738 = vmatprep.subr.mxu0 %v4892_v20  ;;  %1809 = vmatprep.subr.mxu1 %v4898_v21 }
 0x356   :  { %1739 = vmatpush1.msra.mxu0 %v4904_v22  ;;  %1810 = vmatpush1.msra.mxu1 %v4910_v23 }
 0x357   :  { %1740 = vmatprep.subr.mxu0 %v4916_v25  ;;  %1811 = vmatprep.subr.mxu1 %v4922_v26 }
 0x358   :  { %1741 = vmatpush1.msra.mxu0 %v4928_v27  ;;  %1812 = vmatpush1.msra.mxu1 %v4934_v28 }
 0x359   :  { %1742 = vmatprep.subr.mxu0 %v4940_v29  ;;  %1813 = vmatprep.subr.mxu1 %v4946_v30 }
 0x35a   :  { %1743 = vmatpush1.msra.mxu0 %v4952_v31  ;;  %1814 = vmatpush1.msra.mxu1 %v4958_v32  ;;  %v6937_v31 = vld [vmem:[#allocation8_spill] sm:$0xff] }
 0x35b   :  { %1744 = vmatprep.subr.mxu0 %v4964_v33  ;;  %1815 = vmatprep.subr.mxu1 %v4970_v51  ;;  %v6938_v33 = vld [vmem:[#allocation9_spill] sm:$0xff]  ;;  %v6939_v51 = vld [vmem:[#allocation10_spill] sm:$0xff] }
 0x35c   :  { %1745 = vmatpush1.msra.mxu0 %v4976_v37  ;;  %1816 = vmatpush1.msra.mxu1 %v4982_v43  ;;  %v6940_v37 = vld [vmem:[#allocation11_spill] sm:$0xff]  ;;  %v6941_v43 = vld [vmem:[#allocation12_spill] sm:$0xff] }
 0x35d   :  { %1746 = vmatprep.subr.mxu0 %v4988_v48  ;;  %1817 = vmatprep.subr.mxu1 %v4994_v46  ;;  %v6942_v48 = vld [vmem:[#allocation13_spill] sm:$0xff]  ;;  %v6943_v46 = vld [vmem:[#allocation14_spill] sm:$0xff] }
 0x35e   :  { %1747 = vmatpush1.msra.mxu0 %v5000_v52  ;;  %1818 = vmatpush1.msra.mxu1 %v6934_v0  ;;  %v6944_v52 = vld [vmem:[#allocation15_spill] sm:$0xff]  ;;  %v6945_v0 = vld [vmem:[#allocation16_spill] sm:$0xff] }
 0x35f   :  { %1748 = vmatprep.subr.mxu0 %v6935_v34  ;;  %1819 = vmatprep.subr.mxu1 %v6936_v9  ;;  %v6946_v34 = vld [vmem:[#allocation17_spill] sm:$0xff]  ;;  %v6947_v9 = vld [vmem:[#allocation18_spill] sm:$0xff] }
 0x360   :  { %1749 = vmatpush1.msra.mxu0 %v6937_v31  ;;  %1820 = vmatpush1.msra.mxu1 %v6938_v33  ;;  %v6948_v31 = vld [vmem:[#allocation19_spill] sm:$0xff]  ;;  %v6949_v33 = vld [vmem:[#allocation20_spill] sm:$0xff] }
 0x361   :  { %1750 = vmatprep.subr.mxu0 %v6939_v51  ;;  %1821 = vmatprep.subr.mxu1 %v6940_v37  ;;  %v6950_v51 = vld [vmem:[#allocation21_spill] sm:$0xff]  ;;  %v6951_v37 = vld [vmem:[#allocation22_spill] sm:$0xff] }
 0x362   :  { %1751 = vmatpush1.msra.mxu0 %v6941_v43  ;;  %1822 = vmatpush1.msra.mxu1 %v6942_v48  ;;  %v6952_v43 = vld [vmem:[#allocation23_spill] sm:$0xff]  ;;  %v6953_v48 = vld [vmem:[#allocation24_spill] sm:$0xff] }
 0x363   :  { %1752 = vmatprep.subr.mxu0 %v6943_v46  ;;  %1823 = vmatprep.subr.mxu1 %v6944_v52  ;;  %v6954_v46 = vld [vmem:[#allocation25_spill] sm:$0xff]  ;;  %v6955_v52 = vld [vmem:[#allocation26_spill] sm:$0xff] }
 0x364   :  { %1753 = vmatpush1.msra.mxu0 %v6945_v0  ;;  %1824 = vmatpush1.msra.mxu1 %v6946_v34  ;;  %v6956_v0 = vld [vmem:[#allocation27_spill] sm:$0xff]  ;;  %v6957_v34 = vld [vmem:[#allocation28_spill] sm:$0xff] }
 0x365   :  { %1754 = vmatprep.subr.mxu0 %v6947_v9  ;;  %1825 = vmatprep.subr.mxu1 %v6948_v31  ;;  %v6958_v9 = vld [vmem:[#allocation29_spill] sm:$0xff] }
 0x366   :  { %1755 = vmatpush1.msra.mxu0 %v6949_v33  ;;  %1826 = vmatpush1.msra.mxu1 %v6950_v51  ;;  %v6959_v33 = vld [vmem:[#allocation30_spill] sm:$0xff] }
 0x367   :  { %1756 = vmatprep.subr.mxu0 %v6951_v37  ;;  %1827 = vmatprep.subr.mxu1 %v6952_v43  ;;  %v6960_v37 = vld [vmem:[#allocation88_spill] sm:$0xff] }
 0x368   :  { %1757 = vmatpush1.msra.mxu0 %v6953_v48  ;;  %1828 = vmatpush1.msra.mxu1 %v6954_v46 }
 0x369   :  { %1758 = vmatprep.subr.mxu0 %v6955_v52  ;;  %1829 = vmatprep.subr.mxu1 %v6956_v0 }
 0x36a   :  { %1759 = vmatpush1.msra.mxu0 %v6957_v34  ;;  %1792 = vmatprep.mubr.f32.mxu0 %v6698_v58 }
 0x36b   :  { %1830 = vmatpush1.msra.mxu1 %v6958_v9  ;;  %1863 = vmatprep.mubr.f32.mxu1 %v6698_v58  ;;  %v5636_v9 = vld [vmem:[%s6281_s0] sm:$0xff] }
 0x36c   :  { %1924 = vmatprep.subr.mxu0 %v6959_v33  ;;  %1995 = vmatprep.subr.mxu1 %v6960_v37  ;;  %6961 = vst [vmem:[#allocation96_spill] sm:$0xff] %v5636_v9 }
 0x3e9   :  { %v1402_v43 = vpop.f32.mrf.mxu0  ;;  %v1473_v48 = vpop.f32.mrf.mxu1 }
 0x3eb   :  { %v1404_v51 = vpop.f32.mrf.mxu0  ;;  %v1475_v46 = vpop.f32.mrf.mxu1 }
 0x3ec   :  { %v1482_v31 = vcombine.low %v1402_v43, %v1404_v51  ;;  %v1483_v52 = vcombine.low %v1473_v48, %v1475_v46 }
 0x3ee   :  { %v1490_v0 = vrot.slane %v1482_v31, %v6799_v36  ;;  %v1497_v34 = vrot.slane %v1483_v52, %v6799_v36 }
 0x3f0   :  { %v1498_v32 = vcombine.low %v1490_v0, %v1497_v34 }
 0x3f2   :  { %v1500_v33 = vadd.f32 %v5636_v9, %v1498_v32 }
 0x3f4   :  { %v3070_v29 = vmul.f32 -1.442695, %v1500_v33  ;;  %v1508_v37 = vrot.slane %v1500_v33, 2  ;;  %v1519_v27 = vrot.slane %v1500_v33, 6  ;;  %v1516_v48 = vrot.slane %v1500_v33, 4 }
 0x3f6   :  { %3402 = vpow2.f32 %v3070_v29  ;;  %v3071_v30 = vmul.f32 -1.442695, %v1508_v37  ;;  %v3072_v51 = vmul.f32 -1.442695, %v1519_v27 }
 0x3f8   :  { %3404 = vpow2.f32 %v3071_v30 }
 0x3f9   :  { %3406 = vpow2.f32 %v3072_v51  ;;  %v5644_v51 = vld [vmem:[%s6281_s0 + $0x8] sm:$0xff] }
 0x3fa   :  { %6962 = vst [vmem:[#allocation97_spill] sm:$0xff] %v5644_v51 }
 0x403   :  { %v3403_v43 = vpop.eup %3402 }
 0x404   :  { %v1504_v31 = vadd.f32 1.0, %v3403_v43 }
 0x405   :  { %v3405_v46 = vpop.eup %3404 }
 0x406   :  { %3408 = vrcp.f32 %v1504_v31  ;;  %v1513_v52 = vadd.f32 1.0, %v3405_v46  ;;  %v3407_v37 = vpop.eup %3406 }
 0x407   :  { %3410 = vtanh.f32 %v1516_v48 }
 0x408   :  { %3412 = vrcp.f32 %v1513_v52 }
 0x40a   :  { %v1598_v0 = vpop.f32.mrf.mxu0  ;;  %v1669_v34 = vpop.f32.mrf.mxu1 }
 0x40c   :  { %v1600_v28 = vpop.f32.mrf.mxu0  ;;  %v1671_v32 = vpop.f32.mrf.mxu1 }
 0x40d   :  { %v1678_v9 = vcombine.low %v1598_v0, %v1600_v28  ;;  %v1679_v25 = vcombine.low %v1669_v34, %v1671_v32  ;;  %v1524_v28 = vadd.f32 1.0, %v3407_v37 }
 0x40f   :  { %v1686_v29 = vrot.slane %v1678_v9, %v6799_v36  ;;  %v1693_v30 = vrot.slane %v1679_v25, %v6799_v36 }
 0x411   :  { %v1694_v27 = vcombine.low %v1686_v29, %v1693_v30 }
 0x413   :  { %v3409_v33 = vpop.eup %3408  ;;  %v1696_v43 = vadd.f32 %v5644_v51, %v1694_v27 }
 0x414   :  { %v3411_v48 = vpop.eup %3410 }
 0x415   :  { %v3413_v31 = vpop.eup %3412  ;;  %v3073_v46 = vmul.f32 -1.442695, %v1696_v43  ;;  %v1704_v52 = vrot.slane %v1696_v43, 2  ;;  %v1528_v9 = vmul.f32 %v3411_v48, %v3409_v33  ;;  %v1715_v32 = vrot.slane %v1696_v43, 6  ;;  %v6967_v48 = vld [vmem:[#allocation36_spill] sm:$0xff] }
 0x416   :  { %v1527_v0 = vmul.f32 %v3413_v31, %v5174_v39  ;;  %v1712_v27 = vrot.slane %v1696_v43, 4  ;;  %v6966_v43 = vld [vmem:[#allocation35_spill] sm:$0xff] }
 0x417   :  { %3414 = vpow2.f32 %v3073_v46  ;;  %v3074_v25 = vmul.f32 -1.442695, %v1704_v52  ;;  %v3075_v29 = vmul.f32 -1.442695, %v1715_v32  ;;  %v6968_v46 = vld [vmem:[#allocation37_spill] sm:$0xff]  ;;  %v6969_v52 = vld [vmem:[#allocation38_spill] sm:$0xff] }
 0x418   :  { %v5648_v34 = vadd.f32 %v1528_v9, %v1527_v0  ;;  %v6970_v0 = vld [vmem:[#allocation39_spill] sm:$0xff]  ;;  %v6971_v9 = vld [vmem:[#allocation40_spill] sm:$0xff] }
 0x419   :  { %3416 = vpow2.f32 %v3074_v25 }
 0x41a   :  { %3418 = vrcp.f32 %v1524_v28 }
 0x41b   :  { %3420 = vtanh.f32 %v5648_v34 }
 0x41c   :  { %3422 = vpow2.f32 %v3075_v29  ;;  %v6972_v29 = vld [vmem:[#allocation41_spill] sm:$0xff] }
 0x424   :  { %v3415_v30 = vpop.eup %3414 }
 0x425   :  { %v1700_v51 = vadd.f32 1.0, %v3415_v30  ;;  %v6973_v30 = vld [vmem:[#allocation42_spill] sm:$0xff] }
 0x426   :  { %v3417_v36 = vpop.eup %3416 }
 0x427   :  { %v3419_v26 = vpop.eup %3418  ;;  %3424 = vrcp.f32 %v1700_v51  ;;  %v1709_v37 = vadd.f32 1.0, %v3417_v36  ;;  %v6964_v36 = vld [vmem:[#allocation33_spill] sm:$0xff] }
 0x428   :  { %v3421_v39 = vpop.eup %3420  ;;  %3426 = vtanh.f32 %v1712_v27  ;;  %v6974_v27 = vld [vmem:[#allocation43_spill] sm:$0xff] }
 0x429   :  { %3428 = vrcp.f32 %v1709_v37  ;;  %v5651_v33 = vmul.f32 %v3421_v39, %v3419_v26  ;;  %v6965_v26 = vld [vmem:[#allocation34_spill] sm:$0xff]  ;;  %v3423_v51 = vpop.eup %3422  ;;  %v6975_v37 = vld [vmem:[#allocation44_spill] sm:$0xff] }
 0x42a   :  { %v1720_v32 = vadd.f32 1.0, %v3423_v51 }
 0x42b   :  { %6963 = vst [vmem:[#allocation98_spill] sm:$0xff] %v5651_v33  ;;  %1793 = vmatmul.mubr.f32.vlgmr.msra.gmra.mxu0 %v5651_v33  ;;  %1864 = vmatmul.mubr.f32.vlgmr.msra.gmra.mxu1 %v5651_v33 }
 0x42c   :  { %1925 = vmatpush1.msra.mxu0 %v5184_v47  ;;  %1996 = vmatpush1.msra.mxu1 %v5190_v6  ;;  %3430 = vrcp.f32 %v1720_v32  ;;  %v6986_v32 = vld [vmem:[#allocation61_spill] sm:$0xff] }
 0x42d   :  { %1926 = vmatprep.subr.mxu0 %v5196_v1  ;;  %1997 = vmatprep.subr.mxu1 %v5202_v11 }
 0x42e   :  { %1927 = vmatpush1.msra.mxu0 %v5208_v42  ;;  %1998 = vmatpush1.msra.mxu1 %v5214_v45 }
 0x42f   :  { %1928 = vmatprep.subr.mxu0 %v5220_v54  ;;  %1999 = vmatprep.subr.mxu1 %v5226_v12 }
 0x430   :  { %1929 = vmatpush1.msra.mxu0 %v5232_v13  ;;  %2000 = vmatpush1.msra.mxu1 %v5238_v14 }
 0x431   :  { %1930 = vmatprep.subr.mxu0 %v5244_v55  ;;  %2001 = vmatprep.subr.mxu1 %v5250_v8 }
 0x432   :  { %1931 = vmatpush1.msra.mxu0 %v6964_v36  ;;  %2002 = vmatpush1.msra.mxu1 %v6965_v26 }
 0x433   :  { %1932 = vmatprep.subr.mxu0 %v6966_v43  ;;  %2003 = vmatprep.subr.mxu1 %v6967_v48 }
 0x434   :  { %v3425_v31 = vpop.eup %3424  ;;  %1933 = vmatpush1.msra.mxu0 %v6968_v46  ;;  %2004 = vmatpush1.msra.mxu1 %v6969_v52 }
 0x435   :  { %v3427_v28 = vpop.eup %3426  ;;  %1934 = vmatprep.subr.mxu0 %v6970_v0  ;;  %2005 = vmatprep.subr.mxu1 %v6971_v9  ;;  %v6976_v0 = vld [vmem:[#allocation46_spill] sm:$0xff] }
 0x436   :  { %v3429_v25 = vpop.eup %3428  ;;  %1935 = vmatpush1.msra.mxu0 %v6972_v29  ;;  %2006 = vmatpush1.msra.mxu1 %v6973_v30  ;;  %v1724_v33 = vmul.f32 %v3427_v28, %v3425_v31  ;;  %v6977_v29 = vld [vmem:[#allocation47_spill] sm:$0xff]  ;;  %v6978_v30 = vld [vmem:[#allocation48_spill] sm:$0xff]  ;;  %v6982_v31 = vld [vmem:[#allocation53_spill] sm:$0xff] }
 0x437   :  { %1936 = vmatprep.subr.mxu0 %v6974_v27  ;;  %2007 = vmatprep.subr.mxu1 %v6975_v37  ;;  %v1723_v39 = vmul.f32 %v3429_v25, %v5350_v2  ;;  %v6979_v27 = vld [vmem:[#allocation49_spill] sm:$0xff]  ;;  %v6980_v37 = vld [vmem:[#allocation50_spill] sm:$0xff]  ;;  %v6981_v2 = vld [vmem:[#allocation52_spill] sm:$0xff] }
 0x438   :  { %1937 = vmatpush1.msra.mxu0 %v5329_v10  ;;  %2008 = vmatpush1.msra.mxu1 %v5335_v7  ;;  %v6983_v28 = vld [vmem:[#allocation54_spill] sm:$0xff]  ;;  %v6984_v25 = vld [vmem:[#allocation59_spill] sm:$0xff] }
 0x439   :  { %1938 = vmatprep.subr.mxu0 %v5341_v24  ;;  %2009 = vmatprep.subr.mxu1 %v6976_v0  ;;  %v5684_v51 = vadd.f32 %v1724_v33, %v1723_v39  ;;  %v6985_v33 = vld [vmem:[#allocation60_spill] sm:$0xff]  ;;  %v6987_v39 = vld [vmem:[#allocation62_spill] sm:$0xff] }
 0x43a   :  { %1939 = vmatpush1.msra.mxu0 %v6977_v29  ;;  %2010 = vmatpush1.msra.mxu1 %v6978_v30  ;;  %v6988_v29 = vld [vmem:[#allocation63_spill] sm:$0xff]  ;;  %v6991_v30 = vld [vmem:[#allocation66_spill] sm:$0xff]  ;;  %v7005_v24 = vld [vmem:[#allocation92_spill] sm:$0xff] }
 0x43b   :  { %1940 = vmatprep.subr.mxu0 %v6979_v27  ;;  %2011 = vmatprep.subr.mxu1 %v6980_v37  ;;  %3432 = vtanh.f32 %v5684_v51  ;;  %v6989_v27 = vld [vmem:[#allocation64_spill] sm:$0xff]  ;;  %v6990_v37 = vld [vmem:[#allocation65_spill] sm:$0xff] }
 0x43c   :  { %1941 = vmatpush1.msra.mxu0 %v6981_v2  ;;  %2012 = vmatpush1.msra.mxu1 %v6982_v31  ;;  %v6992_v2 = vld [vmem:[#allocation67_spill] sm:$0xff]  ;;  %v6993_v31 = vld [vmem:[#allocation68_spill] sm:$0xff] }
 0x43d   :  { %1942 = vmatprep.subr.mxu0 %v6983_v28  ;;  %2013 = vmatprep.subr.mxu1 %v6984_v25  ;;  %v6994_v28 = vld [vmem:[#allocation69_spill] sm:$0xff]  ;;  %v6995_v25 = vld [vmem:[#allocation70_spill] sm:$0xff] }
 0x43e   :  { %1943 = vmatpush1.msra.mxu0 %v6985_v33  ;;  %2014 = vmatpush1.msra.mxu1 %v6986_v32  ;;  %v6996_v33 = vld [vmem:[#allocation71_spill] sm:$0xff]  ;;  %v6997_v32 = vld [vmem:[#allocation72_spill] sm:$0xff] }
 0x43f   :  { %1944 = vmatprep.subr.mxu0 %v6987_v39  ;;  %2015 = vmatprep.subr.mxu1 %v6988_v29  ;;  %v6998_v39 = vld [vmem:[#allocation73_spill] sm:$0xff]  ;;  %v6999_v29 = vld [vmem:[#allocation74_spill] sm:$0xff] }
 0x440   :  { %1945 = vmatpush1.msra.mxu0 %v6989_v27  ;;  %2016 = vmatpush1.msra.mxu1 %v6990_v37  ;;  %v7000_v27 = vld [vmem:[#allocation75_spill] sm:$0xff]  ;;  %v7001_v37 = vld [vmem:[#allocation76_spill] sm:$0xff] }
 0x441   :  { %1946 = vmatprep.subr.mxu0 %v6991_v30  ;;  %2017 = vmatprep.subr.mxu1 %v6992_v2  ;;  %v7002_v30 = vld [vmem:[#allocation77_spill] sm:$0xff]  ;;  %v3431_v2 = vpop.eup %3430 }
 0x442   :  { %1947 = vmatpush1.msra.mxu0 %v6993_v31  ;;  %2018 = vmatpush1.msra.mxu1 %v6994_v28  ;;  %v7003_v31 = vld [vmem:[#allocation81_spill] sm:$0xff]  ;;  %v7004_v28 = vld [vmem:[#allocation91_spill] sm:$0xff] }
 0x443   :  { %1948 = vmatprep.subr.mxu0 %v6995_v25  ;;  %2019 = vmatprep.subr.mxu1 %v6996_v33  ;;  %v7006_v33 = vld [vmem:[#allocation93_spill] sm:$0xff] }
 0x444   :  { %1949 = vmatpush1.msra.mxu0 %v6997_v32  ;;  %2020 = vmatpush1.msra.mxu1 %v6998_v39  ;;  %v7007_v32 = vld [vmem:[#allocation94_spill] sm:$0xff] }
 0x445   :  { %1950 = vmatprep.subr.mxu0 %v6999_v29  ;;  %2021 = vmatprep.subr.mxu1 %v7000_v27 }
 0x446   :  { %1951 = vmatpush1.msra.mxu0 %v7001_v37  ;;  %2022 = vmatpush1.msra.mxu1 %v7002_v30 }
 0x447   :  { %1952 = vmatprep.subr.mxu0 %v7003_v31  ;;  %2023 = vmatprep.subr.mxu1 %v7004_v28 }
 0x448   :  { %v3433_v25 = vpop.eup %3432  ;;  %1953 = vmatpush1.msra.mxu0 %v7005_v24  ;;  %2024 = vmatpush1.msra.mxu1 %v7006_v33 }
 0x449   :  { %1954 = vmatprep.subr.mxu0 %v7007_v32  ;;  %2025 = vmatprep.subr.mxu1 %v5542_v4  ;;  %v5719_v29 = vmul.f32 %v3433_v25, %v3431_v2  ;;  %v7032_v2 = vld [vmem:[#allocation15_spill] sm:$0xff]  ;;  %v7033_v25 = vld [vmem:[#allocation14_spill] sm:$0xff] }
 0x44a   :  { %1955 = vmatpush1.msra.mxu0 %v5550_v35  ;;  %1988 = vmatprep.mubr.f32.mxu0 %v6698_v58 }
 0x44b   :  { %2026 = vmatpush1.msra.mxu1 %v5557_v5  ;;  %2059 = vmatprep.mubr.f32.mxu1 %v6698_v58 }
 0x44c   :  { %1989 = vmatmul.mubr.f32.vlgmr.msra.gmra.mxu0 %v5719_v29  ;;  %2060 = vmatmul.mubr.f32.vlgmr.msra.gmra.mxu1 %v5719_v29 }
 0x44d   :  { %2191 = vmatprep.subr.mxu1 %v4778_v3  ;;  %2120 = vmatprep.subr.mxu0 %v4772_v60  ;;  %v7008_v60 = vld [vmem:[#allocation56_spill] sm:$0xff]  ;;  %v7009_v3 = vld [vmem:[#allocation55_spill] sm:$0xff] }
 0x44e   :  { %2192 = vmatpush1.msra.mxu1 %v4790_v62  ;;  %2121 = vmatpush1.msra.mxu0 %v4784_v61  ;;  %v7010_v61 = vld [vmem:[#allocation58_spill] sm:$0xff]  ;;  %v7011_v62 = vld [vmem:[#allocation57_spill] sm:$0xff] }
 0x44f   :  { %2193 = vmatprep.subr.mxu1 %v4802_v57  ;;  %2122 = vmatprep.subr.mxu0 %v4796_v63  ;;  %v7012_v63 = vld [vmem:[#allocation79_spill] sm:$0xff]  ;;  %v7013_v57 = vld [vmem:[#allocation78_spill] sm:$0xff] }
 0x450   :  { %2194 = vmatpush1.msra.mxu1 %v4814_v53  ;;  %2123 = vmatpush1.msra.mxu0 %v4808_v50  ;;  %v7014_v50 = vld [vmem:[#allocation82_spill] sm:$0xff]  ;;  %v7015_v53 = vld [vmem:[#allocation80_spill] sm:$0xff] }
 0x451   :  { %2195 = vmatprep.subr.mxu1 %v4826_v40  ;;  %2124 = vmatprep.subr.mxu0 %v4820_v59  ;;  %v7016_v59 = vld [vmem:[#allocation84_spill] sm:$0xff]  ;;  %v7017_v40 = vld [vmem:[#allocation83_spill] sm:$0xff] }
 0x452   :  { %2196 = vmatpush1.msra.mxu1 %v4838_v38  ;;  %2125 = vmatpush1.msra.mxu0 %v4832_v56  ;;  %v7018_v56 = vld [vmem:[#allocation86_spill] sm:$0xff]  ;;  %v7019_v38 = vld [vmem:[#allocation85_spill] sm:$0xff] }
 0x453   :  { %2197 = vmatprep.subr.mxu1 %v4850_v15  ;;  %2126 = vmatprep.subr.mxu0 %v4844_v49  ;;  %v7020_v49 = vld [vmem:[#allocation3_spill] sm:$0xff]  ;;  %v7021_v15 = vld [vmem:[#allocation2_spill] sm:$0xff] }
 0x454   :  { %2198 = vmatpush1.msra.mxu1 %v4862_v44  ;;  %2127 = vmatpush1.msra.mxu0 %v4856_v41  ;;  %v7022_v41 = vld [vmem:[#allocation5_spill] sm:$0xff]  ;;  %v7023_v44 = vld [vmem:[#allocation4_spill] sm:$0xff] }
 0x455   :  { %2199 = vmatprep.subr.mxu1 %v4874_v17  ;;  %2128 = vmatprep.subr.mxu0 %v4868_v16  ;;  %v7024_v16 = vld [vmem:[#allocation7_spill] sm:$0xff]  ;;  %v7025_v17 = vld [vmem:[#allocation6_spill] sm:$0xff] }
 0x456   :  { %2200 = vmatpush1.msra.mxu1 %v4886_v19  ;;  %2129 = vmatpush1.msra.mxu0 %v4880_v18  ;;  %v7026_v18 = vld [vmem:[#allocation9_spill] sm:$0xff]  ;;  %v7027_v19 = vld [vmem:[#allocation8_spill] sm:$0xff] }
 0x457   :  { %2201 = vmatprep.subr.mxu1 %v4898_v21  ;;  %2130 = vmatprep.subr.mxu0 %v4892_v20  ;;  %v7028_v20 = vld [vmem:[#allocation11_spill] sm:$0xff]  ;;  %v7029_v21 = vld [vmem:[#allocation10_spill] sm:$0xff] }
 0x458   :  { %2202 = vmatpush1.msra.mxu1 %v4910_v23  ;;  %2131 = vmatpush1.msra.mxu0 %v4904_v22  ;;  %v7030_v22 = vld [vmem:[#allocation13_spill] sm:$0xff]  ;;  %v7031_v23 = vld [vmem:[#allocation12_spill] sm:$0xff] }
 0x459   :  { %2203 = vmatprep.subr.mxu1 %v7008_v60  ;;  %2132 = vmatprep.subr.mxu0 %v7009_v3  ;;  %v7034_v60 = vld [vmem:[#allocation17_spill] sm:$0xff]  ;;  %v7035_v3 = vld [vmem:[#allocation16_spill] sm:$0xff] }
 0x45a   :  { %2204 = vmatpush1.msra.mxu1 %v7010_v61  ;;  %2133 = vmatpush1.msra.mxu0 %v7011_v62  ;;  %v7036_v61 = vld [vmem:[#allocation19_spill] sm:$0xff]  ;;  %v7037_v62 = vld [vmem:[#allocation18_spill] sm:$0xff] }
 0x45b   :  { %2205 = vmatprep.subr.mxu1 %v7012_v63  ;;  %2134 = vmatprep.subr.mxu0 %v7013_v57  ;;  %v7038_v63 = vld [vmem:[#allocation21_spill] sm:$0xff]  ;;  %v7039_v57 = vld [vmem:[#allocation20_spill] sm:$0xff] }
 0x45c   :  { %2206 = vmatpush1.msra.mxu1 %v7014_v50  ;;  %2135 = vmatpush1.msra.mxu0 %v7015_v53  ;;  %v7040_v50 = vld [vmem:[#allocation23_spill] sm:$0xff]  ;;  %v7041_v53 = vld [vmem:[#allocation22_spill] sm:$0xff] }
 0x45d   :  { %2207 = vmatprep.subr.mxu1 %v7016_v59  ;;  %2136 = vmatprep.subr.mxu0 %v7017_v40  ;;  %v7042_v59 = vld [vmem:[#allocation25_spill] sm:$0xff]  ;;  %v7043_v40 = vld [vmem:[#allocation24_spill] sm:$0xff] }
 0x45e   :  { %2208 = vmatpush1.msra.mxu1 %v7018_v56  ;;  %2137 = vmatpush1.msra.mxu0 %v7019_v38  ;;  %v7044_v56 = vld [vmem:[#allocation27_spill] sm:$0xff]  ;;  %v7045_v38 = vld [vmem:[#allocation26_spill] sm:$0xff] }
 0x45f   :  { %2209 = vmatprep.subr.mxu1 %v7020_v49  ;;  %2138 = vmatprep.subr.mxu0 %v7021_v15  ;;  %v7046_v49 = vld [vmem:[#allocation29_spill] sm:$0xff]  ;;  %v7047_v15 = vld [vmem:[#allocation28_spill] sm:$0xff] }
 0x460   :  { %2210 = vmatpush1.msra.mxu1 %v7022_v41  ;;  %2139 = vmatpush1.msra.mxu0 %v7023_v44  ;;  %v7048_v41 = vld [vmem:[#allocation88_spill] sm:$0xff]  ;;  %v7049_v44 = vld [vmem:[#allocation30_spill] sm:$0xff] }
 0x461   :  { %2211 = vmatprep.subr.mxu1 %v7024_v16  ;;  %2140 = vmatprep.subr.mxu0 %v7025_v17 }
 0x462   :  { %2212 = vmatpush1.msra.mxu1 %v7026_v18  ;;  %2141 = vmatpush1.msra.mxu0 %v7027_v19 }
 0x463   :  { %2213 = vmatprep.subr.mxu1 %v7028_v20  ;;  %2142 = vmatprep.subr.mxu0 %v7029_v21 }
 0x464   :  { %2214 = vmatpush1.msra.mxu1 %v7030_v22  ;;  %2143 = vmatpush1.msra.mxu0 %v7031_v23  ;;  %v7050_v22 = vld [vmem:[#allocation87_spill] sm:$0xff] }
 0x465   :  { %2215 = vmatprep.subr.mxu1 %v7032_v2  ;;  %2144 = vmatprep.subr.mxu0 %v7033_v25 }
 0x466   :  { %2216 = vmatpush1.msra.mxu1 %v7034_v60  ;;  %2145 = vmatpush1.msra.mxu0 %v7035_v3  ;;  %v7051_v60 = vld [vmem:[#allocation96_spill] sm:$0xff] }
 0x467   :  { %2217 = vmatprep.subr.mxu1 %v7036_v61  ;;  %2146 = vmatprep.subr.mxu0 %v7037_v62 }
 0x468   :  { %2218 = vmatpush1.msra.mxu1 %v7038_v63  ;;  %2147 = vmatpush1.msra.mxu0 %v7039_v57 }
 0x469   :  { %2219 = vmatprep.subr.mxu1 %v7040_v50  ;;  %2148 = vmatprep.subr.mxu0 %v7041_v53 }
 0x46a   :  { %2220 = vmatpush1.msra.mxu1 %v7042_v59  ;;  %2149 = vmatpush1.msra.mxu0 %v7043_v40 }
 0x46b   :  { %2221 = vmatprep.subr.mxu1 %v7044_v56  ;;  %2150 = vmatprep.subr.mxu0 %v7045_v38 }
 0x46c   :  { %2222 = vmatpush1.msra.mxu1 %v7046_v49  ;;  %2151 = vmatpush1.msra.mxu0 %v7047_v15 }
 0x46d   :  { %2184 = vmatprep.mubr.f32.mxu0 %v6698_v58  ;;  %2255 = vmatprep.mubr.f32.mxu1 %v6698_v58 }
 0x46e   :  { %2387 = vmatprep.subr.mxu1 %v7048_v41  ;;  %2316 = vmatprep.subr.mxu0 %v7049_v44 }
 0x4eb   :  { %v1794_v16 = vpop.f32.mrf.mxu0  ;;  %v1865_v17 = vpop.f32.mrf.mxu1 }
 0x4ed   :  { %v1796_v18 = vpop.f32.mrf.mxu0  ;;  %v1867_v19 = vpop.f32.mrf.mxu1 }
 0x4ee   :  { %v1874_v20 = vcombine.low %v1794_v16, %v1796_v18  ;;  %v1875_v21 = vcombine.low %v1865_v17, %v1867_v19 }
 0x4f0   :  { %v1882_v23 = vrot.slane %v1874_v20, %v7050_v22  ;;  %v1889_v2 = vrot.slane %v1875_v21, %v7050_v22 }
 0x4f2   :  { %v1890_v25 = vcombine.low %v1882_v23, %v1889_v2  ;;  %v7052_v2 = vld [vmem:[#allocation97_spill] sm:$0xff] }
 0x4f4   :  { %v1892_v3 = vadd.f32 %v7051_v60, %v1890_v25 }
 0x4f6   :  { %v3076_v61 = vmul.f32 -1.442695, %v1892_v3  ;;  %v1900_v62 = vrot.slane %v1892_v3, 2  ;;  %v1911_v57 = vrot.slane %v1892_v3, 6  ;;  %v1908_v59 = vrot.slane %v1892_v3, 4 }
 0x4f8   :  { %3434 = vpow2.f32 %v3076_v61  ;;  %v3077_v63 = vmul.f32 -1.442695, %v1900_v62  ;;  %v3078_v50 = vmul.f32 -1.442695, %v1911_v57 }
 0x4fa   :  { %3436 = vpow2.f32 %v3077_v63 }
 0x4fb   :  { %3438 = vpow2.f32 %v3078_v50 }
 0x505   :  { %v3435_v53 = vpop.eup %3434 }
 0x506   :  { %v1896_v40 = vadd.f32 1.0, %v3435_v53 }
 0x507   :  { %v3437_v56 = vpop.eup %3436 }
 0x508   :  { %3440 = vrcp.f32 %v1896_v40  ;;  %v1905_v38 = vadd.f32 1.0, %v3437_v56  ;;  %v3439_v21 = vpop.eup %3438 }
 0x509   :  { %3442 = vtanh.f32 %v1908_v59  ;;  %v1916_v63 = vadd.f32 1.0, %v3439_v21  ;;  %v7071_v21 = vld [vmem:[#allocation65_spill] sm:$0xff] }
 0x50a   :  { %3444 = vrcp.f32 %v1905_v38 }
 0x50c   :  { %v1990_v49 = vpop.f32.mrf.mxu0  ;;  %v2061_v15 = vpop.f32.mrf.mxu1 }
 0x50e   :  { %v1992_v41 = vpop.f32.mrf.mxu0  ;;  %v2063_v44 = vpop.f32.mrf.mxu1 }
 0x50f   :  { %v2070_v16 = vcombine.low %v1990_v49, %v1992_v41  ;;  %v2071_v17 = vcombine.low %v2061_v15, %v2063_v44 }
 0x511   :  { %v2078_v18 = vrot.slane %v2070_v16, %v7050_v22  ;;  %v2085_v19 = vrot.slane %v2071_v17, %v7050_v22 }
 0x513   :  { %v2086_v20 = vcombine.low %v2078_v18, %v2085_v19  ;;  %v7068_v18 = vld [vmem:[#allocation60_spill] sm:$0xff]  ;;  %v7069_v19 = vld [vmem:[#allocation63_spill] sm:$0xff] }
 0x515   :  { %v3441_v23 = vpop.eup %3440  ;;  %v2088_v25 = vadd.f32 %v7052_v2, %v2086_v20  ;;  %v7070_v20 = vld [vmem:[#allocation62_spill] sm:$0xff]  ;;  %v7073_v2 = vld [vmem:[#allocation67_spill] sm:$0xff] }
 0x516   :  { %v3443_v60 = vpop.eup %3442 }
 0x517   :  { %v3445_v3 = vpop.eup %3444  ;;  %v3079_v61 = vmul.f32 -1.442695, %v2088_v25  ;;  %v2096_v62 = vrot.slane %v2088_v25, 2  ;;  %v1920_v50 = vmul.f32 %v3443_v60, %v3441_v23  ;;  %v2107_v40 = vrot.slane %v2088_v25, 6  ;;  %v7072_v23 = vld [vmem:[#allocation64_spill] sm:$0xff]  ;;  %v7075_v60 = vld [vmem:[#allocation69_spill] sm:$0xff] }
 0x518   :  { %v1919_v57 = vmul.f32 %v3445_v3, %v5648_v34  ;;  %v2104_v49 = vrot.slane %v2088_v25, 4  ;;  %v7074_v25 = vld [vmem:[#allocation66_spill] sm:$0xff]  ;;  %v7076_v3 = vld [vmem:[#allocation68_spill] sm:$0xff] }
 0x519   :  { %3446 = vpow2.f32 %v3079_v61  ;;  %v3080_v53 = vmul.f32 -1.442695, %v2096_v62  ;;  %v3081_v56 = vmul.f32 -1.442695, %v2107_v40  ;;  %v7077_v61 = vld [vmem:[#allocation71_spill] sm:$0xff]  ;;  %v7078_v62 = vld [vmem:[#allocation70_spill] sm:$0xff] }
 0x51a   :  { %v5802_v59 = vadd.f32 %v1920_v50, %v1919_v57  ;;  %v7080_v57 = vld [vmem:[#allocation74_spill] sm:$0xff]  ;;  %v5958_v40 = vld [vmem:[%s6283_s4 + $0xc8] sm:$0xff] }
 0x51b   :  { %3448 = vpow2.f32 %v3080_v53 }
 0x51c   :  { %3450 = vrcp.f32 %v1916_v63  ;;  %v7079_v63 = vld [vmem:[#allocation72_spill] sm:$0xff] }
 0x51d   :  { %3452 = vtanh.f32 %v5802_v59 }
 0x51e   :  { %3454 = vpow2.f32 %v3081_v56  ;;  %v5965_v56 = vld [vmem:[%s6283_s4 + $0x48] sm:$0xff] }
 0x526   :  { %v3447_v38 = vpop.eup %3446 }
 0x527   :  { %v2092_v15 = vadd.f32 1.0, %v3447_v38  ;;  %v5972_v38 = vld [vmem:[%s6283_s4 + $0xc0] sm:$0xff] }
 0x528   :  { %v3449_v41 = vpop.eup %3448 }
 0x529   :  { %v3451_v44 = vpop.eup %3450  ;;  %3456 = vrcp.f32 %v2092_v15  ;;  %v2101_v16 = vadd.f32 1.0, %v3449_v41  ;;  %v5986_v15 = vld [vmem:[%s6283_s4 + $0xb8] sm:$0xff] }
 0x52a   :  { %v3453_v34 = vpop.eup %3452  ;;  %3458 = vtanh.f32 %v2104_v49  ;;  %v5979_v49 = vld [vmem:[%s6283_s4 + $0x40] sm:$0xff]  ;;  %v5993_v41 = vld [vmem:[%s6283_s4 + $0x38] sm:$0xff] }
 0x52b   :  { %3460 = vrcp.f32 %v2101_v16  ;;  %v5805_v17 = vmul.f32 %v3453_v34, %v3451_v44  ;;  %v6000_v44 = vld [vmem:[%s6283_s4 + $0xb0] sm:$0xff]  ;;  %v6014_v34 = vld [vmem:[%s6283_s4 + $0xa8] sm:$0xff] }
 0x52c   :  { %v6007_v16 = vld [vmem:[%s6283_s4 + $0x30] sm:$0xff] }
 0x52d   :  { %2185 = vmatmul.mubr.f32.vlgmr.msra.gmra.mxu0 %v5805_v17  ;;  %2256 = vmatmul.mubr.f32.vlgmr.msra.gmra.mxu1 %v5805_v17 }
 0x52e   :  { %2388 = vmatpush1.msra.mxu1 %v5190_v6  ;;  %2317 = vmatpush1.msra.mxu0 %v5184_v47  ;;  %v3455_v47 = vpop.eup %3454 }
 0x52f   :  { %2389 = vmatprep.subr.mxu1 %v5202_v11  ;;  %2318 = vmatprep.subr.mxu0 %v5196_v1  ;;  %v7053_v11 = vld [vmem:[#allocation39_spill] sm:$0xff] }
 0x530   :  { %2390 = vmatpush1.msra.mxu1 %v5214_v45  ;;  %2319 = vmatpush1.msra.mxu0 %v5208_v42  ;;  %v2112_v45 = vadd.f32 1.0, %v3455_v47  ;;  %v6021_v47 = vld [vmem:[%s6283_s4 + $0x28] sm:$0xff] }
 0x531   :  { %2391 = vmatprep.subr.mxu1 %v5226_v12  ;;  %2320 = vmatprep.subr.mxu0 %v5220_v54  ;;  %v7054_v54 = vld [vmem:[#allocation42_spill] sm:$0xff]  ;;  %v7055_v12 = vld [vmem:[#allocation41_spill] sm:$0xff] }
 0x532   :  { %2392 = vmatpush1.msra.mxu1 %v5238_v14  ;;  %2321 = vmatpush1.msra.mxu0 %v5232_v13  ;;  %v7056_v13 = vld [vmem:[#allocation44_spill] sm:$0xff]  ;;  %v7057_v14 = vld [vmem:[#allocation43_spill] sm:$0xff]  ;;  %3462 = vrcp.f32 %v2112_v45 }
 0x533   :  { %2393 = vmatprep.subr.mxu1 %v5250_v8  ;;  %2322 = vmatprep.subr.mxu0 %v5244_v55  ;;  %v6056_v45 = vld [vmem:[%s6283_s4 + $0x90] sm:$0xff] }
 0x534   :  { %2394 = vmatpush1.msra.mxu1 %v6965_v26  ;;  %2323 = vmatpush1.msra.mxu0 %v6964_v36  ;;  %v7058_v36 = vld [vmem:[#allocation45_spill] sm:$0xff] }
 0x535   :  { %2395 = vmatprep.subr.mxu1 %v6967_v48  ;;  %2324 = vmatprep.subr.mxu0 %v6966_v43  ;;  %v7059_v43 = vld [vmem:[#allocation48_spill] sm:$0xff]  ;;  %v7060_v48 = vld [vmem:[#allocation47_spill] sm:$0xff] }
 0x536   :  { %v3457_v6 = vpop.eup %3456  ;;  %2396 = vmatpush1.msra.mxu1 %v6969_v52  ;;  %2325 = vmatpush1.msra.mxu0 %v6968_v46  ;;  %v7061_v46 = vld [vmem:[#allocation50_spill] sm:$0xff]  ;;  %v7062_v52 = vld [vmem:[#allocation49_spill] sm:$0xff] }
 0x537   :  { %v3459_v1 = vpop.eup %3458  ;;  %2397 = vmatprep.subr.mxu1 %v6971_v9  ;;  %2326 = vmatprep.subr.mxu0 %v7053_v11  ;;  %v7066_v9 = vld [vmem:[#allocation54_spill] sm:$0xff]  ;;  %v6042_v11 = vld [vmem:[%s6283_s4 + $0x98] sm:$0xff] }
 0x538   :  { %v3461_v42 = vpop.eup %3460  ;;  %2398 = vmatpush1.msra.mxu1 %v7054_v54  ;;  %2327 = vmatpush1.msra.mxu0 %v7055_v12  ;;  %v2116_v8 = vmul.f32 %v3459_v1, %v3457_v6  ;;  %v6028_v6 = vld [vmem:[%s6283_s4 + $0xa0] sm:$0xff]  ;;  %v6063_v54 = vld [vmem:[%s6283_s4 + $0x10] sm:$0xff]  ;;  %v6070_v12 = vld [vmem:[%s6283_s4 + $0x88] sm:$0xff] }
 0x539   :  { %2399 = vmatprep.subr.mxu1 %v7056_v13  ;;  %2328 = vmatprep.subr.mxu0 %v7057_v14  ;;  %v2115_v55 = vmul.f32 %v3461_v42, %v5684_v51  ;;  %v7067_v51 = vld [vmem:[#allocation61_spill] sm:$0xff]  ;;  %v6035_v1 = vld [vmem:[%s6283_s4 + $0x20] sm:$0xff]  ;;  %v6077_v13 = vld [vmem:[%s6283_s4 + $0x8] sm:$0xff] }
 0x53a   :  { %2400 = vmatpush1.msra.mxu1 %v5335_v7  ;;  %2329 = vmatpush1.msra.mxu0 %v5329_v10  ;;  %v7063_v7 = vld [vmem:[#allocation53_spill] sm:$0xff]  ;;  %v7064_v10 = vld [vmem:[#allocation52_spill] sm:$0xff]  ;;  %v6084_v14 = vld [vmem:[%s6283_s4 + $0x80] sm:$0xff] }
 0x53b   :  { %2401 = vmatprep.subr.mxu1 %v6976_v0  ;;  %2330 = vmatprep.subr.mxu0 %v7058_v36  ;;  %v5838_v26 = vadd.f32 %v2116_v8, %v2115_v55  ;;  %v7065_v0 = vld [vmem:[#allocation59_spill] sm:$0xff]  ;;  %v6049_v42 = vld [vmem:[%s6283_s4 + $0x18] sm:$0xff]  ;;  %v6091_v55 = vld [vmem:[%s6283_s4] sm:$0xff] }
 0x53c   :  { %2402 = vmatpush1.msra.mxu1 %v7059_v43  ;;  %2331 = vmatpush1.msra.mxu0 %v7060_v48  ;;  %v7081_v8 = vld [vmem:[#allocation32_spill] sm:$0xff]  ;;  %v7082_v36 = vld [vmem:[#allocation95_spill] sm:$0xff]  ;;  %v7083_v43 = vld [vmem:[#allocation98_spill] sm:$0xff] }
 0x53d   :  { %2403 = vmatprep.subr.mxu1 %v7061_v46  ;;  %2332 = vmatprep.subr.mxu0 %v7062_v52  ;;  %3464 = vtanh.f32 %v5838_v26  ;;  %v7084_v48 = vld [vmem:[#allocation31_spill] sm:$0xff] }
 0x53e   :  { %2404 = vmatpush1.msra.mxu1 %v7063_v7  ;;  %2333 = vmatpush1.msra.mxu0 %v7064_v10 }
 0x53f   :  { %2405 = vmatprep.subr.mxu1 %v7065_v0  ;;  %2334 = vmatprep.subr.mxu0 %v7066_v9  ;;  %v3463_v50 = vpop.eup %3462 }
 0x540   :  { %2406 = vmatpush1.msra.mxu1 %v7067_v51  ;;  %2335 = vmatpush1.msra.mxu0 %v7068_v18 }
 0x541   :  { %2407 = vmatprep.subr.mxu1 %v7069_v19  ;;  %2336 = vmatprep.subr.mxu0 %v7070_v20  ;;  %v3628_v20 = vld [vmem:[%s6281_s0] sm:$0xff] }
 0x542   :  { %2408 = vmatpush1.msra.mxu1 %v7071_v21  ;;  %2337 = vmatpush1.msra.mxu0 %v7072_v23 }
 0x543   :  { %2409 = vmatprep.subr.mxu1 %v7073_v2  ;;  %2338 = vmatprep.subr.mxu0 %v7074_v25 }
 0x544   :  { %2410 = vmatpush1.msra.mxu1 %v7075_v60  ;;  %2339 = vmatpush1.msra.mxu0 %v7076_v3 }
 0x545   :  { %2411 = vmatprep.subr.mxu1 %v7077_v61  ;;  %2340 = vmatprep.subr.mxu0 %v7078_v62 }
 0x546   :  { %2412 = vmatpush1.msra.mxu1 %v6998_v39  ;;  %2341 = vmatpush1.msra.mxu0 %v7079_v63  ;;  %v5951_v39 = vld [vmem:[%s6283_s4 + $0x50] sm:$0xff] }
 0x547   :  { %2413 = vmatprep.subr.mxu1 %v7000_v27  ;;  %2342 = vmatprep.subr.mxu0 %v7080_v57 }
 0x548   :  { %2414 = vmatpush1.msra.mxu1 %v7002_v30  ;;  %2343 = vmatpush1.msra.mxu0 %v7001_v37  ;;  %v5876_v30 = vld [vmem:[%s6283_s4 + $0xf8] sm:$0xff]  ;;  %v5916_v37 = vld [vmem:[%s6283_s4 + $0xe0] sm:$0xff] }
 0x549   :  { %2415 = vmatprep.subr.mxu1 %v7004_v28  ;;  %2344 = vmatprep.subr.mxu0 %v7003_v31  ;;  %v5923_v31 = vld [vmem:[%s6283_s4 + $0x60] sm:$0xff]  ;;  %v5930_v28 = vld [vmem:[%s6283_s4 + $0xd8] sm:$0xff] }
 0x54a   :  { %v3465_v53 = vpop.eup %3464  ;;  %2416 = vmatpush1.msra.mxu1 %v7006_v33  ;;  %2345 = vmatpush1.msra.mxu0 %v7005_v24  ;;  %v5885_v24 = vld [vmem:[%s6283_s4 + $0x78] sm:$0xff] }
 0x54b   :  { %2417 = vmatprep.subr.mxu1 %v5542_v4  ;;  %2346 = vmatprep.subr.mxu0 %v7007_v32  ;;  %v2119_v27 = vmul.f32 %v3465_v53, %v3463_v50  ;;  %v5891_v4 = vld [vmem:[%s6283_s4 + $0xf0] sm:$0xff]  ;;  %v5937_v33 = vld [vmem:[%s6283_s4 + $0x58] sm:$0xff] }
 0x54c   :  { %2418 = vmatpush1.msra.mxu1 %v5557_v5  ;;  %2347 = vmatpush1.msra.mxu0 %v5550_v35  ;;  %v5896_v35 = vld [vmem:[%s6283_s4 + $0x70] sm:$0xff]  ;;  %v5909_v5 = vld [vmem:[%s6283_s4 + $0x68] sm:$0xff] }
 0x54d   :  { %2380 = vmatprep.mubr.f32.mxu0 %v6698_v58  ;;  %2451 = vmatprep.mubr.f32.mxu1 %v6698_v58  ;;  %v5903_v58 = vld [vmem:[%s6283_s4 + $0xe8] sm:$0xff]  ;;  %v5944_v32 = vld [vmem:[%s6283_s4 + $0xd0] sm:$0xff] }
 0x54e   :  { %3129 = vmatprep.subr.mxu1 %v5876_v30  ;;  %2381 = vmatmul.mubr.f32.vlgmr.msra.gmra.mxu0 %v2119_v27 }
 0x54f   :  { %2452 = vmatmul.mubr.f32.vlgmr.msra.gmra.mxu1 %v2119_v27  ;;  %3094 = vmatprep.subr.mxu0 %v5876_v30 }
 0x550   :  { %3130 = vmatpush3.msra.mxu1 %v5885_v24  ;;  %2686 = vmatprep.mubr.f32.mxu1 %v2119_v27 }
 0x551   :  { %3131 = vmatprep.subr.mxu1 %v5891_v4  ;;  %3095 = vmatpush3.msra.mxu0 %v5885_v24 }
 0x552   :  { %3132 = vmatpush3.msra.mxu1 %v5896_v35  ;;  %3096 = vmatprep.subr.mxu0 %v5891_v4 }
 0x553   :  { %3133 = vmatprep.subr.mxu1 %v5903_v58  ;;  %3097 = vmatpush3.msra.mxu0 %v5896_v35 }
 0x554   :  { %3134 = vmatpush3.msra.mxu1 %v5909_v5  ;;  %3098 = vmatprep.subr.mxu0 %v5903_v58 }
 0x555   :  { %3135 = vmatprep.subr.mxu1 %v5916_v37  ;;  %3099 = vmatpush3.msra.mxu0 %v5909_v5 }
 0x556   :  { %3136 = vmatpush3.msra.mxu1 %v5923_v31  ;;  %3100 = vmatprep.subr.mxu0 %v5916_v37 }
 0x557   :  { %3137 = vmatprep.subr.mxu1 %v5930_v28  ;;  %3101 = vmatpush3.msra.mxu0 %v5923_v31 }
 0x558   :  { %3138 = vmatpush3.msra.mxu1 %v5937_v33  ;;  %3102 = vmatprep.subr.mxu0 %v5930_v28 }
 0x559   :  { %3139 = vmatprep.subr.mxu1 %v5944_v32  ;;  %3103 = vmatpush3.msra.mxu0 %v5937_v33 }
 0x55a   :  { %3140 = vmatpush3.msra.mxu1 %v5951_v39  ;;  %3104 = vmatprep.subr.mxu0 %v5944_v32 }
 0x55b   :  { %3141 = vmatprep.subr.mxu1 %v5958_v40  ;;  %3105 = vmatpush3.msra.mxu0 %v5951_v39 }
 0x55c   :  { %3142 = vmatpush3.msra.mxu1 %v5965_v56  ;;  %3106 = vmatprep.subr.mxu0 %v5958_v40 }
 0x55d   :  { %3143 = vmatprep.subr.mxu1 %v5972_v38  ;;  %3107 = vmatpush3.msra.mxu0 %v5965_v56 }
 0x55e   :  { %3144 = vmatpush3.msra.mxu1 %v5979_v49  ;;  %3108 = vmatprep.subr.mxu0 %v5972_v38 }
 0x55f   :  { %3145 = vmatprep.subr.mxu1 %v5986_v15  ;;  %3109 = vmatpush3.msra.mxu0 %v5979_v49 }
 0x560   :  { %3146 = vmatpush3.msra.mxu1 %v5993_v41  ;;  %3110 = vmatprep.subr.mxu0 %v5986_v15 }
 0x561   :  { %3147 = vmatprep.subr.mxu1 %v6000_v44  ;;  %3111 = vmatpush3.msra.mxu0 %v5993_v41 }
 0x562   :  { %3148 = vmatpush3.msra.mxu1 %v6007_v16  ;;  %3112 = vmatprep.subr.mxu0 %v6000_v44 }
 0x563   :  { %3149 = vmatprep.subr.mxu1 %v6014_v34  ;;  %3113 = vmatpush3.msra.mxu0 %v6007_v16 }
 0x564   :  { %3150 = vmatpush3.msra.mxu1 %v6021_v47  ;;  %3114 = vmatprep.subr.mxu0 %v6014_v34 }
 0x565   :  { %3151 = vmatprep.subr.mxu1 %v6028_v6  ;;  %3115 = vmatpush3.msra.mxu0 %v6021_v47 }
 0x566   :  { %3152 = vmatpush3.msra.mxu1 %v6035_v1  ;;  %3116 = vmatprep.subr.mxu0 %v6028_v6 }
 0x567   :  { %3153 = vmatprep.subr.mxu1 %v6042_v11  ;;  %3117 = vmatpush3.msra.mxu0 %v6035_v1 }
 0x568   :  { %3154 = vmatpush3.msra.mxu1 %v6049_v42  ;;  %3118 = vmatprep.subr.mxu0 %v6042_v11 }
 0x569   :  { %3155 = vmatprep.subr.mxu1 %v6056_v45  ;;  %3119 = vmatpush3.msra.mxu0 %v6049_v42 }
 0x56a   :  { %3156 = vmatpush3.msra.mxu1 %v6063_v54  ;;  %3120 = vmatprep.subr.mxu0 %v6056_v45 }
 0x56b   :  { %3157 = vmatprep.subr.mxu1 %v6070_v12  ;;  %3121 = vmatpush3.msra.mxu0 %v6063_v54 }
 0x56c   :  { %3158 = vmatpush3.msra.mxu1 %v6077_v13  ;;  %3122 = vmatprep.subr.mxu0 %v6070_v12 }
 0x56d   :  { %3159 = vmatprep.subr.mxu1 %v6084_v14  ;;  %3123 = vmatpush3.msra.mxu0 %v6077_v13 }
 0x56e   :  { %3160 = vmatpush3.msra.mxu1 %v6091_v55  ;;  %3124 = vmatprep.subr.mxu0 %v6084_v14 }
 0x56f   :  { %2687 = vmatmul.mubr.f32.vlgmr.msra.gmra.mxu1 %v7081_v8  ;;  %3199 = vmatprep.subr.mxu1 %v5876_v30 }
 0x570   :  { %3200 = vmatpush3.msra.mxu1 %v5885_v24  ;;  %2830 = vmatprep.mubr.f32.mxu1 %v7082_v36 }
 0x571   :  { %3201 = vmatprep.subr.mxu1 %v5891_v4  ;;  %3125 = vmatpush3.msra.mxu0 %v6091_v55 }
 0x572   :  { %3202 = vmatpush3.msra.mxu1 %v5896_v35  ;;  %3164 = vmatprep.subr.mxu0 %v5876_v30 }
 0x573   :  { %3203 = vmatprep.subr.mxu1 %v5903_v58 }
 0x574   :  { %3204 = vmatpush3.msra.mxu1 %v5909_v5 }
 0x575   :  { %3205 = vmatprep.subr.mxu1 %v5916_v37 }
 0x576   :  { %3206 = vmatpush3.msra.mxu1 %v5923_v31 }
 0x577   :  { %3207 = vmatprep.subr.mxu1 %v5930_v28 }
 0x578   :  { %3208 = vmatpush3.msra.mxu1 %v5937_v33 }
 0x579   :  { %3209 = vmatprep.subr.mxu1 %v5944_v32 }
 0x57a   :  { %3210 = vmatpush3.msra.mxu1 %v5951_v39 }
 0x57b   :  { %3211 = vmatprep.subr.mxu1 %v5958_v40 }
 0x57c   :  { %3212 = vmatpush3.msra.mxu1 %v5965_v56 }
 0x57d   :  { %3213 = vmatprep.subr.mxu1 %v5972_v38 }
 0x57e   :  { %3214 = vmatpush3.msra.mxu1 %v5979_v49 }
 0x57f   :  { %3215 = vmatprep.subr.mxu1 %v5986_v15 }
 0x580   :  { %3216 = vmatpush3.msra.mxu1 %v5993_v41 }
 0x581   :  { %3217 = vmatprep.subr.mxu1 %v6000_v44 }
 0x582   :  { %3218 = vmatpush3.msra.mxu1 %v6007_v16 }
 0x583   :  { %3219 = vmatprep.subr.mxu1 %v6014_v34 }
 0x584   :  { %3220 = vmatpush3.msra.mxu1 %v6021_v47 }
 0x585   :  { %3221 = vmatprep.subr.mxu1 %v6028_v6 }
 0x586   :  { %3222 = vmatpush3.msra.mxu1 %v6035_v1 }
 0x587   :  { %3223 = vmatprep.subr.mxu1 %v6042_v11 }
 0x588   :  { %3224 = vmatpush3.msra.mxu1 %v6049_v42 }
 0x589   :  { %3225 = vmatprep.subr.mxu1 %v6056_v45 }
 0x58a   :  { %3226 = vmatpush3.msra.mxu1 %v6063_v54 }
 0x58b   :  { %3227 = vmatprep.subr.mxu1 %v6070_v12 }
 0x58c   :  { %3228 = vmatpush3.msra.mxu1 %v6077_v13 }
 0x58d   :  { %3229 = vmatprep.subr.mxu1 %v6084_v14 }
 0x58e   :  { %3230 = vmatpush3.msra.mxu1 %v6091_v55 }
 0x58f   :  { %2831 = vmatmul.mubr.f32.vlgmr.msra.gmra.mxu1 %v7083_v43  ;;  %3269 = vmatprep.subr.mxu1 %v5876_v30 }
 0x590   :  { %2974 = vmatprep.mubr.f32.mxu1 %v7084_v48  ;;  %3270 = vmatpush3.msra.mxu1 %v5885_v24 }
 0x591   :  { %3271 = vmatprep.subr.mxu1 %v5891_v4 }
 0x592   :  { %3272 = vmatpush3.msra.mxu1 %v5896_v35 }
 0x593   :  { %3273 = vmatprep.subr.mxu1 %v5903_v58 }
 0x594   :  { %3274 = vmatpush3.msra.mxu1 %v5909_v5 }
 0x595   :  { %3275 = vmatprep.subr.mxu1 %v5916_v37 }
 0x596   :  { %3276 = vmatpush3.msra.mxu1 %v5923_v31 }
 0x597   :  { %3277 = vmatprep.subr.mxu1 %v5930_v28 }
 0x598   :  { %3278 = vmatpush3.msra.mxu1 %v5937_v33 }
 0x599   :  { %3279 = vmatprep.subr.mxu1 %v5944_v32 }
 0x59a   :  { %3280 = vmatpush3.msra.mxu1 %v5951_v39 }
 0x59b   :  { %3281 = vmatprep.subr.mxu1 %v5958_v40 }
 0x59c   :  { %3282 = vmatpush3.msra.mxu1 %v5965_v56 }
 0x59d   :  { %3283 = vmatprep.subr.mxu1 %v5972_v38 }
 0x59e   :  { %3284 = vmatpush3.msra.mxu1 %v5979_v49 }
 0x59f   :  { %3285 = vmatprep.subr.mxu1 %v5986_v15 }
 0x5a0   :  { %3286 = vmatpush3.msra.mxu1 %v5993_v41 }
 0x5a1   :  { %3287 = vmatprep.subr.mxu1 %v6000_v44 }
 0x5a2   :  { %3288 = vmatpush3.msra.mxu1 %v6007_v16 }
 0x5a3   :  { %3289 = vmatprep.subr.mxu1 %v6014_v34 }
 0x5a4   :  { %3290 = vmatpush3.msra.mxu1 %v6021_v47 }
 0x5a5   :  { %3291 = vmatprep.subr.mxu1 %v6028_v6 }
 0x5a6   :  { %3292 = vmatpush3.msra.mxu1 %v6035_v1 }
 0x5a7   :  { %3293 = vmatprep.subr.mxu1 %v6042_v11 }
 0x5a8   :  { %3294 = vmatpush3.msra.mxu1 %v6049_v42 }
 0x5a9   :  { %3295 = vmatprep.subr.mxu1 %v6056_v45 }
 0x5aa   :  { %3296 = vmatpush3.msra.mxu1 %v6063_v54 }
 0x5ab   :  { %3297 = vmatprep.subr.mxu1 %v6070_v12 }
 0x5ac   :  { %3298 = vmatpush3.msra.mxu1 %v6077_v13 }
 0x5ad   :  { %3299 = vmatprep.subr.mxu1 %v6084_v14 }
 0x5ae   :  { %3300 = vmatpush3.msra.mxu1 %v6091_v55 }
 0x5ed   :  { %v2186_v46 = vpop.f32.mrf.mxu0  ;;  %v2257_v52 = vpop.f32.mrf.mxu1 }
 0x5ef   :  { %v2188_v7 = vpop.f32.mrf.mxu0  ;;  %v2259_v10 = vpop.f32.mrf.mxu1 }
 0x5f0   :  { %v2266_v0 = vcombine.low %v2186_v46, %v2188_v7  ;;  %v2267_v9 = vcombine.low %v2257_v52, %v2259_v10 }
 0x5f2   :  { %v2274_v51 = vrot.slane %v2266_v0, %v7050_v22  ;;  %v2281_v18 = vrot.slane %v2267_v9, %v7050_v22  ;;  %v3629_v9 = vld [vmem:[%s6281_s0 + $0x8] sm:$0xff] }
 0x5f4   :  { %v2282_v19 = vcombine.low %v2274_v51, %v2281_v18 }
 0x5f6   :  { %v2284_v21 = vadd.f32 %v3628_v20, %v2282_v19 }
 0x5f8   :  { %v3082_v23 = vmul.f32 -1.442695, %v2284_v21  ;;  %v2292_v2 = vrot.slane %v2284_v21, 2  ;;  %v2303_v60 = vrot.slane %v2284_v21, 6  ;;  %v2300_v57 = vrot.slane %v2284_v21, 4 }
 0x5fa   :  { %3466 = vpow2.f32 %v3082_v23  ;;  %v3083_v25 = vmul.f32 -1.442695, %v2292_v2  ;;  %v3084_v3 = vmul.f32 -1.442695, %v2303_v60 }
 0x5fc   :  { %3468 = vpow2.f32 %v3083_v25 }
 0x5fd   :  { %3470 = vpow2.f32 %v3084_v3 }
 0x607   :  { %v3467_v61 = vpop.eup %3466 }
 0x608   :  { %v2288_v62 = vadd.f32 1.0, %v3467_v61 }
 0x609   :  { %v3469_v63 = vpop.eup %3468 }
 0x60a   :  { %v2297_v50 = vadd.f32 1.0, %v3469_v63  ;;  %3472 = vrcp.f32 %v2288_v62  ;;  %v3471_v10 = vpop.eup %3470 }
 0x60b   :  { %v2308_v23 = vadd.f32 1.0, %v3471_v10 }
 0x60c   :  { %3474 = vrcp.f32 %v2297_v50 }
 0x60d   :  { %3476 = vtanh.f32 %v2300_v57 }
 0x60e   :  { %v2382_v53 = vpop.f32.mrf.mxu0 }
 0x60f   :  { %v2453_v27 = vpop.f32.mrf.mxu1 }
 0x610   :  { %v2384_v8 = vpop.f32.mrf.mxu0 }
 0x611   :  { %v2462_v36 = vcombine.low %v2382_v53, %v2384_v8  ;;  %v2455_v43 = vpop.f32.mrf.mxu1 }
 0x612   :  { %v2463_v48 = vcombine.low %v2453_v27, %v2455_v43  ;;  %v6184_v43 = vld [vmem:[%s6284_s5] ss:$0 sm:$0xff] }
 0x613   :  { %v2470_v46 = vrot.slane %v2462_v36, %v7050_v22 }
 0x614   :  { %v2477_v52 = vrot.slane %v2463_v48, %v7050_v22 }
 0x616   :  { %v2478_v7 = vcombine.low %v2470_v46, %v2477_v52 }
 0x617   :  { %v3473_v0 = vpop.eup %3472 }
 0x618   :  { %v2480_v51 = vadd.f32 %v3629_v9, %v2478_v7 }
 0x619   :  { %v3475_v18 = vpop.eup %3474 }
 0x61a   :  { %v3477_v19 = vpop.eup %3476  ;;  %v3085_v20 = vmul.f32 -1.442695, %v2480_v51  ;;  %v2488_v21 = vrot.slane %v2480_v51, 2  ;;  %v2311_v2 = vmul.f32 %v3475_v18, %v5802_v59  ;;  %v2499_v22 = vrot.slane %v2480_v51, 6 }
 0x61b   :  { %v2312_v25 = vmul.f32 %v3477_v19, %v3473_v0  ;;  %v2496_v63 = vrot.slane %v2480_v51, 4 }
 0x61c   :  { %3478 = vpow2.f32 %v3085_v20  ;;  %v3086_v60 = vmul.f32 -1.442695, %v2488_v21  ;;  %v3087_v61 = vmul.f32 -1.442695, %v2499_v22 }
 0x61d   :  { %v2313_v3 = vadd.f32 %v2312_v25, %v2311_v2 }
 0x61e   :  { %3480 = vpow2.f32 %v3086_v60 }
 0x61f   :  { %3482 = vrcp.f32 %v2308_v23 }
 0x620   :  { %3484 = vtanh.f32 %v2313_v3  ;;  %v7085_v3 = vld [vmem:[#allocation90_spill] sm:$0xff] }
 0x621   :  { %3486 = vpow2.f32 %v3087_v61  ;;  %v7087_v61 = vld [vmem:[#allocation51_spill] sm:$0xff] }
 0x629   :  { %v3479_v62 = vpop.eup %3478 }
 0x62a   :  { %v2484_v57 = vadd.f32 1.0, %v3479_v62 }
 0x62b   :  { %v3481_v50 = vpop.eup %3480 }
 0x62c   :  { %v3483_v53 = vpop.eup %3482  ;;  %3488 = vrcp.f32 %v2484_v57  ;;  %v2493_v27 = vadd.f32 1.0, %v3481_v50 }
 0x62d   :  { %v3485_v8 = vpop.eup %3484  ;;  %3490 = vtanh.f32 %v2496_v63 }
 0x62e   :  { %3492 = vrcp.f32 %v2493_v27  ;;  %v2315_v59 = vmul.f32 %v3485_v8, %v3483_v53  ;;  %v3487_v7 = vpop.eup %3486 }
 0x62f   :  { %v3161_v36 = vpop.f32.mrf.mxu1  ;;  %v2504_v51 = vadd.f32 1.0, %v3487_v7 }
 0x630   :  { %2975 = vmatmul.mubr.f32.vlgmr.msra.gmra.mxu1 %v2315_v59 }
 0x631   :  { %v3162_v48 = vpop.f32.mrf.mxu1  ;;  %3494 = vrcp.f32 %v2504_v51 }
 0x632   :  { %v3163_v46 = vadd.f32 %v3162_v48, %v3161_v36 }
 0x634   :  { %v2689_v52 = vadd.f32 %v3163_v46, %v6184_v43 }
 0x636   :  { %3089 = vst [vmem:[%s6285_s6 + $0x2] sm:$0x3] %v2689_v52 }
 0x639   :  { %v3489_v10 = vpop.eup %3488 }
 0x63a   :  { %v3491_v0 = vpop.eup %3490 }
 0x63b   :  { %v3493_v9 = vpop.eup %3492  ;;  %v2508_v19 = vmul.f32 %v3491_v0, %v3489_v10 }
 0x63c   :  { %v2507_v18 = vmul.f32 %v3493_v9, %v5838_v26 }
 0x63e   :  { %v2509_v20 = vadd.f32 %v2508_v19, %v2507_v18  ;;  %v3495_v21 = vpop.eup %3494 }
 0x640   :  { %3496 = vtanh.f32 %v2509_v20 }
 0x64d   :  { %v3497_v23 = vpop.eup %3496 }
 0x64e   :  { %v2511_v2 = vmul.f32 %v3497_v23, %v3495_v21 }
 0x64f   :  { %v3231_v25 = vpop.f32.mrf.mxu1 }
 0x650   :  { %2615 = vmatprep.mubr.f32.mxu0 %v2511_v2 }
 0x651   :  { %v3232_v60 = vpop.f32.mrf.mxu1  ;;  %2616 = vmatmul.mubr.f32.vlgmr.msra.gmra.mxu0 %v7085_v3 }
 0x652   :  { %v3233_v22 = vadd.f32 %v3232_v60, %v3231_v25  ;;  %3165 = vmatpush3.msra.mxu0 %v5885_v24  ;;  %2758 = vmatprep.mubr.f32.mxu0 %v5719_v29  ;;  %v7086_v29 = vld [vmem:[#allocation89_spill] sm:$0xff] }
 0x653   :  { %3166 = vmatprep.subr.mxu0 %v5891_v4 }
 0x654   :  { %v2833_v26 = vadd.f32 %v3233_v22, %v6184_v43  ;;  %3167 = vmatpush3.msra.mxu0 %v5896_v35 }
 0x655   :  { %3168 = vmatprep.subr.mxu0 %v5903_v58 }
 0x656   :  { %3091 = vst [vmem:[%s6285_s6 + $0x6] sm:$0x3] %v2833_v26  ;;  %3169 = vmatpush3.msra.mxu0 %v5909_v5 }
 0x657   :  { %3170 = vmatprep.subr.mxu0 %v5916_v37 }
 0x658   :  { %3171 = vmatpush3.msra.mxu0 %v5923_v31 }
 0x659   :  { %3172 = vmatprep.subr.mxu0 %v5930_v28 }
 0x65a   :  { %3173 = vmatpush3.msra.mxu0 %v5937_v33 }
 0x65b   :  { %3174 = vmatprep.subr.mxu0 %v5944_v32 }
 0x65c   :  { %3175 = vmatpush3.msra.mxu0 %v5951_v39 }
 0x65d   :  { %3176 = vmatprep.subr.mxu0 %v5958_v40 }
 0x65e   :  { %3177 = vmatpush3.msra.mxu0 %v5965_v56 }
 0x65f   :  { %3178 = vmatprep.subr.mxu0 %v5972_v38 }
 0x660   :  { %3179 = vmatpush3.msra.mxu0 %v5979_v49 }
 0x661   :  { %3180 = vmatprep.subr.mxu0 %v5986_v15 }
 0x662   :  { %3181 = vmatpush3.msra.mxu0 %v5993_v41 }
 0x663   :  { %3182 = vmatprep.subr.mxu0 %v6000_v44 }
 0x664   :  { %3183 = vmatpush3.msra.mxu0 %v6007_v16 }
 0x665   :  { %3184 = vmatprep.subr.mxu0 %v6014_v34 }
 0x666   :  { %3185 = vmatpush3.msra.mxu0 %v6021_v47 }
 0x667   :  { %3186 = vmatprep.subr.mxu0 %v6028_v6 }
 0x668   :  { %3187 = vmatpush3.msra.mxu0 %v6035_v1 }
 0x669   :  { %3188 = vmatprep.subr.mxu0 %v6042_v11 }
 0x66a   :  { %3189 = vmatpush3.msra.mxu0 %v6049_v42 }
 0x66b   :  { %3190 = vmatprep.subr.mxu0 %v6056_v45 }
 0x66c   :  { %3191 = vmatpush3.msra.mxu0 %v6063_v54 }
 0x66d   :  { %3192 = vmatprep.subr.mxu0 %v6070_v12 }
 0x66e   :  { %3193 = vmatpush3.msra.mxu0 %v6077_v13 }
 0x66f   :  { %3194 = vmatprep.subr.mxu0 %v6084_v14 }
 0x670   :  { %3195 = vmatpush3.msra.mxu0 %v6091_v55 }
 0x671   :  { %2759 = vmatmul.mubr.f32.vlgmr.msra.gmra.mxu0 %v7086_v29  ;;  %3234 = vmatprep.subr.mxu0 %v5876_v30 }
 0x672   :  { %3235 = vmatpush3.msra.mxu0 %v5885_v24  ;;  %2902 = vmatprep.mubr.f32.mxu0 %v7087_v61 }
 0x673   :  { %3236 = vmatprep.subr.mxu0 %v5891_v4 }
 0x674   :  { %3237 = vmatpush3.msra.mxu0 %v5896_v35 }
 0x675   :  { %3238 = vmatprep.subr.mxu0 %v5903_v58 }
 0x676   :  { %3239 = vmatpush3.msra.mxu0 %v5909_v5 }
 0x677   :  { %3240 = vmatprep.subr.mxu0 %v5916_v37 }
 0x678   :  { %3241 = vmatpush3.msra.mxu0 %v5923_v31 }
 0x679   :  { %3242 = vmatprep.subr.mxu0 %v5930_v28 }
 0x67a   :  { %3243 = vmatpush3.msra.mxu0 %v5937_v33 }
 0x67b   :  { %3244 = vmatprep.subr.mxu0 %v5944_v32 }
 0x67c   :  { %3245 = vmatpush3.msra.mxu0 %v5951_v39 }
 0x67d   :  { %3246 = vmatprep.subr.mxu0 %v5958_v40 }
 0x67e   :  { %3247 = vmatpush3.msra.mxu0 %v5965_v56 }
 0x67f   :  { %3248 = vmatprep.subr.mxu0 %v5972_v38 }
 0x680   :  { %3249 = vmatpush3.msra.mxu0 %v5979_v49 }
 0x681   :  { %3250 = vmatprep.subr.mxu0 %v5986_v15 }
 0x682   :  { %3251 = vmatpush3.msra.mxu0 %v5993_v41 }
 0x683   :  { %3252 = vmatprep.subr.mxu0 %v6000_v44 }
 0x684   :  { %3253 = vmatpush3.msra.mxu0 %v6007_v16 }
 0x685   :  { %3254 = vmatprep.subr.mxu0 %v6014_v34 }
 0x686   :  { %3255 = vmatpush3.msra.mxu0 %v6021_v47 }
 0x687   :  { %3256 = vmatprep.subr.mxu0 %v6028_v6 }
 0x688   :  { %3257 = vmatpush3.msra.mxu0 %v6035_v1 }
 0x689   :  { %3258 = vmatprep.subr.mxu0 %v6042_v11 }
 0x68a   :  { %3259 = vmatpush3.msra.mxu0 %v6049_v42 }
 0x68b   :  { %3260 = vmatprep.subr.mxu0 %v6056_v45 }
 0x68c   :  { %3261 = vmatpush3.msra.mxu0 %v6063_v54 }
 0x68d   :  { %3262 = vmatprep.subr.mxu0 %v6070_v12 }
 0x68e   :  { %3263 = vmatpush3.msra.mxu0 %v6077_v13 }
 0x68f   :  { %3264 = vmatprep.subr.mxu0 %v6084_v14 }
 0x690   :  { %3265 = vmatpush3.msra.mxu0 %v6091_v55 }
 0x691   :  { %2903 = vmatmul.mubr.f32.vlgmr.msra.gmra.mxu0 %v5805_v17 }
 0x6f0   :  { %v3301_v30 = vpop.f32.mrf.mxu1 }
 0x6f2   :  { %v3302_v24 = vpop.f32.mrf.mxu1 }
 0x6f3   :  { %v3303_v4 = vadd.f32 %v3302_v24, %v3301_v30 }
 0x6f5   :  { %v2977_v35 = vadd.f32 %v3303_v4, %v6184_v43 }
 0x6f7   :  { %3093 = vst [vmem:[%s6285_s6 + $0xa] sm:$0x3] %v2977_v35 }
 0x711   :  { %v3126_v58 = vpop.f32.mrf.mxu0 }
 0x713   :  { %v3127_v5 = vpop.f32.mrf.mxu0 }
 0x714   :  { %v3128_v37 = vadd.f32 %v3127_v5, %v3126_v58 }
 0x716   :  { %v2618_v31 = vadd.f32 %v3128_v37, %v6184_v43 }
 0x718   :  { %2621 = vst [vmem:[%s6285_s6] sm:$0x3] %v2618_v31 }
 0x731   :  { %v3196_v28 = vpop.f32.mrf.mxu0 }
 0x733   :  { %v3197_v17 = vpop.f32.mrf.mxu0 }
 0x734   :  { %v3198_v33 = vadd.f32 %v3197_v17, %v3196_v28 }
 0x736   :  { %v2761_v32 = vadd.f32 %v3198_v33, %v6184_v43 }
 0x738   :  { %3090 = vst [vmem:[%s6285_s6 + $0x4] sm:$0x3] %v2761_v32 }
 0x751   :  { %v3266_v39 = vpop.f32.mrf.mxu0 }
 0x753   :  { %v3267_v40 = vpop.f32.mrf.mxu0 }
 0x754   :  { %v3268_v56 = vadd.f32 %v3267_v40, %v3266_v39 }
 0x756   :  { %v2905_v38 = vadd.f32 %v3268_v56, %v6184_v43 }
 0x758   :  { %3092 = vst [vmem:[%s6285_s6 + $0x8] sm:$0x3] %v2905_v38 }

</bundles_post_ra>
